<compile_context>
chip_gen: v6e
topology: v6e:2x2x1
jax: 0.10.0
libtpu: 0.0.40
codegen_flags: <defaults>
</compile_context>

<pallas_src>
import functools

import jax
import jax.numpy as jnp
from jax.experimental import pallas as pl
from jax.experimental.pallas import tpu as pltpu


LANES = 128


# ----------------------------- helpers -------------------------------------

def _ceil_to(x, m):
    return ((x + m - 1) // m) * m


def _pick_row_tile(rows, max_tile=1024):
    """Largest convenient row tile; (tile, padded_rows)."""
    if rows <= max_tile:
        return rows, rows
    for cand in (1024, 512, 256, 128):
        if rows % cand == 0:
            return cand, rows
    return 128, _ceil_to(rows, 128)


# ----------------------------- Pallas kernels -------------------------------

def _build_patch_lhs(x_ref, taps, Ho, Wo):
    """Build the (Ho*Wo, k*k*Cp) bf16 LHS for one image.

    Shifted tap windows are concatenated along the lane (last) axis so a
    single MXU matmul does the whole k*k*Cp contraction.  Column shifts are
    hoisted: one sublane-shifted slab per unique (phase, col-offset); row
    shifts are leading-dim slices of that slab.
    """
    slabs = {}
    parts = []
    for (ph, qi, qj) in taps:
        key = (ph, qj)
        if key not in slabs:
            slabs[key] = x_ref[ph, :, qj:qj + Wo, :]        # (Hs, Wo, Cp)
        win = slabs[key][qi:qi + Ho]                         # (Ho, Wo, Cp)
        parts.append(win.reshape(Ho * Wo, win.shape[-1]))
    if len(parts) == 1:
        return parts[0]
    return jnp.concatenate(parts, axis=-1)                   # (Ho*Wo, k*k*Cp)


def _conv_bias_act_kernel(x_ref, w_ref, b_ref, o_ref, *, taps, Ho, Wo, slope):
    """Conv + bias + (optional) LeakyReLU, fully fused (non-BN convs)."""
    lhs = _build_patch_lhs(x_ref, taps, Ho, Wo)
    acc = jnp.dot(lhs, w_ref[...], preferred_element_type=jnp.float32)
    y = acc + b_ref[...]
    if slope != 1.0:
        y = jnp.where(y > 0, y, slope * y)
    o_ref[0] = y.astype(o_ref.dtype)


def _conv_bn_stats_kernel(x_ref, w_ref, o_ref, st_ref, *, taps, Ho, Wo):
    """Conv (bf16 out) + per-image per-channel f32 sum / sum-of-squares."""
    lhs = _build_patch_lhs(x_ref, taps, Ho, Wo)
    acc = jnp.dot(lhs, w_ref[...], preferred_element_type=jnp.float32)
    o_ref[0] = acc.astype(o_ref.dtype)
    fp = acc.shape[-1]
    ssum = jnp.sum(acc, axis=0, keepdims=True)               # (1, Fp)
    ssq = jnp.sum(acc * acc, axis=0, keepdims=True)          # (1, Fp)
    # Full 8-sublane block so the store is an unmasked vst.
    st_ref[0] = jnp.concatenate(
        [ssum, ssq, jnp.zeros((6, fp), jnp.float32)], axis=0)


def _affine_leaky_kernel(x_ref, s_ref, b_ref, o_ref, *, slope):
    y = x_ref[...].astype(jnp.float32) * s_ref[...] + b_ref[...]
    if slope != 1.0:
        y = jnp.where(y > 0, y, slope * y)
    o_ref[...] = y.astype(o_ref.dtype)


def _affine_leaky_res_kernel(x_ref, s_ref, b_ref, r_ref, o_ref, f_ref, *, slope):
    """BN affine + leaky, plus fused shortcut add (extra output)."""
    y = x_ref[...].astype(jnp.float32) * s_ref[...] + b_ref[...]
    if slope != 1.0:
        y = jnp.where(y > 0, y, slope * y)
    o_ref[...] = y.astype(o_ref.dtype)
    f_ref[...] = (y + r_ref[...].astype(jnp.float32)).astype(f_ref.dtype)


def _add_kernel(a_ref, b_ref, o_ref):
    o_ref[...] = a_ref[...] + b_ref[...]


# ----------------------------- Pallas wrappers ------------------------------

def affine_leaky_pallas(x2d, scale, shift, slope, residual=None):
    """y = leaky(x * scale + shift) [+ residual]; x2d is lane-dense (R, 128)."""
    R, Cp = x2d.shape
    tm, Rp = _pick_row_tile(R)
    xin = x2d if Rp == R else jnp.pad(x2d, ((0, Rp - R), (0, 0)))
    cp = pltpu.CompilerParams(dimension_semantics=("parallel",))
    x_spec = pl.BlockSpec((tm, Cp), lambda i: (i, 0))
    v_spec = pl.BlockSpec((1, Cp), lambda i: (0, 0))
    if residual is None:
        out = pl.pallas_call(
            functools.partial(_affine_leaky_kernel, slope=float(slope)),
            out_shape=jax.ShapeDtypeStruct((Rp, Cp), jnp.bfloat16),
            grid=(Rp // tm,),
            in_specs=[x_spec, v_spec, v_spec],
            out_specs=x_spec,
            compiler_params=cp,
        )(xin, scale, shift)
        return (out if Rp == R else out[:R]), None
    rin = residual if Rp == R else jnp.pad(residual, ((0, Rp - R), (0, 0)))
    out, fused = pl.pallas_call(
        functools.partial(_affine_leaky_res_kernel, slope=float(slope)),
        out_shape=(jax.ShapeDtypeStruct((Rp, Cp), jnp.bfloat16),
                   jax.ShapeDtypeStruct((Rp, Cp), jnp.bfloat16)),
        grid=(Rp // tm,),
        in_specs=[x_spec, v_spec, v_spec, x_spec],
        out_specs=(x_spec, x_spec),
        compiler_params=cp,
    )(xin, scale, shift, rin)
    if Rp != R:
        out, fused = out[:R], fused[:R]
    return out, fused


def add_pallas(a, b):
    """Standalone residual add (fallback when the shortcut is not fused)."""
    shape = a.shape
    if a.size % LANES == 0:
        a2, b2 = a.reshape(-1, LANES), b.reshape(-1, LANES)
    else:
        a2, b2 = a.reshape(-1, shape[-1]), b.reshape(-1, shape[-1])
    R, Cc = a2.shape
    tm, Rp = _pick_row_tile(R)
    if Rp != R:
        a2 = jnp.pad(a2, ((0, Rp - R), (0, 0)))
        b2 = jnp.pad(b2, ((0, Rp - R), (0, 0)))
    out = pl.pallas_call(
        _add_kernel,
        out_shape=jax.ShapeDtypeStruct((Rp, Cc), a.dtype),
        grid=(Rp // tm,),
        in_specs=[pl.BlockSpec((tm, Cc), lambda i: (i, 0)),
                  pl.BlockSpec((tm, Cc), lambda i: (i, 0))],
        out_specs=pl.BlockSpec((tm, Cc), lambda i: (i, 0)),
        compiler_params=pltpu.CompilerParams(
            dimension_semantics=("parallel",)),
    )(a2, b2)
    if Rp != R:
        out = out[:R]
    return out.reshape(shape)


def conv2d_block(x, seg_in, params, block, residual=None):
    """Conv2d (+BatchNorm2d batch stats) (+LeakyReLU) on lane-padded NHWC bf16.

    x: (N, H, W, 128*len(seg_in)) bf16; real channels of segment m live in
    lanes [m*128, m*128+seg_in[m]); padded lanes are exactly zero.
    Returns (out NHWC bf16 (N,Ho,Wo,Fp), seg_out, fused_shortcut_or_None).
    """
    k = int(block['size'])
    stride = int(block['stride'])
    pad = (k - 1) // 2 if int(block['pad']) else 0
    bn = int(block.get('batch_normalize', 0))
    slope = 0.1 if block['activation'] == 'leaky' else 1.0

    w = params['weight']                      # (F, Cin, k, k), PyTorch layout
    F_, Cin_real, _, _ = w.shape
    N, H, W, Cp = x.shape
    Ho = (H + 2 * pad - k) // stride + 1
    Wo = (W + 2 * pad - k) // stride + 1
    Mimg = Ho * Wo
    Fp = _ceil_to(F_, LANES)

    # Weights: (F, Cin, k, k) -> (k*k*Cp, Fp) bf16; the real input channels
    # are scattered to the lane positions they occupy in the carried padded
    # layout, everything else stays zero (zero lanes x zero weights).
    w_t = jnp.transpose(w, (2, 3, 1, 0)).reshape(k * k, Cin_real, F_)
    wk = jnp.zeros((k * k, Cp, Fp), jnp.float32)
    off = 0
    for m, fm in enumerate(seg_in):
        wk = wk.at[:, m * LANES:m * LANES + fm, :F_].set(w_t[:, off:off + fm, :])
        off += fm
    assert off == Cin_real, (off, Cin_real)
    wk = wk.reshape(k * k * Cp, Fp).astype(jnp.bfloat16)

    # Spatial pad (+ space-to-depth phase split for stride>1) so every tap
    # window inside the kernel is a plain unstrided static slice.
    s = stride
    s2 = s * s
    Hs = -(-(H + 2 * pad) // s)
    Ws = -(-(W + 2 * pad) // s)
    pad_cfg = ((0, 0), (pad, Hs * s - H - pad), (pad, Ws * s - W - pad), (0, 0))
    xp = jnp.pad(x, pad_cfg) if any(p != (0, 0) for p in pad_cfg) else x
    if s == 1:
        xph = xp                                              # no relayout pass
    else:
        xph = xp.reshape(N, Hs, s, Ws, s, Cp).transpose(0, 2, 4, 1, 3, 5)
        xph = xph.reshape(N * s2, Hs, Ws, Cp)

    # (phase, row-offset, col-offset) for each tap, all static Python ints.
    taps = tuple(((di % s) * s + (dj % s), di // s, dj // s)
                 for di in range(k) for dj in range(k))

    x_spec = pl.BlockSpec((s2, Hs, Ws, Cp), lambda n: (n, 0, 0, 0))
    w_spec = pl.BlockSpec((k * k * Cp, Fp), lambda n: (0, 0))
    o_spec = pl.BlockSpec((1, Mimg, Fp), lambda n: (n, 0, 0))
    cp = pltpu.CompilerParams(dimension_semantics=("parallel",),
                              vmem_limit_bytes=32 * 1024 * 1024)

    if bn:
        raw, stats = pl.pallas_call(
            functools.partial(_conv_bn_stats_kernel, taps=taps, Ho=Ho, Wo=Wo),
            out_shape=(jax.ShapeDtypeStruct((N, Mimg, Fp), jnp.bfloat16),
                       jax.ShapeDtypeStruct((N, 8, Fp), jnp.float32)),
            grid=(N,),
            in_specs=[x_spec, w_spec],
            out_specs=(o_spec, pl.BlockSpec((1, 8, Fp), lambda n: (n, 0, 0))),
            compiler_params=cp,
        )(xph, wk)
        # nn.BatchNorm2d (training-mode) batch statistics from the in-kernel
        # f32 sums; no extra HBM pass over the raw tensor.
        cnt = float(N * Mimg)
        ssum = jnp.sum(stats[:, 0, :F_], axis=0)
        ssq = jnp.sum(stats[:, 1, :F_], axis=0)
        mean = ssum / cnt
        var = jnp.maximum(ssq / cnt - mean * mean, 0.0)       # biased variance
        scale_f = params['gamma'] * jax.lax.rsqrt(var + 1e-5)
        shift_f = params['beta'] - mean * scale_f
        scale = jnp.pad(scale_f, (0, Fp - F_)).reshape(1, Fp)
        shift = jnp.pad(shift_f, (0, Fp - F_)).reshape(1, Fp)

        res2d = None
        if residual is not None:
            r_x, r_seg = residual
            if tuple(r_x.shape) == (N, Ho, Wo, Fp) and list(r_seg) == [F_]:
                res2d = r_x.reshape(N * Mimg, Fp)
        out2d, fused2d = affine_leaky_pallas(
            raw.reshape(N * Mimg, Fp), scale, shift, slope, residual=res2d)
        out = out2d.reshape(N, Ho, Wo, Fp)
        fused = None if fused2d is None else fused2d.reshape(N, Ho, Wo, Fp)
        return out, [F_], fused

    bias = jnp.pad(params['bias'], (0, Fp - F_)).reshape(1, Fp)
    out = pl.pallas_call(
        functools.partial(_conv_bias_act_kernel, taps=taps,
                          Ho=Ho, Wo=Wo, slope=slope),
        out_shape=jax.ShapeDtypeStruct((N, Mimg, Fp), jnp.bfloat16),
        grid=(N,),
        in_specs=[x_spec, w_spec, pl.BlockSpec((1, Fp), lambda n: (0, 0))],
        out_specs=o_spec,
        compiler_params=cp,
    )(xph, wk, bias)
    return out.reshape(N, Ho, Wo, Fp), [F_], None


# ----------------------------- yolo decode ----------------------------------

def _real_channels(x, seg):
    """Gather the real channels out of the lane-padded layout."""
    parts = [x[..., m * LANES:m * LANES + fm] for m, fm in enumerate(seg)]
    return parts[0] if len(parts) == 1 else jnp.concatenate(parts, axis=-1)


def predict_transform(pred, inp_dim, anchors, num_classes):
    """Standard YOLOv3 detection decode; pred is NHWC f32 (B, G, G, A*(5+nc))."""
    B, G, _, _ = pred.shape
    stride = inp_dim // G
    A = len(anchors)
    D = 5 + num_classes
    p = pred.reshape(B, G * G * A, D)

    anch = jnp.asarray(anchors, jnp.float32) / float(stride)        # (A, 2)
    xs, ys = jnp.meshgrid(jnp.arange(G, dtype=jnp.float32),
                          jnp.arange(G, dtype=jnp.float32))
    xy_off = jnp.concatenate([xs.reshape(-1, 1), ys.reshape(-1, 1)], axis=1)
    xy_off = jnp.tile(xy_off, (1, A)).reshape(-1, 2)[None]          # (1,GGA,2)
    anch_t = jnp.tile(anch, (G * G, 1))[None]                       # (1,GGA,2)

    xy = jax.nn.sigmoid(p[..., 0:2]) + xy_off
    wh = jnp.exp(p[..., 2:4]) * anch_t
    obj = jax.nn.sigmoid(p[..., 4:5])
    cls = jax.nn.sigmoid(p[..., 5:])
    boxes = jnp.concatenate([xy, wh], axis=-1) * float(stride)
    return jnp.concatenate([boxes, obj, cls], axis=-1)


# ----------------------------- network config -------------------------------

_ANCHORS = '10,13,16,30,33,23,30,61,62,45,59,119'

BLOCKS = [
    {'type': 'net', 'height': '16', 'width': '16', 'channels': '3'},
    {'type': 'convolutional', 'batch_normalize': '1', 'filters': '8',
     'size': '3', 'stride': '1', 'pad': '1', 'activation': 'leaky'},   # 0
    {'type': 'convolutional', 'batch_normalize': '1', 'filters': '16',
     'size': '3', 'stride': '2', 'pad': '1', 'activation': 'leaky'},   # 1
    {'type': 'convolutional', 'batch_normalize': '1', 'filters': '8',
     'size': '1', 'stride': '1', 'pad': '1', 'activation': 'leaky'},   # 2
    {'type': 'convolutional', 'batch_normalize': '1', 'filters': '16',
     'size': '3', 'stride': '1', 'pad': '1', 'activation': 'leaky'},   # 3
    {'type': 'shortcut', 'from': '-3', 'activation': 'linear'},        # 4
    {'type': 'convolutional', 'filters': '27', 'size': '1',
     'stride': '1', 'pad': '1', 'activation': 'linear'},               # 5
    {'type': 'yolo', 'mask': '0,1,2', 'anchors': _ANCHORS,
     'classes': '4', 'num': '6'},                                      # 6
    {'type': 'route', 'layers': '-3'},                                 # 7
    {'type': 'convolutional', 'batch_normalize': '1', 'filters': '8',
     'size': '1', 'stride': '1', 'pad': '1', 'activation': 'leaky'},   # 8
    {'type': 'upsample', 'stride': '2'},                               # 9
    {'type': 'route', 'layers': '-1,-10'},                             # 10
    {'type': 'convolutional', 'filters': '27', 'size': '1',
     'stride': '1', 'pad': '1', 'activation': 'linear'},               # 11
    {'type': 'yolo', 'mask': '3,4,5', 'anchors': _ANCHORS,
     'classes': '4', 'num': '6'},                                      # 12
]


def init_params(blocks, key):
    """Deterministic parameter init mirroring create_modules' shape logic."""
    params = []
    prev_filters = int(blocks[0].get('channels', 3))
    output_filters = []
    for index, b in enumerate(blocks[1:]):
        p = {}
        filters = prev_filters
        if b['type'] == 'convolutional':
            filters = int(b['filters'])
            k = int(b['size'])
            key, wk, bk, gk, bbk = jax.random.split(key, 5)
            p['weight'] = 0.1 * jax.random.normal(
                wk, (filters, prev_filters, k, k), jnp.float32)
            if int(b.get('batch_normalize', 0)):
                p['gamma'] = 1.0 + 0.05 * jax.random.normal(gk, (filters,), jnp.float32)
                p['beta'] = 0.05 * jax.random.normal(bbk, (filters,), jnp.float32)
            else:
                p['bias'] = 0.05 * jax.random.normal(bk, (filters,), jnp.float32)
        elif b['type'] == 'route':
            layers = [int(l) for l in b['layers'].split(',')]
            start = layers[0]
            end = layers[1] if len(layers) > 1 else 0
            if start > 0:
                start -= index
            if end > 0:
                end -= index
            if end < 0:
                filters = output_filters[index + start] + output_filters[index + end]
            else:
                filters = output_filters[index + start]
        params.append(p)
        prev_filters = filters
        output_filters.append(filters)
    return params


def darknet_forward(blocks, params, x_nchw):
    """Mirrors Darknet.forward(x, CUDA); activations kept lane-padded NHWC bf16."""
    net_info = blocks[0]
    layer_blocks = blocks[1:]

    x = jnp.transpose(x_nchw, (0, 2, 3, 1))       # one-time NCHW -> NHWC
    c0 = x.shape[-1]
    x = jnp.pad(x, ((0, 0), (0, 0), (0, 0), (0, _ceil_to(c0, LANES) - c0)))
    x = x.astype(jnp.bfloat16)
    seg = [c0]

    outputs, out_segs = {}, {}
    fused_shortcut = {}
    detections = None
    for i, block in enumerate(layer_blocks):
        t = block['type']
        if t == 'convolutional':
            # Lookahead: if the next block is a shortcut consuming this conv's
            # output, fuse its residual add into the conv's affine epilogue.
            residual = None
            if (i + 1 < len(layer_blocks)
                    and layer_blocks[i + 1]['type'] == 'shortcut'
                    and int(block.get('batch_normalize', 0))):
                ridx = (i + 1) + int(layer_blocks[i + 1]['from'])
                if ridx in outputs and out_segs.get(ridx) is not None:
                    residual = (outputs[ridx], out_segs[ridx])
            x, seg, fused = conv2d_block(x, seg, params[i], block, residual)
            if fused is not None:
                fused_shortcut[i + 1] = (fused, list(seg))
        elif t == 'upsample':
            N, H, W, C = x.shape
            # TODO(synk): bilinear x2 upsample via jax.image.resize
            # (align_corners=False semantics), not a Pallas kernel.
            x = jax.image.resize(x.astype(jnp.float32), (N, 2 * H, 2 * W, C),
                                 method='bilinear').astype(jnp.bfloat16)
        elif t == 'route':
            layers = [int(l) for l in block['layers'].split(',')]
            if layers[0] > 0:
                layers[0] -= i
            if len(layers) == 1:
                x = outputs[i + layers[0]]
                seg = list(out_segs[i + layers[0]])
            else:
                if layers[1] > 0:
                    layers[1] -= i
                a_i, b_i = i + layers[0], i + layers[1]
                x = jnp.concatenate([outputs[a_i], outputs[b_i]], axis=-1)
                seg = list(out_segs[a_i]) + list(out_segs[b_i])
        elif t == 'shortcut':
            if i in fused_shortcut:
                x, seg = fused_shortcut.pop(i)     # add already fused upstream
            else:
                frm = int(block['from'])
                x = add_pallas(outputs[i - 1], outputs[i + frm])
                seg = list(out_segs[i - 1])
        elif t == 'yolo':
            mask = [int(m) for m in block['mask'].split(',')]
            av = [int(v) for v in block['anchors'].split(',')]
            anchors = [(av[j], av[j + 1]) for j in range(0, len(av), 2)]
            anchors = [anchors[m] for m in mask]
            num_classes = int(block['classes'])
            inp_dim = int(net_info['height'])
            pred = _real_channels(x, seg).astype(jnp.float32)
            x = predict_transform(pred, inp_dim, anchors, num_classes)
            seg = None
            detections = x if detections is None else jnp.concatenate(
                [detections, x], axis=1)
        outputs[i] = x
        out_segs[i] = list(seg) if seg is not None else None
    return detections


if __name__ == "__main__":
    key = jax.random.PRNGKey(0)
    pkey, xkey = jax.random.split(key)
    params = init_params(BLOCKS, pkey)
    x = jax.random.normal(xkey, (2, 3, 16, 16), jnp.float32)   # NCHW input

    fwd = jax.jit(lambda inp: darknet_forward(BLOCKS, params, inp))
    det = fwd(x)
    jax.block_until_ready(det)

    # Two yolo heads: 8x8 grid and 16x16 grid, 3 anchors each, 5+4 attrs.
    assert det.shape == (2, 8 * 8 * 3 + 16 * 16 * 3, 9), det.shape
    assert det.dtype == jnp.float32
    print("KERNEL_OK")
</pallas_src>

<mosaic_0001>
module attributes {stable_mosaic.version = 11 : i64} {
  func.func @_conv_bn_stats_kernel(%arg0: i32, %arg1: memref<1x18x18x128xbf16, #tpu.memory_space<vmem>>, %arg2: memref<1152x128xbf16, #tpu.memory_space<vmem>>, %arg3: memref<1x256x128xbf16, #tpu.memory_space<vmem>>, %arg4: memref<1x8x128xf32, #tpu.memory_space<vmem>>) attributes {dimension_semantics = [#tpu.dimension_semantics<parallel>], iteration_bounds = array<i64: 2>, scalar_prefetch = 0 : i64, scratch_operands = 0 : i64, tpu.core_type = #tpu.core_type<tc>, window_params = [{transform_indices = @transform_0, window_bounds = array<i64: 1, 18, 18, 128>}, {pipeline_mode = #tpu.pipeline_mode<synchronous>, transform_indices = @transform_1, window_bounds = array<i64: 1152, 128>}, {transform_indices = @transform_2, window_bounds = array<i64: 1, 256, 128>}, {transform_indices = @transform_3, window_bounds = array<i64: 1, 8, 128>}]} {
    %c0 = arith.constant 0 : index
    %c0_0 = arith.constant 0 : index
    %c0_1 = arith.constant 0 : index
    %c0_2 = arith.constant 0 : index
    %0 = vector.load %arg1[%c0, %c0_0, %c0_1, %c0_2] : memref<1x18x18x128xbf16, #tpu.memory_space<vmem>>, vector<1x18x16x128xbf16>
    %1 = vector.shape_cast %0 : vector<1x18x16x128xbf16> to vector<18x16x128xbf16>
    %2 = vector.extract_strided_slice %1 {offsets = [0, 0, 0], sizes = [16, 16, 128], strides = [1, 1, 1]} : vector<18x16x128xbf16> to vector<16x16x128xbf16>
    %3 = vector.shape_cast %2 : vector<16x16x128xbf16> to vector<256x128xbf16>
    %c0_3 = arith.constant 0 : index
    %c0_4 = arith.constant 0 : index
    %c1 = arith.constant 1 : index
    %c0_5 = arith.constant 0 : index
    %4 = vector.load %arg1[%c0_3, %c0_4, %c1, %c0_5] : memref<1x18x18x128xbf16, #tpu.memory_space<vmem>>, vector<1x18x16x128xbf16>
    %5 = vector.shape_cast %4 : vector<1x18x16x128xbf16> to vector<18x16x128xbf16>
    %6 = vector.extract_strided_slice %5 {offsets = [0, 0, 0], sizes = [16, 16, 128], strides = [1, 1, 1]} : vector<18x16x128xbf16> to vector<16x16x128xbf16>
    %7 = vector.shape_cast %6 : vector<16x16x128xbf16> to vector<256x128xbf16>
    %c0_6 = arith.constant 0 : index
    %c0_7 = arith.constant 0 : index
    %c2 = arith.constant 2 : index
    %c0_8 = arith.constant 0 : index
    %8 = vector.load %arg1[%c0_6, %c0_7, %c2, %c0_8] : memref<1x18x18x128xbf16, #tpu.memory_space<vmem>>, vector<1x18x16x128xbf16>
    %9 = vector.shape_cast %8 : vector<1x18x16x128xbf16> to vector<18x16x128xbf16>
    %10 = vector.extract_strided_slice %9 {offsets = [0, 0, 0], sizes = [16, 16, 128], strides = [1, 1, 1]} : vector<18x16x128xbf16> to vector<16x16x128xbf16>
    %11 = vector.shape_cast %10 : vector<16x16x128xbf16> to vector<256x128xbf16>
    %12 = vector.extract_strided_slice %1 {offsets = [1, 0, 0], sizes = [16, 16, 128], strides = [1, 1, 1]} : vector<18x16x128xbf16> to vector<16x16x128xbf16>
    %13 = vector.shape_cast %12 : vector<16x16x128xbf16> to vector<256x128xbf16>
    %14 = vector.extract_strided_slice %5 {offsets = [1, 0, 0], sizes = [16, 16, 128], strides = [1, 1, 1]} : vector<18x16x128xbf16> to vector<16x16x128xbf16>
    %15 = vector.shape_cast %14 : vector<16x16x128xbf16> to vector<256x128xbf16>
    %16 = vector.extract_strided_slice %9 {offsets = [1, 0, 0], sizes = [16, 16, 128], strides = [1, 1, 1]} : vector<18x16x128xbf16> to vector<16x16x128xbf16>
    %17 = vector.shape_cast %16 : vector<16x16x128xbf16> to vector<256x128xbf16>
    %18 = vector.extract_strided_slice %1 {offsets = [2, 0, 0], sizes = [16, 16, 128], strides = [1, 1, 1]} : vector<18x16x128xbf16> to vector<16x16x128xbf16>
    %19 = vector.shape_cast %18 : vector<16x16x128xbf16> to vector<256x128xbf16>
    %20 = vector.extract_strided_slice %5 {offsets = [2, 0, 0], sizes = [16, 16, 128], strides = [1, 1, 1]} : vector<18x16x128xbf16> to vector<16x16x128xbf16>
    %21 = vector.shape_cast %20 : vector<16x16x128xbf16> to vector<256x128xbf16>
    %22 = vector.extract_strided_slice %9 {offsets = [2, 0, 0], sizes = [16, 16, 128], strides = [1, 1, 1]} : vector<18x16x128xbf16> to vector<16x16x128xbf16>
    %23 = vector.shape_cast %22 : vector<16x16x128xbf16> to vector<256x128xbf16>
    %24 = tpu.concatenate %3, %7, %11, %13, %15, %17, %19, %21, %23 in 1 : vector<256x128xbf16>, vector<256x128xbf16>, vector<256x128xbf16>, vector<256x128xbf16>, vector<256x128xbf16>, vector<256x128xbf16>, vector<256x128xbf16>, vector<256x128xbf16>, vector<256x128xbf16> -> vector<256x1152xbf16>
    %c0_9 = arith.constant 0 : index
    %c0_10 = arith.constant 0 : index
    %25 = vector.load %arg2[%c0_9, %c0_10] : memref<1152x128xbf16, #tpu.memory_space<vmem>>, vector<1152x128xbf16>
    %cst = arith.constant dense<0.000000e+00> : vector<256x128xf32>
    %26 = tpu.matmul %24, %25, %cst {dimension_numbers = #tpu.dot_dimension_numbers<[1], [0], [0], [1], [0, 0, 1, 1], [], []>} : vector<256x1152xbf16>, vector<1152x128xbf16>, vector<256x128xf32> -> vector<256x128xf32>
    %27 = arith.truncf %26 : vector<256x128xf32> to vector<256x128xbf16>
    %c0_11 = arith.constant 0 : index
    %c0_12 = arith.constant 0 : index
    %c0_13 = arith.constant 0 : index
    %28 = vector.load %arg3[%c0_11, %c0_12, %c0_13] : memref<1x256x128xbf16, #tpu.memory_space<vmem>>, vector<1x256x128xbf16>
    %29 = vector.shape_cast %28 : vector<1x256x128xbf16> to vector<256x128xbf16>
    %30 = vector.shape_cast %27 : vector<256x128xbf16> to vector<1x256x128xbf16>
    tpu.vector_store %arg3[%c0_11, %c0_12, %c0_13], %30 {strides = array<i32>} : memref<1x256x128xbf16, #tpu.memory_space<vmem>>, vector<1x256x128xbf16>,
    %cst_14 = arith.constant dense<0.000000e+00> : vector<128xf32>
    %31 = vector.multi_reduction <add>, %26, %cst_14 [0] : vector<256x128xf32> to vector<128xf32>
    %32 = vector.shape_cast %31 : vector<128xf32> to vector<1x128xf32>
    %33 = arith.mulf %26, %26 : vector<256x128xf32>
    %cst_15 = arith.constant dense<0.000000e+00> : vector<128xf32>
    %34 = vector.multi_reduction <add>, %33, %cst_15 [0] : vector<256x128xf32> to vector<128xf32>
    %35 = vector.shape_cast %34 : vector<128xf32> to vector<1x128xf32>
    %cst_16 = arith.constant 0.000000e+00 : f32
    %36 = vector.broadcast %cst_16 : f32 to vector<6x128xf32>
    %37 = tpu.concatenate %32, %35, %36 in 0 : vector<1x128xf32>, vector<1x128xf32>, vector<6x128xf32> -> vector<8x128xf32>
    %c0_17 = arith.constant 0 : index
    %c0_18 = arith.constant 0 : index
    %c0_19 = arith.constant 0 : index
    %38 = vector.load %arg4[%c0_17, %c0_18, %c0_19] : memref<1x8x128xf32, #tpu.memory_space<vmem>>, vector<1x8x128xf32>
    %39 = vector.shape_cast %38 : vector<1x8x128xf32> to vector<8x128xf32>
    %40 = vector.shape_cast %37 : vector<8x128xf32> to vector<1x8x128xf32>
    tpu.vector_store %arg4[%c0_17, %c0_18, %c0_19], %40 {strides = array<i32>} : memref<1x8x128xf32, #tpu.memory_space<vmem>>, vector<1x8x128xf32>,
    return
  }
  func.func @transform_0(%arg0: i32) -> (i32, i32, i32, i32) {
    %c0_i32 = arith.constant 0 : i32
    %c0_i32_0 = arith.constant 0 : i32
    %c0_i32_1 = arith.constant 0 : i32
    %c0_i32_2 = arith.constant 0 : i32
    return %arg0, %c0_i32, %c0_i32_0, %c0_i32_1 : i32, i32, i32, i32
  }
  func.func @transform_1(%arg0: i32) -> (i32, i32) {
    %c0_i32 = arith.constant 0 : i32
    %c0_i32_0 = arith.constant 0 : i32
    %c0_i32_1 = arith.constant 0 : i32
    return %c0_i32, %c0_i32_0 : i32, i32
  }
  func.func @transform_2(%arg0: i32) -> (i32, i32, i32) {
    %c0_i32 = arith.constant 0 : i32
    %c0_i32_0 = arith.constant 0 : i32
    %c0_i32_1 = arith.constant 0 : i32
    return %arg0, %c0_i32, %c0_i32_0 : i32, i32, i32
  }
  func.func @transform_3(%arg0: i32) -> (i32, i32, i32) {
    %c0_i32 = arith.constant 0 : i32
    %c0_i32_0 = arith.constant 0 : i32
    %c0_i32_1 = arith.constant 0 : i32
    return %arg0, %c0_i32, %c0_i32_0 : i32, i32, i32
  }
}

module attributes {stable_mosaic.version = 11 : i64} {
  func.func @_affine_leaky_kernel(%arg0: i32, %arg1: memref<512x128xbf16, #tpu.memory_space<vmem>>, %arg2: memref<1x128xf32, #tpu.memory_space<vmem>>, %arg3: memref<1x128xf32, #tpu.memory_space<vmem>>, %arg4: memref<512x128xbf16, #tpu.memory_space<vmem>>) attributes {dimension_semantics = [#tpu.dimension_semantics<parallel>], iteration_bounds = array<i64: 1>, scalar_prefetch = 0 : i64, scratch_operands = 0 : i64, tpu.core_type = #tpu.core_type<tc>, window_params = [{transform_indices = @transform_0, window_bounds = array<i64: 512, 128>}, {pipeline_mode = #tpu.pipeline_mode<synchronous>, transform_indices = @transform_1, window_bounds = array<i64: 1, 128>}, {pipeline_mode = #tpu.pipeline_mode<synchronous>, transform_indices = @transform_2, window_bounds = array<i64: 1, 128>}, {transform_indices = @transform_3, window_bounds = array<i64: 512, 128>}]} {
    %c0 = arith.constant 0 : index
    %c0_0 = arith.constant 0 : index
    %0 = vector.load %arg1[%c0, %c0_0] : memref<512x128xbf16, #tpu.memory_space<vmem>>, vector<512x128xbf16>
    %1 = arith.extf %0 : vector<512x128xbf16> to vector<512x128xf32>
    %c0_1 = arith.constant 0 : index
    %c0_2 = arith.constant 0 : index
    %2 = vector.load %arg2[%c0_1, %c0_2] : memref<1x128xf32, #tpu.memory_space<vmem>>, vector<1x128xf32>
    %3 = vector.broadcast %2 : vector<1x128xf32> to vector<512x128xf32>
    %4 = arith.mulf %1, %3 : vector<512x128xf32>
    %c0_3 = arith.constant 0 : index
    %c0_4 = arith.constant 0 : index
    %5 = vector.load %arg3[%c0_3, %c0_4] : memref<1x128xf32, #tpu.memory_space<vmem>>, vector<1x128xf32>
    %6 = vector.broadcast %5 : vector<1x128xf32> to vector<512x128xf32>
    %7 = arith.addf %4, %6 : vector<512x128xf32>
    %cst = arith.constant 0.000000e+00 : f32
    %8 = vector.broadcast %cst : f32 to vector<512x128xf32>
    %9 = arith.cmpf ogt, %7, %8 : vector<512x128xf32>
    %cst_5 = arith.constant 1.000000e-01 : f32
    %10 = vector.broadcast %cst_5 : f32 to vector<512x128xf32>
    %11 = arith.mulf %10, %7 : vector<512x128xf32>
    %12 = arith.select %9, %7, %11 : vector<512x128xi1>, vector<512x128xf32>
    %13 = arith.truncf %12 : vector<512x128xf32> to vector<512x128xbf16>
    %c0_6 = arith.constant 0 : index
    %c0_7 = arith.constant 0 : index
    %14 = vector.load %arg4[%c0_6, %c0_7] : memref<512x128xbf16, #tpu.memory_space<vmem>>, vector<512x128xbf16>
    tpu.vector_store %arg4[%c0_6, %c0_7], %13 {strides = array<i32>} : memref<512x128xbf16, #tpu.memory_space<vmem>>, vector<512x128xbf16>,
    return
  }
  func.func @transform_0(%arg0: i32) -> (i32, i32) {
    %c0_i32 = arith.constant 0 : i32
    %c0_i32_0 = arith.constant 0 : i32
    return %arg0, %c0_i32 : i32, i32
  }
  func.func @transform_1(%arg0: i32) -> (i32, i32) {
    %c0_i32 = arith.constant 0 : i32
    %c0_i32_0 = arith.constant 0 : i32
    %c0_i32_1 = arith.constant 0 : i32
    return %c0_i32, %c0_i32_0 : i32, i32
  }
  func.func @transform_2(%arg0: i32) -> (i32, i32) {
    %c0_i32 = arith.constant 0 : i32
    %c0_i32_0 = arith.constant 0 : i32
    %c0_i32_1 = arith.constant 0 : i32
    return %c0_i32, %c0_i32_0 : i32, i32
  }
  func.func @transform_3(%arg0: i32) -> (i32, i32) {
    %c0_i32 = arith.constant 0 : i32
    %c0_i32_0 = arith.constant 0 : i32
    return %arg0, %c0_i32 : i32, i32
  }
}

module attributes {stable_mosaic.version = 11 : i64} {
  func.func @_conv_bn_stats_kernel(%arg0: i32, %arg1: memref<4x9x9x128xbf16, #tpu.memory_space<vmem>>, %arg2: memref<1152x128xbf16, #tpu.memory_space<vmem>>, %arg3: memref<1x64x128xbf16, #tpu.memory_space<vmem>>, %arg4: memref<1x8x128xf32, #tpu.memory_space<vmem>>) attributes {dimension_semantics = [#tpu.dimension_semantics<parallel>], iteration_bounds = array<i64: 2>, scalar_prefetch = 0 : i64, scratch_operands = 0 : i64, tpu.core_type = #tpu.core_type<tc>, window_params = [{transform_indices = @transform_0, window_bounds = array<i64: 4, 9, 9, 128>}, {pipeline_mode = #tpu.pipeline_mode<synchronous>, transform_indices = @transform_1, window_bounds = array<i64: 1152, 128>}, {transform_indices = @transform_2, window_bounds = array<i64: 1, 64, 128>}, {transform_indices = @transform_3, window_bounds = array<i64: 1, 8, 128>}]} {
    %c0 = arith.constant 0 : index
    %c0_0 = arith.constant 0 : index
    %c0_1 = arith.constant 0 : index
    %c0_2 = arith.constant 0 : index
    %0 = vector.load %arg1[%c0, %c0_0, %c0_1, %c0_2] : memref<4x9x9x128xbf16, #tpu.memory_space<vmem>>, vector<1x9x8x128xbf16>
    %1 = vector.shape_cast %0 : vector<1x9x8x128xbf16> to vector<9x8x128xbf16>
    %2 = vector.extract_strided_slice %1 {offsets = [0, 0, 0], sizes = [8, 8, 128], strides = [1, 1, 1]} : vector<9x8x128xbf16> to vector<8x8x128xbf16>
    %3 = vector.shape_cast %2 : vector<8x8x128xbf16> to vector<64x128xbf16>
    %c1 = arith.constant 1 : index
    %c0_3 = arith.constant 0 : index
    %c0_4 = arith.constant 0 : index
    %c0_5 = arith.constant 0 : index
    %4 = vector.load %arg1[%c1, %c0_3, %c0_4, %c0_5] : memref<4x9x9x128xbf16, #tpu.memory_space<vmem>>, vector<1x9x8x128xbf16>
    %5 = vector.shape_cast %4 : vector<1x9x8x128xbf16> to vector<9x8x128xbf16>
    %6 = vector.extract_strided_slice %5 {offsets = [0, 0, 0], sizes = [8, 8, 128], strides = [1, 1, 1]} : vector<9x8x128xbf16> to vector<8x8x128xbf16>
    %7 = vector.shape_cast %6 : vector<8x8x128xbf16> to vector<64x128xbf16>
    %c0_6 = arith.constant 0 : index
    %c0_7 = arith.constant 0 : index
    %c1_8 = arith.constant 1 : index
    %c0_9 = arith.constant 0 : index
    %8 = vector.load %arg1[%c0_6, %c0_7, %c1_8, %c0_9] : memref<4x9x9x128xbf16, #tpu.memory_space<vmem>>, vector<1x9x8x128xbf16>
    %9 = vector.shape_cast %8 : vector<1x9x8x128xbf16> to vector<9x8x128xbf16>
    %10 = vector.extract_strided_slice %9 {offsets = [0, 0, 0], sizes = [8, 8, 128], strides = [1, 1, 1]} : vector<9x8x128xbf16> to vector<8x8x128xbf16>
    %11 = vector.shape_cast %10 : vector<8x8x128xbf16> to vector<64x128xbf16>
    %c2 = arith.constant 2 : index
    %c0_10 = arith.constant 0 : index
    %c0_11 = arith.constant 0 : index
    %c0_12 = arith.constant 0 : index
    %12 = vector.load %arg1[%c2, %c0_10, %c0_11, %c0_12] : memref<4x9x9x128xbf16, #tpu.memory_space<vmem>>, vector<1x9x8x128xbf16>
    %13 = vector.shape_cast %12 : vector<1x9x8x128xbf16> to vector<9x8x128xbf16>
    %14 = vector.extract_strided_slice %13 {offsets = [0, 0, 0], sizes = [8, 8, 128], strides = [1, 1, 1]} : vector<9x8x128xbf16> to vector<8x8x128xbf16>
    %15 = vector.shape_cast %14 : vector<8x8x128xbf16> to vector<64x128xbf16>
    %c3 = arith.constant 3 : index
    %c0_13 = arith.constant 0 : index
    %c0_14 = arith.constant 0 : index
    %c0_15 = arith.constant 0 : index
    %16 = vector.load %arg1[%c3, %c0_13, %c0_14, %c0_15] : memref<4x9x9x128xbf16, #tpu.memory_space<vmem>>, vector<1x9x8x128xbf16>
    %17 = vector.shape_cast %16 : vector<1x9x8x128xbf16> to vector<9x8x128xbf16>
    %18 = vector.extract_strided_slice %17 {offsets = [0, 0, 0], sizes = [8, 8, 128], strides = [1, 1, 1]} : vector<9x8x128xbf16> to vector<8x8x128xbf16>
    %19 = vector.shape_cast %18 : vector<8x8x128xbf16> to vector<64x128xbf16>
    %c2_16 = arith.constant 2 : index
    %c0_17 = arith.constant 0 : index
    %c1_18 = arith.constant 1 : index
    %c0_19 = arith.constant 0 : index
    %20 = vector.load %arg1[%c2_16, %c0_17, %c1_18, %c0_19] : memref<4x9x9x128xbf16, #tpu.memory_space<vmem>>, vector<1x9x8x128xbf16>
    %21 = vector.shape_cast %20 : vector<1x9x8x128xbf16> to vector<9x8x128xbf16>
    %22 = vector.extract_strided_slice %21 {offsets = [0, 0, 0], sizes = [8, 8, 128], strides = [1, 1, 1]} : vector<9x8x128xbf16> to vector<8x8x128xbf16>
    %23 = vector.shape_cast %22 : vector<8x8x128xbf16> to vector<64x128xbf16>
    %24 = vector.extract_strided_slice %1 {offsets = [1, 0, 0], sizes = [8, 8, 128], strides = [1, 1, 1]} : vector<9x8x128xbf16> to vector<8x8x128xbf16>
    %25 = vector.shape_cast %24 : vector<8x8x128xbf16> to vector<64x128xbf16>
    %26 = vector.extract_strided_slice %5 {offsets = [1, 0, 0], sizes = [8, 8, 128], strides = [1, 1, 1]} : vector<9x8x128xbf16> to vector<8x8x128xbf16>
    %27 = vector.shape_cast %26 : vector<8x8x128xbf16> to vector<64x128xbf16>
    %28 = vector.extract_strided_slice %9 {offsets = [1, 0, 0], sizes = [8, 8, 128], strides = [1, 1, 1]} : vector<9x8x128xbf16> to vector<8x8x128xbf16>
    %29 = vector.shape_cast %28 : vector<8x8x128xbf16> to vector<64x128xbf16>
    %30 = tpu.concatenate %3, %7, %11, %15, %19, %23, %25, %27, %29 in 1 : vector<64x128xbf16>, vector<64x128xbf16>, vector<64x128xbf16>, vector<64x128xbf16>, vector<64x128xbf16>, vector<64x128xbf16>, vector<64x128xbf16>, vector<64x128xbf16>, vector<64x128xbf16> -> vector<64x1152xbf16>
    %c0_20 = arith.constant 0 : index
    %c0_21 = arith.constant 0 : index
    %31 = vector.load %arg2[%c0_20, %c0_21] : memref<1152x128xbf16, #tpu.memory_space<vmem>>, vector<1152x128xbf16>
    %cst = arith.constant dense<0.000000e+00> : vector<64x128xf32>
    %32 = tpu.matmul %30, %31, %cst {dimension_numbers = #tpu.dot_dimension_numbers<[1], [0], [0], [1], [0, 0, 1, 1], [], []>} : vector<64x1152xbf16>, vector<1152x128xbf16>, vector<64x128xf32> -> vector<64x128xf32>
    %33 = arith.truncf %32 : vector<64x128xf32> to vector<64x128xbf16>
    %c0_22 = arith.constant 0 : index
    %c0_23 = arith.constant 0 : index
    %c0_24 = arith.constant 0 : index
    %34 = vector.load %arg3[%c0_22, %c0_23, %c0_24] : memref<1x64x128xbf16, #tpu.memory_space<vmem>>, vector<1x64x128xbf16>
    %35 = vector.shape_cast %34 : vector<1x64x128xbf16> to vector<64x128xbf16>
    %36 = vector.shape_cast %33 : vector<64x128xbf16> to vector<1x64x128xbf16>
    tpu.vector_store %arg3[%c0_22, %c0_23, %c0_24], %36 {strides = array<i32>} : memref<1x64x128xbf16, #tpu.memory_space<vmem>>, vector<1x64x128xbf16>,
    %cst_25 = arith.constant dense<0.000000e+00> : vector<128xf32>
    %37 = vector.multi_reduction <add>, %32, %cst_25 [0] : vector<64x128xf32> to vector<128xf32>
    %38 = vector.shape_cast %37 : vector<128xf32> to vector<1x128xf32>
    %39 = arith.mulf %32, %32 : vector<64x128xf32>
    %cst_26 = arith.constant dense<0.000000e+00> : vector<128xf32>
    %40 = vector.multi_reduction <add>, %39, %cst_26 [0] : vector<64x128xf32> to vector<128xf32>
    %41 = vector.shape_cast %40 : vector<128xf32> to vector<1x128xf32>
    %cst_27 = arith.constant 0.000000e+00 : f32
    %42 = vector.broadcast %cst_27 : f32 to vector<6x128xf32>
    %43 = tpu.concatenate %38, %41, %42 in 0 : vector<1x128xf32>, vector<1x128xf32>, vector<6x128xf32> -> vector<8x128xf32>
    %c0_28 = arith.constant 0 : index
    %c0_29 = arith.constant 0 : index
    %c0_30 = arith.constant 0 : index
    %44 = vector.load %arg4[%c0_28, %c0_29, %c0_30] : memref<1x8x128xf32, #tpu.memory_space<vmem>>, vector<1x8x128xf32>
    %45 = vector.shape_cast %44 : vector<1x8x128xf32> to vector<8x128xf32>
    %46 = vector.shape_cast %43 : vector<8x128xf32> to vector<1x8x128xf32>
    tpu.vector_store %arg4[%c0_28, %c0_29, %c0_30], %46 {strides = array<i32>} : memref<1x8x128xf32, #tpu.memory_space<vmem>>, vector<1x8x128xf32>,
    return
  }
  func.func @transform_0(%arg0: i32) -> (i32, i32, i32, i32) {
    %c0_i32 = arith.constant 0 : i32
    %c0_i32_0 = arith.constant 0 : i32
    %c0_i32_1 = arith.constant 0 : i32
    %c0_i32_2 = arith.constant 0 : i32
    return %arg0, %c0_i32, %c0_i32_0, %c0_i32_1 : i32, i32, i32, i32
  }
  func.func @transform_1(%arg0: i32) -> (i32, i32) {
    %c0_i32 = arith.constant 0 : i32
    %c0_i32_0 = arith.constant 0 : i32
    %c0_i32_1 = arith.constant 0 : i32
    return %c0_i32, %c0_i32_0 : i32, i32
  }
  func.func @transform_2(%arg0: i32) -> (i32, i32, i32) {
    %c0_i32 = arith.constant 0 : i32
    %c0_i32_0 = arith.constant 0 : i32
    %c0_i32_1 = arith.constant 0 : i32
    return %arg0, %c0_i32, %c0_i32_0 : i32, i32, i32
  }
  func.func @transform_3(%arg0: i32) -> (i32, i32, i32) {
    %c0_i32 = arith.constant 0 : i32
    %c0_i32_0 = arith.constant 0 : i32
    %c0_i32_1 = arith.constant 0 : i32
    return %arg0, %c0_i32, %c0_i32_0 : i32, i32, i32
  }
}

module attributes {stable_mosaic.version = 11 : i64} {
  func.func @_affine_leaky_kernel(%arg0: i32, %arg1: memref<128x128xbf16, #tpu.memory_space<vmem>>, %arg2: memref<1x128xf32, #tpu.memory_space<vmem>>, %arg3: memref<1x128xf32, #tpu.memory_space<vmem>>, %arg4: memref<128x128xbf16, #tpu.memory_space<vmem>>) attributes {dimension_semantics = [#tpu.dimension_semantics<parallel>], iteration_bounds = array<i64: 1>, scalar_prefetch = 0 : i64, scratch_operands = 0 : i64, tpu.core_type = #tpu.core_type<tc>, window_params = [{transform_indices = @transform_0, window_bounds = array<i64: 128, 128>}, {pipeline_mode = #tpu.pipeline_mode<synchronous>, transform_indices = @transform_1, window_bounds = array<i64: 1, 128>}, {pipeline_mode = #tpu.pipeline_mode<synchronous>, transform_indices = @transform_2, window_bounds = array<i64: 1, 128>}, {transform_indices = @transform_3, window_bounds = array<i64: 128, 128>}]} {
    %c0 = arith.constant 0 : index
    %c0_0 = arith.constant 0 : index
    %0 = vector.load %arg1[%c0, %c0_0] : memref<128x128xbf16, #tpu.memory_space<vmem>>, vector<128x128xbf16>
    %1 = arith.extf %0 : vector<128x128xbf16> to vector<128x128xf32>
    %c0_1 = arith.constant 0 : index
    %c0_2 = arith.constant 0 : index
    %2 = vector.load %arg2[%c0_1, %c0_2] : memref<1x128xf32, #tpu.memory_space<vmem>>, vector<1x128xf32>
    %3 = vector.broadcast %2 : vector<1x128xf32> to vector<128x128xf32>
    %4 = arith.mulf %1, %3 : vector<128x128xf32>
    %c0_3 = arith.constant 0 : index
    %c0_4 = arith.constant 0 : index
    %5 = vector.load %arg3[%c0_3, %c0_4] : memref<1x128xf32, #tpu.memory_space<vmem>>, vector<1x128xf32>
    %6 = vector.broadcast %5 : vector<1x128xf32> to vector<128x128xf32>
    %7 = arith.addf %4, %6 : vector<128x128xf32>
    %cst = arith.constant 0.000000e+00 : f32
    %8 = vector.broadcast %cst : f32 to vector<128x128xf32>
    %9 = arith.cmpf ogt, %7, %8 : vector<128x128xf32>
    %cst_5 = arith.constant 1.000000e-01 : f32
    %10 = vector.broadcast %cst_5 : f32 to vector<128x128xf32>
    %11 = arith.mulf %10, %7 : vector<128x128xf32>
    %12 = arith.select %9, %7, %11 : vector<128x128xi1>, vector<128x128xf32>
    %13 = arith.truncf %12 : vector<128x128xf32> to vector<128x128xbf16>
    %c0_6 = arith.constant 0 : index
    %c0_7 = arith.constant 0 : index
    %14 = vector.load %arg4[%c0_6, %c0_7] : memref<128x128xbf16, #tpu.memory_space<vmem>>, vector<128x128xbf16>
    tpu.vector_store %arg4[%c0_6, %c0_7], %13 {strides = array<i32>} : memref<128x128xbf16, #tpu.memory_space<vmem>>, vector<128x128xbf16>,
    return
  }
  func.func @transform_0(%arg0: i32) -> (i32, i32) {
    %c0_i32 = arith.constant 0 : i32
    %c0_i32_0 = arith.constant 0 : i32
    return %arg0, %c0_i32 : i32, i32
  }
  func.func @transform_1(%arg0: i32) -> (i32, i32) {
    %c0_i32 = arith.constant 0 : i32
    %c0_i32_0 = arith.constant 0 : i32
    %c0_i32_1 = arith.constant 0 : i32
    return %c0_i32, %c0_i32_0 : i32, i32
  }
  func.func @transform_2(%arg0: i32) -> (i32, i32) {
    %c0_i32 = arith.constant 0 : i32
    %c0_i32_0 = arith.constant 0 : i32
    %c0_i32_1 = arith.constant 0 : i32
    return %c0_i32, %c0_i32_0 : i32, i32
  }
  func.func @transform_3(%arg0: i32) -> (i32, i32) {
    %c0_i32 = arith.constant 0 : i32
    %c0_i32_0 = arith.constant 0 : i32
    return %arg0, %c0_i32 : i32, i32
  }
}

module attributes {stable_mosaic.version = 11 : i64} {
  func.func @_conv_bn_stats_kernel(%arg0: i32, %arg1: memref<1x8x8x128xbf16, #tpu.memory_space<vmem>>, %arg2: memref<128x128xbf16, #tpu.memory_space<vmem>>, %arg3: memref<1x64x128xbf16, #tpu.memory_space<vmem>>, %arg4: memref<1x8x128xf32, #tpu.memory_space<vmem>>) attributes {dimension_semantics = [#tpu.dimension_semantics<parallel>], iteration_bounds = array<i64: 2>, scalar_prefetch = 0 : i64, scratch_operands = 0 : i64, tpu.core_type = #tpu.core_type<tc>, window_params = [{transform_indices = @transform_0, window_bounds = array<i64: 1, 8, 8, 128>}, {pipeline_mode = #tpu.pipeline_mode<synchronous>, transform_indices = @transform_1, window_bounds = array<i64: 128, 128>}, {transform_indices = @transform_2, window_bounds = array<i64: 1, 64, 128>}, {transform_indices = @transform_3, window_bounds = array<i64: 1, 8, 128>}]} {
    %c0 = arith.constant 0 : index
    %c0_0 = arith.constant 0 : index
    %c0_1 = arith.constant 0 : index
    %c0_2 = arith.constant 0 : index
    %0 = vector.load %arg1[%c0, %c0_0, %c0_1, %c0_2] : memref<1x8x8x128xbf16, #tpu.memory_space<vmem>>, vector<1x8x8x128xbf16>
    %1 = vector.shape_cast %0 : vector<1x8x8x128xbf16> to vector<8x8x128xbf16>
    %2 = vector.shape_cast %1 : vector<8x8x128xbf16> to vector<64x128xbf16>
    %c0_3 = arith.constant 0 : index
    %c0_4 = arith.constant 0 : index
    %3 = vector.load %arg2[%c0_3, %c0_4] : memref<128x128xbf16, #tpu.memory_space<vmem>>, vector<128x128xbf16>
    %cst = arith.constant dense<0.000000e+00> : vector<64x128xf32>
    %4 = tpu.matmul %2, %3, %cst {dimension_numbers = #tpu.dot_dimension_numbers<[1], [0], [0], [1], [0, 0, 1, 1], [], []>} : vector<64x128xbf16>, vector<128x128xbf16>, vector<64x128xf32> -> vector<64x128xf32>
    %5 = arith.truncf %4 : vector<64x128xf32> to vector<64x128xbf16>
    %c0_5 = arith.constant 0 : index
    %c0_6 = arith.constant 0 : index
    %c0_7 = arith.constant 0 : index
    %6 = vector.load %arg3[%c0_5, %c0_6, %c0_7] : memref<1x64x128xbf16, #tpu.memory_space<vmem>>, vector<1x64x128xbf16>
    %7 = vector.shape_cast %6 : vector<1x64x128xbf16> to vector<64x128xbf16>
    %8 = vector.shape_cast %5 : vector<64x128xbf16> to vector<1x64x128xbf16>
    tpu.vector_store %arg3[%c0_5, %c0_6, %c0_7], %8 {strides = array<i32>} : memref<1x64x128xbf16, #tpu.memory_space<vmem>>, vector<1x64x128xbf16>,
    %cst_8 = arith.constant dense<0.000000e+00> : vector<128xf32>
    %9 = vector.multi_reduction <add>, %4, %cst_8 [0] : vector<64x128xf32> to vector<128xf32>
    %10 = vector.shape_cast %9 : vector<128xf32> to vector<1x128xf32>
    %11 = arith.mulf %4, %4 : vector<64x128xf32>
    %cst_9 = arith.constant dense<0.000000e+00> : vector<128xf32>
    %12 = vector.multi_reduction <add>, %11, %cst_9 [0] : vector<64x128xf32> to vector<128xf32>
    %13 = vector.shape_cast %12 : vector<128xf32> to vector<1x128xf32>
    %cst_10 = arith.constant 0.000000e+00 : f32
    %14 = vector.broadcast %cst_10 : f32 to vector<6x128xf32>
    %15 = tpu.concatenate %10, %13, %14 in 0 : vector<1x128xf32>, vector<1x128xf32>, vector<6x128xf32> -> vector<8x128xf32>
    %c0_11 = arith.constant 0 : index
    %c0_12 = arith.constant 0 : index
    %c0_13 = arith.constant 0 : index
    %16 = vector.load %arg4[%c0_11, %c0_12, %c0_13] : memref<1x8x128xf32, #tpu.memory_space<vmem>>, vector<1x8x128xf32>
    %17 = vector.shape_cast %16 : vector<1x8x128xf32> to vector<8x128xf32>
    %18 = vector.shape_cast %15 : vector<8x128xf32> to vector<1x8x128xf32>
    tpu.vector_store %arg4[%c0_11, %c0_12, %c0_13], %18 {strides = array<i32>} : memref<1x8x128xf32, #tpu.memory_space<vmem>>, vector<1x8x128xf32>,
    return
  }
  func.func @transform_0(%arg0: i32) -> (i32, i32, i32, i32) {
    %c0_i32 = arith.constant 0 : i32
    %c0_i32_0 = arith.constant 0 : i32
    %c0_i32_1 = arith.constant 0 : i32
    %c0_i32_2 = arith.constant 0 : i32
    return %arg0, %c0_i32, %c0_i32_0, %c0_i32_1 : i32, i32, i32, i32
  }
  func.func @transform_1(%arg0: i32) -> (i32, i32) {
    %c0_i32 = arith.constant 0 : i32
    %c0_i32_0 = arith.constant 0 : i32
    %c0_i32_1 = arith.constant 0 : i32
    return %c0_i32, %c0_i32_0 : i32, i32
  }
  func.func @transform_2(%arg0: i32) -> (i32, i32, i32) {
    %c0_i32 = arith.constant 0 : i32
    %c0_i32_0 = arith.constant 0 : i32
    %c0_i32_1 = arith.constant 0 : i32
    return %arg0, %c0_i32, %c0_i32_0 : i32, i32, i32
  }
  func.func @transform_3(%arg0: i32) -> (i32, i32, i32) {
    %c0_i32 = arith.constant 0 : i32
    %c0_i32_0 = arith.constant 0 : i32
    %c0_i32_1 = arith.constant 0 : i32
    return %arg0, %c0_i32, %c0_i32_0 : i32, i32, i32
  }
}

module attributes {stable_mosaic.version = 11 : i64} {
  func.func @_conv_bn_stats_kernel(%arg0: i32, %arg1: memref<1x10x10x128xbf16, #tpu.memory_space<vmem>>, %arg2: memref<1152x128xbf16, #tpu.memory_space<vmem>>, %arg3: memref<1x64x128xbf16, #tpu.memory_space<vmem>>, %arg4: memref<1x8x128xf32, #tpu.memory_space<vmem>>) attributes {dimension_semantics = [#tpu.dimension_semantics<parallel>], iteration_bounds = array<i64: 2>, scalar_prefetch = 0 : i64, scratch_operands = 0 : i64, tpu.core_type = #tpu.core_type<tc>, window_params = [{transform_indices = @transform_0, window_bounds = array<i64: 1, 10, 10, 128>}, {pipeline_mode = #tpu.pipeline_mode<synchronous>, transform_indices = @transform_1, window_bounds = array<i64: 1152, 128>}, {transform_indices = @transform_2, window_bounds = array<i64: 1, 64, 128>}, {transform_indices = @transform_3, window_bounds = array<i64: 1, 8, 128>}]} {
    %c0 = arith.constant 0 : index
    %c0_0 = arith.constant 0 : index
    %c0_1 = arith.constant 0 : index
    %c0_2 = arith.constant 0 : index
    %0 = vector.load %arg1[%c0, %c0_0, %c0_1, %c0_2] : memref<1x10x10x128xbf16, #tpu.memory_space<vmem>>, vector<1x10x8x128xbf16>
    %1 = vector.shape_cast %0 : vector<1x10x8x128xbf16> to vector<10x8x128xbf16>
    %2 = vector.extract_strided_slice %1 {offsets = [0, 0, 0], sizes = [8, 8, 128], strides = [1, 1, 1]} : vector<10x8x128xbf16> to vector<8x8x128xbf16>
    %3 = vector.shape_cast %2 : vector<8x8x128xbf16> to vector<64x128xbf16>
    %c0_3 = arith.constant 0 : index
    %c0_4 = arith.constant 0 : index
    %c1 = arith.constant 1 : index
    %c0_5 = arith.constant 0 : index
    %4 = vector.load %arg1[%c0_3, %c0_4, %c1, %c0_5] : memref<1x10x10x128xbf16, #tpu.memory_space<vmem>>, vector<1x10x8x128xbf16>
    %5 = vector.shape_cast %4 : vector<1x10x8x128xbf16> to vector<10x8x128xbf16>
    %6 = vector.extract_strided_slice %5 {offsets = [0, 0, 0], sizes = [8, 8, 128], strides = [1, 1, 1]} : vector<10x8x128xbf16> to vector<8x8x128xbf16>
    %7 = vector.shape_cast %6 : vector<8x8x128xbf16> to vector<64x128xbf16>
    %c0_6 = arith.constant 0 : index
    %c0_7 = arith.constant 0 : index
    %c2 = arith.constant 2 : index
    %c0_8 = arith.constant 0 : index
    %8 = vector.load %arg1[%c0_6, %c0_7, %c2, %c0_8] : memref<1x10x10x128xbf16, #tpu.memory_space<vmem>>, vector<1x10x8x128xbf16>
    %9 = vector.shape_cast %8 : vector<1x10x8x128xbf16> to vector<10x8x128xbf16>
    %10 = vector.extract_strided_slice %9 {offsets = [0, 0, 0], sizes = [8, 8, 128], strides = [1, 1, 1]} : vector<10x8x128xbf16> to vector<8x8x128xbf16>
    %11 = vector.shape_cast %10 : vector<8x8x128xbf16> to vector<64x128xbf16>
    %12 = vector.extract_strided_slice %1 {offsets = [1, 0, 0], sizes = [8, 8, 128], strides = [1, 1, 1]} : vector<10x8x128xbf16> to vector<8x8x128xbf16>
    %13 = vector.shape_cast %12 : vector<8x8x128xbf16> to vector<64x128xbf16>
    %14 = vector.extract_strided_slice %5 {offsets = [1, 0, 0], sizes = [8, 8, 128], strides = [1, 1, 1]} : vector<10x8x128xbf16> to vector<8x8x128xbf16>
    %15 = vector.shape_cast %14 : vector<8x8x128xbf16> to vector<64x128xbf16>
    %16 = vector.extract_strided_slice %9 {offsets = [1, 0, 0], sizes = [8, 8, 128], strides = [1, 1, 1]} : vector<10x8x128xbf16> to vector<8x8x128xbf16>
    %17 = vector.shape_cast %16 : vector<8x8x128xbf16> to vector<64x128xbf16>
    %18 = vector.extract_strided_slice %1 {offsets = [2, 0, 0], sizes = [8, 8, 128], strides = [1, 1, 1]} : vector<10x8x128xbf16> to vector<8x8x128xbf16>
    %19 = vector.shape_cast %18 : vector<8x8x128xbf16> to vector<64x128xbf16>
    %20 = vector.extract_strided_slice %5 {offsets = [2, 0, 0], sizes = [8, 8, 128], strides = [1, 1, 1]} : vector<10x8x128xbf16> to vector<8x8x128xbf16>
    %21 = vector.shape_cast %20 : vector<8x8x128xbf16> to vector<64x128xbf16>
    %22 = vector.extract_strided_slice %9 {offsets = [2, 0, 0], sizes = [8, 8, 128], strides = [1, 1, 1]} : vector<10x8x128xbf16> to vector<8x8x128xbf16>
    %23 = vector.shape_cast %22 : vector<8x8x128xbf16> to vector<64x128xbf16>
    %24 = tpu.concatenate %3, %7, %11, %13, %15, %17, %19, %21, %23 in 1 : vector<64x128xbf16>, vector<64x128xbf16>, vector<64x128xbf16>, vector<64x128xbf16>, vector<64x128xbf16>, vector<64x128xbf16>, vector<64x128xbf16>, vector<64x128xbf16>, vector<64x128xbf16> -> vector<64x1152xbf16>
    %c0_9 = arith.constant 0 : index
    %c0_10 = arith.constant 0 : index
    %25 = vector.load %arg2[%c0_9, %c0_10] : memref<1152x128xbf16, #tpu.memory_space<vmem>>, vector<1152x128xbf16>
    %cst = arith.constant dense<0.000000e+00> : vector<64x128xf32>
    %26 = tpu.matmul %24, %25, %cst {dimension_numbers = #tpu.dot_dimension_numbers<[1], [0], [0], [1], [0, 0, 1, 1], [], []>} : vector<64x1152xbf16>, vector<1152x128xbf16>, vector<64x128xf32> -> vector<64x128xf32>
    %27 = arith.truncf %26 : vector<64x128xf32> to vector<64x128xbf16>
    %c0_11 = arith.constant 0 : index
    %c0_12 = arith.constant 0 : index
    %c0_13 = arith.constant 0 : index
    %28 = vector.load %arg3[%c0_11, %c0_12, %c0_13] : memref<1x64x128xbf16, #tpu.memory_space<vmem>>, vector<1x64x128xbf16>
    %29 = vector.shape_cast %28 : vector<1x64x128xbf16> to vector<64x128xbf16>
    %30 = vector.shape_cast %27 : vector<64x128xbf16> to vector<1x64x128xbf16>
    tpu.vector_store %arg3[%c0_11, %c0_12, %c0_13], %30 {strides = array<i32>} : memref<1x64x128xbf16, #tpu.memory_space<vmem>>, vector<1x64x128xbf16>,
    %cst_14 = arith.constant dense<0.000000e+00> : vector<128xf32>
    %31 = vector.multi_reduction <add>, %26, %cst_14 [0] : vector<64x128xf32> to vector<128xf32>
    %32 = vector.shape_cast %31 : vector<128xf32> to vector<1x128xf32>
    %33 = arith.mulf %26, %26 : vector<64x128xf32>
    %cst_15 = arith.constant dense<0.000000e+00> : vector<128xf32>
    %34 = vector.multi_reduction <add>, %33, %cst_15 [0] : vector<64x128xf32> to vector<128xf32>
    %35 = vector.shape_cast %34 : vector<128xf32> to vector<1x128xf32>
    %cst_16 = arith.constant 0.000000e+00 : f32
    %36 = vector.broadcast %cst_16 : f32 to vector<6x128xf32>
    %37 = tpu.concatenate %32, %35, %36 in 0 : vector<1x128xf32>, vector<1x128xf32>, vector<6x128xf32> -> vector<8x128xf32>
    %c0_17 = arith.constant 0 : index
    %c0_18 = arith.constant 0 : index
    %c0_19 = arith.constant 0 : index
    %38 = vector.load %arg4[%c0_17, %c0_18, %c0_19] : memref<1x8x128xf32, #tpu.memory_space<vmem>>, vector<1x8x128xf32>
    %39 = vector.shape_cast %38 : vector<1x8x128xf32> to vector<8x128xf32>
    %40 = vector.shape_cast %37 : vector<8x128xf32> to vector<1x8x128xf32>
    tpu.vector_store %arg4[%c0_17, %c0_18, %c0_19], %40 {strides = array<i32>} : memref<1x8x128xf32, #tpu.memory_space<vmem>>, vector<1x8x128xf32>,
    return
  }
  func.func @transform_0(%arg0: i32) -> (i32, i32, i32, i32) {
    %c0_i32 = arith.constant 0 : i32
    %c0_i32_0 = arith.constant 0 : i32
    %c0_i32_1 = arith.constant 0 : i32
    %c0_i32_2 = arith.constant 0 : i32
    return %arg0, %c0_i32, %c0_i32_0, %c0_i32_1 : i32, i32, i32, i32
  }
  func.func @transform_1(%arg0: i32) -> (i32, i32) {
    %c0_i32 = arith.constant 0 : i32
    %c0_i32_0 = arith.constant 0 : i32
    %c0_i32_1 = arith.constant 0 : i32
    return %c0_i32, %c0_i32_0 : i32, i32
  }
  func.func @transform_2(%arg0: i32) -> (i32, i32, i32) {
    %c0_i32 = arith.constant 0 : i32
    %c0_i32_0 = arith.constant 0 : i32
    %c0_i32_1 = arith.constant 0 : i32
    return %arg0, %c0_i32, %c0_i32_0 : i32, i32, i32
  }
  func.func @transform_3(%arg0: i32) -> (i32, i32, i32) {
    %c0_i32 = arith.constant 0 : i32
    %c0_i32_0 = arith.constant 0 : i32
    %c0_i32_1 = arith.constant 0 : i32
    return %arg0, %c0_i32, %c0_i32_0 : i32, i32, i32
  }
}

module attributes {stable_mosaic.version = 11 : i64} {
  func.func @_affine_leaky_res_kernel(%arg0: i32, %arg1: memref<128x128xbf16, #tpu.memory_space<vmem>>, %arg2: memref<1x128xf32, #tpu.memory_space<vmem>>, %arg3: memref<1x128xf32, #tpu.memory_space<vmem>>, %arg4: memref<128x128xbf16, #tpu.memory_space<vmem>>, %arg5: memref<128x128xbf16, #tpu.memory_space<vmem>>, %arg6: memref<128x128xbf16, #tpu.memory_space<vmem>>) attributes {dimension_semantics = [#tpu.dimension_semantics<parallel>], iteration_bounds = array<i64: 1>, scalar_prefetch = 0 : i64, scratch_operands = 0 : i64, tpu.core_type = #tpu.core_type<tc>, window_params = [{transform_indices = @transform_0, window_bounds = array<i64: 128, 128>}, {pipeline_mode = #tpu.pipeline_mode<synchronous>, transform_indices = @transform_1, window_bounds = array<i64: 1, 128>}, {pipeline_mode = #tpu.pipeline_mode<synchronous>, transform_indices = @transform_2, window_bounds = array<i64: 1, 128>}, {transform_indices = @transform_3, window_bounds = array<i64: 128, 128>}, {transform_indices = @transform_4, window_bounds = array<i64: 128, 128>}, {transform_indices = @transform_5, window_bounds = array<i64: 128, 128>}]} {
    %c0 = arith.constant 0 : index
    %c0_0 = arith.constant 0 : index
    %0 = vector.load %arg1[%c0, %c0_0] : memref<128x128xbf16, #tpu.memory_space<vmem>>, vector<128x128xbf16>
    %1 = arith.extf %0 : vector<128x128xbf16> to vector<128x128xf32>
    %c0_1 = arith.constant 0 : index
    %c0_2 = arith.constant 0 : index
    %2 = vector.load %arg2[%c0_1, %c0_2] : memref<1x128xf32, #tpu.memory_space<vmem>>, vector<1x128xf32>
    %3 = vector.broadcast %2 : vector<1x128xf32> to vector<128x128xf32>
    %4 = arith.mulf %1, %3 : vector<128x128xf32>
    %c0_3 = arith.constant 0 : index
    %c0_4 = arith.constant 0 : index
    %5 = vector.load %arg3[%c0_3, %c0_4] : memref<1x128xf32, #tpu.memory_space<vmem>>, vector<1x128xf32>
    %6 = vector.broadcast %5 : vector<1x128xf32> to vector<128x128xf32>
    %7 = arith.addf %4, %6 : vector<128x128xf32>
    %cst = arith.constant 0.000000e+00 : f32
    %8 = vector.broadcast %cst : f32 to vector<128x128xf32>
    %9 = arith.cmpf ogt, %7, %8 : vector<128x128xf32>
    %cst_5 = arith.constant 1.000000e-01 : f32
    %10 = vector.broadcast %cst_5 : f32 to vector<128x128xf32>
    %11 = arith.mulf %10, %7 : vector<128x128xf32>
    %12 = arith.select %9, %7, %11 : vector<128x128xi1>, vector<128x128xf32>
    %13 = arith.truncf %12 : vector<128x128xf32> to vector<128x128xbf16>
    %c0_6 = arith.constant 0 : index
    %c0_7 = arith.constant 0 : index
    %14 = vector.load %arg5[%c0_6, %c0_7] : memref<128x128xbf16, #tpu.memory_space<vmem>>, vector<128x128xbf16>
    tpu.vector_store %arg5[%c0_6, %c0_7], %13 {strides = array<i32>} : memref<128x128xbf16, #tpu.memory_space<vmem>>, vector<128x128xbf16>,
    %c0_8 = arith.constant 0 : index
    %c0_9 = arith.constant 0 : index
    %15 = vector.load %arg4[%c0_8, %c0_9] : memref<128x128xbf16, #tpu.memory_space<vmem>>, vector<128x128xbf16>
    %16 = arith.extf %15 : vector<128x128xbf16> to vector<128x128xf32>
    %17 = arith.addf %12, %16 : vector<128x128xf32>
    %18 = arith.truncf %17 : vector<128x128xf32> to vector<128x128xbf16>
    %c0_10 = arith.constant 0 : index
    %c0_11 = arith.constant 0 : index
    %19 = vector.load %arg6[%c0_10, %c0_11] : memref<128x128xbf16, #tpu.memory_space<vmem>>, vector<128x128xbf16>
    tpu.vector_store %arg6[%c0_10, %c0_11], %18 {strides = array<i32>} : memref<128x128xbf16, #tpu.memory_space<vmem>>, vector<128x128xbf16>,
    return
  }
  func.func @transform_0(%arg0: i32) -> (i32, i32) {
    %c0_i32 = arith.constant 0 : i32
    %c0_i32_0 = arith.constant 0 : i32
    return %arg0, %c0_i32 : i32, i32
  }
  func.func @transform_1(%arg0: i32) -> (i32, i32) {
    %c0_i32 = arith.constant 0 : i32
    %c0_i32_0 = arith.constant 0 : i32
    %c0_i32_1 = arith.constant 0 : i32
    return %c0_i32, %c0_i32_0 : i32, i32
  }
  func.func @transform_2(%arg0: i32) -> (i32, i32) {
    %c0_i32 = arith.constant 0 : i32
    %c0_i32_0 = arith.constant 0 : i32
    %c0_i32_1 = arith.constant 0 : i32
    return %c0_i32, %c0_i32_0 : i32, i32
  }
  func.func @transform_3(%arg0: i32) -> (i32, i32) {
    %c0_i32 = arith.constant 0 : i32
    %c0_i32_0 = arith.constant 0 : i32
    return %arg0, %c0_i32 : i32, i32
  }
  func.func @transform_4(%arg0: i32) -> (i32, i32) {
    %c0_i32 = arith.constant 0 : i32
    %c0_i32_0 = arith.constant 0 : i32
    return %arg0, %c0_i32 : i32, i32
  }
  func.func @transform_5(%arg0: i32) -> (i32, i32) {
    %c0_i32 = arith.constant 0 : i32
    %c0_i32_0 = arith.constant 0 : i32
    return %arg0, %c0_i32 : i32, i32
  }
}

module attributes {stable_mosaic.version = 11 : i64} {
  func.func @_conv_bias_act_kernel(%arg0: i32, %arg1: memref<1x16x16x256xbf16, #tpu.memory_space<vmem>>, %arg2: memref<256x128xbf16, #tpu.memory_space<vmem>>, %arg3: memref<1x128xf32, #tpu.memory_space<vmem>>, %arg4: memref<1x256x128xbf16, #tpu.memory_space<vmem>>) attributes {dimension_semantics = [#tpu.dimension_semantics<parallel>], iteration_bounds = array<i64: 2>, scalar_prefetch = 0 : i64, scratch_operands = 0 : i64, tpu.core_type = #tpu.core_type<tc>, window_params = [{transform_indices = @transform_0, window_bounds = array<i64: 1, 16, 16, 256>}, {pipeline_mode = #tpu.pipeline_mode<synchronous>, transform_indices = @transform_1, window_bounds = array<i64: 256, 128>}, {pipeline_mode = #tpu.pipeline_mode<synchronous>, transform_indices = @transform_2, window_bounds = array<i64: 1, 128>}, {transform_indices = @transform_3, window_bounds = array<i64: 1, 256, 128>}]} {
    %c0 = arith.constant 0 : index
    %c0_0 = arith.constant 0 : index
    %c0_1 = arith.constant 0 : index
    %c0_2 = arith.constant 0 : index
    %0 = vector.load %arg1[%c0, %c0_0, %c0_1, %c0_2] : memref<1x16x16x256xbf16, #tpu.memory_space<vmem>>, vector<1x16x16x256xbf16>
    %1 = vector.shape_cast %0 : vector<1x16x16x256xbf16> to vector<16x16x256xbf16>
    %2 = vector.shape_cast %1 : vector<16x16x256xbf16> to vector<256x256xbf16>
    %c0_3 = arith.constant 0 : index
    %c0_4 = arith.constant 0 : index
    %3 = vector.load %arg2[%c0_3, %c0_4] : memref<256x128xbf16, #tpu.memory_space<vmem>>, vector<256x128xbf16>
    %cst = arith.constant dense<0.000000e+00> : vector<256x128xf32>
    %4 = tpu.matmul %2, %3, %cst {dimension_numbers = #tpu.dot_dimension_numbers<[1], [0], [0], [1], [0, 0, 1, 1], [], []>} : vector<256x256xbf16>, vector<256x128xbf16>, vector<256x128xf32> -> vector<256x128xf32>
    %c0_5 = arith.constant 0 : index
    %c0_6 = arith.constant 0 : index
    %5 = vector.load %arg3[%c0_5, %c0_6] : memref<1x128xf32, #tpu.memory_space<vmem>>, vector<1x128xf32>
    %6 = vector.broadcast %5 : vector<1x128xf32> to vector<256x128xf32>
    %7 = arith.addf %4, %6 : vector<256x128xf32>
    %8 = arith.truncf %7 : vector<256x128xf32> to vector<256x128xbf16>
    %c0_7 = arith.constant 0 : index
    %c0_8 = arith.constant 0 : index
    %c0_9 = arith.constant 0 : index
    %9 = vector.load %arg4[%c0_7, %c0_8, %c0_9] : memref<1x256x128xbf16, #tpu.memory_space<vmem>>, vector<1x256x128xbf16>
    %10 = vector.shape_cast %9 : vector<1x256x128xbf16> to vector<256x128xbf16>
    %11 = vector.shape_cast %8 : vector<256x128xbf16> to vector<1x256x128xbf16>
    tpu.vector_store %arg4[%c0_7, %c0_8, %c0_9], %11 {strides = array<i32>} : memref<1x256x128xbf16, #tpu.memory_space<vmem>>, vector<1x256x128xbf16>,
    return
  }
  func.func @transform_0(%arg0: i32) -> (i32, i32, i32, i32) {
    %c0_i32 = arith.constant 0 : i32
    %c0_i32_0 = arith.constant 0 : i32
    %c0_i32_1 = arith.constant 0 : i32
    %c0_i32_2 = arith.constant 0 : i32
    return %arg0, %c0_i32, %c0_i32_0, %c0_i32_1 : i32, i32, i32, i32
  }
  func.func @transform_1(%arg0: i32) -> (i32, i32) {
    %c0_i32 = arith.constant 0 : i32
    %c0_i32_0 = arith.constant 0 : i32
    %c0_i32_1 = arith.constant 0 : i32
    return %c0_i32, %c0_i32_0 : i32, i32
  }
  func.func @transform_2(%arg0: i32) -> (i32, i32) {
    %c0_i32 = arith.constant 0 : i32
    %c0_i32_0 = arith.constant 0 : i32
    %c0_i32_1 = arith.constant 0 : i32
    return %c0_i32, %c0_i32_0 : i32, i32
  }
  func.func @transform_3(%arg0: i32) -> (i32, i32, i32) {
    %c0_i32 = arith.constant 0 : i32
    %c0_i32_0 = arith.constant 0 : i32
    %c0_i32_1 = arith.constant 0 : i32
    return %arg0, %c0_i32, %c0_i32_0 : i32, i32, i32
  }
}

module attributes {stable_mosaic.version = 11 : i64} {
  func.func @_conv_bias_act_kernel(%arg0: i32, %arg1: memref<1x8x8x128xbf16, #tpu.memory_space<vmem>>, %arg2: memref<128x128xbf16, #tpu.memory_space<vmem>>, %arg3: memref<1x128xf32, #tpu.memory_space<vmem>>, %arg4: memref<1x64x128xbf16, #tpu.memory_space<vmem>>) attributes {dimension_semantics = [#tpu.dimension_semantics<parallel>], iteration_bounds = array<i64: 2>, scalar_prefetch = 0 : i64, scratch_operands = 0 : i64, tpu.core_type = #tpu.core_type<tc>, window_params = [{transform_indices = @transform_0, window_bounds = array<i64: 1, 8, 8, 128>}, {pipeline_mode = #tpu.pipeline_mode<synchronous>, transform_indices = @transform_1, window_bounds = array<i64: 128, 128>}, {pipeline_mode = #tpu.pipeline_mode<synchronous>, transform_indices = @transform_2, window_bounds = array<i64: 1, 128>}, {transform_indices = @transform_3, window_bounds = array<i64: 1, 64, 128>}]} {
    %c0 = arith.constant 0 : index
    %c0_0 = arith.constant 0 : index
    %c0_1 = arith.constant 0 : index
    %c0_2 = arith.constant 0 : index
    %0 = vector.load %arg1[%c0, %c0_0, %c0_1, %c0_2] : memref<1x8x8x128xbf16, #tpu.memory_space<vmem>>, vector<1x8x8x128xbf16>
    %1 = vector.shape_cast %0 : vector<1x8x8x128xbf16> to vector<8x8x128xbf16>
    %2 = vector.shape_cast %1 : vector<8x8x128xbf16> to vector<64x128xbf16>
    %c0_3 = arith.constant 0 : index
    %c0_4 = arith.constant 0 : index
    %3 = vector.load %arg2[%c0_3, %c0_4] : memref<128x128xbf16, #tpu.memory_space<vmem>>, vector<128x128xbf16>
    %cst = arith.constant dense<0.000000e+00> : vector<64x128xf32>
    %4 = tpu.matmul %2, %3, %cst {dimension_numbers = #tpu.dot_dimension_numbers<[1], [0], [0], [1], [0, 0, 1, 1], [], []>} : vector<64x128xbf16>, vector<128x128xbf16>, vector<64x128xf32> -> vector<64x128xf32>
    %c0_5 = arith.constant 0 : index
    %c0_6 = arith.constant 0 : index
    %5 = vector.load %arg3[%c0_5, %c0_6] : memref<1x128xf32, #tpu.memory_space<vmem>>, vector<1x128xf32>
    %6 = vector.broadcast %5 : vector<1x128xf32> to vector<64x128xf32>
    %7 = arith.addf %4, %6 : vector<64x128xf32>
    %8 = arith.truncf %7 : vector<64x128xf32> to vector<64x128xbf16>
    %c0_7 = arith.constant 0 : index
    %c0_8 = arith.constant 0 : index
    %c0_9 = arith.constant 0 : index
    %9 = vector.load %arg4[%c0_7, %c0_8, %c0_9] : memref<1x64x128xbf16, #tpu.memory_space<vmem>>, vector<1x64x128xbf16>
    %10 = vector.shape_cast %9 : vector<1x64x128xbf16> to vector<64x128xbf16>
    %11 = vector.shape_cast %8 : vector<64x128xbf16> to vector<1x64x128xbf16>
    tpu.vector_store %arg4[%c0_7, %c0_8, %c0_9], %11 {strides = array<i32>} : memref<1x64x128xbf16, #tpu.memory_space<vmem>>, vector<1x64x128xbf16>,
    return
  }
  func.func @transform_0(%arg0: i32) -> (i32, i32, i32, i32) {
    %c0_i32 = arith.constant 0 : i32
    %c0_i32_0 = arith.constant 0 : i32
    %c0_i32_1 = arith.constant 0 : i32
    %c0_i32_2 = arith.constant 0 : i32
    return %arg0, %c0_i32, %c0_i32_0, %c0_i32_1 : i32, i32, i32, i32
  }
  func.func @transform_1(%arg0: i32) -> (i32, i32) {
    %c0_i32 = arith.constant 0 : i32
    %c0_i32_0 = arith.constant 0 : i32
    %c0_i32_1 = arith.constant 0 : i32
    return %c0_i32, %c0_i32_0 : i32, i32
  }
  func.func @transform_2(%arg0: i32) -> (i32, i32) {
    %c0_i32 = arith.constant 0 : i32
    %c0_i32_0 = arith.constant 0 : i32
    %c0_i32_1 = arith.constant 0 : i32
    return %c0_i32, %c0_i32_0 : i32, i32
  }
  func.func @transform_3(%arg0: i32) -> (i32, i32, i32) {
    %c0_i32 = arith.constant 0 : i32
    %c0_i32_0 = arith.constant 0 : i32
    %c0_i32_1 = arith.constant 0 : i32
    return %arg0, %c0_i32, %c0_i32_0 : i32, i32, i32
  }
}

</mosaic_0001>

<bundles_post_ra>
// kernel: _lambda_.13
= control target key start
LH: loop header
LB: loop body
LE: loop exit
PB: predicated region body
PF: predicated region fallthrough
CT: control target
= control target key end

     0   :  { %s1631_s0 = inlined_call_operand.vmem [shape: bf16[512,128], index: 0, kind: input, shape index: {}]   ;;  %s1632_s1 = inlined_call_operand.vmem [shape: f32[1,128], index: 1, kind: input, shape index: {}]   ;;  %s1633_s2 = inlined_call_operand.vmem [shape: f32[1,128], index: 2, kind: input, shape index: {}]   ;;  %s1634_s3 = inlined_call_operand.vmem [shape: bf16[512,128], index: 3, kind: output, shape index: {}]  }
   0x1   :  { %v931_v0 = vld [vmem:[%s1631_s0] sm:$0xff]   ;;  %v1218_v4 = vld [vmem:[%s1631_s0 + $0x8] sm:$0xff]   ;;  %v1219_v5 = vld [vmem:[%s1631_s0 + $0x10] sm:$0xff]  }
   0x2   :  { %v1306_v1 = vld [vmem:[%s1632_s1] ss:$0 sm:$0xff]  ;;  %v932_v2 = vunpack.c.l.bf16 %v931_v0  ;;  %v933_v3 = vunpack.c.h.bf16 %v931_v0  ;;  %v1220_v6 = vld [vmem:[%s1631_s0 + $0x18] sm:$0xff]   ;;  %v936_v8 = vunpack.c.l.bf16 %v1218_v4  ;;  %v937_v9 = vunpack.c.h.bf16 %v1218_v4  ;;  %v1222_v35 = vld [vmem:[%s1631_s0 + $0x28] sm:$0xff]  }
   0x3   :  { %v1320_v7 = vld [vmem:[%s1633_s2] ss:$0 sm:$0xff]  ;;  %v940_v10 = vunpack.c.l.bf16 %v1219_v5  ;;  %v941_v11 = vunpack.c.h.bf16 %v1219_v5  ;;  %v944_v14 = vunpack.c.l.bf16 %v1220_v6  ;;  %v945_v15 = vunpack.c.h.bf16 %v1220_v6  ;;  %v1223_v48 = vld [vmem:[%s1631_s0 + $0x30] sm:$0xff]   ;;  %v1224_v4 = vld [vmem:[%s1631_s0 + $0x38] sm:$0xff]  }
   0x4   :  { %v149_v12 = vmul.f32 %v932_v2, %v1306_v1  ;;  %v150_v13 = vmul.f32 %v933_v3, %v1306_v1  ;;  %v151_v16 = vmul.f32 %v936_v8, %v1306_v1  ;;  %v152_v17 = vmul.f32 %v937_v9, %v1306_v1  ;;  %v1221_v34 = vld [vmem:[%s1631_s0 + $0x20] sm:$0xff]  }
   0x5   :  { %v153_v18 = vmul.f32 %v940_v10, %v1306_v1  ;;  %v154_v19 = vmul.f32 %v941_v11, %v1306_v1  ;;  %v155_v22 = vmul.f32 %v944_v14, %v1306_v1  ;;  %v156_v23 = vmul.f32 %v945_v15, %v1306_v1  ;;  %v1225_v15 = vld [vmem:[%s1631_s0 + $0x40] sm:$0xff]  }
   0x6   :  { %v220_v20 = vadd.f32 %v1320_v7, %v149_v12  ;;  %v221_v21 = vadd.f32 %v1320_v7, %v150_v13  ;;  %v222_v24 = vadd.f32 %v1320_v7, %v151_v16  ;;  %v223_v25 = vadd.f32 %v1320_v7, %v152_v17 }
   0x7   :  { %v224_v26 = vadd.f32 %v1320_v7, %v153_v18  ;;  %v225_v27 = vadd.f32 %v1320_v7, %v154_v19  ;;  %v226_v42 = vadd.f32 %v1320_v7, %v155_v22  ;;  %v227_v43 = vadd.f32 %v1320_v7, %v156_v23 }
   0x8   :  { %vm284_vm0 = vcmp.gt.f32.partialorder %v220_v20, 0.0  ;;  %vm285_vm1 = vcmp.gt.f32.partialorder %v221_v21, 0.0  ;;  %v348_v28 = vmul.f32 0.1, %v220_v20  ;;  %v349_v29 = vmul.f32 0.1, %v221_v21 }
   0x9   :  { %vm286_vm2 = vcmp.gt.f32.partialorder %v222_v24, 0.0  ;;  %vm287_vm3 = vcmp.gt.f32.partialorder %v223_v25, 0.0  ;;  %v350_v30 = vmul.f32 0.1, %v222_v24  ;;  %v351_v31 = vmul.f32 0.1, %v223_v25 }
   0xa   :  { %v412_v32 = vsel %vm284_vm0, %v220_v20, %v348_v28  ;;  %v413_v33 = vsel %vm285_vm1, %v221_v21, %v349_v29  ;;  %vm288_vm4 = vcmp.gt.f32.partialorder %v224_v26, 0.0  ;;  %vm289_vm5 = vcmp.gt.f32.partialorder %v225_v27, 0.0 }
   0xb   :  { %v1061_v36 = vpack.c.bf16 %v413_v33, %v412_v32  ;;  %v414_v37 = vsel %vm286_vm2, %v222_v24, %v350_v30  ;;  %v415_v38 = vsel %vm287_vm3, %v223_v25, %v351_v31  ;;  %v352_v39 = vmul.f32 0.1, %v224_v26 }
   0xc   :  { %v1066_v40 = vpack.c.bf16 %v415_v38, %v414_v37  ;;  %v353_v41 = vmul.f32 0.1, %v225_v27  ;;  %v948_v45 = vunpack.c.l.bf16 %v1221_v34  ;;  %v949_v46 = vunpack.c.h.bf16 %v1221_v34 }
   0xd   :  { %1062 = vst [vmem:[%s1634_s3] sm:$0xff] %v1061_v36   ;;  %v416_v44 = vsel %vm288_vm4, %v224_v26, %v352_v39  ;;  %v952_v47 = vunpack.c.l.bf16 %v1222_v35  ;;  %vm290_vm6 = vcmp.gt.f32.partialorder %v226_v42, 0.0  ;;  %vm291_vm7 = vcmp.gt.f32.partialorder %v227_v43, 0.0  ;;  %v1226_v26 = vld [vmem:[%s1631_s0 + $0x48] sm:$0xff]  }
   0xe   :  { %1249 = vst [vmem:[%s1634_s3 + $0x8] sm:$0xff] %v1066_v40   ;;  %v417_v49 = vsel %vm289_vm5, %v225_v27, %v353_v41  ;;  %v354_v50 = vmul.f32 0.1, %v226_v42  ;;  %v355_v52 = vmul.f32 0.1, %v227_v43  ;;  %v157_v53 = vmul.f32 %v948_v45, %v1306_v1  ;;  %v1227_v27 = vld [vmem:[%s1631_s0 + $0x50] sm:$0xff]  }
   0xf   :  { %v1071_v51 = vpack.c.bf16 %v417_v49, %v416_v44  ;;  %v158_v54 = vmul.f32 %v949_v46, %v1306_v1  ;;  %v953_v56 = vunpack.c.h.bf16 %v1222_v35  ;;  %v159_v57 = vmul.f32 %v952_v47, %v1306_v1 }
  0x10   :  { %v418_v55 = vsel %vm290_vm6, %v226_v42, %v354_v50  ;;  %v956_v58 = vunpack.c.l.bf16 %v1223_v48  ;;  %v419_v59 = vsel %vm291_vm7, %v227_v43, %v355_v52  ;;  %v228_v60 = vadd.f32 %v1320_v7, %v157_v53 }
  0x11   :  { %1250 = vst [vmem:[%s1634_s3 + $0x10] sm:$0xff] %v1071_v51   ;;  %v229_v61 = vadd.f32 %v1320_v7, %v158_v54  ;;  %v957_v62 = vunpack.c.h.bf16 %v1223_v48  ;;  %v1076_v63 = vpack.c.bf16 %v419_v59, %v418_v55  ;;  %v160_v0 = vmul.f32 %v953_v56, %v1306_v1  ;;  %v1228_v55 = vld [vmem:[%s1631_s0 + $0x58] sm:$0xff]  }
  0x12   :  { %v230_v2 = vadd.f32 %v1320_v7, %v159_v57  ;;  %v161_v3 = vmul.f32 %v956_v58, %v1306_v1  ;;  %vm292_vm8 = vcmp.gt.f32.partialorder %v228_v60, 0.0  ;;  %v356_v5 = vmul.f32 0.1, %v228_v60 }
  0x13   :  { %vm293_vm9 = vcmp.gt.f32.partialorder %v229_v61, 0.0  ;;  %v357_v6 = vmul.f32 0.1, %v229_v61  ;;  %1251 = vst [vmem:[%s1634_s3 + $0x18] sm:$0xff] %v1076_v63   ;;  %v231_v8 = vadd.f32 %v1320_v7, %v160_v0  ;;  %v162_v10 = vmul.f32 %v957_v62, %v1306_v1 }
  0x14   :  { %vm294_vm10 = vcmp.gt.f32.partialorder %v230_v2, 0.0  ;;  %v358_v9 = vmul.f32 0.1, %v230_v2  ;;  %v420_v11 = vsel %vm292_vm8, %v228_v60, %v356_v5  ;;  %v232_v13 = vadd.f32 %v1320_v7, %v161_v3  ;;  %v1229_v60 = vld [vmem:[%s1631_s0 + $0x60] sm:$0xff]  }
  0x15   :  { %v421_v12 = vsel %vm293_vm9, %v229_v61, %v357_v6  ;;  %v960_v14 = vunpack.c.l.bf16 %v1224_v4  ;;  %vm295_vm11 = vcmp.gt.f32.partialorder %v231_v8, 0.0  ;;  %v359_v17 = vmul.f32 0.1, %v231_v8 }
  0x16   :  { %v1081_v16 = vpack.c.bf16 %v421_v12, %v420_v11  ;;  %v422_v18 = vsel %vm294_vm10, %v230_v2, %v358_v9  ;;  %v233_v19 = vadd.f32 %v1320_v7, %v162_v10  ;;  %vm296_vm12 = vcmp.gt.f32.partialorder %v232_v13, 0.0  ;;  %v1230_v9 = vld [vmem:[%s1631_s0 + $0x68] sm:$0xff]  }
  0x17   :  { %v360_v20 = vmul.f32 0.1, %v232_v13  ;;  %v961_v21 = vunpack.c.h.bf16 %v1224_v4  ;;  %v423_v22 = vsel %vm295_vm11, %v231_v8, %v359_v17  ;;  %v163_v23 = vmul.f32 %v960_v14, %v1306_v1 }
  0x18   :  { %1252 = vst [vmem:[%s1634_s3 + $0x20] sm:$0xff] %v1081_v16   ;;  %v964_v24 = vunpack.c.l.bf16 %v1225_v15  ;;  %v965_v25 = vunpack.c.h.bf16 %v1225_v15  ;;  %v1086_v28 = vpack.c.bf16 %v423_v22, %v422_v18  ;;  %vm297_vm13 = vcmp.gt.f32.partialorder %v233_v19, 0.0 }
  0x19   :  { %v361_v29 = vmul.f32 0.1, %v233_v19  ;;  %v424_v30 = vsel %vm296_vm12, %v232_v13, %v360_v20  ;;  %v164_v31 = vmul.f32 %v961_v21, %v1306_v1  ;;  %v234_v32 = vadd.f32 %v1320_v7, %v163_v23 }
  0x1a   :  { %v165_v33 = vmul.f32 %v964_v24, %v1306_v1  ;;  %v166_v34 = vmul.f32 %v965_v25, %v1306_v1  ;;  %1253 = vst [vmem:[%s1634_s3 + $0x28] sm:$0xff] %v1086_v28   ;;  %v968_v36 = vunpack.c.l.bf16 %v1226_v26  ;;  %v969_v37 = vunpack.c.h.bf16 %v1226_v26  ;;  %v1231_v28 = vld [vmem:[%s1631_s0 + $0x70] sm:$0xff]  }
  0x1b   :  { %v425_v35 = vsel %vm297_vm13, %v233_v19, %v361_v29  ;;  %v972_v38 = vunpack.c.l.bf16 %v1227_v27  ;;  %v235_v40 = vadd.f32 %v1320_v7, %v164_v31  ;;  %vm298_vm14 = vcmp.gt.f32.partialorder %v234_v32, 0.0 }
  0x1c   :  { %v1091_v39 = vpack.c.bf16 %v425_v35, %v424_v30  ;;  %v362_v41 = vmul.f32 0.1, %v234_v32  ;;  %v236_v42 = vadd.f32 %v1320_v7, %v165_v33  ;;  %v237_v43 = vadd.f32 %v1320_v7, %v166_v34 }
  0x1d   :  { %v167_v44 = vmul.f32 %v968_v36, %v1306_v1  ;;  %v168_v45 = vmul.f32 %v969_v37, %v1306_v1  ;;  %vm299_vm15 = vcmp.gt.f32.partialorder %v235_v40, 0.0  ;;  %v363_v46 = vmul.f32 0.1, %v235_v40  ;;  %v1232_v37 = vld [vmem:[%s1631_s0 + $0x78] sm:$0xff]  }
  0x1e   :  { %1254 = vst [vmem:[%s1634_s3 + $0x30] sm:$0xff] %v1091_v39   ;;  %v426_v47 = vsel %vm298_vm14, %v234_v32, %v362_v41  ;;  %v973_v48 = vunpack.c.h.bf16 %v1227_v27  ;;  %vm300_vm0 = vcmp.gt.f32.partialorder %v236_v42, 0.0  ;;  %vm301_vm1 = vcmp.gt.f32.partialorder %v237_v43, 0.0 }
  0x1f   :  { %v364_v49 = vmul.f32 0.1, %v236_v42  ;;  %v365_v50 = vmul.f32 0.1, %v237_v43  ;;  %v427_v51 = vsel %vm299_vm15, %v235_v40, %v363_v46  ;;  %v238_v52 = vadd.f32 %v1320_v7, %v167_v44 }
  0x20   :  { %v239_v53 = vadd.f32 %v1320_v7, %v168_v45  ;;  %v169_v54 = vmul.f32 %v972_v38, %v1306_v1  ;;  %v1096_v56 = vpack.c.bf16 %v427_v51, %v426_v47  ;;  %v170_v59 = vmul.f32 %v973_v48, %v1306_v1 }
  0x21   :  { %v428_v57 = vsel %vm300_vm0, %v236_v42, %v364_v49  ;;  %v429_v58 = vsel %vm301_vm1, %v237_v43, %v365_v50  ;;  %vm302_vm2 = vcmp.gt.f32.partialorder %v238_v52, 0.0  ;;  %v366_v62 = vmul.f32 0.1, %v238_v52  ;;  %v1233_v42 = vld [vmem:[%s1631_s0 + $0x80] sm:$0xff]   ;;  %v1234_v50 = vld [vmem:[%s1631_s0 + $0x88] sm:$0xff]  }
  0x22   :  { %v1101_v61 = vpack.c.bf16 %v429_v58, %v428_v57  ;;  %vm303_vm3 = vcmp.gt.f32.partialorder %v239_v53, 0.0  ;;  %1255 = vst [vmem:[%s1634_s3 + $0x38] sm:$0xff] %v1096_v56   ;;  %v367_v63 = vmul.f32 0.1, %v239_v53  ;;  %v240_v0 = vadd.f32 %v1320_v7, %v169_v54 }
  0x23   :  { %v241_v2 = vadd.f32 %v1320_v7, %v170_v59  ;;  %v976_v3 = vunpack.c.l.bf16 %v1228_v55  ;;  %v430_v4 = vsel %vm302_vm2, %v238_v52, %v366_v62  ;;  %v977_v5 = vunpack.c.h.bf16 %v1228_v55 }
  0x24   :  { %1256 = vst [vmem:[%s1634_s3 + $0x40] sm:$0xff] %v1101_v61   ;;  %v980_v6 = vunpack.c.l.bf16 %v1229_v60  ;;  %v981_v8 = vunpack.c.h.bf16 %v1229_v60  ;;  %v431_v10 = vsel %vm303_vm3, %v239_v53, %v367_v63  ;;  %vm304_vm4 = vcmp.gt.f32.partialorder %v240_v0, 0.0 }
  0x25   :  { %vm305_vm5 = vcmp.gt.f32.partialorder %v241_v2, 0.0  ;;  %v368_v11 = vmul.f32 0.1, %v240_v0  ;;  %v1106_v12 = vpack.c.bf16 %v431_v10, %v430_v4  ;;  %v369_v13 = vmul.f32 0.1, %v241_v2 }
  0x26   :  { %v171_v14 = vmul.f32 %v976_v3, %v1306_v1  ;;  %v172_v15 = vmul.f32 %v977_v5, %v1306_v1  ;;  %v173_v17 = vmul.f32 %v980_v6, %v1306_v1  ;;  %v174_v18 = vmul.f32 %v981_v8, %v1306_v1 }
  0x27   :  { %v432_v16 = vsel %vm304_vm4, %v240_v0, %v368_v11  ;;  %v984_v19 = vunpack.c.l.bf16 %v1230_v9  ;;  %1257 = vst [vmem:[%s1634_s3 + $0x48] sm:$0xff] %v1106_v12   ;;  %v433_v20 = vsel %vm305_vm5, %v241_v2, %v369_v13  ;;  %v985_v23 = vunpack.c.h.bf16 %v1230_v9 }
  0x28   :  { %v242_v21 = vadd.f32 %v1320_v7, %v171_v14  ;;  %v243_v22 = vadd.f32 %v1320_v7, %v172_v15  ;;  %v1111_v24 = vpack.c.bf16 %v433_v20, %v432_v16  ;;  %v244_v25 = vadd.f32 %v1320_v7, %v173_v17  ;;  %v1235_v15 = vld [vmem:[%s1631_s0 + $0x90] sm:$0xff]   ;;  %v1236_v20 = vld [vmem:[%s1631_s0 + $0x98] sm:$0xff]  }
  0x29   :  { %v245_v26 = vadd.f32 %v1320_v7, %v174_v18  ;;  %v175_v27 = vmul.f32 %v984_v19, %v1306_v1  ;;  %v176_v35 = vmul.f32 %v985_v23, %v1306_v1  ;;  %v988_v41 = vunpack.c.l.bf16 %v1231_v28 }
  0x2a   :  { %vm306_vm6 = vcmp.gt.f32.partialorder %v242_v21, 0.0  ;;  %vm307_vm7 = vcmp.gt.f32.partialorder %v243_v22, 0.0  ;;  %v370_v29 = vmul.f32 0.1, %v242_v21  ;;  %v371_v30 = vmul.f32 0.1, %v243_v22 }
  0x2b   :  { %1258 = vst [vmem:[%s1634_s3 + $0x50] sm:$0xff] %v1111_v24   ;;  %vm308_vm8 = vcmp.gt.f32.partialorder %v244_v25, 0.0  ;;  %vm309_vm9 = vcmp.gt.f32.partialorder %v245_v26, 0.0  ;;  %v372_v31 = vmul.f32 0.1, %v244_v25  ;;  %v246_v36 = vadd.f32 %v1320_v7, %v175_v27 }
  0x2c   :  { %v373_v32 = vmul.f32 0.1, %v245_v26  ;;  %v434_v33 = vsel %vm306_vm6, %v242_v21, %v370_v29  ;;  %v435_v34 = vsel %vm307_vm7, %v243_v22, %v371_v30  ;;  %v247_v44 = vadd.f32 %v1320_v7, %v176_v35  ;;  %v1237_v21 = vld [vmem:[%s1631_s0 + $0xa0] sm:$0xff]  }
  0x2d   :  { %v1116_v38 = vpack.c.bf16 %v435_v34, %v434_v33  ;;  %v436_v39 = vsel %vm308_vm8, %v244_v25, %v372_v31  ;;  %vm310_vm10 = vcmp.gt.f32.partialorder %v246_v36, 0.0  ;;  %v374_v45 = vmul.f32 0.1, %v246_v36 }
  0x2e   :  { %v437_v40 = vsel %vm309_vm9, %v245_v26, %v373_v32  ;;  %v989_v46 = vunpack.c.h.bf16 %v1231_v28  ;;  %v177_v47 = vmul.f32 %v988_v41, %v1306_v1  ;;  %v992_v48 = vunpack.c.l.bf16 %v1232_v37 }
  0x2f   :  { %v1121_v43 = vpack.c.bf16 %v437_v40, %v436_v39  ;;  %1259 = vst [vmem:[%s1634_s3 + $0x58] sm:$0xff] %v1116_v38   ;;  %v993_v49 = vunpack.c.h.bf16 %v1232_v37  ;;  %vm311_vm11 = vcmp.gt.f32.partialorder %v247_v44, 0.0  ;;  %v375_v51 = vmul.f32 0.1, %v247_v44  ;;  %v1238_v40 = vld [vmem:[%s1631_s0 + $0xa8] sm:$0xff]  }
  0x30   :  { %v438_v52 = vsel %vm310_vm10, %v246_v36, %v374_v45  ;;  %v996_v53 = vunpack.c.l.bf16 %v1233_v42  ;;  %v178_v54 = vmul.f32 %v989_v46, %v1306_v1  ;;  %v248_v55 = vadd.f32 %v1320_v7, %v177_v47 }
  0x31   :  { %1260 = vst [vmem:[%s1634_s3 + $0x60] sm:$0xff] %v1121_v43   ;;  %v179_v56 = vmul.f32 %v992_v48, %v1306_v1  ;;  %v180_v57 = vmul.f32 %v993_v49, %v1306_v1  ;;  %v439_v58 = vsel %vm311_vm11, %v247_v44, %v375_v51  ;;  %v997_v59 = vunpack.c.h.bf16 %v1233_v42 }
  0x32   :  { %v181_v60 = vmul.f32 %v996_v53, %v1306_v1  ;;  %v1000_v61 = vunpack.c.l.bf16 %v1234_v50  ;;  %v1126_v62 = vpack.c.bf16 %v439_v58, %v438_v52  ;;  %v249_v63 = vadd.f32 %v1320_v7, %v178_v54 }
  0x33   :  { %vm312_vm12 = vcmp.gt.f32.partialorder %v248_v55, 0.0  ;;  %v376_v0 = vmul.f32 0.1, %v248_v55  ;;  %v250_v2 = vadd.f32 %v1320_v7, %v179_v56  ;;  %v251_v3 = vadd.f32 %v1320_v7, %v180_v57 }
  0x34   :  { %v182_v4 = vmul.f32 %v997_v59, %v1306_v1  ;;  %v252_v5 = vadd.f32 %v1320_v7, %v181_v60  ;;  %1261 = vst [vmem:[%s1634_s3 + $0x68] sm:$0xff] %v1126_v62   ;;  %vm313_vm13 = vcmp.gt.f32.partialorder %v249_v63, 0.0  ;;  %v377_v6 = vmul.f32 0.1, %v249_v63 }
  0x35   :  { %v440_v8 = vsel %vm312_vm12, %v248_v55, %v376_v0  ;;  %v1001_v9 = vunpack.c.h.bf16 %v1234_v50  ;;  %vm314_vm14 = vcmp.gt.f32.partialorder %v250_v2, 0.0  ;;  %vm315_vm15 = vcmp.gt.f32.partialorder %v251_v3, 0.0  ;;  %v1239_v0 = vld [vmem:[%s1631_s0 + $0xb0] sm:$0xff]  }
  0x36   :  { %v378_v10 = vmul.f32 0.1, %v250_v2  ;;  %v379_v11 = vmul.f32 0.1, %v251_v3  ;;  %v441_v12 = vsel %vm313_vm13, %v249_v63, %v377_v6  ;;  %v253_v13 = vadd.f32 %v1320_v7, %v182_v4 }
  0x37   :  { %vm316_vm0 = vcmp.gt.f32.partialorder %v252_v5, 0.0  ;;  %v380_v14 = vmul.f32 0.1, %v252_v5  ;;  %v1131_v16 = vpack.c.bf16 %v441_v12, %v440_v8  ;;  %v183_v19 = vmul.f32 %v1000_v61, %v1306_v1 }
  0x38   :  { %v442_v17 = vsel %vm314_vm14, %v250_v2, %v378_v10  ;;  %v443_v18 = vsel %vm315_vm15, %v251_v3, %v379_v11  ;;  %vm317_vm1 = vcmp.gt.f32.partialorder %v253_v13, 0.0  ;;  %v381_v23 = vmul.f32 0.1, %v253_v13  ;;  %v1240_v2 = vld [vmem:[%s1631_s0 + $0xb8] sm:$0xff]  }
  0x39   :  { %v1136_v22 = vpack.c.bf16 %v443_v18, %v442_v17  ;;  %v444_v24 = vsel %vm316_vm0, %v252_v5, %v380_v14  ;;  %1262 = vst [vmem:[%s1634_s3 + $0x70] sm:$0xff] %v1131_v16   ;;  %v184_v25 = vmul.f32 %v1001_v9, %v1306_v1  ;;  %v254_v26 = vadd.f32 %v1320_v7, %v183_v19  ;;  %v1241_v18 = vld [vmem:[%s1631_s0 + $0xc0] sm:$0xff]  }
  0x3a   :  { %v1004_v27 = vunpack.c.l.bf16 %v1235_v15  ;;  %v1005_v28 = vunpack.c.h.bf16 %v1235_v15  ;;  %v445_v29 = vsel %vm317_vm1, %v253_v13, %v381_v23  ;;  %v1008_v30 = vunpack.c.l.bf16 %v1236_v20 }
  0x3b   :  { %1263 = vst [vmem:[%s1634_s3 + $0x78] sm:$0xff] %v1136_v22   ;;  %v1009_v31 = vunpack.c.h.bf16 %v1236_v20  ;;  %v1012_v32 = vunpack.c.l.bf16 %v1237_v21  ;;  %v1141_v33 = vpack.c.bf16 %v445_v29, %v444_v24  ;;  %v255_v34 = vadd.f32 %v1320_v7, %v184_v25 }
  0x3c   :  { %vm318_vm2 = vcmp.gt.f32.partialorder %v254_v26, 0.0  ;;  %v382_v35 = vmul.f32 0.1, %v254_v26  ;;  %v185_v36 = vmul.f32 %v1004_v27, %v1306_v1  ;;  %v186_v37 = vmul.f32 %v1005_v28, %v1306_v1 }
  0x3d   :  { %v187_v38 = vmul.f32 %v1008_v30, %v1306_v1  ;;  %v188_v39 = vmul.f32 %v1009_v31, %v1306_v1  ;;  %1264 = vst [vmem:[%s1634_s3 + $0x80] sm:$0xff] %v1141_v33   ;;  %vm319_vm3 = vcmp.gt.f32.partialorder %v255_v34, 0.0  ;;  %v383_v41 = vmul.f32 0.1, %v255_v34 }
  0x3e   :  { %v446_v42 = vsel %vm318_vm2, %v254_v26, %v382_v35  ;;  %v1013_v43 = vunpack.c.h.bf16 %v1237_v21  ;;  %v256_v44 = vadd.f32 %v1320_v7, %v185_v36  ;;  %v257_v45 = vadd.f32 %v1320_v7, %v186_v37  ;;  %v1242_v36 = vld [vmem:[%s1631_s0 + $0xc8] sm:$0xff]  }
  0x3f   :  { %v258_v46 = vadd.f32 %v1320_v7, %v187_v38  ;;  %v259_v47 = vadd.f32 %v1320_v7, %v188_v39  ;;  %v447_v48 = vsel %vm319_vm3, %v255_v34, %v383_v41  ;;  %v189_v49 = vmul.f32 %v1012_v32, %v1306_v1 }
  0x40   :  { %v190_v50 = vmul.f32 %v1013_v43, %v1306_v1  ;;  %v1016_v51 = vunpack.c.l.bf16 %v1238_v40  ;;  %v1146_v52 = vpack.c.bf16 %v447_v48, %v446_v42  ;;  %vm320_vm4 = vcmp.gt.f32.partialorder %v256_v44, 0.0  ;;  %v1243_v42 = vld [vmem:[%s1631_s0 + $0xd0] sm:$0xff]  }
  0x41   :  { %vm321_vm5 = vcmp.gt.f32.partialorder %v257_v45, 0.0  ;;  %v384_v53 = vmul.f32 0.1, %v256_v44  ;;  %v385_v54 = vmul.f32 0.1, %v257_v45  ;;  %vm322_vm6 = vcmp.gt.f32.partialorder %v258_v46, 0.0 }
  0x42   :  { %vm323_vm7 = vcmp.gt.f32.partialorder %v259_v47, 0.0  ;;  %v386_v55 = vmul.f32 0.1, %v258_v46  ;;  %1265 = vst [vmem:[%s1634_s3 + $0x88] sm:$0xff] %v1146_v52   ;;  %v387_v57 = vmul.f32 0.1, %v259_v47  ;;  %v260_v58 = vadd.f32 %v1320_v7, %v189_v49 }
  0x43   :  { %v448_v56 = vsel %vm320_vm4, %v256_v44, %v384_v53  ;;  %v261_v59 = vadd.f32 %v1320_v7, %v190_v50  ;;  %v449_v60 = vsel %vm321_vm5, %v257_v45, %v385_v54  ;;  %v1017_v62 = vunpack.c.h.bf16 %v1238_v40 }
  0x44   :  { %v450_v61 = vsel %vm322_vm6, %v258_v46, %v386_v55  ;;  %v191_v63 = vmul.f32 %v1016_v51, %v1306_v1  ;;  %v1151_v3 = vpack.c.bf16 %v449_v60, %v448_v56  ;;  %v451_v4 = vsel %vm323_vm7, %v259_v47, %v387_v57  ;;  %v1244_v55 = vld [vmem:[%s1631_s0 + $0xd8] sm:$0xff]  }
  0x45   :  { %vm324_vm8 = vcmp.gt.f32.partialorder %v260_v58, 0.0  ;;  %vm325_vm9 = vcmp.gt.f32.partialorder %v261_v59, 0.0  ;;  %v1156_v5 = vpack.c.bf16 %v451_v4, %v450_v61  ;;  %v388_v6 = vmul.f32 0.1, %v260_v58 }
  0x46   :  { %v389_v8 = vmul.f32 0.1, %v261_v59  ;;  %v192_v9 = vmul.f32 %v1017_v62, %v1306_v1  ;;  %1266 = vst [vmem:[%s1634_s3 + $0x90] sm:$0xff] %v1151_v3   ;;  %v262_v10 = vadd.f32 %v1320_v7, %v191_v63  ;;  %v1020_v11 = vunpack.c.l.bf16 %v1239_v0 }
  0x47   :  { %v1021_v12 = vunpack.c.h.bf16 %v1239_v0  ;;  %v1024_v13 = vunpack.c.l.bf16 %v1240_v2  ;;  %1267 = vst [vmem:[%s1634_s3 + $0x98] sm:$0xff] %v1156_v5   ;;  %v452_v14 = vsel %vm324_vm8, %v260_v58, %v388_v6  ;;  %v1025_v17 = vunpack.c.h.bf16 %v1240_v2 }
  0x48   :  { %v453_v15 = vsel %vm325_vm9, %v261_v59, %v389_v8  ;;  %v263_v16 = vadd.f32 %v1320_v7, %v192_v9  ;;  %vm326_vm10 = vcmp.gt.f32.partialorder %v262_v10, 0.0  ;;  %v390_v20 = vmul.f32 0.1, %v262_v10 }
  0x49   :  { %v1161_v19 = vpack.c.bf16 %v453_v15, %v452_v14  ;;  %v193_v21 = vmul.f32 %v1020_v11, %v1306_v1  ;;  %v194_v23 = vmul.f32 %v1021_v12, %v1306_v1  ;;  %v195_v24 = vmul.f32 %v1024_v13, %v1306_v1  ;;  %v1246_v14 = vld [vmem:[%s1631_s0 + $0xe8] sm:$0xff]  }
  0x4a   :  { %vm327_vm11 = vcmp.gt.f32.partialorder %v263_v16, 0.0  ;;  %v391_v22 = vmul.f32 0.1, %v263_v16  ;;  %v454_v25 = vsel %vm326_vm10, %v262_v10, %v390_v20  ;;  %v196_v27 = vmul.f32 %v1025_v17, %v1306_v1  ;;  %v1245_v10 = vld [vmem:[%s1631_s0 + $0xe0] sm:$0xff]  }
  0x4b   :  { %1268 = vst [vmem:[%s1634_s3 + $0xa0] sm:$0xff] %v1161_v19   ;;  %v264_v26 = vadd.f32 %v1320_v7, %v193_v21  ;;  %v1028_v28 = vunpack.c.l.bf16 %v1241_v18  ;;  %v265_v30 = vadd.f32 %v1320_v7, %v194_v23  ;;  %v266_v31 = vadd.f32 %v1320_v7, %v195_v24 }
  0x4c   :  { %v455_v29 = vsel %vm327_vm11, %v263_v16, %v391_v22  ;;  %v1029_v32 = vunpack.c.h.bf16 %v1241_v18  ;;  %v267_v35 = vadd.f32 %v1320_v7, %v196_v27  ;;  %v1032_v46 = vunpack.c.l.bf16 %v1242_v36 }
  0x4d   :  { %v1166_v33 = vpack.c.bf16 %v455_v29, %v454_v25  ;;  %vm328_vm12 = vcmp.gt.f32.partialorder %v264_v26, 0.0  ;;  %v392_v34 = vmul.f32 0.1, %v264_v26  ;;  %vm329_vm13 = vcmp.gt.f32.partialorder %v265_v30, 0.0 }
  0x4e   :  { %v393_v37 = vmul.f32 0.1, %v265_v30  ;;  %vm330_vm14 = vcmp.gt.f32.partialorder %v266_v31, 0.0  ;;  %v394_v38 = vmul.f32 0.1, %v266_v31  ;;  %vm331_vm15 = vcmp.gt.f32.partialorder %v267_v35, 0.0 }
  0x4f   :  { %1269 = vst [vmem:[%s1634_s3 + $0xa8] sm:$0xff] %v1166_v33   ;;  %v456_v39 = vsel %vm328_vm12, %v264_v26, %v392_v34  ;;  %v395_v40 = vmul.f32 0.1, %v267_v35  ;;  %v197_v41 = vmul.f32 %v1028_v28, %v1306_v1  ;;  %v198_v45 = vmul.f32 %v1029_v32, %v1306_v1 }
  0x50   :  { %v457_v43 = vsel %vm329_vm13, %v265_v30, %v393_v37  ;;  %v458_v44 = vsel %vm330_vm14, %v266_v31, %v394_v38  ;;  %v1033_v50 = vunpack.c.h.bf16 %v1242_v36  ;;  %v199_v53 = vmul.f32 %v1032_v46, %v1306_v1  ;;  %v1247_v30 = vld [vmem:[%s1631_s0 + $0xf0] sm:$0xff]  }
  0x51   :  { %v1171_v47 = vpack.c.bf16 %v457_v43, %v456_v39  ;;  %v459_v48 = vsel %vm331_vm15, %v267_v35, %v395_v40  ;;  %v268_v49 = vadd.f32 %v1320_v7, %v197_v41  ;;  %v269_v52 = vadd.f32 %v1320_v7, %v198_v45 }
  0x52   :  { %v1176_v51 = vpack.c.bf16 %v459_v48, %v458_v44  ;;  %v1036_v54 = vunpack.c.l.bf16 %v1243_v42  ;;  %v200_v57 = vmul.f32 %v1033_v50, %v1306_v1  ;;  %v1037_v58 = vunpack.c.h.bf16 %v1243_v42  ;;  %v1248_v44 = vld [vmem:[%s1631_s0 + $0xf8] sm:$0xff]  }
  0x53   :  { %1270 = vst [vmem:[%s1634_s3 + $0xb0] sm:$0xff] %v1171_v47   ;;  %vm332_vm0 = vcmp.gt.f32.partialorder %v268_v49, 0.0  ;;  %v396_v56 = vmul.f32 0.1, %v268_v49  ;;  %vm333_vm1 = vcmp.gt.f32.partialorder %v269_v52, 0.0  ;;  %v270_v60 = vadd.f32 %v1320_v7, %v199_v53 }
  0x54   :  { %1271 = vst [vmem:[%s1634_s3 + $0xb8] sm:$0xff] %v1176_v51   ;;  %v397_v59 = vmul.f32 0.1, %v269_v52  ;;  %v201_v61 = vmul.f32 %v1036_v54, %v1306_v1  ;;  %v271_v63 = vadd.f32 %v1320_v7, %v200_v57  ;;  %v202_v0 = vmul.f32 %v1037_v58, %v1306_v1 }
  0x55   :  { %v460_v62 = vsel %vm332_vm0, %v268_v49, %v396_v56  ;;  %v1040_v2 = vunpack.c.l.bf16 %v1244_v55  ;;  %vm334_vm2 = vcmp.gt.f32.partialorder %v270_v60, 0.0  ;;  %v398_v4 = vmul.f32 0.1, %v270_v60 }
  0x56   :  { %v461_v3 = vsel %vm333_vm1, %v269_v52, %v397_v59  ;;  %v272_v5 = vadd.f32 %v1320_v7, %v201_v61  ;;  %vm335_vm3 = vcmp.gt.f32.partialorder %v271_v63, 0.0  ;;  %v399_v8 = vmul.f32 0.1, %v271_v63 }
  0x57   :  { %v1181_v6 = vpack.c.bf16 %v461_v3, %v460_v62  ;;  %v273_v9 = vadd.f32 %v1320_v7, %v202_v0  ;;  %v462_v11 = vsel %vm334_vm2, %v270_v60, %v398_v4  ;;  %v1041_v13 = vunpack.c.h.bf16 %v1244_v55 }
  0x58   :  { %vm336_vm4 = vcmp.gt.f32.partialorder %v272_v5, 0.0  ;;  %v400_v12 = vmul.f32 0.1, %v272_v5  ;;  %v463_v15 = vsel %vm335_vm3, %v271_v63, %v399_v8  ;;  %v203_v17 = vmul.f32 %v1040_v2, %v1306_v1 }
  0x59   :  { %1272 = vst [vmem:[%s1634_s3 + $0xc0] sm:$0xff] %v1181_v6   ;;  %vm337_vm5 = vcmp.gt.f32.partialorder %v273_v9, 0.0  ;;  %v401_v16 = vmul.f32 0.1, %v273_v9  ;;  %v1186_v18 = vpack.c.bf16 %v463_v15, %v462_v11  ;;  %v204_v20 = vmul.f32 %v1041_v13, %v1306_v1 }
  0x5a   :  { %v464_v19 = vsel %vm336_vm4, %v272_v5, %v400_v12  ;;  %v1044_v21 = vunpack.c.l.bf16 %v1245_v10  ;;  %v274_v23 = vadd.f32 %v1320_v7, %v203_v17  ;;  %v1045_v24 = vunpack.c.h.bf16 %v1245_v10 }
  0x5b   :  { %v465_v22 = vsel %vm337_vm5, %v273_v9, %v401_v16  ;;  %v1048_v25 = vunpack.c.l.bf16 %v1246_v14  ;;  %1273 = vst [vmem:[%s1634_s3 + $0xc8] sm:$0xff] %v1186_v18   ;;  %v275_v27 = vadd.f32 %v1320_v7, %v204_v20  ;;  %v1049_v29 = vunpack.c.h.bf16 %v1246_v14 }
  0x5c   :  { %v1191_v26 = vpack.c.bf16 %v465_v22, %v464_v19  ;;  %v205_v28 = vmul.f32 %v1044_v21, %v1306_v1  ;;  %vm338_vm6 = vcmp.gt.f32.partialorder %v274_v23, 0.0  ;;  %v402_v31 = vmul.f32 0.1, %v274_v23 }
  0x5d   :  { %v206_v32 = vmul.f32 %v1045_v24, %v1306_v1  ;;  %v207_v33 = vmul.f32 %v1048_v25, %v1306_v1  ;;  %vm339_vm7 = vcmp.gt.f32.partialorder %v275_v27, 0.0  ;;  %v403_v34 = vmul.f32 0.1, %v275_v27 }
  0x5e   :  { %1274 = vst [vmem:[%s1634_s3 + $0xd0] sm:$0xff] %v1191_v26   ;;  %v276_v35 = vadd.f32 %v1320_v7, %v205_v28  ;;  %v208_v36 = vmul.f32 %v1049_v29, %v1306_v1  ;;  %v466_v37 = vsel %vm338_vm6, %v274_v23, %v402_v31  ;;  %v1052_v40 = vunpack.c.l.bf16 %v1247_v30 }
  0x5f   :  { %v277_v38 = vadd.f32 %v1320_v7, %v206_v32  ;;  %v278_v39 = vadd.f32 %v1320_v7, %v207_v33  ;;  %v467_v41 = vsel %vm339_vm7, %v275_v27, %v403_v34  ;;  %v1053_v51 = vunpack.c.h.bf16 %v1247_v30 }
  0x60   :  { %vm340_vm8 = vcmp.gt.f32.partialorder %v276_v35, 0.0  ;;  %v404_v42 = vmul.f32 0.1, %v276_v35  ;;  %v279_v43 = vadd.f32 %v1320_v7, %v208_v36  ;;  %v1196_v45 = vpack.c.bf16 %v467_v41, %v466_v37 }
  0x61   :  { %vm341_vm9 = vcmp.gt.f32.partialorder %v277_v38, 0.0  ;;  %v405_v46 = vmul.f32 0.1, %v277_v38  ;;  %vm342_vm10 = vcmp.gt.f32.partialorder %v278_v39, 0.0  ;;  %v406_v48 = vmul.f32 0.1, %v278_v39 }
  0x62   :  { %v468_v47 = vsel %vm340_vm8, %v276_v35, %v404_v42  ;;  %vm343_vm11 = vcmp.gt.f32.partialorder %v279_v43, 0.0  ;;  %v407_v49 = vmul.f32 0.1, %v279_v43  ;;  %1275 = vst [vmem:[%s1634_s3 + $0xd8] sm:$0xff] %v1196_v45   ;;  %v209_v52 = vmul.f32 %v1052_v40, %v1306_v1 }
  0x63   :  { %v469_v50 = vsel %vm341_vm9, %v277_v38, %v405_v46  ;;  %v1056_v53 = vunpack.c.l.bf16 %v1248_v44  ;;  %v470_v55 = vsel %vm342_vm10, %v278_v39, %v406_v48  ;;  %v1057_v57 = vunpack.c.h.bf16 %v1248_v44 }
  0x64   :  { %v1201_v54 = vpack.c.bf16 %v469_v50, %v468_v47  ;;  %v471_v56 = vsel %vm343_vm11, %v279_v43, %v407_v49  ;;  %v210_v59 = vmul.f32 %v1053_v51, %v1306_v1  ;;  %v280_v60 = vadd.f32 %v1320_v7, %v209_v52 }
  0x65   :  { %v1206_v58 = vpack.c.bf16 %v471_v56, %v470_v55  ;;  %v211_v61 = vmul.f32 %v1056_v53, %v1306_v1  ;;  %v212_v62 = vmul.f32 %v1057_v57, %v1306_v1 }
  0x66   :  { %1276 = vst [vmem:[%s1634_s3 + $0xe0] sm:$0xff] %v1201_v54   ;;  %v281_v63 = vadd.f32 %v1320_v7, %v210_v59  ;;  %vm344_vm12 = vcmp.gt.f32.partialorder %v280_v60, 0.0  ;;  %v408_v0 = vmul.f32 0.1, %v280_v60 }
  0x67   :  { %1277 = vst [vmem:[%s1634_s3 + $0xe8] sm:$0xff] %v1206_v58   ;;  %v282_v2 = vadd.f32 %v1320_v7, %v211_v61  ;;  %v283_v3 = vadd.f32 %v1320_v7, %v212_v62 }
  0x68   :  { %vm345_vm13 = vcmp.gt.f32.partialorder %v281_v63, 0.0  ;;  %v409_v4 = vmul.f32 0.1, %v281_v63  ;;  %v472_v5 = vsel %vm344_vm12, %v280_v60, %v408_v0 }
  0x69   :  { %vm346_vm14 = vcmp.gt.f32.partialorder %v282_v2, 0.0  ;;  %vm347_vm15 = vcmp.gt.f32.partialorder %v283_v3, 0.0  ;;  %v410_v6 = vmul.f32 0.1, %v282_v2  ;;  %v411_v8 = vmul.f32 0.1, %v283_v3 }
  0x6a   :  { %v473_v1 = vsel %vm345_vm13, %v281_v63, %v409_v4 }
  0x6b   :  { %v1211_v9 = vpack.c.bf16 %v473_v1, %v472_v5  ;;  %v474_v10 = vsel %vm346_vm14, %v282_v2, %v410_v6  ;;  %v475_v11 = vsel %vm347_vm15, %v283_v3, %v411_v8 }
  0x6c   :  { %v1216_v12 = vpack.c.bf16 %v475_v11, %v474_v10 }
  0x6d   :  { %1278 = vst [vmem:[%s1634_s3 + $0xf0] sm:$0xff] %v1211_v9  }
  0x6e   :  { %1279 = vst [vmem:[%s1634_s3 + $0xf8] sm:$0xff] %v1216_v12  }

// kernel: _lambda_.12
= control target key start
LH: loop header
LB: loop body
LE: loop exit
PB: predicated region body
PF: predicated region fallthrough
CT: control target
= control target key end

     0   :  { %s3831_s12 = smov 0   ;;  %s5188_s0 = inlined_call_operand.vmem [shape: bf16[2,18,18,128], index: 0, kind: input, shape index: {}]   ;;  %s5189_s1 = inlined_call_operand.vmem [shape: bf16[1152,128], index: 1, kind: input, shape index: {}]   ;;  %s5190_s2 = inlined_call_operand.vmem [shape: bf16[2,256,128], index: 2, kind: output, shape index: {0}]   ;;  %s5191_s3 = inlined_call_operand.vmem [shape: f32[2,8,128], index: 3, kind: output, shape index: {1}]  }
   0x1 LB: > { %s2845_s13 = sadd.s32 4294967295, %s3809_s12   ;;  %p2849_p0 = scmp.ge.s32.totalorder %s3809_s12, 1  ;;  %s3809_s12 = sphi %s3831_s12, %s14_s12  }
   0x2   : > { %p140_p1 = scmp.lt.s32.totalorder %s3809_s12, 3 }
   0x4   : > { %p141_p2 = pnand %p2849_p0, %p140_p1 }
   0x6   : > { %144 = sbr.rel (%p141_p2) target bundleno = 552 (0x228), region = 28 }
   0xb   : > { %v3705_v0 = vld [vmem:[%s5189_s1 + $0x78] sm:$0xff]   ;;  %p168_p3 = scmp.lt.s32.totalorder %s2845_s13, 1  ;;  %v3707_v2 = vld [vmem:[%s5189_s1 + $0x70] sm:$0xff]   ;;  %v3709_v4 = vld [vmem:[%s5189_s1 + $0x68] sm:$0xff]   ;;  %vm237_vm0 = vsmask.f32 3328 }
   0xc   : > { %v3706_v1 = vld [vmem:[%s5189_s1 + $0x38] sm:$0xff]   ;;  %3160 = vmatprep.subr.bf16.mxu0 %v3705_v0  ;;  %3680 = vmatprep.subr.bf16.mxu1 %v3705_v0  ;;  %v3708_v3 = vld [vmem:[%s5189_s1 + $0x30] sm:$0xff]   ;;  %v3710_v5 = vld [vmem:[%s5189_s1 + $0x28] sm:$0xff]   ;;  %vm238_vm1 = vsmask.f32 7440  ;;  %vm690_vm3 = vcmask 1042432  }
   0xd   : > { %3161 = vmatpush3.bf16.msra.mxu0 %v3706_v1  ;;  %3688 = vmatpush3.bf16.msra.mxu1 %v3706_v1  ;;  %s5241_s13 = smov (!%p168_p3, %s2845_s13), 1  ;;  %v3711_v6 = vld [vmem:[%s5189_s1 + $0x60] sm:$0xff]   ;;  %v3713_v8 = vld [vmem:[%s5189_s1 + $0x58] sm:$0xff]   ;;  %v3715_v10 = vld [vmem:[%s5189_s1 + $0x50] sm:$0xff]   ;;  %vm691_vm4 = vcmask 1046532   ;;  %vm2754_vm6 = vcmask 1040384  }
   0xe   : > { %3162 = vmatprep.subr.bf16.mxu0 %v3707_v2  ;;  %3681 = vmatprep.subr.bf16.mxu1 %v3707_v2  ;;  %s3696_s28 = smul.u32 216, %s5241_s13  ;;  %v3712_v7 = vld [vmem:[%s5189_s1 + $0x20] sm:$0xff]   ;;  %v3714_v9 = vld [vmem:[%s5189_s1 + $0x18] sm:$0xff]   ;;  %v3716_v16 = vld [vmem:[%s5189_s1 + $0x10] sm:$0xff]   ;;  %s2853_s20 = sshll.u32 %s5241_s13, 3  ;;  %vm2756_vm7 = vcmask 1041408  }
   0xf   : > { %v3717_v21 = vld [vmem:[%s5189_s1 + $0x48] sm:$0xff]   ;;  %vm3910_vm2 = vmor %vm237_vm0, %vm238_vm1  ;;  %v3719_v43 = vld [vmem:[%s5189_s1 + $0x40] sm:$0xff]   ;;  %s181_s23 = scalar_lea.vmem %s5191_s3, %s2853_s20 }
  0x10   : > { %s3872_s8 = scalar_lea.vmem %s5188_s0, %s3696_s28  ;;  %v3718_v39 = vld [vmem:[%s5189_s1 + $0x8] sm:$0xff]   ;;  %v3720_v47 = vld [vmem:[%s5189_s1] sm:$0xff]   ;;  %v3723_v56 = vld [vmem:[%s5189_s1 + $0xf8] sm:$0xff]  }
  0x11   : > { %3163 = vmatpush3.bf16.msra.mxu0 %v3708_v3  ;;  %3689 = vmatpush3.bf16.msra.mxu1 %v3708_v3  ;;  %v3881_v11 = vld [vmem:[%s3872_s8] sm:$0xf]  ;;  %v3884_v12 = vld [vmem:[%s3872_s8 + $0x4] sm:$0xf]  ;;  %v3887_v13 = vld [vmem:[%s3872_s8 + $0x8] sm:$0x1] }
  0x12   : > { %3164 = vmatprep.subr.bf16.mxu0 %v3709_v4  ;;  %3682 = vmatprep.subr.bf16.mxu1 %v3709_v4  ;;  %v241_v14 = vshrl.u32 %v3881_v11, 16  ;;  %v244_v15 = vshll.u32 %v3881_v11, 16  ;;  %v250_v17 = vshll.u32 %v3884_v12, 16  ;;  %v254_v18 = vshrl.u32 %v3884_v12, 16  ;;  %v3898_v20 = vld [vmem:[%s3872_s8 + $0x90] sm:$0xf]  ;;  %vm4139_vm5 = vmor %vm690_vm3, %vm691_vm4 }
  0x13   : > { %v260_v19 = vshll.u32 %v3887_v13, 16  ;;  %v208_v24 = vld [vmem:[%s3872_s8 + $0x94] sm:$0xf]  ;;  %v529_v25 = vshrl.u32 %v3898_v20, 16  ;;  %v695_v29 = vrot.slane %v3884_v12, 5  ;;  %v532_v33 = vshll.u32 %v3898_v20, 16 }
  0x14   : > { %v243_v22 = vrot.slane %v241_v14, 4  ;;  %v246_v23 = vrot.slane %v244_v15, 5  ;;  %v252_v26 = vrot.slane %v250_v17, 5  ;;  %v256_v27 = vrot.slane %v254_v18, 4  ;;  %v231_v30 = vld [vmem:[%s3872_s8 + $0x98] sm:$0x1] }
  0x15   : > { %3165 = vmatpush3.bf16.msra.mxu0 %v3710_v5  ;;  %3690 = vmatpush3.bf16.msra.mxu1 %v3710_v5  ;;  %v262_v28 = vrot.slane %v260_v19, 5  ;;  %v531_v32 = vrot.slane %v529_v25, 4  ;;  %v538_v34 = vshll.u32 %v208_v24, 16  ;;  %v542_v37 = vshrl.u32 %v208_v24, 16  ;;  %v3724_v59 = vld [vmem:[%s5189_s1 + $0x178] sm:$0xff]   ;;  %v3727_v14 = vld [vmem:[%s5189_s1 + $0xf0] sm:$0xff]  }
  0x16   : > { %3166 = vmatprep.subr.bf16.mxu0 %v3711_v6  ;;  %3683 = vmatprep.subr.bf16.mxu1 %v3711_v6  ;;  %v247_v31 = vor.u32 %v246_v23, %v243_v22  ;;  %v257_v36 = vor.u32 %v256_v27, %v252_v26  ;;  %v548_v38 = vshll.u32 %v231_v30, 16  ;;  %v534_v41 = vrot.slane %v532_v33, 5  ;;  %v185_v60 = vld [vmem:[%s3872_s8 + $0xc] sm:$0xf]  ;;  %v3942_v61 = vld [vmem:[%s3872_s8 + $0x10] sm:$0xf] }
  0x17   : > { %v540_v42 = vrot.slane %v538_v34, 5  ;;  %v698_v45 = vrot.slane %v3887_v13, 5  ;;  %v544_v46 = vrot.slane %v542_v37, 4  ;;  %v3930_v51 = vrot.slane %v695_v29, 4  ;;  %v3725_v63 = vld [vmem:[%s5189_s1 + $0xb8] sm:$0xff]   ;;  %v3728_v23 = vld [vmem:[%s5189_s1 + $0xb0] sm:$0xff]  }
  0x18   : > { %v248_v40 = vrot.slane %v247_v31, 4  ;;  %v258_v44 = vrot.slane %v257_v36, 4  ;;  %v535_v49 = vor.u32 %v534_v41, %v531_v32  ;;  %v550_v53 = vrot.slane %v548_v38, 5  ;;  %v3726_v0 = vld [vmem:[%s5189_s1 + $0x138] sm:$0xff]   ;;  %v3953_v1 = vld [vmem:[%s3872_s8 + $0x14] sm:$0x1] }
  0x19   : > { %3167 = vmatpush3.bf16.msra.mxu0 %v3712_v7  ;;  %3691 = vmatpush3.bf16.msra.mxu1 %v3712_v7  ;;  %v545_v52 = vor.u32 %v544_v46, %v540_v42  ;;  %v2872_v58 = vcombine.low %v3881_v11, %v3884_v12  ;;  %v265_v2 = vshrl.u32 %v185_v60, 16  ;;  %v268_v3 = vshll.u32 %v185_v60, 16  ;;  %v232_v18 = vld [vmem:[%s3872_s8 + $0xa4] sm:$0x1]  ;;  %v3731_v32 = vld [vmem:[%s5189_s1 + $0xe8] sm:$0xff]  }
  0x1a   : > { %3168 = vmatprep.subr.bf16.mxu0 %v3713_v8  ;;  %3684 = vmatprep.subr.bf16.mxu1 %v3713_v8  ;;  %v253_v48 = vsel %vm3910_vm2, %v248_v40, %v252_v26  ;;  %v263_v50 = vsel %vm3910_vm2, %v258_v44, %v262_v28  ;;  %v536_v55 = vrot.slane %v535_v49, 4  ;;  %v274_v4 = vshll.u32 %v3942_v61, 16  ;;  %v3734_v40 = vld [vmem:[%s5189_s1 + $0x170] sm:$0xff]  }
  0x1b   : > { %v2888_v54 = vcombine.low %v253_v48, %v263_v50  ;;  %v546_v57 = vrot.slane %v545_v52, 4  ;;  %v3959_v6 = vcombine.low %v3898_v20, %v208_v24  ;;  %v278_v7 = vshrl.u32 %v3942_v61, 16  ;;  %v3736_v50 = vld [vmem:[%s5189_s1 + $0x130] sm:$0xff]   ;;  %v187_v52 = vld [vmem:[%s3872_s8 + $0x18] sm:$0xf] }
  0x1c   : > { %v541_v62 = vsel %vm3910_vm2, %v536_v55, %v540_v42  ;;  %v284_v8 = vshll.u32 %v3953_v1, 16  ;;  %v267_v15 = vrot.slane %v265_v2, 4  ;;  %v276_v17 = vrot.slane %v274_v4, 5  ;;  %v3733_v55 = vld [vmem:[%s5189_s1 + $0xe0] sm:$0xff]   ;;  %v211_v2 = vld [vmem:[%s3872_s8 + $0xa8] sm:$0xf] }
  0x1d   : > { %3169 = vmatpush3.bf16.msra.mxu0 %v3714_v9  ;;  %3692 = vmatpush3.bf16.msra.mxu1 %v3714_v9  ;;  %v551_v5 = vsel %vm3910_vm2, %v546_v57, %v550_v53  ;;  %v209_v9 = vld [vmem:[%s3872_s8 + $0x9c] sm:$0xf]  ;;  %v280_v19 = vrot.slane %v278_v7, 4  ;;  %v572_v27 = vshll.u32 %v232_v18, 16  ;;  %v3987_v46 = vcombine.low %v185_v60, %v3942_v61 }
  0x1e   : > { %3170 = vmatprep.subr.bf16.mxu0 %v3715_v10  ;;  %3685 = vmatprep.subr.bf16.mxu1 %v3715_v10  ;;  %v210_v10 = vld [vmem:[%s3872_s8 + $0xa0] sm:$0xf]  ;;  %v3965_v11 = vcombine.low %v541_v62, %v551_v5  ;;  %v286_v20 = vrot.slane %v284_v8, 5  ;;  %v556_v22 = vshll.u32 %v209_v9, 16  ;;  %v3999_v53 = vld [vmem:[%s3872_s8 + $0x1c] sm:$0xf] }
  0x1f   : > { %1715 = vmatprep.mubr.bf16.mxu0 %v2888_v54  ;;  %v562_v25 = vshll.u32 %v210_v10, 16  ;;  %v566_v26 = vshrl.u32 %v210_v10, 16  ;;  %v281_v28 = vor.u32 %v280_v19, %v276_v17  ;;  %v574_v37 = vrot.slane %v572_v27, 5  ;;  %v3735_v5 = vld [vmem:[%s5189_s1 + $0xa0] sm:$0xff]  }
  0x20   : > { %5204 = vst [vmem:[#allocation2_spill] sm:$0xff] %v3965_v11  ;;  %1811 = vmatprep.mubr.bf16.mxu1 %v3965_v11  ;;  %v558_v31 = vrot.slane %v556_v22, 5  ;;  %v289_v57 = vshrl.u32 %v187_v52, 16  ;;  %v4013_v62 = vcombine.low %v209_v9, %v210_v10  ;;  %v3739_v22 = vld [vmem:[%s5189_s1 + $0xd8] sm:$0xff]  }
  0x21   : > { %3171 = vmatpush3.bf16.msra.mxu0 %v3716_v16  ;;  %3693 = vmatpush3.bf16.msra.mxu1 %v3716_v16  ;;  %v270_v16 = vrot.slane %v268_v3, 5  ;;  %v564_v34 = vrot.slane %v562_v25, 5  ;;  %v568_v36 = vrot.slane %v566_v26, 4  ;;  %v282_v38 = vrot.slane %v281_v28, 4  ;;  %v212_v3 = vld [vmem:[%s3872_s8 + $0xac] sm:$0xf] }
  0x22   : > { %3172 = vmatprep.subr.bf16.mxu0 %v3717_v21  ;;  %3686 = vmatprep.subr.bf16.mxu1 %v3717_v21  ;;  %v553_v21 = vshrl.u32 %v209_v9, 16  ;;  %v291_v7 = vrot.slane %v289_v57, 4  ;;  %v233_v9 = vld [vmem:[%s3872_s8 + $0xb0] sm:$0x1]  ;;  %v586_v19 = vshll.u32 %v212_v3, 16  ;;  %v3740_v26 = vld [vmem:[%s5189_s1 + $0x98] sm:$0xff]  }
  0x23   : > { %v271_v24 = vor.u32 %v270_v16, %v267_v15  ;;  %v569_v42 = vor.u32 %v568_v36, %v564_v34  ;;  %v577_v16 = vshrl.u32 %v211_v2, 16 }
  0x24   : > { %v555_v30 = vrot.slane %v553_v21, 4  ;;  %v596_v21 = vshll.u32 %v233_v9, 16  ;;  %v588_v28 = vrot.slane %v586_v19, 5  ;;  %v234_v9 = vld [vmem:[%s3872_s8 + $0xbc] sm:$0x1] }
  0x25   : > { %3173 = vmatpush3.bf16.msra.mxu0 %v3718_v39  ;;  %3694 = vmatpush3.bf16.msra.mxu1 %v3718_v39  ;;  %v272_v33 = vrot.slane %v271_v24, 4  ;;  %v570_v49 = vrot.slane %v569_v42, 4  ;;  %v579_v24 = vrot.slane %v577_v16, 4 }
  0x26   : > { %3174 = vmatprep.subr.bf16.mxu0 %v3719_v43  ;;  %3687 = vmatprep.subr.bf16.mxu1 %v3719_v43  ;;  %v559_v39 = vor.u32 %v558_v31, %v555_v30  ;;  %v287_v43 = vsel %vm3910_vm2, %v282_v38, %v286_v20  ;;  %v590_v20 = vshrl.u32 %v212_v3, 16  ;;  %v3741_v31 = vld [vmem:[%s5189_s1 + $0xd0] sm:$0xff]   ;;  %v4040_v38 = vcombine.low %v187_v52, %v3999_v53 }
  0x27   : > { %v277_v41 = vsel %vm3910_vm2, %v272_v33, %v276_v17  ;;  %v575_v60 = vsel %vm3910_vm2, %v570_v49, %v574_v37  ;;  %v580_v17 = vshll.u32 %v211_v2, 16 }
  0x28   : > { %v560_v44 = vrot.slane %v559_v39, 4  ;;  %v3992_v48 = vcombine.low %v277_v41, %v287_v43  ;;  %v592_v30 = vrot.slane %v590_v20, 4  ;;  %v4042_v39 = vcombine.low %v211_v2, %v212_v3  ;;  %v4046_v41 = vld [vmem:[%s3872_s8 + $0x28] sm:$0xf]  ;;  %v214_v3 = vld [vmem:[%s3872_s8 + $0xb8] sm:$0xf] }
  0x29   : > { %3175 = vmatpush3.bf16.msra.mxu0 %v3720_v47  ;;  %3695 = vmatpush3.bf16.msra.mxu1 %v3720_v47  ;;  %v3732_v47 = vld [vmem:[%s5189_s1 + $0xa8] sm:$0xff]   ;;  %v582_v25 = vrot.slane %v580_v17, 5  ;;  %v326_v57 = vshrl.u32 %v4046_v41, 16 }
  0x2a   : > { %3272 = vmatprep.subr.bf16.mxu1 %v3723_v56  ;;  %3384 = vmatprep.subr.bf16.mxu0 %v3724_v59  ;;  %v565_v54 = vsel %vm3910_vm2, %v560_v44, %v564_v34  ;;  %v4007_v56 = vld [vmem:[%s3872_s8 + $0x20] sm:$0x1]  ;;  %v298_v59 = vshll.u32 %v3999_v53, 16  ;;  %v598_v34 = vrot.slane %v596_v21, 5  ;;  %v593_v37 = vor.u32 %v592_v30, %v588_v28  ;;  %v3742_v44 = vld [vmem:[%s5189_s1 + $0x90] sm:$0xff]  }
  0x2b   : > { %v4019_v4 = vcombine.low %v565_v54, %v575_v60  ;;  %v583_v33 = vor.u32 %v582_v25, %v579_v24 }
  0x2c   : > { %1716 = vmatmul.mubr.bf16.vlgmr.msra.gmra.mxu0 %v2872_v58  ;;  %1812 = vmatmul.mubr.bf16.vlgmr.msra.gmra.mxu1 %v3959_v6  ;;  %v292_v58 = vshll.u32 %v187_v52, 16  ;;  %v594_v54 = vrot.slane %v593_v37, 4  ;;  %v3750_v37 = vld [vmem:[%s5189_s1 + $0x80] sm:$0xff]  }
  0x2d   : > { %3273 = vmatpush3.bf16.msra.mxu1 %v3725_v63  ;;  %3385 = vmatpush3.bf16.msra.mxu0 %v3726_v0  ;;  %v302_v63 = vshrl.u32 %v3999_v53, 16  ;;  %v308_v0 = vshll.u32 %v4007_v56, 16  ;;  %5205 = vst [vmem:[#allocation3_spill] sm:$0xff] %v4019_v4  ;;  %v584_v43 = vrot.slane %v583_v33, 4 }
  0x2e   : > { %3274 = vmatprep.subr.bf16.mxu1 %v3727_v14  ;;  %3386 = vmatprep.subr.bf16.mxu0 %v3734_v40  ;;  %v294_v8 = vrot.slane %v292_v58, 5  ;;  %v300_v14 = vrot.slane %v298_v59, 5  ;;  %v189_v40 = vld [vmem:[%s3872_s8 + $0x24] sm:$0xf]  ;;  %v4061_v58 = vld [vmem:[%s3872_s8 + $0xb4] sm:$0xf] }
  0x2f   : > { %1723 = vmatprep.mubr.bf16.mxu0 %v3992_v48  ;;  %v304_v10 = vrot.slane %v302_v63, 4  ;;  %v310_v15 = vrot.slane %v308_v0, 5  ;;  %1819 = vmatprep.mubr.bf16.mxu1 %v4019_v4  ;;  %v313_v49 = vshrl.u32 %v189_v40, 16  ;;  %v3746_v59 = vld [vmem:[%s5189_s1 + $0x168] sm:$0xff]   ;;  %v589_v60 = vsel %vm3910_vm2, %v584_v43, %v588_v28 }
  0x30   : > { %v295_v18 = vor.u32 %v294_v8, %v291_v7  ;;  %v599_v7 = vsel %vm3910_vm2, %v594_v54, %v598_v34  ;;  %v604_v19 = vshll.u32 %v4061_v58, 16 }
  0x31   : > { %3275 = vmatpush3.bf16.msra.mxu1 %v3728_v23  ;;  %3387 = vmatpush3.bf16.msra.mxu0 %v3736_v50  ;;  %v305_v23 = vor.u32 %v304_v10, %v300_v14  ;;  %v316_v50 = vshll.u32 %v189_v40, 16  ;;  %v315_v63 = vrot.slane %v313_v49, 4  ;;  %v601_v10 = vshrl.u32 %v4061_v58, 16  ;;  %v3752_v49 = vld [vmem:[%s5189_s1 + $0x1f8] sm:$0xff]  }
  0x32   : > { %3276 = vmatprep.subr.bf16.mxu1 %v3731_v32  ;;  %v296_v27 = vrot.slane %v295_v18, 4  ;;  %v4081_v16 = vcombine.low %v589_v60, %v599_v7  ;;  %3388 = vmatprep.subr.bf16.mxu0 %v3746_v59  ;;  %v606_v25 = vrot.slane %v604_v19, 5  ;;  %v191_v59 = vld [vmem:[%s3872_s8 + $0x30] sm:$0xf]  ;;  %v4113_v60 = vld [vmem:[%s3872_s8 + $0x34] sm:$0xf] }
  0x33   : > { %v306_v32 = vrot.slane %v305_v23, 4  ;;  %v318_v0 = vrot.slane %v316_v50, 5  ;;  %v603_v21 = vrot.slane %v601_v10, 4  ;;  %v614_v23 = vshrl.u32 %v214_v3, 16 }
  0x34   : > { %1724 = vmatmul.mubr.bf16.gmra.mxu0 %v3987_v46  ;;  %1820 = vmatmul.mubr.bf16.gmra.mxu1 %v4013_v62  ;;  %v301_v36 = vsel %vm3910_vm2, %v296_v27, %v300_v14  ;;  %v328_v14 = vrot.slane %v326_v57, 4  ;;  %5206 = vst [vmem:[#allocation4_spill] sm:$0xff] %v4081_v16  ;;  %v3747_v27 = vld [vmem:[%s5189_s1 + $0x88] sm:$0xff]   ;;  %v346_v7 = vshll.u32 %v4113_v60, 16  ;;  %v350_v10 = vshrl.u32 %v4113_v60, 16 }
  0x35   : > { %3277 = vmatpush3.bf16.msra.mxu1 %v3732_v47  ;;  %v311_v42 = vsel %vm3910_vm2, %v306_v32, %v310_v15  ;;  %v4054_v47 = vld [vmem:[%s3872_s8 + $0x2c] sm:$0x1]  ;;  %v319_v17 = vor.u32 %v318_v0, %v315_v63  ;;  %1827 = vmatprep.mubr.bf16.mxu1 %v4081_v16  ;;  %v3749_v32 = vld [vmem:[%s5189_s1 + $0xc0] sm:$0xff]   ;;  %v607_v34 = vor.u32 %v606_v25, %v603_v21  ;;  %v4122_v0 = vld [vmem:[%s3872_s8 + $0x38] sm:$0x1] }
  0x36   : > { %3278 = vmatprep.subr.bf16.mxu1 %v3733_v55  ;;  %v4056_v52 = vcombine.low %v301_v36, %v311_v42  ;;  %v322_v55 = vshll.u32 %v4046_v41, 16  ;;  %v332_v2 = vshll.u32 %v4054_v47, 16  ;;  %v3748_v15 = vld [vmem:[%s5189_s1 + $0x128] sm:$0xff]   ;;  %v4160_v13 = vcombine.low %v191_v59, %v4113_v60 }
  0x37   : > { %3389 = vmatpush3.bf16.msra.mxu0 %v3748_v15  ;;  %v320_v24 = vrot.slane %v319_v17, 4  ;;  %v608_v54 = vrot.slane %v607_v34, 4  ;;  %v356_v15 = vshll.u32 %v4122_v0, 16  ;;  %v624_v17 = vld [vmem:[%s3872_s8] sm:$0xe] }
  0x38   : > { %1731 = vmatprep.mubr.bf16.mxu0 %v4056_v52  ;;  %v324_v8 = vrot.slane %v322_v55, 5  ;;  %v334_v18 = vrot.slane %v332_v2, 5  ;;  %v3754_v55 = vld [vmem:[%s5189_s1 + $0x160] sm:$0xff]   ;;  %v337_v2 = vshrl.u32 %v191_v59, 16  ;;  %v625_v34 = vld [vmem:[%s3872_s8 + $0xc] sm:$0xe] }
  0x39   : > { %3279 = vmatpush3.bf16.msra.mxu1 %v3735_v5  ;;  %v3745_v5 = vld [vmem:[%s5189_s1 + $0xc8] sm:$0xff]   ;;  %3390 = vmatprep.subr.bf16.mxu0 %v3754_v55 }
  0x3a   : > { %3280 = vmatprep.subr.bf16.mxu1 %v3739_v22  ;;  %v329_v20 = vor.u32 %v328_v14, %v324_v8  ;;  %v610_v22 = vshll.u32 %v214_v3, 16  ;;  %v325_v33 = vsel %vm3910_vm2, %v320_v24, %v324_v8  ;;  %v3758_v8 = vld [vmem:[%s5189_s1 + $0x158] sm:$0xff]   ;;  %v702_v24 = vrot.slane %v3942_v61, 5 }
  0x3b   : > { %v193_v61 = vld [vmem:[%s3872_s8 + $0x3c] sm:$0xf] }
  0x3c   : > { %1732 = vmatmul.mubr.bf16.gmra.mxu0 %v4040_v38  ;;  %1828 = vmatmul.mubr.bf16.gmra.mxu1 %v4042_v39  ;;  %v330_v28 = vrot.slane %v329_v20, 4  ;;  %v612_v30 = vrot.slane %v610_v22, 5  ;;  %v339_v20 = vrot.slane %v337_v2, 4  ;;  %v348_v22 = vrot.slane %v346_v7, 5 }
  0x3d   : > { %3281 = vmatpush3.bf16.msra.mxu1 %v3740_v26  ;;  %v620_v26 = vshll.u32 %v234_v9, 16  ;;  %v4132_v9 = vcombine.low %v4061_v58, %v214_v3  ;;  %v352_v58 = vrot.slane %v350_v10, 4  ;;  %v358_v3 = vrot.slane %v356_v15, 5  ;;  %v3759_v10 = vld [vmem:[%s5189_s1 + $0x1f0] sm:$0xff]  }
  0x3e   : > { %3282 = vmatprep.subr.bf16.mxu1 %v3741_v31  ;;  %v616_v31 = vrot.slane %v614_v23, 4  ;;  %v335_v42 = vsel %vm3910_vm2, %v330_v28, %v334_v18  ;;  %v613_v63 = vsel %vm3910_vm2, %v608_v54, %v612_v30  ;;  %v2854_v23 = vrot.slane %v624_v17, 9 }
  0x3f   : > { %v622_v36 = vrot.slane %v620_v26, 5  ;;  %v4106_v50 = vcombine.low %v325_v33, %v335_v42  ;;  %v699_v26 = vsel %vm4139_vm5, %v3930_v51, %v698_v45  ;;  %v361_v45 = vshrl.u32 %v193_v61, 16 }
  0x40   : > { %v617_v43 = vor.u32 %v616_v31, %v612_v30  ;;  %v696_v28 = vsel %vm4139_vm5, %v2854_v23, %v695_v29  ;;  %v4163_v31 = vld [vmem:[%s3872_s8 + $0x40] sm:$0xf]  ;;  %v364_v33 = vshll.u32 %v193_v61, 16  ;;  %v2855_v7 = vrot.slane %v625_v34, 9 }
  0x41   : > { %3283 = vmatpush3.bf16.msra.mxu1 %v3742_v44  ;;  %v4101_v44 = vcombine.low %v189_v40, %v4046_v41  ;;  %v3755_v40 = vld [vmem:[%s5189_s1 + $0x120] sm:$0xff]   ;;  %1739 = vmatprep.mubr.bf16.mxu0 %v4106_v50  ;;  %v370_v12 = vshll.u32 %v4163_v31, 16  ;;  %v374_v29 = vshrl.u32 %v4163_v31, 16  ;;  %v363_v42 = vrot.slane %v361_v45, 4 }
  0x42   : > { %3284 = vmatprep.subr.bf16.mxu1 %v3745_v5  ;;  %v618_v57 = vrot.slane %v617_v43, 4  ;;  %v340_v5 = vshll.u32 %v191_v59, 16  ;;  %3391 = vmatpush3.bf16.msra.mxu0 %v3755_v40  ;;  %v366_v55 = vrot.slane %v364_v33, 5  ;;  %v4183_v40 = vld [vmem:[%s3872_s8 + $0x4c] sm:$0xf]  ;;  %v4218_v45 = vcombine.low %v193_v61, %v4163_v31 }
  0x43   : > { %3392 = vmatprep.subr.bf16.mxu0 %v3758_v8  ;;  %v376_v59 = vrot.slane %v374_v29, 4  ;;  %v704_v8 = vrot.slane %v702_v24, 4  ;;  %v394_v23 = vshll.u32 %v4183_v40, 16  ;;  %v3761_v29 = vld [vmem:[%s5189_s1 + $0x1b0] sm:$0xff]  }
  0x44   : > { %v623_v14 = vsel %vm3910_vm2, %v618_v57, %v622_v36  ;;  %1740 = vmatmul.mubr.bf16.gmra.mxu0 %v4101_v44  ;;  %v342_v21 = vrot.slane %v340_v5, 5  ;;  %v372_v57 = vrot.slane %v370_v12, 5  ;;  %v367_v15 = vor.u32 %v366_v55, %v363_v42  ;;  %5210 = vst [vmem:[#allocation6_spill] sm:$0xff] %v4218_v45 }
  0x45   : > { %3285 = vmatpush3.bf16.msra.mxu1 %v3747_v27  ;;  %v4143_v19 = vcombine.low %v613_v63, %v623_v14  ;;  %v353_v27 = vor.u32 %v352_v58, %v348_v22  ;;  %v3760_v63 = vld [vmem:[%s5189_s1 + $0x118] sm:$0xff]   ;;  %v4191_v14 = vld [vmem:[%s3872_s8 + $0x50] sm:$0x1]  ;;  %v703_v58 = vsel %vm4139_vm5, %v2855_v7, %v702_v24  ;;  %v396_v33 = vrot.slane %v394_v23, 5 }
  0x46   : > { %3286 = vmatprep.subr.bf16.mxu1 %v3749_v32  ;;  %v343_v25 = vor.u32 %v342_v21, %v339_v20  ;;  %v4166_v32 = vld [vmem:[%s3872_s8 + $0x44] sm:$0x1]  ;;  %v377_v17 = vor.u32 %v376_v59, %v372_v57  ;;  %v705_v20 = vrot.slane %v3953_v1, 5  ;;  %3393 = vmatpush3.bf16.msra.mxu0 %v3760_v63  ;;  %v3763_v1 = vld [vmem:[%s5189_s1 + $0x150] sm:$0xff]   ;;  %v404_v61 = vshll.u32 %v4191_v14, 16  ;;  %v3767_v59 = vld [vmem:[%s5189_s1 + $0x1a8] sm:$0xff]  }
  0x47   : > { %5209 = vst [vmem:[#allocation5_spill] sm:$0xff] %v4143_v19  ;;  %1835 = vmatprep.mubr.bf16.mxu1 %v4143_v19  ;;  %v354_v51 = vrot.slane %v353_v27, 4  ;;  %v380_v43 = vshll.u32 %v4166_v32, 16  ;;  %v3764_v24 = vld [vmem:[%s5189_s1 + $0x110] sm:$0xff]   ;;  %3394 = vmatprep.subr.bf16.mxu0 %v3763_v1  ;;  %v3769_v63 = vld [vmem:[%s5189_s1 + $0x148] sm:$0xff]   ;;  %v709_v7 = vrot.slane %v3999_v53, 5 }
  0x48   : > { %1836 = vmatmul.mubr.bf16.gmra.mxu1 %v4132_v9  ;;  %v344_v30 = vrot.slane %v343_v25, 4  ;;  %v398_v25 = vshrl.u32 %v4183_v40, 16  ;;  %v378_v27 = vrot.slane %v377_v17, 4 }
  0x49   : > { %3287 = vmatpush3.bf16.msra.mxu1 %v3750_v37  ;;  %1876 = vmatprep.mubr.bf16.mxu1 %v3987_v46  ;;  %v2904_v46 = vcombine.low %v696_v28, %v699_v26  ;;  %v3753_v37 = vld [vmem:[%s5189_s1 + $0x1b8] sm:$0xff]   ;;  %v359_v54 = vsel %vm3910_vm2, %v354_v51, %v358_v3  ;;  %v382_v5 = vrot.slane %v380_v43, 5  ;;  %v368_v26 = vrot.slane %v367_v15, 4 }
  0x4a   : > { %3496 = vmatprep.subr.bf16.mxu1 %v3752_v49  ;;  %v349_v36 = vsel %vm3910_vm2, %v344_v30, %v348_v22  ;;  %v4178_v49 = vld [vmem:[%s3872_s8 + $0x48] sm:$0xf]  ;;  %v4199_v22 = vld [vmem:[%s3872_s8 + $0x18] sm:$0xe]  ;;  %v706_v28 = vsel %vm4139_vm5, %v704_v8, %v705_v20  ;;  %v400_v12 = vrot.slane %v398_v25, 4  ;;  %3395 = vmatpush3.bf16.msra.mxu0 %v3764_v24  ;;  %v712_v8 = vrot.slane %v4007_v56, 5 }
  0x4b   : > { %v4188_v2 = vcombine.low %v349_v36, %v359_v54  ;;  %v385_v21 = vshrl.u32 %v4178_v49, 16  ;;  %v388_v3 = vshll.u32 %v4178_v49, 16  ;;  %v373_v34 = vsel %vm3910_vm2, %v368_v26, %v372_v57  ;;  %v4237_v57 = vld [vmem:[%s3872_s8 + $0x54] sm:$0xf]  ;;  %v627_v56 = vld [vmem:[%s3872_s8 + $0x24] sm:$0xe]  ;;  %3396 = vmatprep.subr.bf16.mxu0 %v3769_v63 }
  0x4c   : > { %v383_v36 = vsel %vm3910_vm2, %v378_v27, %v382_v5  ;;  %v401_v54 = vor.u32 %v400_v12, %v396_v33  ;;  %v2856_v55 = vrot.slane %v4199_v22, 9  ;;  %v406_v5 = vrot.slane %v404_v61, 5  ;;  %v3770_v25 = vld [vmem:[%s5189_s1 + $0x108] sm:$0xff]   ;;  %v4281_v61 = vld [vmem:[%s3872_s8 + $0x60] sm:$0xf] }
  0x4d   : > { %1747 = vmatprep.mubr.bf16.mxu0 %v4188_v2  ;;  %v387_v30 = vrot.slane %v385_v21, 4  ;;  %v390_v51 = vrot.slane %v388_v3, 5  ;;  %v4233_v42 = vcombine.low %v373_v34, %v383_v36  ;;  %v409_v15 = vshrl.u32 %v4237_v57, 16  ;;  %v4253_v21 = vld [vmem:[%s3872_s8 + $0x5c] sm:$0x1] }
  0x4e   : > { %1748 = vmatmul.mubr.bf16.gmra.mxu0 %v4160_v13  ;;  %v402_v20 = vrot.slane %v401_v54, 4  ;;  %v412_v22 = vshll.u32 %v4237_v57, 16  ;;  %v711_v3 = vrot.slane %v709_v7, 4  ;;  %v4272_v24 = vcombine.low %v4178_v49, %v4183_v40  ;;  %v3772_v49 = vld [vmem:[%s5189_s1 + $0x1e0] sm:$0xff]  }
  0x4f   : > { %v391_v43 = vor.u32 %v390_v51, %v387_v30  ;;  %1755 = vmatprep.mubr.bf16.mxu0 %v4233_v42  ;;  %v411_v23 = vrot.slane %v409_v15, 4  ;;  %v710_v12 = vsel %vm4139_vm5, %v2856_v55, %v709_v7  ;;  %v2857_v36 = vrot.slane %v627_v56, 9  ;;  %3397 = vmatpush3.bf16.msra.mxu0 %v3770_v25  ;;  %v3773_v7 = vld [vmem:[%s5189_s1 + $0x1a0] sm:$0xff]  }
  0x50   : > { %1877 = vmatmul.mubr.bf16.vlgmr.msra.gmra.mxu1 %v2904_v46  ;;  %v4227_v46 = vcombine.low %v703_v58, %v706_v28  ;;  %v407_v26 = vsel %vm3910_vm2, %v402_v20, %v406_v5  ;;  %v414_v27 = vrot.slane %v412_v22, 5  ;;  %5211 = vst [vmem:[#allocation7_spill] sm:$0xff] %v4272_v24  ;;  %v716_v55 = vrot.slane %v4046_v41, 5  ;;  %v4293_v5 = vld [vmem:[%s3872_s8 + $0x68] sm:$0x1] }
  0x51   : > { %3497 = vmatpush3.bf16.msra.mxu1 %v3753_v37  ;;  %1884 = vmatprep.mubr.bf16.mxu1 %v4040_v38  ;;  %v3766_v37 = vld [vmem:[%s5189_s1 + $0x1e8] sm:$0xff]   ;;  %v392_v17 = vrot.slane %v391_v43, 4  ;;  %v719_v63 = vrot.slane %v4054_v47, 5  ;;  %v436_v15 = vshll.u32 %v4281_v61, 16  ;;  %v4302_v20 = vld [vmem:[%s3872_s8 + $0x30] sm:$0xe] }
  0x52   : > { %3498 = vmatprep.subr.bf16.mxu1 %v3759_v10  ;;  %v4248_v10 = vld [vmem:[%s3872_s8 + $0x58] sm:$0xf]  ;;  %v415_v34 = vor.u32 %v414_v27, %v411_v23  ;;  %v718_v22 = vrot.slane %v716_v55, 4 }
  0x53   : > { %v418_v58 = vshll.u32 %v4248_v10, 16  ;;  %v422_v53 = vshrl.u32 %v4248_v10, 16  ;;  %v397_v1 = vsel %vm3910_vm2, %v392_v17, %v396_v33  ;;  %v428_v33 = vshll.u32 %v4253_v21, 16 }
  0x54   : > { %v4268_v30 = vcombine.low %v397_v1, %v407_v26  ;;  %v438_v56 = vrot.slane %v436_v15, 5  ;;  %v3775_v1 = vld [vmem:[%s5189_s1 + $0x100] sm:$0xff]  }
  0x55   : > { %3499 = vmatpush3.bf16.msra.mxu1 %v3761_v29  ;;  %v420_v28 = vrot.slane %v418_v58, 5  ;;  %v424_v51 = vrot.slane %v422_v53, 4  ;;  %v713_v29 = vsel %vm4139_vm5, %v711_v3, %v712_v8  ;;  %v430_v54 = vrot.slane %v428_v33, 5  ;;  %v3774_v3 = vld [vmem:[%s5189_s1 + $0x140] sm:$0xff]  }
  0x56   : > { %3500 = vmatprep.subr.bf16.mxu1 %v3766_v37  ;;  %1756 = vmatmul.mubr.bf16.gmra.mxu0 %v4218_v45  ;;  %v4284_v37 = vld [vmem:[%s3872_s8 + $0x64] sm:$0xf]  ;;  %v433_v8 = vshrl.u32 %v4281_v61, 16  ;;  %v4304_v41 = vcombine.low %v710_v12, %v713_v29  ;;  %v720_v12 = vsel %vm4139_vm5, %v718_v22, %v719_v63 }
  0x57   : > { %1763 = vmatprep.mubr.bf16.mxu0 %v4268_v30  ;;  %v425_v43 = vor.u32 %v424_v51, %v420_v28  ;;  %v442_v17 = vshll.u32 %v4284_v37, 16  ;;  %v446_v58 = vshrl.u32 %v4284_v37, 16  ;;  %v452_v51 = vshll.u32 %v4293_v5, 16  ;;  %3398 = vmatprep.subr.bf16.mxu0 %v3774_v3 }
  0x58   : > { %1885 = vmatmul.mubr.bf16.gmra.mxu1 %v4227_v46  ;;  %v435_v53 = vrot.slane %v433_v8, 4  ;;  %3399 = vmatpush3.bf16.msra.mxu0 %v3775_v1  ;;  %v726_v8 = vrot.slane %v4122_v0, 5 }
  0x59   : > { %1892 = vmatprep.mubr.bf16.mxu1 %v4101_v44  ;;  %3501 = vmatpush3.bf16.msra.mxu1 %v3767_v59  ;;  %v416_v59 = vrot.slane %v415_v34, 4  ;;  %v426_v47 = vrot.slane %v425_v43, 4  ;;  %v444_v25 = vrot.slane %v442_v17, 5  ;;  %v448_v27 = vrot.slane %v446_v58, 4  ;;  %v4325_v34 = vld [vmem:[%s3872_s8 + $0x6c] sm:$0xf] }
  0x5a   : > { %3502 = vmatprep.subr.bf16.mxu1 %v3772_v49  ;;  %v439_v29 = vor.u32 %v438_v56, %v435_v53  ;;  %v4328_v49 = vld [vmem:[%s3872_s8 + $0x70] sm:$0xf]  ;;  %v457_v15 = vshrl.u32 %v4325_v34, 16  ;;  %v460_v17 = vshll.u32 %v4325_v34, 16  ;;  %v4353_v58 = vld [vmem:[%s5189_s1 + $0x238] sm:$0xff]  }
  0x5b   : > { %v421_v23 = vsel %vm3910_vm2, %v416_v59, %v420_v28  ;;  %v431_v26 = vsel %vm3910_vm2, %v426_v47, %v430_v54  ;;  %v717_v28 = vsel %vm4139_vm5, %v2857_v36, %v716_v55  ;;  %v449_v43 = vor.u32 %v448_v27, %v444_v25  ;;  %v4335_v36 = vld [vmem:[%s3872_s8 + $0x74] sm:$0x1]  ;;  %v3777_v55 = vld [vmem:[%s5189_s1 + $0x1d8] sm:$0xff]   ;;  %3632 = vmatprep.subr.bf16.mxu0 %v4353_v58 }
  0x5c   : > { %v4318_v33 = vcombine.low %v421_v23, %v431_v26  ;;  %v454_v54 = vrot.slane %v452_v51, 5  ;;  %v723_v59 = vrot.slane %v4113_v60, 5  ;;  %v440_v63 = vrot.slane %v439_v29, 4  ;;  %v3779_v53 = vld [vmem:[%s5189_s1 + $0x198] sm:$0xff]  }
  0x5d   : > { %3503 = vmatpush3.bf16.msra.mxu1 %v3773_v7  ;;  %v2858_v7 = vrot.slane %v4302_v20, 9  ;;  %v4347_v60 = vcombine.low %v4237_v57, %v4248_v10  ;;  %v450_v20 = vrot.slane %v449_v43, 4  ;;  %v466_v22 = vshll.u32 %v4328_v49, 16  ;;  %v4367_v51 = vld [vmem:[%s3872_s8 + $0x78] sm:$0xf] }
  0x5e   : > { %1764 = vmatmul.mubr.bf16.gmra.mxu0 %v4272_v24  ;;  %v725_v47 = vrot.slane %v723_v59, 4  ;;  %3504 = vmatprep.subr.bf16.mxu1 %v3777_v55  ;;  %v445_v0 = vsel %vm3910_vm2, %v440_v63, %v444_v25  ;;  %v459_v3 = vrot.slane %v457_v15, 4  ;;  %v462_v23 = vrot.slane %v460_v17, 5  ;;  %v4373_v55 = vld [vmem:[%s3872_s8 + $0x7c] sm:$0xf] }
  0x5f   : > { %1771 = vmatprep.mubr.bf16.mxu0 %v4318_v33  ;;  %v470_v57 = vshrl.u32 %v4328_v49, 16  ;;  %v4361_v56 = vcombine.low %v717_v28, %v720_v12  ;;  %v455_v1 = vsel %vm3910_vm2, %v450_v20, %v454_v54  ;;  %v468_v26 = vrot.slane %v466_v22, 5  ;;  %v3780_v28 = vld [vmem:[%s5189_s1 + $0x1d0] sm:$0xff]   ;;  %v4379_v12 = vld [vmem:[%s3872_s8 + $0x80] sm:$0x1] }
  0x60   : > { %1893 = vmatmul.mubr.bf16.gmra.mxu1 %v4304_v41  ;;  %v476_v27 = vshll.u32 %v4335_v36, 16  ;;  %v4370_v25 = vcombine.low %v445_v0, %v455_v1  ;;  %v463_v29 = vor.u32 %v462_v23, %v459_v3  ;;  %v629_v17 = vld [vmem:[%s3872_s8 + $0x3c] sm:$0xe]  ;;  %v481_v20 = vshrl.u32 %v4367_v51, 16  ;;  %v3782_v22 = vld [vmem:[%s5189_s1 + $0x190] sm:$0xff]  }
  0x61   : > { %1900 = vmatprep.mubr.bf16.mxu1 %v4160_v13  ;;  %v472_v43 = vrot.slane %v470_v57, 4  ;;  %3505 = vmatpush3.bf16.msra.mxu1 %v3779_v53  ;;  %v724_v0 = vsel %vm4139_vm5, %v2858_v7, %v723_v59  ;;  %v727_v3 = vsel %vm4139_vm5, %v725_v47, %v726_v8  ;;  %v484_v23 = vshll.u32 %v4367_v51, 16  ;;  %v3783_v53 = vld [vmem:[%s5189_s1 + $0x1c8] sm:$0xff]  }
  0x62   : > { %v464_v54 = vrot.slane %v463_v29, 4  ;;  %v478_v15 = vrot.slane %v476_v27, 5  ;;  %3506 = vmatprep.subr.bf16.mxu1 %v3780_v28  ;;  %v490_v57 = vshll.u32 %v4373_v55, 16  ;;  %v730_v27 = vrot.slane %v4163_v31, 5  ;;  %v3785_v28 = vld [vmem:[%s5189_s1 + $0x188] sm:$0xff]  }
  0x63   : > { %v473_v63 = vor.u32 %v472_v43, %v468_v26  ;;  %v483_v29 = vrot.slane %v481_v20, 4  ;;  %v494_v7 = vshrl.u32 %v4373_v55, 16  ;;  %v486_v8 = vrot.slane %v484_v23, 5 }
  0x64   : > { %v469_v59 = vsel %vm3910_vm2, %v464_v54, %v468_v26  ;;  %v492_v47 = vrot.slane %v490_v57, 5  ;;  %v500_v43 = vshll.u32 %v4379_v12, 16  ;;  %v4409_v31 = vcombine.low %v4281_v61, %v4284_v37  ;;  %v3786_v54 = vld [vmem:[%s5189_s1 + $0x1c0] sm:$0xff]  }
  0x65   : > { %v474_v1 = vrot.slane %v473_v63, 4  ;;  %3507 = vmatpush3.bf16.msra.mxu1 %v3782_v22  ;;  %v496_v26 = vrot.slane %v494_v7, 4  ;;  %v4416_v20 = vcombine.low %v724_v0, %v727_v3  ;;  %v2859_v22 = vrot.slane %v629_v17, 9 }
  0x66   : > { %1772 = vmatmul.mubr.bf16.gmra.mxu0 %v4347_v60  ;;  %3508 = vmatprep.subr.bf16.mxu1 %v3783_v53  ;;  %v733_v23 = vrot.slane %v4166_v32, 5  ;;  %v487_v57 = vor.u32 %v486_v8, %v483_v29  ;;  %v732_v61 = vrot.slane %v730_v27, 4  ;;  %v502_v4 = vrot.slane %v500_v43, 5  ;;  %v630_v29 = vld [vmem:[%s3872_s8 + $0x48] sm:$0xe] }
  0x67   : > { %1779 = vmatprep.mubr.bf16.mxu0 %v4370_v25  ;;  %v479_v63 = vsel %vm3910_vm2, %v474_v1, %v478_v15  ;;  %v497_v16 = vor.u32 %v496_v26, %v492_v47  ;;  %v4425_v15 = vld [vmem:[%s3872_s8 + $0x88] sm:$0xf]  ;;  %v4428_v1 = vld [vmem:[%s3872_s8 + $0x8c] sm:$0x1]  ;;  %v3788_v26 = vld [vmem:[%s5189_s1 + $0x180] sm:$0xff]  }
  0x68   : > { %1901 = vmatmul.mubr.bf16.gmra.mxu1 %v4361_v56  ;;  %v4419_v19 = vcombine.low %v469_v59, %v479_v63  ;;  %v488_v53 = vrot.slane %v487_v57, 4  ;;  %v514_v3 = vshll.u32 %v4425_v15, 16  ;;  %v518_v7 = vshrl.u32 %v4425_v15, 16 }
  0x69   : > { %1908 = vmatprep.mubr.bf16.mxu1 %v4218_v45  ;;  %v4422_v45 = vld [vmem:[%s3872_s8 + $0x84] sm:$0xf]  ;;  %3509 = vmatpush3.bf16.msra.mxu1 %v3785_v28  ;;  %v498_v32 = vrot.slane %v497_v16, 4  ;;  %v737_v59 = vrot.slane %v4183_v40, 5  ;;  %v731_v16 = vsel %vm4139_vm5, %v2859_v22, %v730_v27  ;;  %v734_v28 = vsel %vm4139_vm5, %v732_v61, %v733_v23 }
  0x6a   : > { %v505_v0 = vshrl.u32 %v4422_v45, 16  ;;  %v508_v17 = vshll.u32 %v4422_v45, 16  ;;  %3510 = vmatprep.subr.bf16.mxu1 %v3786_v54  ;;  %v516_v63 = vrot.slane %v514_v3, 5  ;;  %v520_v54 = vrot.slane %v518_v7, 4 }
  0x6b   : > { %v524_v40 = vshll.u32 %v4428_v1, 16  ;;  %v493_v57 = vsel %vm3910_vm2, %v488_v53, %v492_v47  ;;  %v4456_v27 = vcombine.low %v731_v16, %v734_v28  ;;  %v2860_v22 = vrot.slane %v630_v29, 9 }
  0x6c   : > { %v507_v8 = vrot.slane %v505_v0, 4  ;;  %v510_v43 = vrot.slane %v508_v17, 5  ;;  %v503_v0 = vsel %vm3910_vm2, %v498_v32, %v502_v4  ;;  %v521_v3 = vor.u32 %v520_v54, %v516_v63 }
  0x6d   : > { %3511 = vmatpush3.bf16.msra.mxu1 %v3788_v26  ;;  %v4458_v23 = vcombine.low %v493_v57, %v503_v0  ;;  %v739_v61 = vrot.slane %v737_v59, 4  ;;  %v740_v7 = vrot.slane %v4191_v14, 5  ;;  %v526_v47 = vrot.slane %v524_v40, 5 }
  0x6e   : > { %1780 = vmatmul.mubr.bf16.gmra.mxu0 %v4409_v31  ;;  %v511_v17 = vor.u32 %v510_v43, %v507_v8  ;;  %v522_v11 = vrot.slane %v521_v3, 4  ;;  %v738_v4 = vsel %vm4139_vm5, %v2860_v22, %v737_v59  ;;  %v744_v14 = vrot.slane %v4248_v10, 5  ;;  %v631_v8 = vld [vmem:[%s3872_s8 + $0x54] sm:$0xe]  ;;  %v632_v10 = vld [vmem:[%s3872_s8 + $0x60] sm:$0xe] }
  0x6f   : > { %1787 = vmatprep.mubr.bf16.mxu0 %v4419_v19  ;;  %v4477_v43 = vcombine.low %v4367_v51, %v4373_v55  ;;  %v2861_v59 = vrot.slane %v631_v8, 9  ;;  %v747_v54 = vrot.slane %v4253_v21, 5  ;;  %v4496_v21 = vcombine.low %v4422_v45, %v4425_v15  ;;  %v633_v22 = vld [vmem:[%s3872_s8 + $0x6c] sm:$0xe] }
  0x70   : > { %1909 = vmatmul.mubr.bf16.gmra.mxu1 %v4416_v20  ;;  %v512_v53 = vrot.slane %v511_v17, 4  ;;  %v527_v29 = vsel %vm3910_vm2, %v522_v11, %v526_v47  ;;  %v746_v28 = vrot.slane %v744_v14, 4  ;;  %v751_v11 = vrot.slane %v4284_v37, 5 }
  0x71   : > { %1916 = vmatprep.mubr.bf16.mxu1 %v4272_v24  ;;  %v4454_v24 = vcombine.low %v4325_v34, %v4328_v49  ;;  %v741_v34 = vsel %vm4139_vm5, %v739_v61, %v740_v7  ;;  %v745_v51 = vsel %vm4139_vm5, %v2861_v59, %v744_v14  ;;  %v2862_v57 = vrot.slane %v632_v10, 9  ;;  %v635_v59 = vld [vmem:[%s3872_s8 + $0x84] sm:$0xe] }
  0x72   : > { %v517_v32 = vsel %vm3910_vm2, %v512_v53, %v516_v63  ;;  %v4479_v26 = vcombine.low %v738_v4, %v741_v34  ;;  %v748_v63 = vsel %vm4139_vm5, %v746_v28, %v747_v54  ;;  %v753_v0 = vrot.slane %v751_v11, 4  ;;  %v634_v4 = vld [vmem:[%s3872_s8 + $0x78] sm:$0xe] }
  0x73   : > { %v4481_v16 = vcombine.low %v517_v32, %v527_v29  ;;  %v4498_v40 = vcombine.low %v745_v51, %v748_v63  ;;  %v754_v37 = vrot.slane %v4293_v5, 5  ;;  %v752_v17 = vsel %vm4139_vm5, %v2862_v57, %v751_v11  ;;  %v3790_v28 = vld [vmem:[%s5189_s1 + $0x218] sm:$0xff]   ;;  %v3795_v57 = vld [vmem:[%s3872_s8 + $0x94] sm:$0xf] }
  0x74   : > { %v758_v3 = vrot.slane %v4328_v49, 5  ;;  %v2863_v5 = vrot.slane %v633_v22, 9  ;;  %v761_v47 = vrot.slane %v4335_v36, 5  ;;  %v765_v36 = vrot.slane %v4373_v55, 5  ;;  %v3787_v55 = vld [vmem:[%s5189_s1 + $0x220] sm:$0xff]  }
  0x75   : > { %v755_v45 = vsel %vm4139_vm5, %v753_v0, %v754_v37  ;;  %v2864_v34 = vrot.slane %v634_v4, 9  ;;  %v768_v32 = vrot.slane %v4379_v12, 5  ;;  %v772_v8 = vrot.slane %v4425_v15, 5  ;;  %v3791_v15 = vld [vmem:[%s5189_s1 + $0x210] sm:$0xff]   ;;  %v637_v4 = vld [vmem:[%s3872_s8 + $0x9c] sm:$0xe] }
  0x76   : > { %1788 = vmatmul.mubr.bf16.gmra.mxu0 %v4454_v24  ;;  %v4511_v61 = vcombine.low %v752_v17, %v755_v45  ;;  %v760_v7 = vrot.slane %v758_v3, 4  ;;  %v759_v49 = vsel %vm4139_vm5, %v2863_v5, %v758_v3  ;;  %v767_v14 = vrot.slane %v765_v36, 4  ;;  %v636_v37 = vld [vmem:[%s3872_s8 + $0x90] sm:$0xe]  ;;  %v3792_v17 = vld [vmem:[%s5189_s1 + $0x208] sm:$0xff]  }
  0x77   : > { %1795 = vmatprep.mubr.bf16.mxu0 %v4458_v23  ;;  %v766_v29 = vsel %vm4139_vm5, %v2864_v34, %v765_v36  ;;  %v2865_v10 = vrot.slane %v635_v59, 9  ;;  %v774_v11 = vrot.slane %v772_v8, 4  ;;  %v775_v51 = vrot.slane %v4428_v1, 5  ;;  %v3796_v5 = vld [vmem:[%s3872_s8 + $0x98] sm:$0x1] }
  0x78   : > { %1917 = vmatmul.mubr.bf16.gmra.mxu1 %v4456_v27  ;;  %v762_v53 = vsel %vm4139_vm5, %v760_v7, %v761_v47  ;;  %v769_v12 = vsel %vm4139_vm5, %v767_v14, %v768_v32  ;;  %v779_v0 = vrot.slane %v3795_v57, 5  ;;  %v2866_v3 = vrot.slane %v636_v37, 9  ;;  %v3793_v47 = vld [vmem:[%s5189_s1 + $0x200] sm:$0xff]  }
  0x79   : > { %1924 = vmatprep.mubr.bf16.mxu1 %v4347_v60  ;;  %v4550_v54 = vcombine.low %v766_v29, %v769_v12  ;;  %v773_v63 = vsel %vm4139_vm5, %v2865_v10, %v772_v8  ;;  %v776_v1 = vsel %vm4139_vm5, %v774_v11, %v775_v51  ;;  %v782_v7 = vrot.slane %v3796_v5, 5  ;;  %v3798_v32 = vld [vmem:[%s3872_s8 + $0xa4] sm:$0x1]  ;;  %v3799_v8 = vld [vmem:[%s3872_s8 + $0xac] sm:$0xf] }
  0x7a   : > { %v4569_v45 = vcombine.low %v773_v63, %v776_v1  ;;  %v781_v22 = vrot.slane %v779_v0, 4  ;;  %v2867_v34 = vrot.slane %v637_v4, 9  ;;  %v793_v59 = vrot.slane %v3799_v8, 5 }
  0x7c   : > { %v795_v51 = vrot.slane %v793_v59, 4 }
  0x7e   : > { %1796 = vmatmul.mubr.bf16.gmra.mxu0 %v4477_v43 }
  0x7f   : > { %1803 = vmatprep.mubr.bf16.mxu0 %v4481_v16 }
  0x80   : > { %1925 = vmatmul.mubr.bf16.gmra.mxu1 %v4479_v26 }
  0x81   : > { %1932 = vmatprep.mubr.bf16.mxu1 %v4409_v31 }
  0x86   : > { %1804 = vmatmul.mubr.bf16.gmra.mxu0 %v4496_v21 }
  0x87   : > { %2037 = vmatprep.mubr.bf16.mxu0 %v4227_v46  ;;  %v3781_v46 = vld [vmem:[%s5189_s1 + $0x230] sm:$0xff]  }
  0x88   : > { %1933 = vmatmul.mubr.bf16.gmra.mxu1 %v4498_v40 }
  0x89   : > { %1940 = vmatprep.mubr.bf16.mxu1 %v4454_v24 }
  0x8e   : > { %2038 = vmatmul.mubr.bf16.vlgmr.msra.gmra.mxu0 %v3992_v48  ;;  %v3784_v48 = vld [vmem:[%s5189_s1 + $0x228] sm:$0xff]  }
  0x8f   : > { %3633 = vmatpush3.bf16.msra.mxu0 %v4353_v58  ;;  %2045 = vmatprep.mubr.bf16.mxu0 %v4304_v41  ;;  %v4531_v58 = vcombine.low %v759_v49, %v762_v53  ;;  %v783_v49 = vsel %vm4139_vm5, %v781_v22, %v782_v7  ;;  %v3797_v53 = vld [vmem:[%s3872_s8 + $0xa0] sm:$0xf]  ;;  %v639_v22 = vld [vmem:[%s3872_s8 + $0xb4] sm:$0xe] }
  0x90   : > { %1941 = vmatmul.mubr.bf16.gmra.mxu1 %v4511_v61  ;;  %3634 = vmatprep.subr.bf16.mxu0 %v3781_v46  ;;  %v786_v36 = vrot.slane %v3797_v53, 5 }
  0x91   : > { %1948 = vmatprep.mubr.bf16.mxu1 %v4477_v43 }
  0x92   : > { %v788_v14 = vrot.slane %v786_v36, 4  ;;  %v787_v29 = vsel %vm4139_vm5, %v2867_v34, %v786_v36 }
  0x93   : > { %3635 = vmatpush3.bf16.msra.mxu0 %v3781_v46  ;;  %v780_v46 = vsel %vm4139_vm5, %v2866_v3, %v779_v0  ;;  %v3801_v0 = vld [vmem:[%s3872_s8 + $0xb8] sm:$0xf]  ;;  %v4614_v3 = vld [vmem:[%s3872_s8 + $0xc4] sm:$0xf] }
  0x94   : > { %3636 = vmatprep.subr.bf16.mxu0 %v3784_v48  ;;  %v800_v37 = vrot.slane %v3801_v0, 5  ;;  %v834_v0 = vrot.slane %v4614_v3, 5 }
  0x96   : > { %2046 = vmatmul.mubr.bf16.gmra.mxu0 %v4056_v52 }
  0x97   : > { %2053 = vmatprep.mubr.bf16.mxu0 %v4361_v56  ;;  %3637 = vmatpush3.bf16.msra.mxu0 %v3784_v48  ;;  %v4585_v48 = vcombine.low %v780_v46, %v783_v49  ;;  %v802_v46 = vrot.slane %v800_v37, 4  ;;  %v3802_v49 = vld [vmem:[%s3872_s8 + $0xbc] sm:$0x1] }
  0x98   : > { %1949 = vmatmul.mubr.bf16.gmra.mxu1 %v4531_v58  ;;  %3638 = vmatprep.subr.bf16.mxu0 %v3787_v55  ;;  %v803_v53 = vrot.slane %v3802_v49, 5 }
  0x99   : > { %1956 = vmatprep.mubr.bf16.mxu1 %v4496_v21 }
  0x9a   : > { %v804_v4 = vsel %vm4139_vm5, %v802_v46, %v803_v53  ;;  %v640_v46 = vld [vmem:[%s3872_s8 + $0xc0] sm:$0xe] }
  0x9b   : > { %3639 = vmatpush3.bf16.msra.mxu0 %v3787_v55  ;;  %v789_v55 = vrot.slane %v3798_v32, 5 }
  0x9c   : > { %3640 = vmatprep.subr.bf16.mxu0 %v3790_v28 }
  0x9d   : > { %v790_v12 = vsel %vm4139_vm5, %v788_v14, %v789_v55 }
  0x9e   : > { %2054 = vmatmul.mubr.bf16.gmra.mxu0 %v4106_v50  ;;  %v4598_v10 = vcombine.low %v787_v29, %v790_v12 }
  0x9f   : > { %2061 = vmatprep.mubr.bf16.mxu0 %v4416_v20  ;;  %3641 = vmatpush3.bf16.msra.mxu0 %v3790_v28  ;;  %v638_v28 = vld [vmem:[%s3872_s8 + $0xa8] sm:$0xe] }
  0xa0   : > { %1957 = vmatmul.mubr.bf16.gmra.mxu1 %v4550_v54  ;;  %3642 = vmatprep.subr.bf16.mxu0 %v3791_v15  ;;  %v2868_v11 = vrot.slane %v638_v28, 9  ;;  %v5214_v28 = vld [vmem:[#allocation3_spill] sm:$0xff] }
  0xa1   : > { %1964 = vmatprep.mubr.bf16.mxu1 %v3959_v6 }
  0xa2   : > { %v794_v1 = vsel %vm4139_vm5, %v2868_v11, %v793_v59  ;;  %v5215_v11 = vld [vmem:[#allocation7_spill] sm:$0xff] }
  0xa3   : > { %3643 = vmatpush3.bf16.msra.mxu0 %v3791_v15  ;;  %v3800_v15 = vld [vmem:[%s3872_s8 + $0xb0] sm:$0x1] }
  0xa4   : > { %3644 = vmatprep.subr.bf16.mxu0 %v3792_v17  ;;  %v796_v63 = vrot.slane %v3800_v15, 5 }
  0xa6   : > { %2062 = vmatmul.mubr.bf16.gmra.mxu0 %v4188_v2  ;;  %v797_v57 = vsel %vm4139_vm5, %v795_v51, %v796_v63  ;;  %v819_v63 = vshrl.u32 %v4614_v3, 16 }
  0xa7   : > { %2069 = vmatprep.mubr.bf16.mxu0 %v4456_v27  ;;  %3645 = vmatpush3.bf16.msra.mxu0 %v3792_v17  ;;  %v4611_v17 = vld [vmem:[%s3872_s8 + $0xc0] sm:$0xf]  ;;  %v4617_v5 = vcombine.low %v794_v1, %v797_v57  ;;  %v815_v1 = vshll.u32 %v4614_v3, 16 }
  0xa8   : > { %1965 = vmatmul.mubr.bf16.gmra.mxu1 %v4569_v45  ;;  %3646 = vmatprep.subr.bf16.mxu0 %v3793_v47  ;;  %v4621_v7 = vcombine.low %v4611_v17, %v4614_v3  ;;  %v806_v51 = vshrl.u32 %v4611_v17, 16  ;;  %v809_v15 = vshll.u32 %v4611_v17, 16  ;;  %v5216_v3 = vld [vmem:[#allocation4_spill] sm:$0xff] }
  0xa9   : > { %1972 = vmatprep.mubr.bf16.mxu1 %v4013_v62 }
  0xaa   : > { %v808_v53 = vrot.slane %v806_v51, 4 }
  0xab   : > { %3647 = vmatpush3.bf16.msra.mxu0 %v3793_v47  ;;  %v2869_v47 = vrot.slane %v639_v22, 9 }
  0xad   : > { %v801_v36 = vsel %vm4139_vm5, %v2869_v47, %v800_v37  ;;  %v235_v47 = vld [vmem:[%s3872_s8 + $0xc8] sm:$0x1] }
  0xae   : > { %2070 = vmatmul.mubr.bf16.gmra.mxu0 %v4233_v42  ;;  %v4632_v34 = vcombine.low %v801_v36, %v804_v4  ;;  %v811_v36 = vrot.slane %v809_v15, 5  ;;  %v817_v4 = vrot.slane %v815_v1, 5 }
  0xaf   : > { %2077 = vmatprep.mubr.bf16.mxu0 %v4479_v26 }
  0xb0   : > { %1973 = vmatmul.mubr.bf16.gmra.mxu1 %v4585_v48 }
  0xb1   : > { %1980 = vmatprep.mubr.bf16.mxu1 %v4042_v39 }
  0xb6   : > { %2078 = vmatmul.mubr.bf16.gmra.mxu0 %v4268_v30 }
  0xb7   : > { %2085 = vmatprep.mubr.bf16.mxu0 %v4498_v40 }
  0xb8   : > { %1981 = vmatmul.mubr.bf16.gmra.mxu1 %v4598_v10 }
  0xb9   : > { %1988 = vmatprep.mubr.bf16.mxu1 %v4132_v9 }
  0xbe   : > { %2086 = vmatmul.mubr.bf16.gmra.mxu0 %v4318_v33 }
  0xbf   : > { %2093 = vmatprep.mubr.bf16.mxu0 %v4511_v61 }
  0xc0   : > { %1989 = vmatmul.mubr.bf16.gmra.mxu1 %v4617_v5 }
  0xc1   : > { %1996 = vmatprep.mubr.bf16.mxu1 %v4621_v7 }
  0xc6   : > { %2094 = vmatmul.mubr.bf16.gmra.mxu0 %v4370_v25 }
  0xc7   : > { %2101 = vmatprep.mubr.bf16.mxu0 %v4531_v58 }
  0xc8   : > { %1997 = vmatmul.mubr.bf16.gmra.mxu1 %v4632_v34 }
  0xc9   : > { %2198 = vmatprep.mubr.bf16.mxu1 %v4056_v52  ;;  %v5213_v52 = vld [vmem:[#allocation6_spill] sm:$0xff] }
  0xce   : > { %2102 = vmatmul.mubr.bf16.gmra.mxu0 %v4419_v19 }
  0xcf   : > { %2109 = vmatprep.mubr.bf16.mxu0 %v4550_v54 }
  0xd0   : > { %2199 = vmatmul.mubr.bf16.vlgmr.msra.gmra.mxu1 %v4040_v38  ;;  %v5212_v38 = vld [vmem:[#allocation2_spill] sm:$0xff] }
  0xd1   : > { %2206 = vmatprep.mubr.bf16.mxu1 %v4106_v50 }
  0xd6   : > { %2110 = vmatmul.mubr.bf16.gmra.mxu0 %v4458_v23 }
  0xd7   : > { %2117 = vmatprep.mubr.bf16.mxu0 %v4569_v45 }
  0xd8   : > { %2207 = vmatmul.mubr.bf16.gmra.mxu1 %v4101_v44 }
  0xd9   : > { %2214 = vmatprep.mubr.bf16.mxu1 %v4188_v2 }
  0xde   : > { %2118 = vmatmul.mubr.bf16.gmra.mxu0 %v4481_v16 }
  0xdf   : > { %2125 = vmatprep.mubr.bf16.mxu0 %v4585_v48 }
  0xe0   : > { %2215 = vmatmul.mubr.bf16.gmra.mxu1 %v4160_v13 }
  0xe1   : > { %2222 = vmatprep.mubr.bf16.mxu1 %v4233_v42 }
  0xe6   : > { %2126 = vmatmul.mubr.bf16.gmra.mxu0 %v5212_v38 }
  0xe7   : > { %2133 = vmatprep.mubr.bf16.mxu0 %v4598_v10 }
  0xe8   : > { %2223 = vmatmul.mubr.bf16.gmra.mxu1 %v5213_v52  ;;  %v821_v52 = vrot.slane %v819_v63, 4 }
  0xe9   : > { %2230 = vmatprep.mubr.bf16.mxu1 %v4268_v30 }
  0xec   : > { %v3176_v50 = vpop.f32.mrf.mxu0  ;;  %v3248_v14 = vpop.f32.mrf.mxu1 }
  0xee   : > { %v3177_v44 = vpop.f32.mrf.mxu0  ;;  %v3249_v2 = vpop.f32.mrf.mxu1  ;;  %2134 = vmatmul.mubr.bf16.gmra.mxu0 %v5214_v28 }
  0xef   : > { %v4654_v32 = vadd.f32 %v3177_v44, %v3176_v50  ;;  %v4656_v55 = vadd.f32 %v3249_v2, %v3248_v14  ;;  %2141 = vmatprep.mubr.bf16.mxu0 %v4617_v5  ;;  %v836_v44 = vrot.slane %v834_v0, 4  ;;  %v837_v2 = vrot.slane %v235_v47, 5 }
  0xf0   : > { %v3179_v13 = vpop.f32.mrf.mxu0  ;;  %v3251_v29 = vpop.f32.mrf.mxu1  ;;  %2231 = vmatmul.mubr.bf16.gmra.mxu1 %v5215_v11  ;;  %v822_v11 = vor.u32 %v821_v52, %v817_v4 }
  0xf1   : > { %2238 = vmatprep.mubr.bf16.mxu1 %v4318_v33  ;;  %v2870_v33 = vrot.slane %v640_v46, 9  ;;  %v838_v63 = vsel %vm4139_vm5, %v836_v44, %v837_v2 }
  0xf2   : > { %v3180_v12 = vpop.f32.mrf.mxu0  ;;  %v3252_v42 = vpop.f32.mrf.mxu1  ;;  %v823_v46 = vrot.slane %v822_v11, 4 }
  0xf3   : > { %v4658_v8 = vadd.f32 %v3180_v12, %v3179_v13  ;;  %v4660_v59 = vadd.f32 %v3252_v42, %v3251_v29  ;;  %v812_v42 = vor.u32 %v811_v36, %v808_v53  ;;  %v835_v15 = vsel %vm4139_vm5, %v2870_v33, %v834_v0 }
  0xf4   : > { %v3182_v30 = vpop.f32.mrf.mxu0  ;;  %v3254_v37 = vpop.f32.mrf.mxu1 }
  0xf6   : > { %v3183_v57 = vpop.f32.mrf.mxu0  ;;  %v3255_v17 = vpop.f32.mrf.mxu1  ;;  %2142 = vmatmul.mubr.bf16.gmra.mxu0 %v5216_v3 }
  0xf7   : > { %v4671_v22 = vadd.f32 %v3183_v57, %v3182_v30  ;;  %v4675_v50 = vadd.f32 %v3255_v17, %v3254_v37  ;;  %2149 = vmatprep.mubr.bf16.mxu0 %v4632_v34  ;;  %v825_v30 = vshll.u32 %v235_v47, 16  ;;  %v4689_v37 = vcombine.low %v835_v15, %v838_v63  ;;  %v5217_v47 = vld [vmem:[#allocation5_spill] sm:$0xff] }
  0xf8   : > { %v3185_v49 = vpop.f32.mrf.mxu0  ;;  %v3257_v13 = vpop.f32.mrf.mxu1  ;;  %2239 = vmatmul.mubr.bf16.gmra.mxu1 %v4347_v60  ;;  %v813_v60 = vrot.slane %v812_v42, 4 }
  0xf9   : > { %2246 = vmatprep.mubr.bf16.mxu1 %v4370_v25 }
  0xfa   : > { %v3186_v14 = vpop.f32.mrf.mxu0  ;;  %v3258_v12 = vpop.f32.mrf.mxu1 }
  0xfb   : > { %v4677_v29 = vadd.f32 %v3186_v14, %v3185_v49  ;;  %v4683_v51 = vadd.f32 %v3258_v12, %v3257_v13  ;;  %v827_v49 = vrot.slane %v825_v30, 5  ;;  %v818_v14 = vsel %vm3910_vm2, %v813_v60, %v817_v4 }
  0xfc   : > { %v3188_v1 = vpop.f32.mrf.mxu0  ;;  %v3260_v17 = vpop.f32.mrf.mxu1 }
  0xfd   : > { %v828_v33 = vsel %vm3910_vm2, %v823_v46, %v827_v49 }
  0xfe   : > { %v3189_v57 = vpop.f32.mrf.mxu0  ;;  %2150 = vmatmul.mubr.bf16.gmra.mxu0 %v5217_v47  ;;  %v3261_v36 = vpop.f32.mrf.mxu1 }
  0xff   : > { %v4691_v25 = vadd.f32 %v3189_v57, %v3188_v1  ;;  %v4695_v0 = vadd.f32 %v3261_v36, %v3260_v17  ;;  %2157 = vmatprep.mubr.bf16.mxu0 %v4689_v37 }
 0x100   : > { %v3191_v53 = vpop.f32.mrf.mxu0  ;;  %2247 = vmatmul.mubr.bf16.gmra.mxu1 %v4409_v31  ;;  %v3263_v44 = vpop.f32.mrf.mxu1  ;;  %v4705_v31 = vcombine.low %v818_v14, %v828_v33 }
 0x101   : > { %2254 = vmatprep.mubr.bf16.mxu1 %v4419_v19 }
 0x102   : > { %v3192_v52 = vpop.f32.mrf.mxu0  ;;  %v3264_v13 = vpop.f32.mrf.mxu1 }
 0x103   : > { %v4703_v2 = vadd.f32 %v3192_v52, %v3191_v53  ;;  %v4707_v42 = vadd.f32 %v3264_v13, %v3263_v44 }
 0x104   : > { %v3194_v12 = vpop.f32.mrf.mxu0 }
 0x106   : > { %v3195_v11 = vpop.f32.mrf.mxu0  ;;  %2158 = vmatmul.mubr.bf16.gmra.mxu0 %v4705_v31 }
 0x107   : > { %v4709_v30 = vadd.f32 %v3195_v11, %v3194_v12  ;;  %3648 = vmatprep.mubr.bf16.mxu0 %v4304_v41 }
 0x108   : > { %v3266_v15 = vpop.f32.mrf.mxu1  ;;  %2255 = vmatmul.mubr.bf16.gmra.mxu1 %v4454_v24  ;;  %v3197_v19 = vpop.f32.mrf.mxu0 }
 0x109   : > { %2262 = vmatprep.mubr.bf16.mxu1 %v4458_v23 }
 0x10a   : > { %v3267_v4 = vpop.f32.mrf.mxu1  ;;  %v3198_v63 = vpop.f32.mrf.mxu0 }
 0x10b   : > { %v4715_v1 = vadd.f32 %v3267_v4, %v3266_v15  ;;  %v4717_v57 = vadd.f32 %v3198_v63, %v3197_v19 }
 0x10c   : > { %v3269_v60 = vpop.f32.mrf.mxu1 }
 0x10e   : > { %v3270_v46 = vpop.f32.mrf.mxu1  ;;  %v3200_v17 = vpop.f32.mrf.mxu0  ;;  %3649 = vmatmul.mubr.bf16.vlgmr.msra.gmra.mxu0 %v4361_v56 }
 0x10f   : > { %v4719_v49 = vadd.f32 %v3270_v46, %v3269_v60  ;;  %3652 = vmatprep.mubr.bf16.mxu0 %v4416_v20 }
 0x110   : > { %v3288_v53 = vpop.f32.mrf.mxu1  ;;  %2263 = vmatmul.mubr.bf16.gmra.mxu1 %v4477_v43  ;;  %v3201_v24 = vpop.f32.mrf.mxu0 }
 0x111   : > { %2270 = vmatprep.mubr.bf16.mxu1 %v4481_v16  ;;  %v4725_v23 = vadd.f32 %v3201_v24, %v3200_v17 }
 0x112   : > { %v3289_v41 = vpop.f32.mrf.mxu1  ;;  %v3203_v52 = vpop.f32.mrf.mxu0 }
 0x113   : > { %v3290_v36 = vadd.f32 %v3289_v41, %v3288_v53 }
 0x114   : > { %v3291_v14 = vpop.f32.mrf.mxu1  ;;  %v3204_v44 = vpop.f32.mrf.mxu0 }
 0x115   : > { %v4728_v33 = vadd.f32 %v3290_v36, %v4654_v32  ;;  %v4730_v12 = vadd.f32 %v3204_v44, %v3203_v52 }
 0x116   : > { %v3292_v13 = vpop.f32.mrf.mxu1  ;;  %v3206_v56 = vpop.f32.mrf.mxu0  ;;  %3653 = vmatmul.mubr.bf16.gmra.mxu0 %v4456_v27 }
 0x117   : > { %v3293_v43 = vadd.f32 %v3292_v13, %v3291_v14  ;;  %3656 = vmatprep.mubr.bf16.mxu0 %v4479_v26  ;;  %v4761_v13 = vld [vmem:[%s3872_s8 + $0xcc] sm:$0xf] }
 0x118   : > { %v3294_v11 = vpop.f32.mrf.mxu1  ;;  %2271 = vmatmul.mubr.bf16.gmra.mxu1 %v4496_v21  ;;  %v3207_v16 = vpop.f32.mrf.mxu0 }
 0x119   : > { %v4735_v20 = vadd.f32 %v3293_v43, %v4658_v8  ;;  %2278 = vmatprep.mubr.bf16.mxu1 %v5212_v38  ;;  %v4739_v15 = vadd.f32 %v3207_v16, %v3206_v56  ;;  %v840_v16 = vshrl.u32 %v4761_v13, 16 }
 0x11a   : > { %v3295_v32 = vpop.f32.mrf.mxu1  ;;  %v3209_v4 = vpop.f32.mrf.mxu0 }
 0x11b   : > { %v3296_v19 = vadd.f32 %v3295_v32, %v3294_v11  ;;  %v843_v32 = vshll.u32 %v4761_v13, 16 }
 0x11c   : > { %v3297_v63 = vpop.f32.mrf.mxu1  ;;  %v3210_v21 = vpop.f32.mrf.mxu0 }
 0x11d   : > { %v4742_v60 = vadd.f32 %v3296_v19, %v4671_v22  ;;  %v4744_v27 = vadd.f32 %v3210_v21, %v3209_v4 }
 0x11e   : > { %v3298_v46 = vpop.f32.mrf.mxu1  ;;  %v3212_v17 = vpop.f32.mrf.mxu0  ;;  %3657 = vmatmul.mubr.bf16.gmra.mxu0 %v4498_v40 }
 0x11f   : > { %v3299_v8 = vadd.f32 %v3298_v46, %v3297_v63  ;;  %3660 = vmatprep.mubr.bf16.mxu0 %v4511_v61  ;;  %v842_v46 = vrot.slane %v840_v16, 4 }
 0x120   : > { %v3300_v53 = vpop.f32.mrf.mxu1  ;;  %2279 = vmatmul.mubr.bf16.gmra.mxu1 %v3959_v6  ;;  %v3213_v38 = vpop.f32.mrf.mxu0 }
 0x121   : > { %v4749_v26 = vadd.f32 %v3299_v8, %v4677_v29  ;;  %2286 = vmatprep.mubr.bf16.mxu1 %v5214_v28  ;;  %v4753_v24 = vadd.f32 %v3213_v38, %v3212_v17  ;;  %v4764_v28 = vld [vmem:[%s3872_s8 + $0xd0] sm:$0xf]  ;;  %v845_v8 = vrot.slane %v843_v32, 5 }
 0x122   : > { %v3301_v22 = vpop.f32.mrf.mxu1  ;;  %v3215_v36 = vpop.f32.mrf.mxu0  ;;  %v849_v19 = vshll.u32 %v4764_v28, 16 }
 0x123   : > { %v3302_v41 = vadd.f32 %v3301_v22, %v3300_v53 }
 0x124   : > { %v3303_v52 = vpop.f32.mrf.mxu1  ;;  %v3216_v14 = vpop.f32.mrf.mxu0  ;;  %v851_v17 = vrot.slane %v849_v19, 5 }
 0x125   : > { %v4756_v6 = vadd.f32 %v3302_v41, %v4691_v25  ;;  %v4758_v44 = vadd.f32 %v3216_v14, %v3215_v36  ;;  %v236_v41 = vld [vmem:[%s3872_s8 + $0xd4] sm:$0x1] }
 0x126   : > { %v3304_v40 = vpop.f32.mrf.mxu1  ;;  %v3218_v61 = vpop.f32.mrf.mxu0  ;;  %3661 = vmatmul.mubr.bf16.gmra.mxu0 %v4531_v58 }
 0x127   : > { %v3305_v29 = vadd.f32 %v3304_v40, %v3303_v52  ;;  %3664 = vmatprep.mubr.bf16.mxu0 %v4550_v54 }
 0x128   : > { %v3306_v43 = vpop.f32.mrf.mxu1  ;;  %2287 = vmatmul.mubr.bf16.gmra.mxu1 %v4013_v62  ;;  %v3219_v25 = vpop.f32.mrf.mxu0  ;;  %v853_v62 = vshrl.u32 %v4764_v28, 16 }
 0x129   : > { %v4769_v56 = vadd.f32 %v3305_v29, %v4703_v2  ;;  %2294 = vmatprep.mubr.bf16.mxu1 %v5216_v3  ;;  %v4777_v4 = vadd.f32 %v3219_v25, %v3218_v61  ;;  %v846_v29 = vor.u32 %v845_v8, %v842_v46 }
 0x12a   : > { %v3307_v11 = vpop.f32.mrf.mxu1  ;;  %v3221_v2 = vpop.f32.mrf.mxu0  ;;  %v855_v53 = vrot.slane %v853_v62, 4 }
 0x12b   : > { %v3308_v58 = vadd.f32 %v3307_v11, %v3306_v43  ;;  %v859_v43 = vshll.u32 %v236_v41, 16  ;;  %v847_v19 = vrot.slane %v846_v29, 4 }
 0x12c   : > { %v3309_v63 = vpop.f32.mrf.mxu1  ;;  %v3222_v54 = vpop.f32.mrf.mxu0  ;;  %v856_v61 = vor.u32 %v855_v53, %v851_v17 }
 0x12d   : > { %v4780_v3 = vadd.f32 %v3308_v58, %v4709_v30  ;;  %v4782_v38 = vadd.f32 %v3222_v54, %v3221_v2  ;;  %v852_v8 = vsel %vm3910_vm2, %v847_v19, %v851_v17 }
 0x12e   : > { %v3310_v21 = vpop.f32.mrf.mxu1  ;;  %v3224_v36 = vpop.f32.mrf.mxu0  ;;  %3665 = vmatmul.mubr.bf16.gmra.mxu0 %v4569_v45  ;;  %v857_v62 = vrot.slane %v856_v61, 4 }
 0x12f   : > { %v3311_v22 = vadd.f32 %v3310_v21, %v3309_v63  ;;  %3668 = vmatprep.mubr.bf16.mxu0 %v4585_v48 }
 0x130   : > { %v3312_v52 = vpop.f32.mrf.mxu1  ;;  %2295 = vmatmul.mubr.bf16.gmra.mxu1 %v4042_v39  ;;  %v3225_v30 = vpop.f32.mrf.mxu0 }
 0x131   : > { %v4788_v14 = vadd.f32 %v3311_v22, %v4717_v57  ;;  %2302 = vmatprep.mubr.bf16.mxu1 %v5217_v47  ;;  %v4792_v25 = vadd.f32 %v3225_v30, %v3224_v36  ;;  %v861_v47 = vrot.slane %v859_v43, 5 }
 0x132   : > { %v3313_v40 = vpop.f32.mrf.mxu1  ;;  %v3227_v16 = vpop.f32.mrf.mxu0 }
 0x133   : > { %v3314_v11 = vadd.f32 %v3313_v40, %v3312_v52  ;;  %v862_v53 = vsel %vm3910_vm2, %v857_v62, %v861_v47  ;;  %v871_v52 = vrot.slane %v236_v41, 5 }
 0x134   : > { %v3315_v32 = vpop.f32.mrf.mxu1  ;;  %v3228_v45 = vpop.f32.mrf.mxu0 }
 0x135   : > { %v4795_v39 = vadd.f32 %v3314_v11, %v4725_v23  ;;  %v4797_v48 = vadd.f32 %v3228_v45, %v3227_v16  ;;  %v868_v23 = vrot.slane %v4764_v28, 5 }
 0x136   : > { %v3316_v57 = vpop.f32.mrf.mxu1  ;;  %v3230_v2 = vpop.f32.mrf.mxu0  ;;  %3669 = vmatmul.mubr.bf16.gmra.mxu0 %v4598_v10 }
 0x137   : > { %v3317_v58 = vadd.f32 %v3316_v57, %v3315_v32  ;;  %3672 = vmatprep.mubr.bf16.mxu0 %v4617_v5  ;;  %v2924_v5 = vcombine.low %v852_v8, %v862_v53  ;;  %v870_v40 = vrot.slane %v868_v23, 4 }
 0x138   : > { %v3318_v63 = vpop.f32.mrf.mxu1  ;;  %2303 = vmatmul.mubr.bf16.gmra.mxu1 %v4132_v9  ;;  %v3231_v21 = vpop.f32.mrf.mxu0  ;;  %v641_v9 = vld [vmem:[%s3872_s8 + $0xcc] sm:$0xe]  ;;  %s3032_s8 = sshll.u32 %s5241_s13, 7 }
 0x139   : > { %v4802_v54 = vadd.f32 %v3317_v58, %v4730_v12  ;;  %2310 = vmatprep.mubr.bf16.mxu1 %v4705_v31  ;;  %v4812_v22 = vadd.f32 %v3231_v21, %v3230_v2  ;;  %v2871_v30 = vrot.slane %v641_v9, 9  ;;  %v872_v41 = vsel %vm4139_vm5, %v870_v40, %v871_v52  ;;  %s5082_s19 = scalar_lea.vmem %s5190_s2, %s3032_s8 }
 0x13a   : > { %v3319_v46 = vpop.f32.mrf.mxu1  ;;  %v3233_v12 = vpop.f32.mrf.mxu0 }
 0x13b   : > { %v3320_v10 = vadd.f32 %v3319_v46, %v3318_v63 }
 0x13c   : > { %v3321_v36 = vpop.f32.mrf.mxu1  ;;  %v3234_v29 = vpop.f32.mrf.mxu0 }
 0x13d   : > { %v4815_v31 = vadd.f32 %v3320_v10, %v4739_v15  ;;  %v4817_v43 = vadd.f32 %v3234_v29, %v3233_v12  ;;  %v869_v15 = vsel %vm4139_vm5, %v2871_v30, %v868_v23 }
 0x13e   : > { %v3322_v61 = vpop.f32.mrf.mxu1  ;;  %v3236_v35 = vpop.f32.mrf.mxu0  ;;  %3673 = vmatmul.mubr.bf16.gmra.mxu0 %v4632_v34  ;;  %v2923_v34 = vcombine.low %v4761_v13, %v4764_v28 }
 0x13f   : > { %v3323_v17 = vadd.f32 %v3322_v61, %v3321_v36  ;;  %3676 = vmatprep.mubr.bf16.mxu0 %v4689_v37 }
 0x140   : > { %v3324_v11 = vpop.f32.mrf.mxu1  ;;  %2311 = vmatmul.mubr.bf16.gmra.mxu1 %v4621_v7  ;;  %v3237_v32 = vpop.f32.mrf.mxu0 }
 0x141   : > { %v4822_v16 = vadd.f32 %v3323_v17, %v4744_v27  ;;  %2318 = vmatprep.mubr.bf16.mxu1 %v2924_v5  ;;  %v4829_v57 = vadd.f32 %v3237_v32, %v3236_v35  ;;  %v2925_v27 = vcombine.low %v869_v15, %v872_v41 }
 0x142   : > { %v3325_v45 = vpop.f32.mrf.mxu1  ;;  %v3239_v7 = vpop.f32.mrf.mxu0 }
 0x143   : > { %v3326_v19 = vadd.f32 %v3325_v45, %v3324_v11 }
 0x144   : > { %v3327_v62 = vpop.f32.mrf.mxu1  ;;  %v3240_v37 = vpop.f32.mrf.mxu0 }
 0x145   : > { %v4834_v47 = vadd.f32 %v3326_v19, %v4753_v24  ;;  %v4836_v2 = vadd.f32 %v3240_v37, %v3239_v7 }
 0x146   : > { %v3328_v58 = vpop.f32.mrf.mxu1  ;;  %v3242_v63 = vpop.f32.mrf.mxu0  ;;  %3677 = vmatmul.mubr.bf16.gmra.mxu0 %v2925_v27 }
 0x147   : > { %v3329_v18 = vadd.f32 %v3328_v58, %v3327_v62 }
 0x148   : > { %v3330_v23 = vpop.f32.mrf.mxu1  ;;  %2319 = vmatmul.mubr.bf16.gmra.mxu1 %v2923_v34  ;;  %v3243_v46 = vpop.f32.mrf.mxu0 }
 0x149   : > { %v4839_v21 = vadd.f32 %v3329_v18, %v4758_v44  ;;  %v4841_v53 = vadd.f32 %v3243_v46, %v3242_v63 }
 0x14a   : > { %v3331_v8 = vpop.f32.mrf.mxu1  ;;  %v3245_v28 = vpop.f32.mrf.mxu0 }
 0x14b   : > { %v3332_v13 = vadd.f32 %v3331_v8, %v3330_v23 }
 0x14c   : > { %v3333_v24 = vpop.f32.mrf.mxu1  ;;  %v3246_v10 = vpop.f32.mrf.mxu0 }
 0x14d   : > { %v4844_v9 = vadd.f32 %v3332_v13, %v4777_v4  ;;  %v4846_v36 = vadd.f32 %v3246_v10, %v3245_v28 }
 0x14e   : > { %v3334_v12 = vpop.f32.mrf.mxu1  ;;  %v3400_v30 = vpop.f32.mrf.mxu0 }
 0x14f   : > { %v3335_v52 = vadd.f32 %v3334_v12, %v3333_v24 }
 0x150   : > { %v3336_v5 = vpop.f32.mrf.mxu1  ;;  %v3401_v29 = vpop.f32.mrf.mxu0 }
 0x151   : > { %v4849_v44 = vadd.f32 %v3335_v52, %v4782_v38  ;;  %v3402_v17 = vadd.f32 %v3401_v29, %v3400_v30 }
 0x152   : > { %v3337_v40 = vpop.f32.mrf.mxu1  ;;  %v3403_v11 = vpop.f32.mrf.mxu0 }
 0x153   : > { %v3338_v61 = vadd.f32 %v3337_v40, %v3336_v5  ;;  %v4855_v4 = vadd.f32 %v3402_v17, %v4728_v33 }
 0x154   : > { %v3339_v35 = vpop.f32.mrf.mxu1  ;;  %v3404_v32 = vpop.f32.mrf.mxu0 }
 0x155   : > { %v4852_v15 = vadd.f32 %v3338_v61, %v4792_v25  ;;  %v3405_v19 = vadd.f32 %v3404_v32, %v3403_v11 }
 0x156   : > { %v3340_v41 = vpop.f32.mrf.mxu1  ;;  %v3406_v62 = vpop.f32.mrf.mxu0 }
 0x157   : > { %v3341_v45 = vadd.f32 %v3340_v41, %v3339_v35  ;;  %v4861_v34 = vadd.f32 %v3405_v19, %v4735_v20 }
 0x158   : > { %v3342_v7 = vpop.f32.mrf.mxu1  ;;  %v3407_v37 = vpop.f32.mrf.mxu0 }
 0x159   : > { %v4858_v38 = vadd.f32 %v3341_v45, %v4797_v48  ;;  %v3408_v25 = vadd.f32 %v3407_v37, %v3406_v62 }
 0x15a   : > { %v3343_v27 = vpop.f32.mrf.mxu1  ;;  %v3409_v63 = vpop.f32.mrf.mxu0 }
 0x15b   : > { %v3344_v58 = vadd.f32 %v3343_v27, %v3342_v7  ;;  %v4867_v23 = vadd.f32 %v3408_v25, %v4742_v60 }
 0x15c   : > { %v3345_v18 = vpop.f32.mrf.mxu1  ;;  %v3410_v8 = vpop.f32.mrf.mxu0 }
 0x15d   : > { %v4864_v33 = vadd.f32 %v3344_v58, %v4812_v22  ;;  %v3411_v48 = vadd.f32 %v3410_v8, %v3409_v63 }
 0x15e   : > { %v3346_v46 = vpop.f32.mrf.mxu1  ;;  %v3412_v24 = vpop.f32.mrf.mxu0 }
 0x15f   : > { %v3347_v13 = vadd.f32 %v3346_v46, %v3345_v18  ;;  %v4873_v10 = vadd.f32 %v3411_v48, %v4749_v26 }
 0x160   : > { %v3348_v28 = vpop.f32.mrf.mxu1  ;;  %v3413_v52 = vpop.f32.mrf.mxu0 }
 0x161   : > { %v4870_v20 = vadd.f32 %v3347_v13, %v4817_v43  ;;  %v3414_v22 = vadd.f32 %v3413_v52, %v3412_v24 }
 0x162   : > { %v3349_v12 = vpop.f32.mrf.mxu1  ;;  %v3415_v40 = vpop.f32.mrf.mxu0 }
 0x163   : > { %v3350_v5 = vadd.f32 %v3349_v12, %v3348_v28  ;;  %v4879_v29 = vadd.f32 %v3414_v22, %v4756_v6 }
 0x164   : > { %v3351_v30 = vpop.f32.mrf.mxu1  ;;  %v3416_v17 = vpop.f32.mrf.mxu0 }
 0x165   : > { %v4876_v60 = vadd.f32 %v3350_v5, %v4829_v57  ;;  %v3417_v43 = vadd.f32 %v3416_v17, %v3415_v40 }
 0x166   : > { %v3352_v61 = vpop.f32.mrf.mxu1  ;;  %v3418_v41 = vpop.f32.mrf.mxu0 }
 0x167   : > { %v3353_v35 = vadd.f32 %v3352_v61, %v3351_v30  ;;  %v4885_v32 = vadd.f32 %v3417_v43, %v4769_v56 }
 0x168   : > { %v3354_v11 = vpop.f32.mrf.mxu1  ;;  %v3419_v19 = vpop.f32.mrf.mxu0 }
 0x169   : > { %v4882_v26 = vadd.f32 %v3353_v35, %v4836_v2  ;;  %v3420_v57 = vadd.f32 %v3419_v19, %v3418_v41 }
 0x16a   : > { %v3355_v45 = vpop.f32.mrf.mxu1  ;;  %v3421_v27 = vpop.f32.mrf.mxu0 }
 0x16b   : > { %v3356_v7 = vadd.f32 %v3355_v45, %v3354_v11  ;;  %v4891_v37 = vadd.f32 %v3420_v57, %v4780_v3 }
 0x16c   : > { %v3357_v62 = vpop.f32.mrf.mxu1  ;;  %v3422_v25 = vpop.f32.mrf.mxu0 }
 0x16d   : > { %v4888_v6 = vadd.f32 %v3356_v7, %v4841_v53  ;;  %v3423_v2 = vadd.f32 %v3422_v25, %v3421_v27 }
 0x16e   : > { %v3358_v58 = vpop.f32.mrf.mxu1  ;;  %v3424_v46 = vpop.f32.mrf.mxu0 }
 0x16f   : > { %v3359_v18 = vadd.f32 %v3358_v58, %v3357_v62  ;;  %v4897_v8 = vadd.f32 %v3423_v2, %v4788_v14 }
 0x170   : > { %v3360_v63 = vpop.f32.mrf.mxu1  ;;  %v3425_v48 = vpop.f32.mrf.mxu0 }
 0x171   : > { %v4894_v56 = vadd.f32 %v3359_v18, %v4846_v36  ;;  %v3426_v53 = vadd.f32 %v3425_v48, %v3424_v46 }
 0x172   : > { %v3361_v13 = vpop.f32.mrf.mxu1  ;;  %v3427_v12 = vpop.f32.mrf.mxu0 }
 0x173   : > { %v3362_v28 = vadd.f32 %v3361_v13, %v3360_v63  ;;  %v4903_v52 = vadd.f32 %v3426_v53, %v4795_v39 }
 0x174   : > { %v3363_v24 = vpop.f32.mrf.mxu1  ;;  %v3428_v22 = vpop.f32.mrf.mxu0 }
 0x175   : > { %v4900_v3 = vadd.f32 %v3362_v28, %v4656_v55  ;;  %v3429_v36 = vadd.f32 %v3428_v22, %v3427_v12 }
 0x176   : > { %v3364_v5 = vpop.f32.mrf.mxu1  ;;  %v3430_v61 = vpop.f32.mrf.mxu0 }
 0x177   : > { %v3365_v30 = vadd.f32 %v3364_v5, %v3363_v24  ;;  %v4909_v17 = vadd.f32 %v3429_v36, %v4802_v54 }
 0x178   : > { %v3366_v40 = vpop.f32.mrf.mxu1  ;;  %v3431_v43 = vpop.f32.mrf.mxu0 }
 0x179   : > { %v4906_v14 = vadd.f32 %v3365_v30, %v4660_v59  ;;  %v3432_v55 = vadd.f32 %v3431_v43, %v3430_v61 }
 0x17a   : > { %v3367_v35 = vpop.f32.mrf.mxu1  ;;  %v3433_v45 = vpop.f32.mrf.mxu0 }
 0x17b   : > { %v3368_v11 = vadd.f32 %v3367_v35, %v3366_v40  ;;  %v4915_v19 = vadd.f32 %v3432_v55, %v4815_v31 }
 0x17c   : > { %v3369_v41 = vpop.f32.mrf.mxu1  ;;  %v3434_v57 = vpop.f32.mrf.mxu0 }
 0x17d   : > { %v4912_v39 = vadd.f32 %v3368_v11, %v4675_v50  ;;  %v3435_v59 = vadd.f32 %v3434_v57, %v3433_v45 }
 0x17e   : > { %v3370_v7 = vpop.f32.mrf.mxu1  ;;  %v3436_v58 = vpop.f32.mrf.mxu0 }
 0x17f   : > { %v3371_v62 = vadd.f32 %v3370_v7, %v3369_v41  ;;  %v4921_v25 = vadd.f32 %v3435_v59, %v4822_v16 }
 0x180   : > { %v3372_v27 = vpop.f32.mrf.mxu1  ;;  %v3437_v2 = vpop.f32.mrf.mxu0 }
 0x181   : > { %v4918_v54 = vadd.f32 %v3371_v62, %v4683_v51  ;;  %v3438_v50 = vadd.f32 %v3437_v2, %v3436_v58 }
 0x182   : > { %v3373_v18 = vpop.f32.mrf.mxu1  ;;  %v3439_v13 = vpop.f32.mrf.mxu0 }
 0x183   : > { %v3374_v63 = vadd.f32 %v3373_v18, %v3372_v27  ;;  %v4927_v48 = vadd.f32 %v3438_v50, %v4834_v47 }
 0x184   : > { %v3375_v46 = vpop.f32.mrf.mxu1  ;;  %v3440_v53 = vpop.f32.mrf.mxu0 }
 0x185   : > { %v4924_v31 = vadd.f32 %v3374_v63, %v4695_v0  ;;  %v3441_v51 = vadd.f32 %v3440_v53, %v3439_v13 }
 0x186   : > { %v3376_v28 = vpop.f32.mrf.mxu1  ;;  %v3442_v5 = vpop.f32.mrf.mxu0 }
 0x187   : > { %v3377_v24 = vadd.f32 %v3376_v28, %v3375_v46  ;;  %v4933_v22 = vadd.f32 %v3441_v51, %v4839_v21 }
 0x188   : > { %v3378_v12 = vpop.f32.mrf.mxu1  ;;  %v3443_v36 = vpop.f32.mrf.mxu0 }
 0x189   : > { %v4930_v16 = vadd.f32 %v3377_v24, %v4707_v42  ;;  %v3444_v0 = vadd.f32 %v3443_v36, %v3442_v5 }
 0x18a   : > { %v3379_v30 = vpop.f32.mrf.mxu1  ;;  %v3445_v35 = vpop.f32.mrf.mxu0 }
 0x18b   : > { %v3380_v40 = vadd.f32 %v3379_v30, %v3378_v12  ;;  %v4939_v43 = vadd.f32 %v3444_v0, %v4844_v9 }
 0x18c   : > { %v3381_v61 = vpop.f32.mrf.mxu1  ;;  %v3446_v55 = vpop.f32.mrf.mxu0 }
 0x18d   : > { %v4936_v47 = vadd.f32 %v3380_v40, %v4715_v1  ;;  %v3447_v42 = vadd.f32 %v3446_v55, %v3445_v35 }
 0x18e   : > { %v3382_v11 = vpop.f32.mrf.mxu1  ;;  %v3448_v45 = vpop.f32.mrf.mxu0 }
 0x18f   : > { %v3383_v41 = vadd.f32 %v3382_v11, %v3381_v61  ;;  %v4945_v57 = vadd.f32 %v3447_v42, %v4849_v44 }
 0x190   : > { %v3512_v7 = vpop.f32.mrf.mxu1  ;;  %v3449_v62 = vpop.f32.mrf.mxu0 }
 0x191   : > { %v4942_v21 = vadd.f32 %v3383_v41, %v4719_v49  ;;  %v3450_v27 = vadd.f32 %v3449_v62, %v3448_v45 }
 0x192   : > { %v3513_v59 = vpop.f32.mrf.mxu1  ;;  %v3451_v58 = vpop.f32.mrf.mxu0 }
 0x193   : > { %v3514_v1 = vadd.f32 %v3513_v59, %v3512_v7  ;;  %v4950_v9 = vadd.f32 %v3450_v27, %v4852_v15 }
 0x194   : > { %v4947_v18 = vpop.f32.mrf.mxu1  ;;  %v3452_v63 = vpop.f32.mrf.mxu0 }
 0x195   : > { %v4953_v2 = vadd.f32 %v3514_v1, %v4855_v4  ;;  %v3453_v49 = vadd.f32 %v3452_v63, %v3451_v58 }
 0x196   : > { %v4955_v50 = vpop.f32.mrf.mxu1  ;;  %v3454_v46 = vpop.f32.mrf.mxu0 }
 0x197   : > { %v4960_v13 = vadd.f32 %v3453_v49, %v4858_v38 }
 0x198   : > { %v4957_v44 = vpop.f32.mrf.mxu1  ;;  %v3455_v28 = vpop.f32.mrf.mxu0 }
 0x199   : > { %v3456_v24 = vadd.f32 %v3455_v28, %v3454_v46 }
 0x19a   : > { %v4962_v53 = vpop.f32.mrf.mxu1  ;;  %v3457_v51 = vpop.f32.mrf.mxu0 }
 0x19b   : > { %v4967_v4 = vadd.f32 %v3456_v24, %v4864_v33 }
 0x19c   : > { %v4964_v15 = vpop.f32.mrf.mxu1  ;;  %v3458_v12 = vpop.f32.mrf.mxu0 }
 0x19d   : > { %v3459_v30 = vadd.f32 %v3458_v12, %v3457_v51 }
 0x19e   : > { %v4969_v5 = vpop.f32.mrf.mxu1  ;;  %v3460_v36 = vpop.f32.mrf.mxu0 }
 0x19f   : > { %v4974_v38 = vadd.f32 %v3459_v30, %v4870_v20 }
 0x1a0   : > { %v4971_v40 = vpop.f32.mrf.mxu1  ;;  %v3461_v0 = vpop.f32.mrf.mxu0 }
 0x1a1   : > { %v3462_v35 = vadd.f32 %v3461_v0, %v3460_v36 }
 0x1a2   : > { %v4976_v61 = vpop.f32.mrf.mxu1  ;;  %v3463_v11 = vpop.f32.mrf.mxu0 }
 0x1a3   : > { %v4981_v33 = vadd.f32 %v3462_v35, %v4876_v60 }
 0x1a4   : > { %v4978_v55 = vpop.f32.mrf.mxu1  ;;  %v3464_v41 = vpop.f32.mrf.mxu0 }
 0x1a5   : > { %v3465_v45 = vadd.f32 %v3464_v41, %v3463_v11 }
 0x1a6   : > { %v4983_v42 = vpop.f32.mrf.mxu1  ;;  %v3466_v7 = vpop.f32.mrf.mxu0 }
 0x1a7   : > { %v4988_v20 = vadd.f32 %v3465_v45, %v4882_v26 }
 0x1a8   : > { %v4985_v62 = vpop.f32.mrf.mxu1  ;;  %v3467_v59 = vpop.f32.mrf.mxu0 }
 0x1a9   : > { %5218 = vst [vmem:[#allocation2_spill] sm:$0xff] %v4988_v20  ;;  %v3468_v1 = vadd.f32 %v3467_v59, %v3466_v7 }
 0x1aa   : > { %v4990_v27 = vpop.f32.mrf.mxu1  ;;  %v3469_v58 = vpop.f32.mrf.mxu0 }
 0x1ab   : > { %v4995_v60 = vadd.f32 %v3468_v1, %v4888_v6 }
 0x1ac   : > { %v4992_v63 = vpop.f32.mrf.mxu1  ;;  %v3470_v49 = vpop.f32.mrf.mxu0 }
 0x1ad   : > { %5219 = vst [vmem:[#allocation6_spill] sm:$0xff] %v4995_v60  ;;  %v3471_v28 = vadd.f32 %v3470_v49, %v3469_v58 }
 0x1ae   : > { %v4997_v46 = vpop.f32.mrf.mxu1  ;;  %v3472_v24 = vpop.f32.mrf.mxu0 }
 0x1af   : > { %v5002_v26 = vadd.f32 %v3471_v28, %v4894_v56 }
 0x1b0   : > { %v4999_v51 = vpop.f32.mrf.mxu1  ;;  %v3473_v12 = vpop.f32.mrf.mxu0 }
 0x1b1   : > { %5220 = vst [vmem:[#allocation3_spill] sm:$0xff] %v5002_v26  ;;  %v3474_v36 = vadd.f32 %v3473_v12, %v3472_v24 }
 0x1b2   : > { %v5004_v30 = vpop.f32.mrf.mxu1  ;;  %v3475_v0 = vpop.f32.mrf.mxu0 }
 0x1b3   : > { %v5009_v6 = vadd.f32 %v3474_v36, %v4900_v3 }
 0x1b4   : > { %v5006_v35 = vpop.f32.mrf.mxu1  ;;  %v3476_v11 = vpop.f32.mrf.mxu0 }
 0x1b5   : > { %5221 = vst [vmem:[#allocation7_spill] sm:$0xff] %v5009_v6  ;;  %v3477_v45 = vadd.f32 %v3476_v11, %v3475_v0 }
 0x1b6   : > { %v5011_v41 = vpop.f32.mrf.mxu1  ;;  %v3478_v7 = vpop.f32.mrf.mxu0 }
 0x1b7   : > { %v5016_v56 = vadd.f32 %v3477_v45, %v4906_v14 }
 0x1b8   : > { %v5013_v59 = vpop.f32.mrf.mxu1  ;;  %v3479_v1 = vpop.f32.mrf.mxu0 }
 0x1b9   : > { %5222 = vst [vmem:[#allocation4_spill] sm:$0xff] %v5016_v56  ;;  %v3480_v49 = vadd.f32 %v3479_v1, %v3478_v7 }
 0x1ba   : > { %v5018_v58 = vpop.f32.mrf.mxu1  ;;  %v3481_v28 = vpop.f32.mrf.mxu0 }
 0x1bb   : > { %v5023_v3 = vadd.f32 %v3480_v49, %v4912_v39 }
 0x1bc   : > { %v5020_v24 = vpop.f32.mrf.mxu1  ;;  %v3482_v12 = vpop.f32.mrf.mxu0 }
 0x1bd   : > { %5223 = vst [vmem:[#allocation5_spill] sm:$0xff] %v5023_v3  ;;  %v3483_v0 = vadd.f32 %v3482_v12, %v3481_v28 }
 0x1be   : > { %v5025_v36 = vpop.f32.mrf.mxu1  ;;  %v3484_v11 = vpop.f32.mrf.mxu0 }
 0x1bf   : > { %v5030_v14 = vadd.f32 %v3483_v0, %v4918_v54 }
 0x1c0   : > { %v5027_v6 = vpop.f32.mrf.mxu1  ;;  %v3485_v45 = vpop.f32.mrf.mxu0 }
 0x1c1   : > { %5224 = vst [vmem:[#allocation8_spill] sm:$0xff] %v5030_v14  ;;  %v3486_v7 = vadd.f32 %v3485_v45, %v3484_v11 }
 0x1c2   : > { %v5032_v56 = vpop.f32.mrf.mxu1  ;;  %v3487_v1 = vpop.f32.mrf.mxu0 }
 0x1c3   : > { %v5037_v39 = vadd.f32 %v3486_v7, %v4924_v31 }
 0x1c4   : > { %v5034_v20 = vpop.f32.mrf.mxu1  ;;  %v3488_v49 = vpop.f32.mrf.mxu0 }
 0x1c5   : > { %5225 = vst [vmem:[#allocation9_spill] sm:$0xff] %v5037_v39  ;;  %v3489_v28 = vadd.f32 %v3488_v49, %v3487_v1  ;;  %v3520_v1 = vadd.f32 %v4962_v53, %v4957_v44 }
 0x1c6   : > { %v5039_v3 = vpop.f32.mrf.mxu1  ;;  %v3490_v12 = vpop.f32.mrf.mxu0 }
 0x1c7   : > { %v5044_v54 = vadd.f32 %v3489_v28, %v4930_v16  ;;  %v3523_v16 = vadd.f32 %v4969_v5, %v4964_v15 }
 0x1c8   : > { %v5041_v26 = vpop.f32.mrf.mxu1  ;;  %v3491_v0 = vpop.f32.mrf.mxu0 }
 0x1c9   : > { %5226 = vst [vmem:[#allocation10_spill] sm:$0xff] %v5044_v54  ;;  %v3492_v11 = vadd.f32 %v3491_v0, %v3490_v12  ;;  %v3517_v0 = vadd.f32 %v4955_v50, %v4947_v18  ;;  %v2212_v44 = vadd.f32 %v3523_v16, %v4873_v10  ;;  %v3532_v50 = vadd.f32 %v4990_v27, %v4985_v62 }
 0x1ca   : > { %v5046_v14 = vpop.f32.mrf.mxu1  ;;  %v3493_v45 = vpop.f32.mrf.mxu0 }
 0x1cb   : > { %v5051_v31 = vadd.f32 %v3492_v11, %v4936_v47  ;;  %v2204_v18 = vadd.f32 %v3517_v0, %v4861_v34 }
 0x1cc   : > { %v5048_v60 = vpop.f32.mrf.mxu1  ;;  %v3494_v7 = vpop.f32.mrf.mxu0 }
 0x1cd   : > { %5227 = vst [vmem:[#allocation11_spill] sm:$0xff] %v5051_v31  ;;  %v3495_v49 = vadd.f32 %v3494_v7, %v3493_v45  ;;  %v2209_v31 = vadd.f32 %v3520_v1, %v4867_v23 }
 0x1ce   : > { %v5053_v39 = vpop.f32.mrf.mxu1  ;;  %v3650_v12 = vpop.f32.mrf.mxu0 }
 0x1cf   : > { %v5064_v54 = vadd.f32 %v3495_v49, %v4942_v21  ;;  %v2370_v5 = vadd.f32 %v3650_v12, %v2209_v31  ;;  %v3526_v21 = vadd.f32 %v4976_v61, %v4971_v40  ;;  %v3529_v49 = vadd.f32 %v4983_v42, %v4978_v55 }
 0x1d0   : > { %v5059_v28 = vpop.f32.mrf.mxu1  ;;  %v2361_v11 = vpop.f32.mrf.mxu0  ;;  %v2225_v12 = vadd.f32 %v3532_v50, %v4891_v37 }
 0x1d1   : > { %5228 = vst [vmem:[#allocation12_spill] sm:$0xff] %v5064_v54  ;;  %v2362_v45 = vadd.f32 %v2361_v11, %v4953_v2  ;;  %v3535_v2 = vadd.f32 %v4997_v46, %v4992_v63  ;;  %v2217_v63 = vadd.f32 %v3526_v21, %v4879_v29  ;;  %v2687_v11 = vmul.f32 %v2370_v5, %v2370_v5 }
 0x1d2   : > { %v5066_v47 = vpop.f32.mrf.mxu1  ;;  %v3651_v15 = vpop.f32.mrf.mxu0  ;;  %v3538_v29 = vadd.f32 %v5004_v30, %v4999_v51  ;;  %v3544_v21 = vadd.f32 %v5018_v58, %v5013_v59  ;;  %v2220_v50 = vadd.f32 %v3529_v49, %v4885_v32  ;;  %v3541_v30 = vadd.f32 %v5011_v41, %v5006_v35 }
 0x1d3   : > { %v2373_v7 = vadd.f32 %v3651_v15, %v2212_v44  ;;  %v2685_v61 = vmul.f32 %v2362_v45, %v2362_v45 }
 0x1d4   : > { %v5071_v53 = vpop.f32.mrf.mxu1  ;;  %v2364_v10 = vpop.f32.mrf.mxu0  ;;  %v2233_v32 = vadd.f32 %v3538_v29, %v4903_v52  ;;  %v3550_v52 = vadd.f32 %v5032_v56, %v5027_v6 }
 0x1d5   : > { %v3073_v34 = vpack.c.bf16 %v2373_v7, %v2370_v5  ;;  %v2365_v31 = vadd.f32 %v2364_v10, %v2204_v18  ;;  %v2228_v18 = vadd.f32 %v3535_v2, %v4897_v8  ;;  %v2688_v10 = vmul.f32 %v2373_v7, %v2373_v7 }
 0x1d6   : > { %v5084_v23 = vpop.f32.mrf.mxu1  ;;  %v3654_v40 = vpop.f32.mrf.mxu0 }
 0x1d7   : > { %3145 = vst [vmem:[%s5082_s19 + $0x8] sm:$0xff] %v3073_v34   ;;  %v3068_v62 = vpack.c.bf16 %v2365_v31, %v2362_v45  ;;  %v2648_v27 = vadd.f32 %v2365_v31, %v2362_v45  ;;  %v2686_v16 = vmul.f32 %v2365_v31, %v2365_v31  ;;  %v2386_v55 = vadd.f32 %v3654_v40, %v2225_v12 }
 0x1d8   : > { %v5088_v1 = vpop.f32.mrf.mxu1  ;;  %v2377_v46 = vpop.f32.mrf.mxu0 }
 0x1d9   : > { %3069 = vst [vmem:[%s5082_s19] sm:$0xff] %v3068_v62   ;;  %v2649_v44 = vadd.f32 %v2648_v27, %v2370_v5  ;;  %v2717_v15 = vadd.f32 %v2686_v16, %v2685_v61  ;;  %v2378_v34 = vadd.f32 %v2377_v46, %v2217_v63  ;;  %v3547_v5 = vadd.f32 %v5025_v36, %v5020_v24 }
 0x1da   : > { %v5094_v0 = vpop.f32.mrf.mxu1  ;;  %v3655_v31 = vpop.f32.mrf.mxu0  ;;  %v2691_v46 = vmul.f32 %v2386_v55, %v2386_v55 }
 0x1db   : > { %v2718_v54 = vadd.f32 %v2717_v15, %v2687_v11  ;;  %v2650_v42 = vadd.f32 %v2649_v44, %v2373_v7  ;;  %v2389_v37 = vadd.f32 %v3655_v31, %v2228_v18  ;;  %v2689_v62 = vmul.f32 %v2378_v34, %v2378_v34 }
 0x1dc   : > { %v5099_v45 = vpop.f32.mrf.mxu1  ;;  %v2380_v2 = vpop.f32.mrf.mxu0  ;;  %v2244_v63 = vadd.f32 %v3547_v5, %v4921_v25 }
 0x1dd   : > { %v2651_v61 = vadd.f32 %v2650_v42, %v2378_v34  ;;  %v2719_v40 = vadd.f32 %v2718_v54, %v2688_v10  ;;  %v3083_v7 = vpack.c.bf16 %v2389_v37, %v2386_v55  ;;  %v2381_v27 = vadd.f32 %v2380_v2, %v2220_v50 }
 0x1de   : > { %v5107_v8 = vpop.f32.mrf.mxu1  ;;  %v3658_v51 = vpop.f32.mrf.mxu0  ;;  %v2241_v54 = vadd.f32 %v3544_v21, %v4915_v19  ;;  %v2692_v31 = vmul.f32 %v2389_v37, %v2389_v37  ;;  %v3559_v21 = vadd.f32 %v5053_v39, %v5048_v60  ;;  %v2249_v60 = vadd.f32 %v3550_v52, %v4927_v48 }
 0x1df   : > { %v2720_v59 = vadd.f32 %v2719_v40, %v2689_v62  ;;  %3147 = vst [vmem:[%s5082_s19 + $0x18] sm:$0xff] %v3083_v7   ;;  %v3078_v58 = vpack.c.bf16 %v2381_v27, %v2378_v34  ;;  %v2652_v24 = vadd.f32 %v2651_v61, %v2381_v27  ;;  %v2690_v36 = vmul.f32 %v2381_v27, %v2381_v27 }
 0x1e0   : > { %v5110_v16 = vpop.f32.mrf.mxu1  ;;  %v2393_v49 = vpop.f32.mrf.mxu0  ;;  %v2402_v18 = vadd.f32 %v3658_v51, %v2241_v54  ;;  %v2236_v34 = vadd.f32 %v3541_v30, %v4909_v17  ;;  %v2260_v51 = vadd.f32 %v3559_v21, %v4945_v57  ;;  %v3562_v54 = vadd.f32 %v5066_v47, %v5059_v28 }
 0x1e1   : > { %3146 = vst [vmem:[%s5082_s19 + $0x10] sm:$0xff] %v3078_v58   ;;  %v2653_v11 = vadd.f32 %v2652_v24, %v2386_v55  ;;  %v2721_v44 = vadd.f32 %v2720_v59, %v2690_v36  ;;  %v2394_v15 = vadd.f32 %v2393_v49, %v2233_v32  ;;  %v3556_v55 = vadd.f32 %v5046_v14, %v5041_v26 }
 0x1e2   : > { %v5115_v12 = vpop.f32.mrf.mxu1  ;;  %v3659_v41 = vpop.f32.mrf.mxu0  ;;  %v2695_v30 = vmul.f32 %v2402_v18, %v2402_v18  ;;  %v3568_v57 = vadd.f32 %v5094_v0, %v5088_v1  ;;  %v3565_v47 = vadd.f32 %v5084_v23, %v5071_v53  ;;  %v2265_v0 = vadd.f32 %v3562_v54, %v4950_v9 }
 0x1e3   : > { %v2405_v10 = vadd.f32 %v3659_v41, %v2244_v63  ;;  %v2722_v19 = vadd.f32 %v2721_v44, %v2691_v46  ;;  %v2654_v42 = vadd.f32 %v2653_v11, %v2389_v37  ;;  %v2693_v2 = vmul.f32 %v2394_v15, %v2394_v15 }
 0x1e4   : > { %v5121_v35 = vpop.f32.mrf.mxu1  ;;  %v2396_v29 = vpop.f32.mrf.mxu0  ;;  %v3553_v37 = vadd.f32 %v5039_v3, %v5034_v20  ;;  %v2257_v27 = vadd.f32 %v3556_v55, %v4939_v43  ;;  %v3571_v44 = vadd.f32 %v5107_v8, %v5099_v45  ;;  %v2273_v8 = vadd.f32 %v3568_v57, %v4967_v4  ;;  %v5231_v57 = vld [vmem:[#allocation2_spill] sm:$0xff] }
 0x1e5   : > { %v3093_v5 = vpack.c.bf16 %v2405_v10, %v2402_v18  ;;  %v2397_v50 = vadd.f32 %v2396_v29, %v2236_v34  ;;  %v2655_v17 = vadd.f32 %v2654_v42, %v2394_v15  ;;  %v2723_v61 = vadd.f32 %v2722_v19, %v2692_v31 }
 0x1e6   : > { %v5126_v25 = vpop.f32.mrf.mxu1  ;;  %v3662_v56 = vpop.f32.mrf.mxu0  ;;  %v2252_v49 = vadd.f32 %v3553_v37, %v4933_v22  ;;  %v2696_v48 = vmul.f32 %v2405_v10, %v2405_v10  ;;  %v2276_v29 = vadd.f32 %v3571_v44, %v4974_v38 }
 0x1e7   : > { %3149 = vst [vmem:[%s5082_s19 + $0x28] sm:$0xff] %v3093_v5   ;;  %v3088_v62 = vpack.c.bf16 %v2397_v50, %v2394_v15  ;;  %v2694_v40 = vmul.f32 %v2397_v50, %v2397_v50  ;;  %v2724_v7 = vadd.f32 %v2723_v61, %v2693_v2  ;;  %v2656_v26 = vadd.f32 %v2655_v17, %v2397_v50 }
 0x1e8   : > { %v5132_v6 = vpop.f32.mrf.mxu1  ;;  %v2409_v39 = vpop.f32.mrf.mxu0  ;;  %v2418_v3 = vadd.f32 %v3662_v56, %v2257_v27  ;;  %v2268_v61 = vadd.f32 %v3565_v47, %v4960_v13  ;;  %v3574_v56 = vadd.f32 %v5115_v12, %v5110_v16  ;;  %v3577_v16 = vadd.f32 %v5126_v25, %v5121_v35 }
 0x1e9   : > { %3148 = vst [vmem:[%s5082_s19 + $0x20] sm:$0xff] %v3088_v62   ;;  %v2657_v59 = vadd.f32 %v2656_v26, %v2402_v18  ;;  %v2725_v58 = vadd.f32 %v2724_v7, %v2694_v40  ;;  %v2410_v24 = vadd.f32 %v2409_v39, %v2249_v60 }
 0x1ea   : > { %v3579_v14 = vpop.f32.mrf.mxu1  ;;  %v3663_v20 = vpop.f32.mrf.mxu0  ;;  %v2699_v55 = vmul.f32 %v2418_v3, %v2418_v3  ;;  %v2284_v44 = vadd.f32 %v3577_v16, %v5231_v57 }
 0x1eb   : > { %v2421_v32 = vadd.f32 %v3663_v20, %v2260_v51  ;;  %v2726_v63 = vadd.f32 %v2725_v58, %v2695_v30  ;;  %v2658_v46 = vadd.f32 %v2657_v59, %v2405_v10  ;;  %v2697_v22 = vmul.f32 %v2410_v24, %v2410_v24 }
 0x1ec   : > { %v3581_v36 = vpop.f32.mrf.mxu1  ;;  %v2412_v11 = vpop.f32.mrf.mxu0  ;;  %v3580_v38 = vadd.f32 %v3579_v14, %v5132_v6  ;;  %v2281_v6 = vadd.f32 %v3574_v56, %v4981_v33  ;;  %v5234_v56 = vld [vmem:[#allocation8_spill] sm:$0xff] }
 0x1ed   : > { %v3103_v15 = vpack.c.bf16 %v2421_v32, %v2418_v3  ;;  %v2413_v41 = vadd.f32 %v2412_v11, %v2252_v49  ;;  %v2659_v18 = vadd.f32 %v2658_v46, %v2410_v24  ;;  %v2727_v34 = vadd.f32 %v2726_v63, %v2696_v48 }
 0x1ee   : > { %v3582_v43 = vpop.f32.mrf.mxu1  ;;  %v3666_v28 = vpop.f32.mrf.mxu0  ;;  %v2700_v9 = vmul.f32 %v2421_v32, %v2421_v32 }
 0x1ef   : > { %3151 = vst [vmem:[%s5082_s19 + $0x38] sm:$0xff] %v3103_v15   ;;  %v3098_v10 = vpack.c.bf16 %v2413_v41, %v2410_v24  ;;  %v2698_v31 = vmul.f32 %v2413_v41, %v2413_v41  ;;  %v2728_v19 = vadd.f32 %v2727_v34, %v2697_v22  ;;  %v2660_v42 = vadd.f32 %v2659_v18, %v2413_v41 }
 0x1f0   : > { %v3584_v52 = vpop.f32.mrf.mxu1  ;;  %v2425_v45 = vpop.f32.mrf.mxu0  ;;  %v2434_v23 = vadd.f32 %v3666_v28, %v2273_v8  ;;  %v3583_v7 = vadd.f32 %v3582_v43, %v3581_v36  ;;  %v5229_v36 = vld [vmem:[#allocation6_spill] sm:$0xff] }
 0x1f1   : > { %3150 = vst [vmem:[%s5082_s19 + $0x30] sm:$0xff] %v3098_v10   ;;  %v2661_v21 = vadd.f32 %v2660_v42, %v2418_v3  ;;  %v2729_v5 = vadd.f32 %v2728_v19, %v2698_v31  ;;  %v2426_v50 = vadd.f32 %v2425_v45, %v2265_v0  ;;  %v2289_v3 = vadd.f32 %v3580_v38, %v5229_v36 }
 0x1f2   : > { %v3585_v1 = vpop.f32.mrf.mxu1  ;;  %v3667_v53 = vpop.f32.mrf.mxu0  ;;  %v2703_v54 = vmul.f32 %v2434_v23, %v2434_v23 }
 0x1f3   : > { %v2437_v2 = vadd.f32 %v3667_v53, %v2276_v29  ;;  %v2730_v37 = vadd.f32 %v2729_v5, %v2699_v55  ;;  %v2662_v62 = vadd.f32 %v2661_v21, %v2421_v32  ;;  %v2701_v27 = vmul.f32 %v2426_v50, %v2426_v50  ;;  %v5230_v32 = vld [vmem:[#allocation3_spill] sm:$0xff] }
 0x1f4   : > { %v3587_v17 = vpop.f32.mrf.mxu1  ;;  %v2428_v40 = vpop.f32.mrf.mxu0  ;;  %v2292_v49 = vadd.f32 %v3583_v7, %v5230_v32  ;;  %v3586_v15 = vadd.f32 %v3585_v1, %v3584_v52 }
 0x1f5   : > { %v3113_v26 = vpack.c.bf16 %v2437_v2, %v2434_v23  ;;  %v2429_v60 = vadd.f32 %v2428_v40, %v2268_v61  ;;  %v2663_v39 = vadd.f32 %v2662_v62, %v2426_v50  ;;  %v2731_v51 = vadd.f32 %v2730_v37, %v2700_v9 }
 0x1f6   : > { %v3588_v4 = vpop.f32.mrf.mxu1  ;;  %v3670_v13 = vpop.f32.mrf.mxu0  ;;  %v2704_v41 = vmul.f32 %v2437_v2, %v2437_v2 }
 0x1f7   : > { %3153 = vst [vmem:[%s5082_s19 + $0x48] sm:$0xff] %v3113_v26   ;;  %v3108_v12 = vpack.c.bf16 %v2429_v60, %v2426_v50  ;;  %v2702_v59 = vmul.f32 %v2429_v60, %v2429_v60  ;;  %v2732_v58 = vadd.f32 %v2731_v51, %v2701_v27  ;;  %v2664_v24 = vadd.f32 %v2663_v39, %v2429_v60  ;;  %v5232_v50 = vld [vmem:[#allocation7_spill] sm:$0xff]  ;;  %v5235_v60 = vld [vmem:[#allocation4_spill] sm:$0xff] }
 0x1f8   : > { %v3590_v30 = vpop.f32.mrf.mxu1  ;;  %v2441_v14 = vpop.f32.mrf.mxu0  ;;  %v2450_v25 = vadd.f32 %v3670_v13, %v2289_v3  ;;  %v3589_v29 = vadd.f32 %v3588_v4, %v3587_v17  ;;  %v2297_v53 = vadd.f32 %v3586_v15, %v5232_v50 }
 0x1f9   : > { %3152 = vst [vmem:[%s5082_s19 + $0x40] sm:$0xff] %v3108_v12   ;;  %v2665_v48 = vadd.f32 %v2664_v24, %v2434_v23  ;;  %v2733_v63 = vadd.f32 %v2732_v58, %v2702_v59  ;;  %v2442_v46 = vadd.f32 %v2441_v14, %v2281_v6 }
 0x1fa   : > { %v3591_v20 = vpop.f32.mrf.mxu1  ;;  %v3671_v35 = vpop.f32.mrf.mxu0  ;;  %v2707_v37 = vmul.f32 %v2450_v25, %v2450_v25  ;;  %v2300_v39 = vadd.f32 %v3589_v29, %v5235_v60 }
 0x1fb   : > { %v2453_v11 = vadd.f32 %v3671_v35, %v2292_v49  ;;  %v2734_v33 = vadd.f32 %v2733_v63, %v2703_v54  ;;  %v2666_v18 = vadd.f32 %v2665_v48, %v2437_v2  ;;  %v3592_v28 = vadd.f32 %v3591_v20, %v3590_v30  ;;  %v5233_v2 = vld [vmem:[#allocation5_spill] sm:$0xff] }
 0x1fc   : > { %v3593_v43 = vpop.f32.mrf.mxu1  ;;  %v2444_v34 = vpop.f32.mrf.mxu0  ;;  %v2705_v42 = vmul.f32 %v2442_v46, %v2442_v46 }
 0x1fd   : > { %v3123_v47 = vpack.c.bf16 %v2453_v11, %v2450_v25  ;;  %v2445_v31 = vadd.f32 %v2444_v34, %v2284_v44  ;;  %v2667_v19 = vadd.f32 %v2666_v18, %v2442_v46  ;;  %v2735_v0 = vadd.f32 %v2734_v33, %v2704_v41  ;;  %v5237_v18 = vld [vmem:[#allocation11_spill] sm:$0xff]  ;;  %v5238_v34 = vld [vmem:[#allocation10_spill] sm:$0xff] }
 0x1fe   : > { %v3594_v22 = vpop.f32.mrf.mxu1  ;;  %v3674_v8 = vpop.f32.mrf.mxu0  ;;  %v2305_v61 = vadd.f32 %v3592_v28, %v5233_v2  ;;  %v2708_v27 = vmul.f32 %v2453_v11, %v2453_v11 }
 0x1ff   : > { %v3595_v10 = vadd.f32 %v3594_v22, %v3593_v43  ;;  %3155 = vst [vmem:[%s5082_s19 + $0x58] sm:$0xff] %v3123_v47   ;;  %v3118_v55 = vpack.c.bf16 %v2445_v31, %v2442_v46  ;;  %v2706_v52 = vmul.f32 %v2445_v31, %v2445_v31  ;;  %v2736_v1 = vadd.f32 %v2735_v0, %v2705_v42  ;;  %v5236_v46 = vld [vmem:[#allocation9_spill] sm:$0xff] }
 0x200   : > { %v3596_v45 = vpop.f32.mrf.mxu1  ;;  %v2668_v21 = vadd.f32 %v2667_v19, %v2445_v31  ;;  %v2457_v23 = vpop.f32.mrf.mxu0  ;;  %v2466_v4 = vadd.f32 %v3674_v8, %v2305_v61 }
 0x201   : > { %3154 = vst [vmem:[%s5082_s19 + $0x50] sm:$0xff] %v3118_v55   ;;  %v2308_v9 = vadd.f32 %v3595_v10, %v5234_v56  ;;  %v2737_v40 = vadd.f32 %v2736_v1, %v2706_v52  ;;  %v2458_v38 = vadd.f32 %v2457_v23, %v2297_v53  ;;  %v5239_v1 = vld [vmem:[#allocation12_spill] sm:$0xff] }
 0x202   : > { %v3597_v5 = vpop.f32.mrf.mxu1  ;;  %v2669_v62 = vadd.f32 %v2668_v21, %v2450_v25  ;;  %v3675_v17 = vpop.f32.mrf.mxu0 }
 0x203   : > { %v2469_v26 = vadd.f32 %v3675_v17, %v2308_v9  ;;  %v2738_v51 = vadd.f32 %v2737_v40, %v2707_v37  ;;  %v3598_v30 = vadd.f32 %v3597_v5, %v3596_v45  ;;  %v2709_v20 = vmul.f32 %v2458_v38, %v2458_v38 }
 0x204   : > { %v3599_v7 = vpop.f32.mrf.mxu1  ;;  %v2670_v13 = vadd.f32 %v2669_v62, %v2453_v11  ;;  %v2460_v12 = vpop.f32.mrf.mxu0  ;;  %v2711_v11 = vmul.f32 %v2466_v4, %v2466_v4 }
 0x205   : > { %v3133_v59 = vpack.c.bf16 %v2469_v26, %v2466_v4  ;;  %v2461_v58 = vadd.f32 %v2460_v12, %v2300_v39  ;;  %v2739_v6 = vadd.f32 %v2738_v51, %v2708_v27  ;;  %v2313_v43 = vadd.f32 %v3598_v30, %v5236_v46 }
 0x206   : > { %v3600_v16 = vpop.f32.mrf.mxu1  ;;  %v2671_v24 = vadd.f32 %v2670_v13, %v2458_v38  ;;  %v3678_v36 = vpop.f32.mrf.mxu0  ;;  %v2712_v47 = vmul.f32 %v2469_v26, %v2469_v26 }
 0x207   : > { %3157 = vst [vmem:[%s5082_s19 + $0x68] sm:$0xff] %v3133_v59   ;;  %v3601_v3 = vadd.f32 %v3600_v16, %v3599_v7  ;;  %v3128_v32 = vpack.c.bf16 %v2461_v58, %v2458_v38  ;;  %v2710_v49 = vmul.f32 %v2461_v58, %v2461_v58  ;;  %v2740_v54 = vadd.f32 %v2739_v6, %v2709_v20 }
 0x208   : > { %v3602_v14 = vpop.f32.mrf.mxu1  ;;  %v2672_v48 = vadd.f32 %v2671_v24, %v2461_v58  ;;  %v2473_v35 = vpop.f32.mrf.mxu0 }
 0x209   : > { %3156 = vst [vmem:[%s5082_s19 + $0x60] sm:$0xff] %v3128_v32   ;;  %v2741_v44 = vadd.f32 %v2740_v54, %v2710_v49  ;;  %v2474_v15 = vadd.f32 %v2473_v35, %v2313_v43  ;;  %v2316_v28 = vadd.f32 %v3601_v3, %v5238_v34 }
 0x20a   : > { %v3603_v63 = vpop.f32.mrf.mxu1  ;;  %v2673_v57 = vadd.f32 %v2672_v48, %v2466_v4  ;;  %v3679_v33 = vpop.f32.mrf.mxu0 }
 0x20b   : > { %v3604_v25 = vadd.f32 %v3603_v63, %v3602_v14  ;;  %v2742_v10 = vadd.f32 %v2741_v44, %v2711_v11  ;;  %v2713_v55 = vmul.f32 %v2474_v15, %v2474_v15 }
 0x20c   : > { %v3605_v41 = vpop.f32.mrf.mxu1  ;;  %v2674_v31 = vadd.f32 %v2673_v57, %v2469_v26  ;;  %v2476_v42 = vpop.f32.mrf.mxu0 }
 0x20d   : > { %v2321_v22 = vadd.f32 %v3604_v25, %v5237_v18  ;;  %v2477_v45 = vadd.f32 %v2476_v42, %v2316_v28  ;;  %v2743_v52 = vadd.f32 %v2742_v10, %v2712_v47 }
 0x20e   : > { %v3606_v19 = vpop.f32.mrf.mxu1  ;;  %v2675_v29 = vadd.f32 %v2674_v31, %v2474_v15 }
 0x20f   : > { %v3607_v0 = vadd.f32 %v3606_v19, %v3605_v41  ;;  %v2482_v8 = vadd.f32 %v3678_v36, %v2321_v22  ;;  %v3138_v5 = vpack.c.bf16 %v2477_v45, %v2474_v15  ;;  %v2714_v50 = vmul.f32 %v2477_v45, %v2477_v45 }
 0x210   : > { %v2744_v53 = vadd.f32 %v2743_v52, %v2713_v55  ;;  %v2676_v23 = vadd.f32 %v2675_v29, %v2477_v45 }
 0x211   : > { %v2324_v21 = vadd.f32 %v3607_v0, %v5239_v1  ;;  %3158 = vst [vmem:[%s5082_s19 + $0x70] sm:$0xff] %v3138_v5   ;;  %v2715_v61 = vmul.f32 %v2482_v8, %v2482_v8 }
 0x212   : > { %v2677_v56 = vadd.f32 %v2676_v23, %v2482_v8  ;;  %v2745_v9 = vadd.f32 %v2744_v53, %v2714_v50 }
 0x213   : > { %v2485_v2 = vadd.f32 %v3679_v33, %v2324_v21 }
 0x214   : > { %v2746_v38 = vadd.f32 %v2745_v9, %v2715_v61 }
 0x215   : > { %v3143_v37 = vpack.c.bf16 %v2485_v2, %v2482_v8  ;;  %v2716_v62 = vmul.f32 %v2485_v2, %v2485_v2  ;;  %v2678_v40 = vadd.f32 %v2677_v56, %v2485_v2 }
 0x217   : > { %3159 = vst [vmem:[%s5082_s19 + $0x78] sm:$0xff] %v3143_v37   ;;  %v2679_v7 = vrot.slane %v2678_v40, 4  ;;  %v2747_v17 = vadd.f32 %v2746_v38, %v2716_v62 }
 0x219   : > { %v2680_v4 = vadd.f32 %v2679_v7, %v2678_v40  ;;  %v2748_v26 = vrot.slane %v2747_v17, 4 }
 0x21b   : > { %v2681_v60 = vrot.slane %v2680_v4, 2  ;;  %v2749_v39 = vadd.f32 %v2748_v26, %v2747_v17 }
 0x21d   : > { %v2682_v27 = vadd.f32 %v2681_v60, %v2680_v4  ;;  %v2750_v51 = vrot.slane %v2749_v39, 2 }
 0x21f   : > { %v2683_v30 = vrot.slane %v2682_v27, 1  ;;  %v2751_v13 = vadd.f32 %v2750_v51, %v2749_v39 }
 0x221   : > { %v2752_v16 = vrot.slane %v2751_v13, 1  ;;  %v2684_v12 = vadd.f32 %v2683_v30, %v2682_v27 }
 0x223   : > { %v2753_v59 = vadd.f32 %v2752_v16, %v2751_v13 }
 0x225   : > { %v2755_v58 = vsel %vm2754_vm6, %v2684_v12, %v2753_v59 }
 0x226   : > { %v2757_v24 = vsel %vm2756_vm7, %v2755_v58, 0.0 }
 0x227   : > { %2758 = vst [vmem:[%s181_s23] sm:$0xff] %v2757_v24 }
 0x228 PF: > { %s14_s12 = sadd.s32 1, %s3809_s12  }
 0x229   : > { %p11_p4 = scmp.ge.s32.totalorder %s14_s12, 4  }
 0x22b   :  { %13 = sbr.rel (!%p11_p4) target bundleno = 1 (0x1), region = 70 }

// kernel: _lambda_.15
= control target key start
LH: loop header
LB: loop body
LE: loop exit
PB: predicated region body
PF: predicated region fallthrough
CT: control target
= control target key end

     0   :  { %s455_s0 = inlined_call_operand.vmem [shape: bf16[128,128], index: 0, kind: input, shape index: {}]   ;;  %s456_s1 = inlined_call_operand.vmem [shape: f32[1,128], index: 1, kind: input, shape index: {}]   ;;  %s457_s2 = inlined_call_operand.vmem [shape: f32[1,128], index: 2, kind: input, shape index: {}]   ;;  %s458_s3 = inlined_call_operand.vmem [shape: bf16[128,128], index: 3, kind: output, shape index: {}]  }
   0x1   :  { %v259_v0 = vld [vmem:[%s455_s0] sm:$0xff]   ;;  %v330_v4 = vld [vmem:[%s455_s0 + $0x8] sm:$0xff]   ;;  %v331_v5 = vld [vmem:[%s455_s0 + $0x10] sm:$0xff]  }
   0x2   :  { %v370_v1 = vld [vmem:[%s456_s1] ss:$0 sm:$0xff]  ;;  %v260_v2 = vunpack.c.l.bf16 %v259_v0  ;;  %v261_v3 = vunpack.c.h.bf16 %v259_v0  ;;  %v332_v6 = vld [vmem:[%s455_s0 + $0x18] sm:$0xff]   ;;  %v264_v8 = vunpack.c.l.bf16 %v330_v4  ;;  %v265_v9 = vunpack.c.h.bf16 %v330_v4  ;;  %v334_v35 = vld [vmem:[%s455_s0 + $0x28] sm:$0xff]  }
   0x3   :  { %v384_v7 = vld [vmem:[%s457_s2] ss:$0 sm:$0xff]  ;;  %v268_v10 = vunpack.c.l.bf16 %v331_v5  ;;  %v269_v11 = vunpack.c.h.bf16 %v331_v5  ;;  %v272_v14 = vunpack.c.l.bf16 %v332_v6  ;;  %v273_v15 = vunpack.c.h.bf16 %v332_v6  ;;  %v335_v48 = vld [vmem:[%s455_s0 + $0x30] sm:$0xff]   ;;  %v336_v4 = vld [vmem:[%s455_s0 + $0x38] sm:$0xff]  }
   0x4   :  { %v53_v12 = vmul.f32 %v260_v2, %v370_v1  ;;  %v54_v13 = vmul.f32 %v261_v3, %v370_v1  ;;  %v55_v16 = vmul.f32 %v264_v8, %v370_v1  ;;  %v56_v17 = vmul.f32 %v265_v9, %v370_v1  ;;  %v333_v34 = vld [vmem:[%s455_s0 + $0x20] sm:$0xff]  }
   0x5   :  { %v57_v18 = vmul.f32 %v268_v10, %v370_v1  ;;  %v58_v19 = vmul.f32 %v269_v11, %v370_v1  ;;  %v59_v22 = vmul.f32 %v272_v14, %v370_v1  ;;  %v60_v23 = vmul.f32 %v273_v15, %v370_v1 }
   0x6   :  { %v76_v20 = vadd.f32 %v384_v7, %v53_v12  ;;  %v77_v21 = vadd.f32 %v384_v7, %v54_v13  ;;  %v78_v24 = vadd.f32 %v384_v7, %v55_v16  ;;  %v79_v25 = vadd.f32 %v384_v7, %v56_v17 }
   0x7   :  { %v80_v26 = vadd.f32 %v384_v7, %v57_v18  ;;  %v81_v27 = vadd.f32 %v384_v7, %v58_v19  ;;  %v82_v42 = vadd.f32 %v384_v7, %v59_v22  ;;  %v83_v43 = vadd.f32 %v384_v7, %v60_v23 }
   0x8   :  { %vm92_vm0 = vcmp.gt.f32.partialorder %v76_v20, 0.0  ;;  %vm93_vm1 = vcmp.gt.f32.partialorder %v77_v21, 0.0  ;;  %v108_v28 = vmul.f32 0.1, %v76_v20  ;;  %v109_v29 = vmul.f32 0.1, %v77_v21 }
   0x9   :  { %vm94_vm2 = vcmp.gt.f32.partialorder %v78_v24, 0.0  ;;  %vm95_vm3 = vcmp.gt.f32.partialorder %v79_v25, 0.0  ;;  %v110_v30 = vmul.f32 0.1, %v78_v24  ;;  %v111_v31 = vmul.f32 0.1, %v79_v25 }
   0xa   :  { %v124_v32 = vsel %vm92_vm0, %v76_v20, %v108_v28  ;;  %v125_v33 = vsel %vm93_vm1, %v77_v21, %v109_v29  ;;  %vm96_vm4 = vcmp.gt.f32.partialorder %v80_v26, 0.0  ;;  %vm97_vm5 = vcmp.gt.f32.partialorder %v81_v27, 0.0 }
   0xb   :  { %v293_v36 = vpack.c.bf16 %v125_v33, %v124_v32  ;;  %v126_v37 = vsel %vm94_vm2, %v78_v24, %v110_v30  ;;  %v127_v38 = vsel %vm95_vm3, %v79_v25, %v111_v31  ;;  %v112_v39 = vmul.f32 0.1, %v80_v26 }
   0xc   :  { %v298_v40 = vpack.c.bf16 %v127_v38, %v126_v37  ;;  %v113_v41 = vmul.f32 0.1, %v81_v27  ;;  %v276_v45 = vunpack.c.l.bf16 %v333_v34  ;;  %v277_v46 = vunpack.c.h.bf16 %v333_v34 }
   0xd   :  { %294 = vst [vmem:[%s458_s3] sm:$0xff] %v293_v36   ;;  %v128_v44 = vsel %vm96_vm4, %v80_v26, %v112_v39  ;;  %v280_v47 = vunpack.c.l.bf16 %v334_v35  ;;  %vm98_vm6 = vcmp.gt.f32.partialorder %v82_v42, 0.0  ;;  %vm99_vm7 = vcmp.gt.f32.partialorder %v83_v43, 0.0 }
   0xe   :  { %337 = vst [vmem:[%s458_s3 + $0x8] sm:$0xff] %v298_v40   ;;  %v129_v49 = vsel %vm97_vm5, %v81_v27, %v113_v41  ;;  %v114_v50 = vmul.f32 0.1, %v82_v42  ;;  %v115_v52 = vmul.f32 0.1, %v83_v43  ;;  %v61_v53 = vmul.f32 %v276_v45, %v370_v1 }
   0xf   :  { %v303_v51 = vpack.c.bf16 %v129_v49, %v128_v44  ;;  %v62_v54 = vmul.f32 %v277_v46, %v370_v1  ;;  %v281_v56 = vunpack.c.h.bf16 %v334_v35  ;;  %v63_v57 = vmul.f32 %v280_v47, %v370_v1 }
  0x10   :  { %v130_v55 = vsel %vm98_vm6, %v82_v42, %v114_v50  ;;  %v284_v58 = vunpack.c.l.bf16 %v335_v48  ;;  %v131_v59 = vsel %vm99_vm7, %v83_v43, %v115_v52  ;;  %v84_v60 = vadd.f32 %v384_v7, %v61_v53 }
  0x11   :  { %338 = vst [vmem:[%s458_s3 + $0x10] sm:$0xff] %v303_v51   ;;  %v85_v61 = vadd.f32 %v384_v7, %v62_v54  ;;  %v285_v62 = vunpack.c.h.bf16 %v335_v48  ;;  %v308_v63 = vpack.c.bf16 %v131_v59, %v130_v55  ;;  %v64_v0 = vmul.f32 %v281_v56, %v370_v1 }
  0x12   :  { %v86_v2 = vadd.f32 %v384_v7, %v63_v57  ;;  %v65_v3 = vmul.f32 %v284_v58, %v370_v1  ;;  %vm100_vm8 = vcmp.gt.f32.partialorder %v84_v60, 0.0  ;;  %v116_v5 = vmul.f32 0.1, %v84_v60 }
  0x13   :  { %vm101_vm9 = vcmp.gt.f32.partialorder %v85_v61, 0.0  ;;  %v117_v6 = vmul.f32 0.1, %v85_v61  ;;  %339 = vst [vmem:[%s458_s3 + $0x18] sm:$0xff] %v308_v63   ;;  %v87_v8 = vadd.f32 %v384_v7, %v64_v0  ;;  %v66_v10 = vmul.f32 %v285_v62, %v370_v1 }
  0x14   :  { %vm102_vm10 = vcmp.gt.f32.partialorder %v86_v2, 0.0  ;;  %v118_v9 = vmul.f32 0.1, %v86_v2  ;;  %v132_v11 = vsel %vm100_vm8, %v84_v60, %v116_v5  ;;  %v88_v13 = vadd.f32 %v384_v7, %v65_v3 }
  0x15   :  { %v133_v12 = vsel %vm101_vm9, %v85_v61, %v117_v6  ;;  %v288_v14 = vunpack.c.l.bf16 %v336_v4  ;;  %vm103_vm11 = vcmp.gt.f32.partialorder %v87_v8, 0.0  ;;  %v119_v16 = vmul.f32 0.1, %v87_v8 }
  0x16   :  { %v313_v15 = vpack.c.bf16 %v133_v12, %v132_v11  ;;  %v134_v17 = vsel %vm102_vm10, %v86_v2, %v118_v9  ;;  %v89_v18 = vadd.f32 %v384_v7, %v66_v10  ;;  %vm104_vm12 = vcmp.gt.f32.partialorder %v88_v13, 0.0 }
  0x17   :  { %v120_v19 = vmul.f32 0.1, %v88_v13  ;;  %v289_v20 = vunpack.c.h.bf16 %v336_v4  ;;  %v135_v21 = vsel %vm103_vm11, %v87_v8, %v119_v16  ;;  %v67_v22 = vmul.f32 %v288_v14, %v370_v1 }
  0x18   :  { %340 = vst [vmem:[%s458_s3 + $0x20] sm:$0xff] %v313_v15   ;;  %v318_v23 = vpack.c.bf16 %v135_v21, %v134_v17  ;;  %vm105_vm13 = vcmp.gt.f32.partialorder %v89_v18, 0.0  ;;  %v121_v24 = vmul.f32 0.1, %v89_v18 }
  0x19   :  { %v136_v25 = vsel %vm104_vm12, %v88_v13, %v120_v19  ;;  %v68_v26 = vmul.f32 %v289_v20, %v370_v1  ;;  %v90_v27 = vadd.f32 %v384_v7, %v67_v22 }
  0x1a   :  { %341 = vst [vmem:[%s458_s3 + $0x28] sm:$0xff] %v318_v23   ;;  %v137_v28 = vsel %vm105_vm13, %v89_v18, %v121_v24 }
  0x1b   :  { %v323_v29 = vpack.c.bf16 %v137_v28, %v136_v25  ;;  %v91_v30 = vadd.f32 %v384_v7, %v68_v26  ;;  %vm106_vm14 = vcmp.gt.f32.partialorder %v90_v27, 0.0  ;;  %v122_v31 = vmul.f32 0.1, %v90_v27 }
  0x1d   :  { %342 = vst [vmem:[%s458_s3 + $0x30] sm:$0xff] %v323_v29   ;;  %vm107_vm15 = vcmp.gt.f32.partialorder %v91_v30, 0.0  ;;  %v123_v32 = vmul.f32 0.1, %v91_v30  ;;  %v138_v33 = vsel %vm106_vm14, %v90_v27, %v122_v31 }
  0x1f   :  { %v139_v1 = vsel %vm107_vm15, %v91_v30, %v123_v32 }
  0x20   :  { %v328_v34 = vpack.c.bf16 %v139_v1, %v138_v33 }
  0x22   :  { %343 = vst [vmem:[%s458_s3 + $0x38] sm:$0xff] %v328_v34  }

// kernel: _lambda_.16
= control target key start
LH: loop header
LB: loop body
LE: loop exit
PB: predicated region body
PF: predicated region fallthrough
CT: control target
= control target key end

     0   :  { %s674_s12 = smov 0   ;;  %s732_s0 = inlined_call_operand.vmem [shape: bf16[2,8,8,128], index: 0, kind: input, shape index: {}]   ;;  %s733_s1 = inlined_call_operand.vmem [shape: bf16[128,128], index: 1, kind: input, shape index: {}]   ;;  %s734_s2 = inlined_call_operand.vmem [shape: bf16[2,64,128], index: 2, kind: output, shape index: {0}]   ;;  %s735_s3 = inlined_call_operand.vmem [shape: f32[2,8,128], index: 3, kind: output, shape index: {1}]  }
   0x1 LB: > { %s509_s13 = sadd.s32 4294967295, %s652_s12   ;;  %p513_p0 = scmp.ge.s32.totalorder %s652_s12, 1  ;;  %s652_s12 = sphi %s674_s12, %s14_s12  }
   0x2   : > { %p140_p1 = scmp.lt.s32.totalorder %s652_s12, 3 }
   0x4   : > { %p141_p2 = pnand %p513_p0, %p140_p1 }
   0x5   : > { %p168_p3 = scmp.lt.s32.totalorder (!%p141_p2), %s509_s13, 1 }
   0x6   : > { %144 = sbr.rel (%p141_p2) target bundleno = 274 (0x112), region = 28 }
   0xb   : > { %v634_v0 = vld [vmem:[%s733_s1 + $0x38] sm:$0xff]   ;;  %v635_v1 = vld [vmem:[%s733_s1 + $0x30] sm:$0xff]   ;;  %s737_s13 = smov (!%p168_p3, %s509_s13), 1  ;;  %v636_v2 = vld [vmem:[%s733_s1 + $0x28] sm:$0xff]   ;;  %vm418_vm0 = vcmask 1040384   ;;  %vm420_vm1 = vcmask 1041408  }
   0xc   : > { %586 = vmatprep.subr.bf16.mxu0 %v634_v0  ;;  %610 = vmatprep.subr.bf16.mxu1 %v634_v0  ;;  %s541_s20 = sshll.u32 %s737_s13, 5  ;;  %v637_v3 = vld [vmem:[%s733_s1 + $0x20] sm:$0xff]   ;;  %v638_v6 = vld [vmem:[%s733_s1 + $0x18] sm:$0xff]   ;;  %v639_v7 = vld [vmem:[%s733_s1 + $0x10] sm:$0xff]   ;;  %s518_s10 = sshll.u32 %s737_s13, 3 }
   0xd   : > { %587 = vmatpush3.bf16.msra.mxu0 %v634_v0  ;;  %618 = vmatpush3.bf16.msra.mxu1 %v634_v0  ;;  %s699_s23 = scalar_lea.vmem %s732_s0, %s541_s20  ;;  %v640_v8 = vld [vmem:[%s733_s1 + $0x8] sm:$0xff]   ;;  %v641_v9 = vld [vmem:[%s733_s1] sm:$0xff]   ;;  %s177_s9 = scalar_lea.vmem %s734_s2, %s541_s20 }
   0xe   : > { %588 = vmatprep.subr.bf16.mxu0 %v635_v1  ;;  %611 = vmatprep.subr.bf16.mxu1 %v635_v1  ;;  %v642_v4 = vld [vmem:[%s699_s23] sm:$0xff]   ;;  %v644_v5 = vld [vmem:[%s699_s23 + $0x10] sm:$0xff]   ;;  %v643_v10 = vld [vmem:[%s699_s23 + $0x8] sm:$0xff]   ;;  %s181_s15 = scalar_lea.vmem %s735_s3, %s518_s10 }
   0xf   : > { %602 = vmatprep.mubr.bf16.mxu0 %v642_v4  ;;  %606 = vmatprep.mubr.bf16.mxu1 %v644_v5  ;;  %v645_v11 = vld [vmem:[%s699_s23 + $0x18] sm:$0xff]  }
  0x11   : > { %589 = vmatpush3.bf16.msra.mxu0 %v635_v1  ;;  %619 = vmatpush3.bf16.msra.mxu1 %v635_v1 }
  0x12   : > { %590 = vmatprep.subr.bf16.mxu0 %v636_v2  ;;  %612 = vmatprep.subr.bf16.mxu1 %v636_v2 }
  0x15   : > { %591 = vmatpush3.bf16.msra.mxu0 %v636_v2  ;;  %620 = vmatpush3.bf16.msra.mxu1 %v636_v2 }
  0x16   : > { %592 = vmatprep.subr.bf16.mxu0 %v637_v3  ;;  %613 = vmatprep.subr.bf16.mxu1 %v637_v3 }
  0x19   : > { %593 = vmatpush3.bf16.msra.mxu0 %v637_v3  ;;  %621 = vmatpush3.bf16.msra.mxu1 %v637_v3 }
  0x1a   : > { %594 = vmatprep.subr.bf16.mxu0 %v638_v6  ;;  %614 = vmatprep.subr.bf16.mxu1 %v638_v6 }
  0x1d   : > { %595 = vmatpush3.bf16.msra.mxu0 %v638_v6  ;;  %622 = vmatpush3.bf16.msra.mxu1 %v638_v6 }
  0x1e   : > { %596 = vmatprep.subr.bf16.mxu0 %v639_v7  ;;  %615 = vmatprep.subr.bf16.mxu1 %v639_v7 }
  0x21   : > { %597 = vmatpush3.bf16.msra.mxu0 %v639_v7  ;;  %623 = vmatpush3.bf16.msra.mxu1 %v639_v7 }
  0x22   : > { %598 = vmatprep.subr.bf16.mxu0 %v640_v8  ;;  %616 = vmatprep.subr.bf16.mxu1 %v640_v8 }
  0x25   : > { %599 = vmatpush3.bf16.msra.mxu0 %v640_v8  ;;  %624 = vmatpush3.bf16.msra.mxu1 %v640_v8 }
  0x26   : > { %600 = vmatprep.subr.bf16.mxu0 %v641_v9  ;;  %617 = vmatprep.subr.bf16.mxu1 %v641_v9 }
  0x29   : > { %601 = vmatpush3.bf16.msra.mxu0 %v641_v9  ;;  %625 = vmatpush3.bf16.msra.mxu1 %v641_v9 }
  0x2c   : > { %603 = vmatmul.mubr.bf16.vlgmr.msra.gmra.mxu0 %v643_v10  ;;  %607 = vmatmul.mubr.bf16.vlgmr.msra.gmra.mxu1 %v645_v11 }
  0xec   : > { %v604_v12 = vpop.f32.mrf.mxu0  ;;  %v608_v13 = vpop.f32.mrf.mxu1 }
  0xed   : > { %v399_v27 = vmul.f32 %v604_v12, %v604_v12  ;;  %v403_v39 = vmul.f32 %v608_v13, %v608_v13 }
  0xee   : > { %v313_v14 = vpop.f32.mrf.mxu0  ;;  %v329_v15 = vpop.f32.mrf.mxu1 }
  0xef   : > { %v397_v20 = vmul.f32 %v313_v14, %v313_v14  ;;  %v401_v33 = vmul.f32 %v329_v15, %v329_v15 }
  0xf0   : > { %v605_v16 = vpop.f32.mrf.mxu0  ;;  %v609_v17 = vpop.f32.mrf.mxu1 }
  0xf1   : > { %v559_v18 = vpack.c.bf16 %v605_v16, %v604_v12  ;;  %v569_v19 = vpack.c.bf16 %v609_v17, %v608_v13  ;;  %v400_v30 = vmul.f32 %v605_v16, %v605_v16  ;;  %v404_v42 = vmul.f32 %v609_v17, %v609_v17 }
  0xf2   : > { %v316_v21 = vpop.f32.mrf.mxu0  ;;  %v332_v22 = vpop.f32.mrf.mxu1 }
  0xf3   : > { %571 = vst [vmem:[%s177_s9 + $0x8] sm:$0xff] %v559_v18   ;;  %v554_v23 = vpack.c.bf16 %v316_v21, %v313_v14  ;;  %v384_v24 = vadd.f32 %v316_v21, %v313_v14  ;;  %v398_v25 = vmul.f32 %v316_v21, %v316_v21  ;;  %573 = vst [vmem:[%s177_s9 + $0x18] sm:$0xff] %v569_v19  }
  0xf4   : > { %v564_v26 = vpack.c.bf16 %v332_v22, %v329_v15  ;;  %v402_v37 = vmul.f32 %v332_v22, %v332_v22 }
  0xf5   : > { %555 = vst [vmem:[%s177_s9] sm:$0xff] %v554_v23   ;;  %v385_v28 = vadd.f32 %v604_v12, %v384_v24  ;;  %v405_v29 = vadd.f32 %v398_v25, %v397_v20 }
  0xf6   : > { %572 = vst [vmem:[%s177_s9 + $0x10] sm:$0xff] %v564_v26  }
  0xf7   : > { %v406_v31 = vadd.f32 %v405_v29, %v399_v27  ;;  %v386_v32 = vadd.f32 %v605_v16, %v385_v28 }
  0xf9   : > { %v387_v34 = vadd.f32 %v386_v32, %v329_v15  ;;  %v407_v35 = vadd.f32 %v406_v31, %v400_v30 }
  0xfb   : > { %v388_v36 = vadd.f32 %v387_v34, %v332_v22  ;;  %v408_v38 = vadd.f32 %v407_v35, %v401_v33 }
  0xfd   : > { %v389_v40 = vadd.f32 %v608_v13, %v388_v36  ;;  %v409_v41 = vadd.f32 %v408_v38, %v402_v37 }
  0xff   : > { %v390_v43 = vadd.f32 %v609_v17, %v389_v40  ;;  %v410_v44 = vadd.f32 %v409_v41, %v403_v39 }
 0x101   : > { %v391_v45 = vrot.slane %v390_v43, 4  ;;  %v411_v46 = vadd.f32 %v410_v44, %v404_v42 }
 0x103   : > { %v392_v47 = vadd.f32 %v391_v45, %v390_v43  ;;  %v412_v48 = vrot.slane %v411_v46, 4 }
 0x105   : > { %v393_v49 = vrot.slane %v392_v47, 2  ;;  %v413_v50 = vadd.f32 %v412_v48, %v411_v46 }
 0x107   : > { %v394_v51 = vadd.f32 %v393_v49, %v392_v47  ;;  %v414_v52 = vrot.slane %v413_v50, 2 }
 0x109   : > { %v395_v53 = vrot.slane %v394_v51, 1  ;;  %v415_v54 = vadd.f32 %v414_v52, %v413_v50 }
 0x10b   : > { %v416_v55 = vrot.slane %v415_v54, 1  ;;  %v396_v56 = vadd.f32 %v395_v53, %v394_v51 }
 0x10d   : > { %v417_v57 = vadd.f32 %v416_v55, %v415_v54 }
 0x10f   : > { %v419_v58 = vsel %vm418_vm0, %v396_v56, %v417_v57 }
 0x110   : > { %v421_v59 = vsel %vm420_vm1, %v419_v58, 0.0 }
 0x111   : > { %422 = vst [vmem:[%s181_s15] sm:$0xff] %v421_v59 }
 0x112 PF: > { %s14_s12 = sadd.s32 1, %s652_s12  }
 0x113   : > { %p11_p4 = scmp.ge.s32.totalorder %s14_s12, 4  }
 0x115   :  { %13 = sbr.rel (!%p11_p4) target bundleno = 1 (0x1), region = 70 }

// kernel: _lambda_.14
= control target key start
LH: loop header
LB: loop body
LE: loop exit
PB: predicated region body
PF: predicated region fallthrough
CT: control target
= control target key end

     0   :  { %s2244_s12 = smov 0   ;;  %s2763_s0 = inlined_call_operand.vmem [shape: bf16[8,9,9,128], index: 0, kind: input, shape index: {}]   ;;  %s2764_s1 = inlined_call_operand.vmem [shape: bf16[1152,128], index: 1, kind: input, shape index: {}]   ;;  %s2765_s2 = inlined_call_operand.vmem [shape: bf16[2,64,128], index: 2, kind: output, shape index: {0}]   ;;  %s2766_s3 = inlined_call_operand.vmem [shape: f32[2,8,128], index: 3, kind: output, shape index: {1}]  }
   0x1 LB: > { %s2250_s13 = sadd.s32 4294967295, %s2222_s12   ;;  %p1710_p0 = scmp.ge.s32.totalorder %s2222_s12, 1  ;;  %s2222_s12 = sphi %s2244_s12, %s14_s12  }
   0x2   : > { %p142_p1 = scmp.lt.s32.totalorder %s2222_s12, 3 }
   0x4   : > { %p143_p2 = pnand %p1710_p0, %p142_p1 }
   0x6   : > { %146 = sbr.rel (%p143_p2) target bundleno = 341 (0x155), region = 28 }
   0xb   : > { %v2120_v0 = vld [vmem:[%s2764_s1 + $0x78] sm:$0xff]   ;;  %v2124_v4 = vld [vmem:[%s2764_s1 + $0x70] sm:$0xff]   ;;  %v2128_v8 = vld [vmem:[%s2764_s1 + $0x68] sm:$0xff]   ;;  %s1711_s21 = sshll.u32 %s2250_s13, 2  ;;  %vm216_vm0 = vsmask.f32 3328 }
   0xc   : > { %v2121_v1 = vld [vmem:[%s2764_s1 + $0xf8] sm:$0xff]   ;;  %1899 = vmatprep.subr.bf16.mxu0 %v2120_v0  ;;  %v2125_v5 = vld [vmem:[%s2764_s1 + $0xf0] sm:$0xff]   ;;  %v2129_v9 = vld [vmem:[%s2764_s1 + $0xe8] sm:$0xff]   ;;  %p172_p3 = scmp.lt.s32.totalorder %s1711_s21, 7  ;;  %vm217_vm1 = vsmask.f32 7440 }
   0xd   : > { %v2122_v2 = vld [vmem:[%s2764_s1 + $0x38] sm:$0xff]   ;;  %1939 = vmatprep.subr.bf16.mxu1 %v2121_v1  ;;  %v2126_v6 = vld [vmem:[%s2764_s1 + $0x30] sm:$0xff]   ;;  %v2130_v10 = vld [vmem:[%s2764_s1 + $0x28] sm:$0xff]   ;;  %p178_p4 = scmp.lt.s32.totalorder %s2250_s13, 1  ;;  %vm1615_vm3 = vcmask 1040384   ;;  %vm1617_vm4 = vcmask 1041408  }
   0xe   : > { %v2123_v3 = vld [vmem:[%s2764_s1 + $0xb8] sm:$0xff]   ;;  %1900 = vmatpush3.bf16.msra.mxu0 %v2122_v2  ;;  %v2127_v7 = vld [vmem:[%s2764_s1 + $0xb0] sm:$0xff]   ;;  %v2131_v11 = vld [vmem:[%s2764_s1 + $0xa8] sm:$0xff]   ;;  %s2774_s21 = smov (!%p172_p3, %s1711_s21), 7 }
   0xf   : > { %1940 = vmatpush3.bf16.msra.mxu1 %v2123_v3  ;;  %1901 = vmatprep.subr.bf16.mxu0 %v2124_v4  ;;  %v2132_v12 = vld [vmem:[%s2764_s1 + $0x60] sm:$0xff]   ;;  %v2136_v16 = vld [vmem:[%s2764_s1 + $0x58] sm:$0xff]   ;;  %v2140_v20 = vld [vmem:[%s2764_s1 + $0x50] sm:$0xff]   ;;  %s2111_s19 = smul.u32 72, %s2774_s21  ;;  %s2776_s13 = smov (!%p178_p4, %s2250_s13), 1 }
  0x10   : > { %1941 = vmatprep.subr.bf16.mxu1 %v2125_v5  ;;  %v2133_v13 = vld [vmem:[%s2764_s1 + $0xe0] sm:$0xff]   ;;  %v2137_v17 = vld [vmem:[%s2764_s1 + $0xd8] sm:$0xff]   ;;  %v2141_v21 = vld [vmem:[%s2764_s1 + $0xd0] sm:$0xff]  }
  0x11   : > { %v2134_v14 = vld [vmem:[%s2764_s1 + $0x20] sm:$0xff]   ;;  %v2138_v18 = vld [vmem:[%s2764_s1 + $0x18] sm:$0xff]   ;;  %v2142_v22 = vld [vmem:[%s2764_s1 + $0x10] sm:$0xff]   ;;  %s2351_s30 = scalar_lea.vmem %s2763_s0, %s2111_s19  ;;  %s1715_s19 = sshll.u32 %s2776_s13, 3 }
  0x12   : > { %1902 = vmatpush3.bf16.msra.mxu0 %v2126_v6  ;;  %v2135_v15 = vld [vmem:[%s2764_s1 + $0xa0] sm:$0xff]   ;;  %v2139_v19 = vld [vmem:[%s2764_s1 + $0x98] sm:$0xff]   ;;  %v2143_v23 = vld [vmem:[%s2764_s1 + $0x90] sm:$0xff]   ;;  %s186_s23 = scalar_lea.vmem %s2766_s3, %s1715_s19 }
  0x13   : > { %1942 = vmatpush3.bf16.msra.mxu1 %v2127_v7  ;;  %1903 = vmatprep.subr.bf16.mxu0 %v2128_v8  ;;  %v2144_v24 = vld [vmem:[%s2764_s1 + $0x48] sm:$0xff]   ;;  %v2148_v28 = vld [vmem:[%s2764_s1 + $0x40] sm:$0xff]   ;;  %v2358_v33 = vld [vmem:[%s2351_s30 + $0x50] sm:$0xf] }
  0x14   : > { %1943 = vmatprep.subr.bf16.mxu1 %v2129_v9  ;;  %v2145_v25 = vld [vmem:[%s2764_s1 + $0xc8] sm:$0xff]   ;;  %v2149_v29 = vld [vmem:[%s2764_s1 + $0xc0] sm:$0xff]   ;;  %v2362_v35 = vld [vmem:[%s2351_s30 + $0x90] sm:$0xf] }
  0x15   : > { %v2146_v26 = vld [vmem:[%s2764_s1 + $0x8] sm:$0xff]   ;;  %v2150_v30 = vld [vmem:[%s2764_s1] sm:$0xff]   ;;  %v2365_v36 = vld [vmem:[%s2351_s30 + $0x98] sm:$0xf] }
  0x16   : > { %1904 = vmatpush3.bf16.msra.mxu0 %v2130_v10  ;;  %v2147_v27 = vld [vmem:[%s2764_s1 + $0x88] sm:$0xff]   ;;  %v2151_v31 = vld [vmem:[%s2764_s1 + $0x80] sm:$0xff]   ;;  %v1761_v39 = vcombine.low %v2362_v35, %v2365_v36  ;;  %v2156_v43 = vld [vmem:[%s2764_s1 + $0x178] sm:$0xff]  }
  0x17   : > { %1944 = vmatpush3.bf16.msra.mxu1 %v2131_v11  ;;  %1905 = vmatprep.subr.bf16.mxu0 %v2132_v12  ;;  %v1716_v32 = vld [vmem:[%s2351_s30 + $0x48] sm:$0xf]  ;;  %v188_v37 = vld [vmem:[%s2351_s30] sm:$0xf]  ;;  %v207_v44 = vld [vmem:[%s2351_s30 + $0x4] sm:$0x1] }
  0x18   : > { %1945 = vmatprep.subr.bf16.mxu1 %v2133_v13  ;;  %v1753_v34 = vcombine.low %v1716_v32, %v2358_v33  ;;  %v2369_v38 = vld [vmem:[%s2351_s30 + $0x8] sm:$0xf]  ;;  %v220_v40 = vshrl.u32 %v188_v37, 16  ;;  %v223_v41 = vshll.u32 %v188_v37, 16  ;;  %v208_v45 = vld [vmem:[%s2351_s30 + $0xc] sm:$0x1]  ;;  %1313 = vmatprep.mubr.bf16.mxu1 %v1761_v39  ;;  %vm2387_vm2 = vmor %vm216_vm0, %vm217_vm1 }
  0x19   : > { %v234_v42 = vshrl.u32 %v2369_v38, 16  ;;  %v237_v48 = vshll.u32 %v2369_v38, 16  ;;  %v1749_v49 = vcombine.low %v188_v37, %v2369_v38  ;;  %v2157_v50 = vld [vmem:[%s2764_s1 + $0x1f8] sm:$0xff]   ;;  %v229_v52 = vshll.u32 %v207_v44, 16  ;;  %v2160_v63 = vld [vmem:[%s2764_s1 + $0x170] sm:$0xff]  }
  0x1a   : > { %1906 = vmatpush3.bf16.msra.mxu0 %v2134_v14  ;;  %1248 = vmatprep.mubr.bf16.mxu0 %v1753_v34  ;;  %v222_v46 = vrot.slane %v220_v40, 4  ;;  %v225_v47 = vrot.slane %v223_v41, 5  ;;  %v2158_v55 = vld [vmem:[%s2764_s1 + $0x138] sm:$0xff]   ;;  %v243_v57 = vshll.u32 %v208_v45, 16  ;;  %v2162_v4 = vld [vmem:[%s2764_s1 + $0x130] sm:$0xff]   ;;  %v358_v12 = vshrl.u32 %v2362_v35, 16 }
  0x1b   : > { %1946 = vmatpush3.bf16.msra.mxu1 %v2135_v15  ;;  %1907 = vmatprep.subr.bf16.mxu0 %v2136_v16  ;;  %v236_v53 = vrot.slane %v234_v42, 4  ;;  %v239_v54 = vrot.slane %v237_v48, 5  ;;  %v231_v59 = vrot.slane %v229_v52, 5  ;;  %v2392_v61 = vld [vmem:[%s2351_s30 + $0x58] sm:$0xf]  ;;  %v2161_v6 = vld [vmem:[%s2764_s1 + $0x1f0] sm:$0xff]  }
  0x1c   : > { %1947 = vmatprep.subr.bf16.mxu1 %v2137_v17  ;;  %v226_v51 = vor.u32 %v225_v47, %v222_v46  ;;  %v245_v62 = vrot.slane %v243_v57, 5  ;;  %v2159_v2 = vld [vmem:[%s2764_s1 + $0x1b8] sm:$0xff]   ;;  %v2414_v7 = vld [vmem:[%s2351_s30 + $0x60] sm:$0xf]  ;;  %v2422_v10 = vld [vmem:[%s2351_s30 + $0xa8] sm:$0xf] }
  0x1d   : > { %v240_v60 = vor.u32 %v239_v54, %v236_v53  ;;  %v1754_v8 = vcombine.low %v2392_v61, %v2414_v7  ;;  %v2419_v9 = vld [vmem:[%s2351_s30 + $0xa0] sm:$0xf]  ;;  %v2425_v11 = vld [vmem:[%s2351_s30 + $0x10] sm:$0xf]  ;;  %v361_v13 = vshll.u32 %v2362_v35, 16  ;;  %v2170_v40 = vld [vmem:[%s2764_s1 + $0x1a8] sm:$0xff]  }
  0x1e   : > { %1908 = vmatpush3.bf16.msra.mxu0 %v2138_v18  ;;  %v227_v58 = vrot.slane %v226_v51, 4  ;;  %v2163_v14 = vld [vmem:[%s2764_s1 + $0x1b0] sm:$0xff]   ;;  %v2433_v15 = vld [vmem:[%s2351_s30 + $0x18] sm:$0xf]  ;;  %v1762_v16 = vcombine.low %v2419_v9, %v2422_v10  ;;  %v248_v17 = vshrl.u32 %v2425_v11, 16  ;;  %v251_v18 = vshll.u32 %v2425_v11, 16 }
  0x1f   : > { %1948 = vmatpush3.bf16.msra.mxu1 %v2139_v19  ;;  %1909 = vmatprep.subr.bf16.mxu0 %v2140_v20  ;;  %v241_v1 = vrot.slane %v240_v60, 4  ;;  %v262_v19 = vshrl.u32 %v2433_v15, 16  ;;  %v209_v20 = vld [vmem:[%s2351_s30 + $0x14] sm:$0x1]  ;;  %v2171_v45 = vld [vmem:[%s2764_s1 + $0x160] sm:$0xff]   ;;  %v403_v51 = vshll.u32 %v2422_v10, 16 }
  0x20   : > { %1949 = vmatprep.subr.bf16.mxu1 %v2141_v21  ;;  %v232_v0 = vsel %vm2387_vm2, %v227_v58, %v231_v59  ;;  %v2167_v21 = vld [vmem:[%s2764_s1 + $0x168] sm:$0xff]   ;;  %v257_v32 = vshll.u32 %v209_v20, 16  ;;  %v2172_v48 = vld [vmem:[%s2764_s1 + $0x1e0] sm:$0xff]   ;;  %v2489_v57 = vld [vmem:[%s2351_s30 + $0x70] sm:$0xf]  ;;  %v2497_v60 = vrot.slane %v358_v12, 4 }
  0x21   : > { %v2404_v3 = vsel %vm2387_vm2, %v241_v1, %v245_v62  ;;  %v264_v34 = vrot.slane %v262_v19, 4  ;;  %v2174_v53 = vld [vmem:[%s2764_s1 + $0x1a0] sm:$0xff]   ;;  %v2484_v54 = vld [vmem:[%s2351_s30 + $0x68] sm:$0xf]  ;;  %v2492_v58 = vld [vmem:[%s2351_s30 + $0xb0] sm:$0xf] }
  0x22   : > { %1910 = vmatpush3.bf16.msra.mxu0 %v2142_v22  ;;  %v1757_v5 = vcombine.low %v232_v0, %v2404_v3  ;;  %v372_v22 = vshrl.u32 %v2365_v36, 16  ;;  %v259_v41 = vrot.slane %v257_v32, 5  ;;  %v2495_v59 = vld [vmem:[%s2351_s30 + $0xb8] sm:$0xf]  ;;  %v2499_v62 = vrot.slane %v361_v13, 5 }
  0x23   : > { %1950 = vmatpush3.bf16.msra.mxu1 %v2143_v23  ;;  %1911 = vmatprep.subr.bf16.mxu0 %v2144_v24  ;;  %v375_v23 = vshll.u32 %v2365_v36, 16  ;;  %v386_v24 = vshrl.u32 %v2419_v9, 16  ;;  %v2169_v36 = vld [vmem:[%s2764_s1 + $0x128] sm:$0xff]   ;;  %v1755_v0 = vcombine.low %v2484_v54, %v2489_v57  ;;  %v2506_v1 = vld [vmem:[%s2351_s30 + $0x20] sm:$0xf] }
  0x24   : > { %1951 = vmatprep.subr.bf16.mxu1 %v2145_v25  ;;  %v389_v25 = vshll.u32 %v2419_v9, 16  ;;  %v279_v9 = vshll.u32 %v2506_v1, 16 }
  0x25   : > { %v2523_v12 = vrot.slane %v386_v24, 4 }
  0x26   : > { %1912 = vmatpush3.bf16.msra.mxu0 %v2146_v26  ;;  %v210_v26 = vld [vmem:[%s2351_s30 + $0x1c] sm:$0x1]  ;;  %v2525_v13 = vrot.slane %v389_v25, 5  ;;  %v281_v24 = vrot.slane %v279_v9, 5 }
  0x27   : > { %1952 = vmatpush3.bf16.msra.mxu1 %v2147_v27  ;;  %1913 = vmatprep.subr.bf16.mxu0 %v2148_v28  ;;  %v265_v27 = vshll.u32 %v2433_v15, 16  ;;  %v1750_v28 = vcombine.low %v2425_v11, %v2433_v15  ;;  %v271_v35 = vshll.u32 %v210_v26, 16 }
  0x28   : > { %1953 = vmatprep.subr.bf16.mxu1 %v2149_v29  ;;  %v250_v29 = vrot.slane %v248_v17, 4  ;;  %v211_v17 = vld [vmem:[%s2351_s30 + $0x24] sm:$0x1] }
  0x29   : > { %v267_v39 = vrot.slane %v265_v27, 5  ;;  %v273_v42 = vrot.slane %v271_v35, 5  ;;  %v285_v25 = vshll.u32 %v211_v17, 16 }
  0x2a   : > { %1914 = vmatpush3.bf16.msra.mxu0 %v2150_v30  ;;  %v253_v30 = vrot.slane %v251_v18, 5  ;;  %v2531_v18 = vrot.slane %v403_v51, 5  ;;  %v428_v51 = vshrl.u32 %v2495_v59, 16 }
  0x2b   : > { %1954 = vmatpush3.bf16.msra.mxu1 %v2151_v31  ;;  %1979 = vmatprep.subr.bf16.mxu0 %v2156_v43  ;;  %v2168_v31 = vld [vmem:[%s2764_s1 + $0x1e8] sm:$0xff]   ;;  %v268_v44 = vor.u32 %v267_v39, %v264_v34  ;;  %v2183_v39 = vld [vmem:[%s2764_s1 + $0x1d0] sm:$0xff]  }
  0x2c   : > { %2019 = vmatprep.subr.bf16.mxu1 %v2157_v50  ;;  %v254_v37 = vor.u32 %v253_v30, %v250_v29  ;;  %v2173_v50 = vld [vmem:[%s2764_s1 + $0x120] sm:$0xff]   ;;  %v2181_v29 = vld [vmem:[%s2764_s1 + $0x198] sm:$0xff]  }
  0x2d   : > { %1249 = vmatmul.mubr.bf16.vlgmr.msra.gmra.mxu0 %v1749_v49  ;;  %v269_v47 = vrot.slane %v268_v44, 4  ;;  %v400_v49 = vshrl.u32 %v2422_v10, 16  ;;  %v2179_v10 = vld [vmem:[%s2764_s1 + $0x1d8] sm:$0xff]  }
  0x2e   : > { %1980 = vmatpush3.bf16.msra.mxu0 %v2158_v55  ;;  %1314 = vmatmul.mubr.bf16.vlgmr.msra.gmra.mxu1 %v1757_v5  ;;  %v255_v43 = vrot.slane %v254_v37, 4  ;;  %v1763_v5 = vcombine.low %v2492_v58, %v2495_v59 }
  0x2f   : > { %1981 = vmatprep.subr.bf16.mxu0 %v2160_v63  ;;  %2020 = vmatpush3.bf16.msra.mxu1 %v2159_v2  ;;  %v2478_v52 = vsel %vm2387_vm2, %v269_v47, %v273_v42  ;;  %v2501_v63 = vrot.slane %v372_v22, 4  ;;  %v2178_v2 = vld [vmem:[%s2764_s1 + $0x158] sm:$0xff]   ;;  %v2184_v42 = vld [vmem:[%s2764_s1 + $0x110] sm:$0xff]  }
  0x30   : > { %1256 = vmatprep.mubr.bf16.mxu0 %v1754_v8  ;;  %2021 = vmatprep.subr.bf16.mxu1 %v2161_v6  ;;  %v2466_v46 = vsel %vm2387_vm2, %v255_v43, %v259_v41  ;;  %v2516_v6 = vld [vmem:[%s2351_s30 + $0x28] sm:$0xf]  ;;  %v276_v8 = vshrl.u32 %v2506_v1, 16  ;;  %v417_v43 = vshll.u32 %v2492_v58, 16 }
  0x31   : > { %1321 = vmatprep.mubr.bf16.mxu1 %v1762_v16  ;;  %v1758_v55 = vcombine.low %v2466_v46, %v2478_v52  ;;  %v290_v16 = vshrl.u32 %v2516_v6, 16  ;;  %v293_v19 = vshll.u32 %v2516_v6, 16  ;;  %v1751_v20 = vcombine.low %v2506_v1, %v2516_v6 }
  0x32   : > { %1982 = vmatpush3.bf16.msra.mxu0 %v2162_v4  ;;  %v2511_v4 = vrot.slane %v375_v23, 5  ;;  %v278_v22 = vrot.slane %v276_v8, 4  ;;  %v2180_v23 = vld [vmem:[%s2764_s1 + $0x118] sm:$0xff]   ;;  %v419_v17 = vrot.slane %v417_v43, 5 }
  0x33   : > { %1983 = vmatprep.subr.bf16.mxu0 %v2167_v21  ;;  %2022 = vmatpush3.bf16.msra.mxu1 %v2163_v14  ;;  %v2527_v14 = vrot.slane %v400_v49, 4  ;;  %v212_v21 = vld [vmem:[%s2351_s30 + $0x2c] sm:$0x1]  ;;  %v292_v26 = vrot.slane %v290_v16, 4  ;;  %v2571_v49 = vld [vmem:[%s2351_s30 + $0x80] sm:$0xf] }
  0x34   : > { %2023 = vmatprep.subr.bf16.mxu1 %v2168_v31  ;;  %v299_v27 = vshll.u32 %v212_v21, 16  ;;  %v282_v30 = vor.u32 %v281_v24, %v278_v22  ;;  %v287_v31 = vrot.slane %v285_v25, 5  ;;  %v213_v21 = vld [vmem:[%s2351_s30 + $0x34] sm:$0x1]  ;;  %v2190_v22 = vld [vmem:[%s2764_s1 + $0x1c8] sm:$0xff]  }
  0x35   : > { %1257 = vmatmul.mubr.bf16.gmra.mxu0 %v1750_v28  ;;  %v295_v28 = vrot.slane %v293_v19, 5 }
  0x36   : > { %1984 = vmatpush3.bf16.msra.mxu0 %v2169_v36  ;;  %1322 = vmatmul.mubr.bf16.gmra.mxu1 %v1758_v55  ;;  %v301_v32 = vrot.slane %v299_v27, 5  ;;  %v283_v35 = vrot.slane %v282_v30, 4  ;;  %v2182_v36 = vld [vmem:[%s2764_s1 + $0x150] sm:$0xff]  }
  0x37   : > { %2024 = vmatpush3.bf16.msra.mxu1 %v2170_v40  ;;  %1985 = vmatprep.subr.bf16.mxu0 %v2171_v45  ;;  %v296_v34 = vor.u32 %v295_v28, %v292_v26  ;;  %v414_v40 = vshrl.u32 %v2492_v58, 16  ;;  %v2185_v45 = vld [vmem:[%s2764_s1 + $0x190] sm:$0xff]   ;;  %v2581_v58 = vld [vmem:[%s2351_s30 + $0xc8] sm:$0xf] }
  0x38   : > { %2025 = vmatprep.subr.bf16.mxu1 %v2172_v48  ;;  %1264 = vmatprep.mubr.bf16.mxu0 %v1755_v0  ;;  %v2552_v41 = vsel %vm2387_vm2, %v283_v35, %v287_v31  ;;  %v2568_v48 = vld [vmem:[%s2351_s30 + $0x78] sm:$0xf]  ;;  %v2584_v0 = vld [vmem:[%s2351_s30 + $0x30] sm:$0xf]  ;;  %v2191_v31 = vld [vmem:[%s2764_s1 + $0x108] sm:$0xff]  }
  0x39   : > { %1329 = vmatprep.mubr.bf16.mxu1 %v1763_v5  ;;  %v297_v37 = vrot.slane %v296_v34, 4  ;;  %v1756_v55 = vcombine.low %v2568_v48, %v2571_v49  ;;  %v378_v5 = vor.u32 %v2511_v4, %v2501_v63  ;;  %v304_v9 = vshrl.u32 %v2584_v0, 16 }
  0x3a   : > { %1986 = vmatpush3.bf16.msra.mxu0 %v2173_v50  ;;  %v2574_v50 = vld [vmem:[%s2351_s30 + $0xc0] sm:$0xf]  ;;  %v392_v63 = vor.u32 %v2525_v13, %v2523_v12  ;;  %v406_v4 = vor.u32 %v2531_v18, %v2527_v14  ;;  %v416_v16 = vrot.slane %v414_v40, 4  ;;  %v214_v12 = vld [vmem:[%s2351_s30 + $0x3c] sm:$0x1]  ;;  %v313_v14 = vshll.u32 %v213_v21, 16 }
  0x3b   : > { %2026 = vmatpush3.bf16.msra.mxu1 %v2174_v53  ;;  %1987 = vmatprep.subr.bf16.mxu0 %v2178_v2  ;;  %v2560_v44 = vsel %vm2387_vm2, %v297_v37, %v301_v32  ;;  %v431_v53 = vshll.u32 %v2495_v59, 16  ;;  %v364_v2 = vor.u32 %v2499_v62, %v2497_v60  ;;  %v1764_v8 = vcombine.low %v2574_v50, %v2581_v58  ;;  %v2593_v59 = vld [vmem:[%s2351_s30 + $0x38] sm:$0xf] }
  0x3c   : > { %2027 = vmatprep.subr.bf16.mxu1 %v2179_v10  ;;  %v1759_v47 = vcombine.low %v2552_v41, %v2560_v44  ;;  %v2189_v10 = vld [vmem:[%s2764_s1 + $0x148] sm:$0xff]   ;;  %v307_v60 = vshll.u32 %v2584_v0, 16  ;;  %v318_v62 = vshrl.u32 %v2593_v59, 16  ;;  %v321_v19 = vshll.u32 %v2593_v59, 16 }
  0x3d   : > { %1265 = vmatmul.mubr.bf16.gmra.mxu0 %v1751_v20  ;;  %v1752_v20 = vcombine.low %v2584_v0, %v2593_v59  ;;  %v433_v24 = vrot.slane %v431_v53, 5  ;;  %v306_v13 = vrot.slane %v304_v9, 4  ;;  %v327_v27 = vshll.u32 %v214_v12, 16  ;;  %v2195_v9 = vld [vmem:[%s2764_s1 + $0x100] sm:$0xff]  }
  0x3e   : > { %1988 = vmatpush3.bf16.msra.mxu0 %v2180_v23  ;;  %1330 = vmatmul.mubr.bf16.gmra.mxu1 %v1759_v47  ;;  %v430_v23 = vrot.slane %v428_v51, 4  ;;  %v309_v25 = vrot.slane %v307_v60, 5  ;;  %v320_v18 = vrot.slane %v318_v62, 4  ;;  %v323_v26 = vrot.slane %v321_v19, 5  ;;  %v2196_v60 = vld [vmem:[%s2764_s1 + $0x180] sm:$0xff]  }
  0x3f   : > { %2028 = vmatpush3.bf16.msra.mxu1 %v2181_v29  ;;  %1989 = vmatprep.subr.bf16.mxu0 %v2182_v36  ;;  %v365_v28 = vrot.slane %v364_v2, 4  ;;  %v379_v29 = vrot.slane %v378_v5, 4  ;;  %v315_v32 = vrot.slane %v313_v14, 5  ;;  %v329_v35 = vrot.slane %v327_v27, 5  ;;  %v1741_v62 = vld [vmem:[%s2351_s30 + $0x94] sm:$0x1] }
  0x40   : > { %2029 = vmatprep.subr.bf16.mxu1 %v2183_v39  ;;  %1272 = vmatprep.mubr.bf16.mxu0 %v1756_v55  ;;  %v310_v30 = vor.u32 %v309_v25, %v306_v13  ;;  %v324_v34 = vor.u32 %v323_v26, %v320_v18  ;;  %v420_v36 = vor.u32 %v419_v17, %v416_v16  ;;  %v2616_v39 = vrot.slane %v392_v63, 4  ;;  %v2193_v55 = vld [vmem:[%s2764_s1 + $0x140] sm:$0xff]   ;;  %v1742_v63 = vld [vmem:[%s2351_s30 + $0x9c] sm:$0x1]  ;;  %v1744_v13 = vld [vmem:[%s2351_s30 + $0xac] sm:$0x1] }
  0x41   : > { %1337 = vmatprep.mubr.bf16.mxu1 %v1764_v8  ;;  %v2618_v40 = vrot.slane %v406_v4, 4  ;;  %v1777_v51 = vcombine.low %v2358_v33, %v2392_v61  ;;  %v2194_v8 = vld [vmem:[%s2764_s1 + $0x1c0] sm:$0xff]   ;;  %v442_v61 = vshrl.u32 %v2574_v50, 16  ;;  %v367_v4 = vshll.u32 %v1741_v62, 16 }
  0x42   : > { %1990 = vmatpush3.bf16.msra.mxu0 %v2184_v42  ;;  %v311_v37 = vrot.slane %v310_v30, 4  ;;  %v434_v42 = vor.u32 %v433_v24, %v430_v23  ;;  %v325_v43 = vrot.slane %v324_v34, 4  ;;  %v2636_v2 = vrot.slane %v420_v36, 4  ;;  %v2199_v23 = vld [vmem:[%s2764_s1 + $0x238] sm:$0xff]   ;;  %v1743_v12 = vld [vmem:[%s2351_s30 + $0xa4] sm:$0x1] }
  0x43   : > { %2030 = vmatpush3.bf16.msra.mxu1 %v2185_v45  ;;  %1991 = vmatprep.subr.bf16.mxu0 %v2189_v10  ;;  %v2192_v45 = vld [vmem:[%s2764_s1 + $0x188] sm:$0xff]   ;;  %v445_v10 = vshll.u32 %v2574_v50, 16  ;;  %v381_v16 = vshll.u32 %v1742_v63, 16  ;;  %v456_v17 = vshrl.u32 %v2581_v58, 16  ;;  %v459_v19 = vshll.u32 %v2581_v58, 16 }
  0x44   : > { %2031 = vmatprep.subr.bf16.mxu1 %v2190_v22  ;;  %v2625_v47 = vsel %vm2387_vm2, %v311_v37, %v315_v32  ;;  %v2631_v53 = vsel %vm2387_vm2, %v325_v43, %v329_v35  ;;  %v2643_v33 = vrot.slane %v434_v42, 4  ;;  %v444_v50 = vrot.slane %v442_v61, 4  ;;  %v2197_v22 = vld [vmem:[%s2351_s30 + $0xd8] ss:$8 sps:$4 sm:$0xff]   ;;  %v1746_v34 = vld [vmem:[%s2351_s30 + $0xbc] sm:$0x1] }
  0x45   : > { %1273 = vmatmul.mubr.bf16.gmra.mxu0 %v1752_v20  ;;  %v1760_v5 = vcombine.low %v2625_v47, %v2631_v53  ;;  %v369_v20 = vrot.slane %v367_v4, 5  ;;  %v383_v21 = vrot.slane %v381_v16, 5  ;;  %v1773_v24 = vcombine.low %v2369_v38, %v2425_v11  ;;  %v2200_v38 = vld [vmem:[%s2764_s1 + $0x230] sm:$0xff]   ;;  %v2204_v42 = vld [vmem:[%s2764_s1 + $0x228] sm:$0xff]  }
  0x46   : > { %1992 = vmatpush3.bf16.msra.mxu0 %v2191_v31  ;;  %v395_v14 = vshll.u32 %v1743_v12, 16  ;;  %v409_v18 = vshll.u32 %v1744_v13, 16  ;;  %v447_v26 = vrot.slane %v445_v10, 5  ;;  %v1778_v11 = vcombine.low %v2414_v7, %v2484_v54  ;;  %v2202_v61 = vld [vmem:[%s2351_s30 + $0xe8] ss:$8 sps:$4 sm:$0xff]  }
  0x47   : > { %2032 = vmatpush3.bf16.msra.mxu1 %v2192_v45  ;;  %1993 = vmatprep.subr.bf16.mxu0 %v2193_v55  ;;  %v370_v25 = vsel %vm2387_vm2, %v365_v28, %v369_v20  ;;  %v384_v58 = vsel %vm2387_vm2, %v379_v29, %v383_v21  ;;  %v458_v30 = vrot.slane %v456_v17, 4  ;;  %v461_v28 = vrot.slane %v459_v19, 5  ;;  %v1745_v29 = vld [vmem:[%s2351_s30 + $0xb4] sm:$0x1]  ;;  %v2686_v55 = vld [vmem:[%s2351_s30 + $0x40] sm:$0xf] }
  0x48   : > { %1338 = vmatmul.mubr.bf16.gmra.mxu1 %v1760_v5  ;;  %2033 = vmatprep.subr.bf16.mxu1 %v2194_v8  ;;  %v1769_v27 = vcombine.low %v370_v25, %v384_v58  ;;  %v397_v31 = vrot.slane %v395_v14, 5  ;;  %v411_v32 = vrot.slane %v409_v18, 5  ;;  %v423_v7 = vshll.u32 %v1745_v29, 16  ;;  %v1747_v5 = vld [vmem:[%s2351_s30 + $0xc4] sm:$0x1]  ;;  %v2210_v13 = vld [vmem:[%s2764_s1 + $0x210] sm:$0xff]  }
  0x49   : > { %1443 = vmatprep.mubr.bf16.mxu1 %v1777_v51  ;;  %v437_v54 = vshll.u32 %v1746_v34, 16  ;;  %v448_v45 = vor.u32 %v447_v26, %v444_v50  ;;  %v462_v51 = vor.u32 %v461_v28, %v458_v30  ;;  %v1748_v8 = vld [vmem:[%s2351_s30 + $0xcc] sm:$0x1]  ;;  %v473_v19 = vshll.u32 %v2686_v55, 16  ;;  %v2209_v50 = vld [vmem:[%s2764_s1 + $0x218] sm:$0xff]  }
  0x4a   : > { %1994 = vmatpush3.bf16.msra.mxu0 %v2195_v9  ;;  %1378 = vmatprep.mubr.bf16.mxu0 %v1769_v27  ;;  %v398_v35 = vsel %vm2387_vm2, %v2616_v39, %v397_v31  ;;  %v412_v36 = vsel %vm2387_vm2, %v2618_v40, %v411_v32  ;;  %v425_v43 = vrot.slane %v423_v7, 5  ;;  %v1774_v40 = vcombine.low %v2433_v15, %v2506_v1  ;;  %v2205_v15 = vld [vmem:[%s2764_s1 + $0x220] sm:$0xff]   ;;  %v2214_v14 = vld [vmem:[%s2764_s1 + $0x208] sm:$0xff]  }
  0x4b   : > { %2034 = vmatpush3.bf16.msra.mxu1 %v2196_v60  ;;  %2071 = vmatprep.subr.bf16.mxu0 %v2199_v23  ;;  %v1770_v37 = vcombine.low %v398_v35, %v412_v36  ;;  %v439_v39 = vrot.slane %v437_v54, 5  ;;  %v451_v60 = vshll.u32 %v1747_v5, 16  ;;  %v465_v62 = vshll.u32 %v1748_v8, 16  ;;  %v215_v12 = vld [vmem:[%s2351_s30 + $0x44] sm:$0x1] }
  0x4c   : > { %2095 = vmatprep.subr.bf16.mxu1 %v2199_v23  ;;  %v426_v9 = vsel %vm2387_vm2, %v2636_v2, %v425_v43  ;;  %v449_v63 = vrot.slane %v448_v45, 4  ;;  %v463_v4 = vrot.slane %v462_v51, 4  ;;  %v1779_v2 = vcombine.low %v2489_v57, %v2568_v48 }
  0x4d   : > { %1379 = vmatmul.mubr.bf16.vlgmr.msra.gmra.mxu0 %v2197_v22  ;;  %v440_v10 = vsel %vm2387_vm2, %v2643_v33, %v439_v39  ;;  %v453_v16 = vrot.slane %v451_v60, 5  ;;  %v467_v17 = vrot.slane %v465_v62, 5  ;;  %v470_v33 = vshrl.u32 %v2686_v55, 16 }
  0x4e   : > { %2072 = vmatpush3.bf16.msra.mxu0 %v2199_v23  ;;  %1386 = vmatprep.mubr.bf16.mxu0 %v1770_v37  ;;  %v1771_v1 = vcombine.low %v426_v9, %v440_v10  ;;  %v1775_v57 = vcombine.low %v2516_v6, %v2584_v0  ;;  %v475_v22 = vrot.slane %v473_v19, 5  ;;  %v479_v58 = vshll.u32 %v215_v12, 16 }
  0x4f   : > { %2073 = vmatprep.subr.bf16.mxu0 %v2200_v38  ;;  %v454_v48 = vsel %vm2387_vm2, %v449_v63, %v453_v16  ;;  %v468_v20 = vsel %vm2387_vm2, %v463_v4, %v467_v17  ;;  %v472_v21 = vrot.slane %v470_v33, 4  ;;  %v1776_v18 = vcombine.low %v2593_v59, %v2686_v55 }
  0x50   : > { %1444 = vmatmul.mubr.bf16.vlgmr.msra.gmra.mxu1 %v1773_v24  ;;  %v1724_v24 = vld [vmem:[%s2351_s30 + $0x88] sm:$0xf]  ;;  %v1772_v6 = vcombine.low %v454_v48, %v468_v20  ;;  %v481_v27 = vrot.slane %v479_v58, 5  ;;  %v1783_v30 = vcombine.low %v2560_v44, %v2625_v47  ;;  %v1782_v31 = vcombine.low %v2478_v52, %v2552_v41 }
  0x51   : > { %2103 = vmatpush3.bf16.msra.mxu1 %v2199_v23  ;;  %1451 = vmatprep.mubr.bf16.mxu1 %v1778_v11  ;;  %v2207_v23 = vld [vmem:[%s2351_s30 + $0xf8] ss:$8 sps:$4 sm:$0xff]   ;;  %v1780_v0 = vcombine.low %v2571_v49, %v1724_v24  ;;  %v476_v25 = vor.u32 %v475_v22, %v472_v21  ;;  %v2212_v49 = vld [vmem:[%s2351_s30 + $0x108] ss:$8 sps:$4 sm:$0xff]   ;;  %v1781_v11 = vcombine.low %v2404_v3, %v2466_v46  ;;  %s1867_s30 = sshll.u32 %s2776_s13, 5 }
  0x52   : > { %2096 = vmatprep.subr.bf16.mxu1 %v2200_v38  ;;  %2074 = vmatpush3.bf16.msra.mxu0 %v2200_v38  ;;  %s182_s18 = scalar_lea.vmem %s2765_s2, %s1867_s30 }
  0x53   : > { %2075 = vmatprep.subr.bf16.mxu0 %v2204_v42  ;;  %v477_v26 = vrot.slane %v476_v25, 4 }
  0x55   : > { %2104 = vmatpush3.bf16.msra.mxu1 %v2200_v38  ;;  %1387 = vmatmul.mubr.bf16.gmra.mxu0 %v2202_v61  ;;  %v2215_v38 = vld [vmem:[%s2764_s1 + $0x200] sm:$0xff]   ;;  %v482_v59 = vsel %vm2387_vm2, %v477_v26, %v481_v27 }
  0x56   : > { %2097 = vmatprep.subr.bf16.mxu1 %v2204_v42  ;;  %2076 = vmatpush3.bf16.msra.mxu0 %v2204_v42  ;;  %v1784_v28 = vcombine.low %v2631_v53, %v482_v59 }
  0x57   : > { %2077 = vmatprep.subr.bf16.mxu0 %v2205_v15  ;;  %1394 = vmatprep.mubr.bf16.mxu0 %v1771_v1 }
  0x58   : > { %1452 = vmatmul.mubr.bf16.gmra.mxu1 %v1774_v40 }
  0x59   : > { %2105 = vmatpush3.bf16.msra.mxu1 %v2204_v42  ;;  %1459 = vmatprep.mubr.bf16.mxu1 %v1779_v2 }
  0x5a   : > { %2098 = vmatprep.subr.bf16.mxu1 %v2205_v15  ;;  %2078 = vmatpush3.bf16.msra.mxu0 %v2205_v15 }
  0x5b   : > { %2079 = vmatprep.subr.bf16.mxu0 %v2209_v50 }
  0x5d   : > { %2106 = vmatpush3.bf16.msra.mxu1 %v2205_v15  ;;  %1395 = vmatmul.mubr.bf16.gmra.mxu0 %v2207_v23 }
  0x5e   : > { %2099 = vmatprep.subr.bf16.mxu1 %v2209_v50  ;;  %2080 = vmatpush3.bf16.msra.mxu0 %v2209_v50 }
  0x5f   : > { %2081 = vmatprep.subr.bf16.mxu0 %v2210_v13  ;;  %1402 = vmatprep.mubr.bf16.mxu0 %v1772_v6 }
  0x60   : > { %1460 = vmatmul.mubr.bf16.gmra.mxu1 %v1775_v57 }
  0x61   : > { %2107 = vmatpush3.bf16.msra.mxu1 %v2209_v50  ;;  %1467 = vmatprep.mubr.bf16.mxu1 %v1780_v0 }
  0x62   : > { %2100 = vmatprep.subr.bf16.mxu1 %v2210_v13  ;;  %2082 = vmatpush3.bf16.msra.mxu0 %v2210_v13 }
  0x63   : > { %2083 = vmatprep.subr.bf16.mxu0 %v2214_v14 }
  0x65   : > { %2108 = vmatpush3.bf16.msra.mxu1 %v2210_v13  ;;  %1403 = vmatmul.mubr.bf16.gmra.mxu0 %v2212_v49 }
  0x66   : > { %2101 = vmatprep.subr.bf16.mxu1 %v2214_v14  ;;  %2084 = vmatpush3.bf16.msra.mxu0 %v2214_v14 }
  0x67   : > { %2085 = vmatprep.subr.bf16.mxu0 %v2215_v38  ;;  %2087 = vmatprep.mubr.bf16.mxu0 %v1781_v11 }
  0x68   : > { %1468 = vmatmul.mubr.bf16.gmra.mxu1 %v1776_v18 }
  0x69   : > { %2109 = vmatpush3.bf16.msra.mxu1 %v2214_v14  ;;  %2091 = vmatprep.mubr.bf16.mxu1 %v1783_v30 }
  0x6a   : > { %2102 = vmatprep.subr.bf16.mxu1 %v2215_v38  ;;  %2086 = vmatpush3.bf16.msra.mxu0 %v2215_v38 }
  0x6d   : > { %2110 = vmatpush3.bf16.msra.mxu1 %v2215_v38  ;;  %2088 = vmatmul.mubr.bf16.vlgmr.msra.gmra.mxu0 %v1782_v31 }
  0x70   : > { %2092 = vmatmul.mubr.bf16.vlgmr.msra.gmra.mxu1 %v1784_v28 }
  0xed   : > { %v1915_v3 = vpop.f32.mrf.mxu0 }
  0xee   : > { %v1955_v44 = vpop.f32.mrf.mxu1 }
  0xef   : > { %v1916_v46 = vpop.f32.mrf.mxu0 }
  0xf0   : > { %v1956_v32 = vpop.f32.mrf.mxu1  ;;  %v1917_v18 = vadd.f32 %v1916_v46, %v1915_v3 }
  0xf1   : > { %v1918_v56 = vpop.f32.mrf.mxu0  ;;  %v1957_v26 = vadd.f32 %v1956_v32, %v1955_v44 }
  0xf2   : > { %v1958_v34 = vpop.f32.mrf.mxu1 }
  0xf3   : > { %v1919_v47 = vpop.f32.mrf.mxu0 }
  0xf4   : > { %v1959_v36 = vpop.f32.mrf.mxu1  ;;  %v1920_v49 = vadd.f32 %v1919_v47, %v1918_v56 }
  0xf5   : > { %v1921_v29 = vpop.f32.mrf.mxu0  ;;  %v1960_v38 = vadd.f32 %v1959_v36, %v1958_v34  ;;  %v1316_v34 = vadd.f32 %v1957_v26, %v1917_v18 }
  0xf6   : > { %v1961_v53 = vpop.f32.mrf.mxu1 }
  0xf7   : > { %v1922_v35 = vpop.f32.mrf.mxu0 }
  0xf8   : > { %v1962_v37 = vpop.f32.mrf.mxu1  ;;  %v1923_v11 = vadd.f32 %v1922_v35, %v1921_v29 }
  0xf9   : > { %v1924_v7 = vpop.f32.mrf.mxu0  ;;  %v1963_v30 = vadd.f32 %v1962_v37, %v1961_v53  ;;  %v1319_v37 = vadd.f32 %v1960_v38, %v1920_v49 }
  0xfa   : > { %v1964_v52 = vpop.f32.mrf.mxu1 }
  0xfb   : > { %v1925_v54 = vpop.f32.mrf.mxu0  ;;  %v1324_v53 = vadd.f32 %v1963_v30, %v1923_v11 }
  0xfc   : > { %v1965_v43 = vpop.f32.mrf.mxu1  ;;  %v1926_v28 = vadd.f32 %v1925_v54, %v1924_v7 }
  0xfd   : > { %v1927_v42 = vpop.f32.mrf.mxu0  ;;  %v1966_v31 = vadd.f32 %v1965_v43, %v1964_v52 }
  0xfe   : > { %v1967_v45 = vpop.f32.mrf.mxu1 }
  0xff   : > { %v1928_v41 = vpop.f32.mrf.mxu0  ;;  %v1327_v52 = vadd.f32 %v1966_v31, %v1926_v28 }
 0x100   : > { %v1968_v51 = vpop.f32.mrf.mxu1  ;;  %v1929_v46 = vadd.f32 %v1928_v41, %v1927_v42 }
 0x101   : > { %v1930_v39 = vpop.f32.mrf.mxu0  ;;  %v1969_v32 = vadd.f32 %v1968_v51, %v1967_v45 }
 0x102   : > { %v1970_v40 = vpop.f32.mrf.mxu1 }
 0x103   : > { %v1931_v55 = vpop.f32.mrf.mxu0  ;;  %v1332_v42 = vadd.f32 %v1969_v32, %v1929_v46 }
 0x104   : > { %v1971_v8 = vpop.f32.mrf.mxu1  ;;  %v1932_v44 = vadd.f32 %v1931_v55, %v1930_v39 }
 0x105   : > { %v1933_v5 = vpop.f32.mrf.mxu0  ;;  %v1972_v47 = vadd.f32 %v1971_v8, %v1970_v40 }
 0x107   : > { %v1934_v61 = vpop.f32.mrf.mxu0  ;;  %v1335_v41 = vadd.f32 %v1972_v47, %v1932_v44 }
 0x108   : > { %v1973_v9 = vpop.f32.mrf.mxu1 }
 0x109   : > { %v1936_v10 = vpop.f32.mrf.mxu0 }
 0x10a   : > { %v1974_v60 = vpop.f32.mrf.mxu1 }
 0x10b   : > { %v1937_v15 = vpop.f32.mrf.mxu0 }
 0x10c   : > { %v1976_v62 = vpop.f32.mrf.mxu1  ;;  %v1938_v36 = vadd.f32 %v1937_v15, %v1936_v10 }
 0x10d   : > { %v1995_v4 = vpop.f32.mrf.mxu0 }
 0x10e   : > { %v1977_v1 = vpop.f32.mrf.mxu1 }
 0x10f   : > { %v1996_v16 = vpop.f32.mrf.mxu0  ;;  %v1978_v29 = vadd.f32 %v1977_v1, %v1976_v62 }
 0x110   : > { %v2035_v63 = vpop.f32.mrf.mxu1  ;;  %v1997_v7 = vadd.f32 %v1996_v16, %v1995_v4 }
 0x111   : > { %v1998_v33 = vpop.f32.mrf.mxu0  ;;  %v1343_v55 = vadd.f32 %v1978_v29, %v1938_v36 }
 0x112   : > { %v2036_v2 = vpop.f32.mrf.mxu1  ;;  %v1381_v15 = vadd.f32 %v1997_v7, %v1316_v34 }
 0x113   : > { %v1999_v50 = vpop.f32.mrf.mxu0  ;;  %v2037_v40 = vadd.f32 %v2036_v2, %v2035_v63 }
 0x114   : > { %v2740_v17 = vpop.f32.mrf.mxu1  ;;  %v2000_v1 = vadd.f32 %v1999_v50, %v1998_v33 }
 0x115   : > { %2769 = vst [vmem:[#allocation2_spill] sm:$0xff] %v2740_v17  ;;  %v2001_v48 = vpop.f32.mrf.mxu0  ;;  %v1975_v17 = vadd.f32 %v1974_v60, %v1973_v9 }
 0x116   : > { %v2742_v19 = vpop.f32.mrf.mxu1  ;;  %v1384_v50 = vadd.f32 %v2000_v1, %v1319_v37 }
 0x117   : > { %2770 = vst [vmem:[#allocation3_spill] sm:$0xff] %v2742_v19  ;;  %v2002_v21 = vpop.f32.mrf.mxu0  ;;  %v1935_v19 = vadd.f32 %v1934_v61, %v1933_v5 }
 0x118   : > { %v2041_v57 = vpop.f32.mrf.mxu1  ;;  %v2003_v54 = vadd.f32 %v2002_v21, %v2001_v48 }
 0x119   : > { %v2004_v23 = vpop.f32.mrf.mxu0  ;;  %v1340_v5 = vadd.f32 %v1975_v17, %v1935_v19 }
 0x11a   : > { %v2042_v20 = vpop.f32.mrf.mxu1  ;;  %v1389_v4 = vadd.f32 %v2003_v54, %v1324_v53 }
 0x11b   : > { %v2005_v12 = vpop.f32.mrf.mxu0  ;;  %v2043_v16 = vadd.f32 %v2042_v20, %v2041_v57 }
 0x11c   : > { %v2044_v22 = vpop.f32.mrf.mxu1  ;;  %v2006_v61 = vadd.f32 %v2005_v12, %v2004_v23  ;;  %v2771_v57 = vld [vmem:[#allocation2_spill] sm:$0xff] }
 0x11d   : > { %v2007_v6 = vpop.f32.mrf.mxu0 }
 0x11e   : > { %v2045_v24 = vpop.f32.mrf.mxu1  ;;  %v1392_v19 = vadd.f32 %v2006_v61, %v1327_v52  ;;  %v2772_v20 = vld [vmem:[#allocation3_spill] sm:$0xff] }
 0x11f   : > { %v2008_v25 = vpop.f32.mrf.mxu0  ;;  %v2046_v48 = vadd.f32 %v2045_v24, %v2044_v22  ;;  %v2040_v49 = vadd.f32 %v2772_v20, %v2771_v57  ;;  %v1454_v24 = vadd.f32 %v2043_v16, %v1389_v4 }
 0x120   : > { %v2047_v13 = vpop.f32.mrf.mxu1  ;;  %v2009_v39 = vadd.f32 %v2008_v25, %v2007_v6 }
 0x121   : > { %v2010_v14 = vpop.f32.mrf.mxu0  ;;  %v1457_v38 = vadd.f32 %v2046_v48, %v1392_v19  ;;  %v1449_v47 = vadd.f32 %v2040_v49, %v1384_v50 }
 0x122   : > { %v2048_v0 = vpop.f32.mrf.mxu1  ;;  %v1397_v6 = vadd.f32 %v2009_v39, %v1332_v42 }
 0x123   : > { %v2011_v59 = vpop.f32.mrf.mxu0  ;;  %v2049_v25 = vadd.f32 %v2048_v0, %v2047_v13 }
 0x124   : > { %v2050_v58 = vpop.f32.mrf.mxu1  ;;  %v2012_v45 = vadd.f32 %v2011_v59, %v2010_v14  ;;  %v1446_v59 = vadd.f32 %v2037_v40, %v1381_v15 }
 0x125   : > { %v2013_v56 = vpop.f32.mrf.mxu0  ;;  %v1462_v28 = vadd.f32 %v2049_v25, %v1397_v6 }
 0x126   : > { %v2051_v27 = vpop.f32.mrf.mxu1  ;;  %v1400_v63 = vadd.f32 %v2012_v45, %v1335_v41 }
 0x127   : > { %v2014_v43 = vpop.f32.mrf.mxu0  ;;  %v2052_v2 = vadd.f32 %v2051_v27, %v2050_v58 }
 0x128   : > { %v2053_v3 = vpop.f32.mrf.mxu1  ;;  %v2015_v9 = vadd.f32 %v2014_v43, %v2013_v56 }
 0x129   : > { %v2016_v51 = vpop.f32.mrf.mxu0  ;;  %v1465_v13 = vadd.f32 %v2052_v2, %v1400_v63 }
 0x12a   : > { %v2054_v35 = vpop.f32.mrf.mxu1  ;;  %v1405_v8 = vadd.f32 %v2015_v9, %v1340_v5 }
 0x12b   : > { %v2055_v10 = vadd.f32 %v2054_v35, %v2053_v3  ;;  %v2017_v17 = vpop.f32.mrf.mxu0 }
 0x12c   : > { %v2056_v60 = vpop.f32.mrf.mxu1  ;;  %v2018_v21 = vadd.f32 %v2017_v17, %v2016_v51 }
 0x12d   : > { %v2089_v14 = vpop.f32.mrf.mxu0  ;;  %v1470_v26 = vadd.f32 %v2055_v10, %v1405_v8 }
 0x12e   : > { %v2057_v62 = vpop.f32.mrf.mxu1  ;;  %v1408_v18 = vadd.f32 %v2018_v21, %v1343_v55  ;;  %v1519_v0 = vadd.f32 %v2089_v14, %v1454_v24 }
 0x12f   : > { %v2058_v23 = vadd.f32 %v2057_v62, %v2056_v60  ;;  %v1510_v22 = vpop.f32.mrf.mxu0 }
 0x130   : > { %v2093_v12 = vpop.f32.mrf.mxu1  ;;  %v1511_v32 = vadd.f32 %v1510_v22, %v1446_v59  ;;  %v1596_v52 = vmul.f32 %v1519_v0, %v1519_v0 }
 0x131   : > { %v1473_v11 = vadd.f32 %v2058_v23, %v1408_v18  ;;  %v2090_v31 = vpop.f32.mrf.mxu0  ;;  %v1535_v58 = vadd.f32 %v2093_v12, %v1470_v26 }
 0x132   : > { %v1526_v33 = vpop.f32.mrf.mxu1  ;;  %v1522_v27 = vadd.f32 %v2090_v31, %v1457_v38  ;;  %v1594_v53 = vmul.f32 %v1511_v32, %v1511_v32 }
 0x133   : > { %v1527_v44 = vadd.f32 %v1526_v33, %v1462_v28  ;;  %v1513_v56 = vpop.f32.mrf.mxu0  ;;  %v1600_v8 = vmul.f32 %v1535_v58, %v1535_v58 }
 0x134   : > { %v2094_v30 = vpop.f32.mrf.mxu1  ;;  %v1884_v36 = vpack.c.bf16 %v1522_v27, %v1519_v0  ;;  %v1514_v35 = vadd.f32 %v1513_v56, %v1449_v47  ;;  %v1597_v9 = vmul.f32 %v1522_v27, %v1522_v27 }
 0x135   : > { %v1538_v3 = vadd.f32 %v2094_v30, %v1473_v11  ;;  %v1598_v41 = vmul.f32 %v1527_v44, %v1527_v44 }
 0x136   : > { %v1529_v46 = vpop.f32.mrf.mxu1  ;;  %1896 = vst [vmem:[%s182_s18 + $0x8] sm:$0xff] %v1884_v36   ;;  %v1879_v7 = vpack.c.bf16 %v1514_v35, %v1511_v32  ;;  %v1581_v54 = vadd.f32 %v1514_v35, %v1511_v32  ;;  %v1595_v43 = vmul.f32 %v1514_v35, %v1514_v35 }
 0x137   : > { %v1530_v34 = vadd.f32 %v1529_v46, %v1465_v13  ;;  %v1894_v29 = vpack.c.bf16 %v1538_v3, %v1535_v58  ;;  %v1601_v15 = vmul.f32 %v1538_v3, %v1538_v3 }
 0x138   : > { %1880 = vst [vmem:[%s182_s18] sm:$0xff] %v1879_v7   ;;  %v1582_v5 = vadd.f32 %v1581_v54, %v1519_v0  ;;  %v1602_v61 = vadd.f32 %v1595_v43, %v1594_v53 }
 0x139   : > { %v1889_v37 = vpack.c.bf16 %v1530_v34, %v1527_v44  ;;  %1898 = vst [vmem:[%s182_s18 + $0x18] sm:$0xff] %v1894_v29   ;;  %v1599_v55 = vmul.f32 %v1530_v34, %v1530_v34 }
 0x13a   : > { %v1603_v60 = vadd.f32 %v1602_v61, %v1596_v52  ;;  %v1583_v42 = vadd.f32 %v1582_v5, %v1522_v27 }
 0x13b   : > { %1897 = vst [vmem:[%s182_s18 + $0x10] sm:$0xff] %v1889_v37  }
 0x13c   : > { %v1584_v39 = vadd.f32 %v1583_v42, %v1527_v44  ;;  %v1604_v45 = vadd.f32 %v1603_v60, %v1597_v9 }
 0x13e   : > { %v1585_v51 = vadd.f32 %v1584_v39, %v1530_v34  ;;  %v1605_v40 = vadd.f32 %v1604_v45, %v1598_v41 }
 0x140   : > { %v1586_v10 = vadd.f32 %v1585_v51, %v1535_v58  ;;  %v1606_v62 = vadd.f32 %v1605_v40, %v1599_v55 }
 0x142   : > { %v1587_v1 = vadd.f32 %v1586_v10, %v1538_v3  ;;  %v1607_v4 = vadd.f32 %v1606_v62, %v1600_v8 }
 0x144   : > { %v1588_v16 = vrot.slane %v1587_v1, 4  ;;  %v1608_v17 = vadd.f32 %v1607_v4, %v1601_v15 }
 0x146   : > { %v1589_v19 = vadd.f32 %v1588_v16, %v1587_v1  ;;  %v1609_v48 = vrot.slane %v1608_v17, 4 }
 0x148   : > { %v1590_v21 = vrot.slane %v1589_v19, 2  ;;  %v1610_v23 = vadd.f32 %v1609_v48, %v1608_v17 }
 0x14a   : > { %v1591_v12 = vadd.f32 %v1590_v21, %v1589_v19  ;;  %v1611_v6 = vrot.slane %v1610_v23, 2 }
 0x14c   : > { %v1592_v25 = vrot.slane %v1591_v12, 1  ;;  %v1612_v63 = vadd.f32 %v1611_v6, %v1610_v23 }
 0x14e   : > { %v1613_v2 = vrot.slane %v1612_v63, 1  ;;  %v1593_v14 = vadd.f32 %v1592_v25, %v1591_v12 }
 0x150   : > { %v1614_v18 = vadd.f32 %v1613_v2, %v1612_v63 }
 0x152   : > { %v1616_v26 = vsel %vm1615_vm3, %v1593_v14, %v1614_v18 }
 0x153   : > { %v1618_v33 = vsel %vm1617_vm4, %v1616_v26, 0.0 }
 0x154   : > { %1619 = vst [vmem:[%s186_s23] sm:$0xff] %v1618_v33 }
 0x155 PF: > { %s14_s12 = sadd.s32 1, %s2222_s12  }
 0x156   : > { %p11_p5 = scmp.ge.s32.totalorder %s14_s12, 4  }
 0x158   :  { %13 = sbr.rel (!%p11_p5) target bundleno = 1 (0x1), region = 73 }

// kernel: _lambda_.19
= control target key start
LH: loop header
LB: loop body
LE: loop exit
PB: predicated region body
PF: predicated region fallthrough
CT: control target
= control target key end

     0   :  { %s844_s0 = inlined_call_operand.vmem [shape: bf16[128,128], index: 0, kind: input, shape index: {}]   ;;  %s845_s1 = inlined_call_operand.vmem [shape: f32[1,128], index: 1, kind: input, shape index: {}]   ;;  %s846_s2 = inlined_call_operand.vmem [shape: f32[1,128], index: 2, kind: input, shape index: {}]   ;;  %s847_s3 = inlined_call_operand.vmem [shape: bf16[128,128], index: 3, kind: input, shape index: {}]   ;;  %s848_s4 = inlined_call_operand.hbm [shape: bf16[128,128], index: 4, kind: output, shape index: {0}]   ;;  %s849_s5 = inlined_call_operand.vmem [shape: bf16[128,128], index: 5, kind: output, shape index: {1}]  }
   0x1   :  { %v441_v0 = vld [vmem:[%s844_s0] sm:$0xff]   ;;  %v584_v4 = vld [vmem:[%s844_s0 + $0x8] sm:$0xff]   ;;  %v585_v5 = vld [vmem:[%s844_s0 + $0x10] sm:$0xff]  }
   0x2   :  { %v676_v1 = vld [vmem:[%s845_s1] ss:$0 sm:$0xff]  ;;  %v442_v2 = vunpack.c.l.bf16 %v441_v0  ;;  %v443_v3 = vunpack.c.h.bf16 %v441_v0  ;;  %v586_v6 = vld [vmem:[%s844_s0 + $0x18] sm:$0xff]   ;;  %v446_v8 = vunpack.c.l.bf16 %v584_v4  ;;  %v447_v9 = vunpack.c.h.bf16 %v584_v4 }
   0x3   :  { %v690_v7 = vld [vmem:[%s846_s2] ss:$0 sm:$0xff]  ;;  %v450_v10 = vunpack.c.l.bf16 %v585_v5  ;;  %v451_v11 = vunpack.c.h.bf16 %v585_v5  ;;  %v454_v14 = vunpack.c.l.bf16 %v586_v6  ;;  %v455_v15 = vunpack.c.h.bf16 %v586_v6 }
   0x4   :  { %v59_v12 = vmul.f32 %v442_v2, %v676_v1  ;;  %v60_v13 = vmul.f32 %v443_v3, %v676_v1  ;;  %v61_v16 = vmul.f32 %v446_v8, %v676_v1  ;;  %v62_v17 = vmul.f32 %v447_v9, %v676_v1 }
   0x5   :  { %v63_v18 = vmul.f32 %v450_v10, %v676_v1  ;;  %v64_v19 = vmul.f32 %v451_v11, %v676_v1  ;;  %v65_v22 = vmul.f32 %v454_v14, %v676_v1  ;;  %v66_v23 = vmul.f32 %v455_v15, %v676_v1 }
   0x6   :  { %v82_v20 = vadd.f32 %v690_v7, %v59_v12  ;;  %v83_v21 = vadd.f32 %v690_v7, %v60_v13  ;;  %v84_v24 = vadd.f32 %v690_v7, %v61_v16  ;;  %v85_v25 = vadd.f32 %v690_v7, %v62_v17 }
   0x7   :  { %v86_v26 = vadd.f32 %v690_v7, %v63_v18  ;;  %v87_v27 = vadd.f32 %v690_v7, %v64_v19 }
   0x8   :  { %11 = vsyncpa [#allocation3], 0  ;;  %vm98_vm0 = vcmp.gt.f32.partialorder %v82_v20, 0.0  ;;  %vm99_vm1 = vcmp.gt.f32.partialorder %v83_v21, 0.0  ;;  %v114_v28 = vmul.f32 0.1, %v82_v20  ;;  %v88_v42 = vadd.f32 %v690_v7, %v65_v22 }
   0x9   :  { %v115_v29 = vmul.f32 0.1, %v83_v21  ;;  %vm100_vm2 = vcmp.gt.f32.partialorder %v84_v24, 0.0  ;;  %vm101_vm3 = vcmp.gt.f32.partialorder %v85_v25, 0.0  ;;  %v116_v30 = vmul.f32 0.1, %v84_v24 }
   0xa   :  { %v117_v31 = vmul.f32 0.1, %v85_v25  ;;  %v706_v32 = vsel %vm98_vm0, %v82_v20, %v114_v28  ;;  %vm102_vm4 = vcmp.gt.f32.partialorder %v86_v26, 0.0  ;;  %vm103_vm5 = vcmp.gt.f32.partialorder %v87_v27, 0.0  ;;  %v587_v34 = vld [vmem:[%s844_s0 + $0x20] sm:$0xff]   ;;  %v588_v35 = vld [vmem:[%s844_s0 + $0x28] sm:$0xff]  }
   0xb   :  { %v708_v33 = vsel %vm99_vm1, %v83_v21, %v115_v29  ;;  %v718_v37 = vsel %vm100_vm2, %v84_v24, %v116_v30  ;;  %v118_v39 = vmul.f32 0.1, %v86_v26  ;;  %v119_v41 = vmul.f32 0.1, %v87_v27  ;;  %v589_v48 = vld [vmem:[%s844_s0 + $0x30] sm:$0xff]   ;;  %v590_v4 = vld [vmem:[%s844_s0 + $0x38] sm:$0xff]  }
   0xc   :  { %v475_v36 = vpack.c.bf16 %v708_v33, %v706_v32  ;;  %v720_v38 = vsel %vm101_vm3, %v85_v25, %v117_v31  ;;  %v89_v43 = vadd.f32 %v690_v7, %v66_v23  ;;  %v458_v45 = vunpack.c.l.bf16 %v587_v34  ;;  %v513_v15 = vld [vmem:[%s847_s3] sm:$0xff]   ;;  %s637_s22 = smov [#allocation2]  }
   0xd   :  { %v480_v40 = vpack.c.bf16 %v720_v38, %v718_v37  ;;  %v726_v44 = vsel %vm102_vm4, %v86_v26, %v118_v39  ;;  %v459_v46 = vunpack.c.h.bf16 %v587_v34  ;;  %v462_v47 = vunpack.c.l.bf16 %v588_v35  ;;  %v598_v26 = vld [vmem:[%s847_s3 + $0x8] sm:$0xff]   ;;  %s359_s23 = sshll.u32 %s637_s22, 4  ;;  %s360_s23 = int_to_ptr.vmem [resolvable:$true] %s359_s23 }
   0xe   :  { %476 = vst [vmem:[#allocation2] sm:$0xff] %v475_v36   ;;  %v732_v49 = vsel %vm103_vm5, %v87_v27, %v119_v41  ;;  %vm104_vm6 = vcmp.gt.f32.partialorder %v88_v42, 0.0  ;;  %vm105_vm7 = vcmp.gt.f32.partialorder %v89_v43, 0.0  ;;  %v120_v50 = vmul.f32 0.1, %v88_v42  ;;  %v599_v27 = vld [vmem:[%s847_s3 + $0x10] sm:$0xff]   ;;  %p620_p1 = scmp.lt.s32.totalorder %s360_s23, %s360_s23 }
   0xf   :  { %591 = vst [vmem:[#allocation2 + $0x8] sm:$0xff] %v480_v40   ;;  %v485_v51 = vpack.c.bf16 %v732_v49, %v726_v44  ;;  %v121_v52 = vmul.f32 0.1, %v89_v43  ;;  %v67_v53 = vmul.f32 %v458_v45, %v676_v1  ;;  %v68_v54 = vmul.f32 %v459_v46, %v676_v1  ;;  %s615_s6 = scalar_lea.vmem %s360_s23, 1024 }
  0x10   :  { %v738_v55 = vsel %vm104_vm6, %v88_v42, %v120_v50  ;;  %v463_v56 = vunpack.c.h.bf16 %v588_v35  ;;  %v69_v57 = vmul.f32 %v462_v47, %v676_v1  ;;  %v466_v58 = vunpack.c.l.bf16 %v589_v48  ;;  %v601_v50 = vld [vmem:[%s847_s3 + $0x20] sm:$0xff]   ;;  %p616_p0 = scmp.ne.s32.totalorder %s360_s23, %s615_s6  ;;  %p621_p2 = scmp.lt.s32.totalorder %s615_s6, %s615_s6 }
  0x11   :  { %592 = vst [vmem:[#allocation2 + $0x10] sm:$0xff] %v485_v51   ;;  %v741_v59 = vsel %vm105_vm7, %v89_v43, %v121_v52  ;;  %v90_v60 = vadd.f32 %v690_v7, %v67_v53  ;;  %v91_v61 = vadd.f32 %v690_v7, %v68_v54  ;;  %v467_v62 = vunpack.c.h.bf16 %v589_v48 }
  0x12   :  { %v490_v63 = vpack.c.bf16 %v741_v59, %v738_v55  ;;  %v70_v0 = vmul.f32 %v463_v56, %v676_v1  ;;  %v92_v2 = vadd.f32 %v690_v7, %v69_v57  ;;  %v71_v3 = vmul.f32 %v466_v58, %v676_v1  ;;  %p622_p3 = por %p621_p2, %p620_p1 }
  0x13   :  { %vm106_vm8 = vcmp.gt.f32.partialorder %v90_v60, 0.0  ;;  %vm107_vm9 = vcmp.gt.f32.partialorder %v91_v61, 0.0  ;;  %v122_v5 = vmul.f32 0.1, %v90_v60  ;;  %v123_v6 = vmul.f32 0.1, %v91_v61 }
  0x14   :  { %593 = vst [vmem:[#allocation2 + $0x18] sm:$0xff] %v490_v63   ;;  %v93_v8 = vadd.f32 %v690_v7, %v70_v0  ;;  %vm108_vm10 = vcmp.gt.f32.partialorder %v92_v2, 0.0  ;;  %v124_v9 = vmul.f32 0.1, %v92_v2  ;;  %v72_v10 = vmul.f32 %v467_v62, %v676_v1  ;;  %v603_v62 = vld [vmem:[%s847_s3 + $0x30] sm:$0xff]   ;;  %p623_p4 = pnand %p622_p3, %p616_p0 }
  0x15   :  { %v755_v11 = vsel %vm106_vm8, %v90_v60, %v122_v5  ;;  %v757_v12 = vsel %vm107_vm9, %v91_v61, %v123_v6  ;;  %v94_v13 = vadd.f32 %v690_v7, %v71_v3  ;;  %v470_v14 = vunpack.c.l.bf16 %v590_v4 }
  0x16   :  { %v495_v16 = vpack.c.bf16 %v757_v12, %v755_v11  ;;  %vm109_vm11 = vcmp.gt.f32.partialorder %v93_v8, 0.0  ;;  %v125_v17 = vmul.f32 0.1, %v93_v8  ;;  %v765_v18 = vsel %vm108_vm10, %v92_v2, %v124_v9 }
  0x17   :  { %v95_v19 = vadd.f32 %v690_v7, %v72_v10  ;;  %vm110_vm12 = vcmp.gt.f32.partialorder %v94_v13, 0.0  ;;  %v126_v20 = vmul.f32 0.1, %v94_v13  ;;  %v471_v21 = vunpack.c.h.bf16 %v590_v4 }
  0x18   :  { %594 = vst [vmem:[#allocation2 + $0x20] sm:$0xff] %v495_v16   ;;  %v768_v22 = vsel %vm109_vm11, %v93_v8, %v125_v17  ;;  %v73_v23 = vmul.f32 %v470_v14, %v676_v1  ;;  %v514_v24 = vunpack.c.l.bf16 %v513_v15  ;;  %v515_v25 = vunpack.c.h.bf16 %v513_v15 }
  0x19   :  { %v500_v28 = vpack.c.bf16 %v768_v22, %v765_v18  ;;  %vm111_vm13 = vcmp.gt.f32.partialorder %v95_v19, 0.0  ;;  %v127_v29 = vmul.f32 0.1, %v95_v19  ;;  %v779_v30 = vsel %vm110_vm12, %v94_v13, %v126_v20 }
  0x1a   :  { %v74_v31 = vmul.f32 %v471_v21, %v676_v1  ;;  %v96_v34 = vadd.f32 %v690_v7, %v73_v23  ;;  %v258_v35 = vadd.f32 %v514_v24, %v706_v32  ;;  %v259_v36 = vadd.f32 %v515_v25, %v708_v33  ;;  %v600_v1 = vld [vmem:[%s847_s3 + $0x18] sm:$0xff]  }
  0x1b   :  { %595 = vst [vmem:[#allocation2 + $0x28] sm:$0xff] %v500_v28   ;;  %v785_v39 = vsel %vm111_vm13, %v95_v19, %v127_v29  ;;  %v518_v40 = vunpack.c.l.bf16 %v598_v26  ;;  %v519_v41 = vunpack.c.h.bf16 %v598_v26  ;;  %v522_v42 = vunpack.c.l.bf16 %v599_v27 }
  0x1c   :  { %v505_v43 = vpack.c.bf16 %v785_v39, %v779_v30  ;;  %v97_v45 = vadd.f32 %v690_v7, %v74_v31  ;;  %vm112_vm14 = vcmp.gt.f32.partialorder %v96_v34, 0.0  ;;  %v128_v46 = vmul.f32 0.1, %v96_v34  ;;  %v602_v7 = vld [vmem:[%s847_s3 + $0x28] sm:$0xff]  }
  0x1d   :  { %v547_v32 = vpack.c.bf16 %v259_v36, %v258_v35  ;;  %v260_v33 = vadd.f32 %v518_v40, %v718_v37  ;;  %v261_v47 = vadd.f32 %v519_v41, %v720_v38  ;;  %v523_v48 = vunpack.c.h.bf16 %v599_v27 }
  0x1e   :  { %596 = vst [vmem:[#allocation2 + $0x30] sm:$0xff] %v505_v43   ;;  %vm113_vm15 = vcmp.gt.f32.partialorder %v97_v45, 0.0  ;;  %v129_v51 = vmul.f32 0.1, %v97_v45  ;;  %v144_v52 = vsel %vm112_vm14, %v96_v34, %v128_v46  ;;  %v262_v53 = vadd.f32 %v522_v42, %v726_v44  ;;  %v604_v44 = vld [vmem:[%s847_s3 + $0x38] sm:$0xff]  }
  0x1f   :  { %548 = vst [vmem:[%s849_s5] sm:$0xff] %v547_v32   ;;  %v552_v37 = vpack.c.bf16 %v261_v47, %v260_v33  ;;  %v263_v38 = vadd.f32 %v523_v48, %v732_v49  ;;  %v526_v54 = vunpack.c.l.bf16 %v600_v1  ;;  %v527_v56 = vunpack.c.h.bf16 %v600_v1 }
  0x20   :  { %v145_v57 = vsel %vm113_vm15, %v97_v45, %v129_v51  ;;  %v530_v58 = vunpack.c.l.bf16 %v601_v50  ;;  %v531_v60 = vunpack.c.h.bf16 %v601_v50  ;;  %v534_v61 = vunpack.c.l.bf16 %v602_v7 }
  0x21   :  { %v510_v63 = vpack.c.bf16 %v145_v57, %v144_v52  ;;  %605 = vst [vmem:[%s849_s5 + $0x8] sm:$0xff] %v552_v37   ;;  %v557_v49 = vpack.c.bf16 %v263_v38, %v262_v53  ;;  %v264_v0 = vadd.f32 %v526_v54, %v738_v55  ;;  %v265_v2 = vadd.f32 %v527_v56, %v741_v59 }
  0x22   :  { %v266_v3 = vadd.f32 %v530_v58, %v755_v11  ;;  %v267_v4 = vadd.f32 %v531_v60, %v757_v12  ;;  %v535_v5 = vunpack.c.h.bf16 %v602_v7  ;;  %v268_v6 = vadd.f32 %v534_v61, %v765_v18 }
  0x23   :  { %597 = vst [vmem:[#allocation2 + $0x38] sm:$0xff] %v510_v63   ;;  %606 = vst [vmem:[%s849_s5 + $0x10] sm:$0xff] %v557_v49   ;;  %v562_v8 = vpack.c.bf16 %v265_v2, %v264_v0  ;;  %v538_v9 = vunpack.c.l.bf16 %v603_v62  ;;  %v539_v10 = vunpack.c.h.bf16 %v603_v62  ;;  %v542_v13 = vunpack.c.l.bf16 %v604_v44 }
  0x24   :  { %v567_v55 = vpack.c.bf16 %v267_v4, %v266_v3  ;;  %v269_v59 = vadd.f32 %v535_v5, %v768_v22  ;;  %v543_v14 = vunpack.c.h.bf16 %v604_v44 }
  0x25   :  { %626 = shalt.err (!%p623_p4)
}
  0x26   :  { %s638_s7 = smov 64   ;;  %s639_s8 = smov 4   ;;  %607 = vst [vmem:[%s849_s5 + $0x18] sm:$0xff] %v562_v8   ;;  %v270_v11 = vadd.f32 %v538_v9, %v779_v30  ;;  %v271_v12 = vadd.f32 %v539_v10, %v785_v39  ;;  %v272_v15 = vadd.f32 %v542_v13, %v144_v52  ;;  %608 = vst [vmem:[%s849_s5 + $0x20] sm:$0xff] %v567_v55  }
  0x27   :  { %365 = dma.vmem_to_hbm [thread:$0]  %s360_s23, 1024, %s848_s4, [#allocation3], %s638_s7, %s638_s7, %s639_s8   ;;  %v572_v16 = vpack.c.bf16 %v269_v59, %v268_v6  ;;  %v273_v17 = vadd.f32 %v543_v14, %v145_v57 }
  0x28   :  { %v577_v18 = vpack.c.bf16 %v271_v12, %v270_v11 }
  0x29   :  { %609 = vst [vmem:[%s849_s5 + $0x28] sm:$0xff] %v572_v16   ;;  %v582_v19 = vpack.c.bf16 %v273_v17, %v272_v15 }
  0x2a   :  { %610 = vst [vmem:[%s849_s5 + $0x30] sm:$0xff] %v577_v18  }
  0x2b   :  { %611 = vst [vmem:[%s849_s5 + $0x38] sm:$0xff] %v582_v19  }
  0x2c   :  { %635 = dma.done.wait [#allocation3], 1024  }
  0x2d   :  { %636 = vsyncadd [#allocation3], 4294966272 }
  0x2e   :  { %373 = vsyncpa [#allocation3], 1 }

// kernel: _lambda_.18
= control target key start
LH: loop header
LB: loop body
LE: loop exit
PB: predicated region body
PF: predicated region fallthrough
CT: control target
= control target key end

     0   :  { %s2069_s12 = smov 0   ;;  %s2560_s0 = inlined_call_operand.vmem [shape: bf16[2,10,10,128], index: 0, kind: input, shape index: {}]   ;;  %s2561_s1 = inlined_call_operand.vmem [shape: bf16[1152,128], index: 1, kind: input, shape index: {}]   ;;  %s2562_s2 = inlined_call_operand.vmem [shape: bf16[2,64,128], index: 2, kind: output, shape index: {0}]   ;;  %s2563_s3 = inlined_call_operand.vmem [shape: f32[2,8,128], index: 3, kind: output, shape index: {1}]  }
   0x1 LB: > { %s1579_s13 = sadd.s32 4294967295, %s2047_s12   ;;  %p1583_p0 = scmp.ge.s32.totalorder %s2047_s12, 1  ;;  %s2047_s12 = sphi %s2069_s12, %s14_s12  }
   0x2   : > { %p140_p1 = scmp.lt.s32.totalorder %s2047_s12, 3 }
   0x4   : > { %p141_p2 = pnand %p1583_p0, %p140_p1 }
   0x6   : > { %144 = sbr.rel (%p141_p2) target bundleno = 341 (0x155), region = 28 }
   0xb   : > { %v1960_v0 = vld [vmem:[%s2561_s1 + $0x78] sm:$0xff]   ;;  %v1964_v4 = vld [vmem:[%s2561_s1 + $0x70] sm:$0xff]   ;;  %v1968_v8 = vld [vmem:[%s2561_s1 + $0x68] sm:$0xff]   ;;  %p168_p3 = scmp.lt.s32.totalorder %s1579_s13, 1  ;;  %vm344_vm0 = vcmask 1042432   ;;  %vm345_vm1 = vcmask 1046532  }
   0xc   : > { %v1961_v1 = vld [vmem:[%s2561_s1 + $0xf8] sm:$0xff]   ;;  %1739 = vmatprep.subr.bf16.mxu0 %v1960_v0  ;;  %v1965_v5 = vld [vmem:[%s2561_s1 + $0xf0] sm:$0xff]   ;;  %v1969_v9 = vld [vmem:[%s2561_s1 + $0xe8] sm:$0xff]   ;;  %vm203_vm2 = vsmask.f32 3328  ;;  %vm1488_vm6 = vcmask 1040384  }
   0xd   : > { %v1962_v2 = vld [vmem:[%s2561_s1 + $0x38] sm:$0xff]   ;;  %1779 = vmatprep.subr.bf16.mxu1 %v1961_v1  ;;  %v1966_v6 = vld [vmem:[%s2561_s1 + $0x30] sm:$0xff]   ;;  %v1970_v10 = vld [vmem:[%s2561_s1 + $0x28] sm:$0xff]   ;;  %s2585_s13 = smov (!%p168_p3, %s1579_s13), 1  ;;  %vm204_vm3 = vsmask.f32 7440 }
   0xe   : > { %v1963_v3 = vld [vmem:[%s2561_s1 + $0xb8] sm:$0xff]   ;;  %1740 = vmatpush3.bf16.msra.mxu0 %v1962_v2  ;;  %v1967_v7 = vld [vmem:[%s2561_s1 + $0xb0] sm:$0xff]   ;;  %v1971_v11 = vld [vmem:[%s2561_s1 + $0xa8] sm:$0xff]   ;;  %s1951_s16 = smul.u32 80, %s2585_s13  ;;  %s1707_s14 = sshll.u32 %s2585_s13, 5  ;;  %vm1490_vm7 = vcmask 1041408  }
   0xf   : > { %1780 = vmatpush3.bf16.msra.mxu1 %v1963_v3  ;;  %1741 = vmatprep.subr.bf16.mxu0 %v1964_v4  ;;  %v1972_v12 = vld [vmem:[%s2561_s1 + $0x60] sm:$0xff]   ;;  %v1976_v16 = vld [vmem:[%s2561_s1 + $0x58] sm:$0xff]   ;;  %v1980_v20 = vld [vmem:[%s2561_s1 + $0x50] sm:$0xff]   ;;  %s177_s17 = scalar_lea.vmem %s2562_s2, %s1707_s14  ;;  %s1587_s18 = sshll.u32 %s2585_s13, 3 }
  0x10   : > { %1781 = vmatprep.subr.bf16.mxu1 %v1965_v5  ;;  %v1973_v13 = vld [vmem:[%s2561_s1 + $0xe0] sm:$0xff]   ;;  %v1977_v17 = vld [vmem:[%s2561_s1 + $0xd8] sm:$0xff]   ;;  %v1981_v21 = vld [vmem:[%s2561_s1 + $0xd0] sm:$0xff]   ;;  %s2177_s27 = scalar_lea.vmem %s2560_s0, %s1951_s16  ;;  %s181_s21 = scalar_lea.vmem %s2563_s3, %s1587_s18 }
  0x11   : > { %v1974_v14 = vld [vmem:[%s2561_s1 + $0x20] sm:$0xff]   ;;  %v1978_v18 = vld [vmem:[%s2561_s1 + $0x18] sm:$0xff]   ;;  %v1982_v22 = vld [vmem:[%s2561_s1 + $0x10] sm:$0xff]  }
  0x12   : > { %1742 = vmatpush3.bf16.msra.mxu0 %v1966_v6  ;;  %v1975_v15 = vld [vmem:[%s2561_s1 + $0xa0] sm:$0xff]   ;;  %v1979_v19 = vld [vmem:[%s2561_s1 + $0x98] sm:$0xff]   ;;  %v1983_v23 = vld [vmem:[%s2561_s1 + $0x90] sm:$0xff]  }
  0x13   : > { %1782 = vmatpush3.bf16.msra.mxu1 %v1967_v7  ;;  %1743 = vmatprep.subr.bf16.mxu0 %v1968_v8  ;;  %v1984_v24 = vld [vmem:[%s2561_s1 + $0x48] sm:$0xff]   ;;  %v1988_v28 = vld [vmem:[%s2561_s1 + $0x40] sm:$0xff]   ;;  %v2192_v34 = vld [vmem:[%s2177_s27 + $0x10] sm:$0xf] }
  0x14   : > { %1783 = vmatprep.subr.bf16.mxu1 %v1969_v9  ;;  %v1985_v25 = vld [vmem:[%s2561_s1 + $0xc8] sm:$0xff]   ;;  %v1989_v29 = vld [vmem:[%s2561_s1 + $0xc0] sm:$0xff]   ;;  %v2201_v40 = vld [vmem:[%s2177_s27 + $0x14] sm:$0x1]  ;;  %v235_v48 = vshrl.u32 %v2192_v34, 16  ;;  %v238_v49 = vshll.u32 %v2192_v34, 16 }
  0x15   : > { %v1986_v26 = vld [vmem:[%s2561_s1 + $0x8] sm:$0xff]   ;;  %v1990_v30 = vld [vmem:[%s2561_s1] sm:$0xff]   ;;  %vm2211_vm4 = vmor %vm344_vm0, %vm345_vm1  ;;  %v244_v3 = vshll.u32 %v2201_v40, 16 }
  0x16   : > { %1744 = vmatpush3.bf16.msra.mxu0 %v1970_v10  ;;  %v1987_v27 = vld [vmem:[%s2561_s1 + $0x88] sm:$0xff]   ;;  %v1991_v31 = vld [vmem:[%s2561_s1 + $0x80] sm:$0xff]   ;;  %v237_v56 = vrot.slane %v235_v48, 4  ;;  %v240_v57 = vrot.slane %v238_v49, 5  ;;  %v1994_v59 = vld [vmem:[%s2561_s1 + $0x178] sm:$0xff]  }
  0x17   : > { %1784 = vmatpush3.bf16.msra.mxu1 %v1971_v11  ;;  %1745 = vmatprep.subr.bf16.mxu0 %v1972_v12  ;;  %v2186_v32 = vld [vmem:[%s2177_s27] sm:$0xf]  ;;  %v2189_v33 = vld [vmem:[%s2177_s27 + $0x8] sm:$0xf]  ;;  %v193_v35 = vld [vmem:[%s2177_s27 + $0x4] sm:$0x1] }
  0x18   : > { %1785 = vmatprep.subr.bf16.mxu1 %v1973_v13  ;;  %v194_v36 = vld [vmem:[%s2177_s27 + $0xc] sm:$0x1]  ;;  %v1610_v37 = vcombine.low %v2189_v33, %v2192_v34  ;;  %v207_v38 = vshrl.u32 %v2186_v32, 16  ;;  %v210_v39 = vshll.u32 %v2186_v32, 16  ;;  %v216_v41 = vshll.u32 %v193_v35, 16  ;;  %vm2220_vm5 = vmor %vm203_vm2, %vm204_vm3  ;;  %v1995_v1 = vld [vmem:[%s2561_s1 + $0x1f8] sm:$0xff]  }
  0x19   : > { %v221_v42 = vshrl.u32 %v2189_v33, 16  ;;  %v224_v43 = vshll.u32 %v2189_v33, 16  ;;  %v230_v44 = vshll.u32 %v194_v36, 16  ;;  %v318_v45 = vld [vmem:[%s2177_s27] sm:$0xe]  ;;  %v349_v62 = vrot.slane %v193_v35, 5 }
  0x1a   : > { %1746 = vmatpush3.bf16.msra.mxu0 %v1974_v14  ;;  %1186 = vmatprep.mubr.bf16.mxu1 %v1610_v37  ;;  %v209_v46 = vrot.slane %v207_v38, 4  ;;  %v212_v47 = vrot.slane %v210_v39, 5  ;;  %v319_v50 = vld [vmem:[%s2177_s27 + $0x8] sm:$0xe]  ;;  %v218_v51 = vrot.slane %v216_v41, 5  ;;  %v353_v63 = vrot.slane %v194_v36, 5 }
  0x1b   : > { %1786 = vmatpush3.bf16.msra.mxu1 %v1975_v15  ;;  %1747 = vmatprep.subr.bf16.mxu0 %v1976_v16  ;;  %v223_v52 = vrot.slane %v221_v42, 4  ;;  %v226_v53 = vrot.slane %v224_v43, 5  ;;  %v232_v55 = vrot.slane %v230_v44, 5  ;;  %v1588_v0 = vrot.slane %v318_v45, 9  ;;  %v1996_v10 = vld [vmem:[%s2561_s1 + $0x138] sm:$0xff]   ;;  %v2005_v44 = vld [vmem:[%s2561_s1 + $0x1e8] sm:$0xff]  }
  0x1c   : > { %1787 = vmatprep.subr.bf16.mxu1 %v1977_v17  ;;  %v213_v54 = vor.u32 %v212_v47, %v209_v46  ;;  %v1589_v4 = vrot.slane %v319_v50, 9  ;;  %v241_v6 = vor.u32 %v240_v57, %v237_v56  ;;  %v1997_v11 = vld [vmem:[%s2561_s1 + $0x1b8] sm:$0xff]   ;;  %v1598_v13 = vcombine.low %v2186_v32, %v2189_v33  ;;  %v1999_v17 = vld [vmem:[%s2561_s1 + $0x1f0] sm:$0xff]   ;;  %v2004_v33 = vld [vmem:[%s2561_s1 + $0x168] sm:$0xff]  }
  0x1d   : > { %v227_v61 = vor.u32 %v226_v53, %v223_v52  ;;  %v350_v7 = vsel %vm2211_vm4, %v1588_v0, %v349_v62  ;;  %v246_v15 = vrot.slane %v244_v3, 5  ;;  %v320_v32 = vld [vmem:[%s2177_s27 + $0x10] sm:$0xe]  ;;  %v321_v37 = vld [vmem:[%s2177_s27 + $0x18] sm:$0xe]  ;;  %v2006_v47 = vld [vmem:[%s2561_s1 + $0x128] sm:$0xff]  }
  0x1e   : > { %1748 = vmatpush3.bf16.msra.mxu0 %v1978_v18  ;;  %v214_v2 = vrot.slane %v213_v54, 4  ;;  %v2234_v9 = vsel %vm2211_vm4, %v1589_v4, %v353_v63  ;;  %v242_v18 = vrot.slane %v241_v6, 4  ;;  %v1590_v38 = vrot.slane %v320_v32, 9  ;;  %v2007_v52 = vld [vmem:[%s2561_s1 + $0x1a8] sm:$0xff]   ;;  %v2008_v53 = vld [vmem:[%s2561_s1 + $0x160] sm:$0xff]  }
  0x1f   : > { %1788 = vmatpush3.bf16.msra.mxu1 %v1979_v19  ;;  %1749 = vmatprep.subr.bf16.mxu0 %v1980_v20  ;;  %v228_v5 = vrot.slane %v227_v61, 4  ;;  %v1606_v14 = vcombine.low %v350_v7, %v2234_v9  ;;  %v1998_v19 = vld [vmem:[%s2561_s1 + $0x170] sm:$0xff]   ;;  %v1591_v41 = vrot.slane %v321_v37, 9  ;;  %v2009_v57 = vld [vmem:[%s2561_s1 + $0x1e0] sm:$0xff]   ;;  %v188_v63 = vld [vmem:[%s2177_s27 + $0x28] sm:$0xf] }
  0x20   : > { %1789 = vmatprep.subr.bf16.mxu1 %v1981_v21  ;;  %v219_v8 = vsel %vm2220_vm5, %v214_v2, %v218_v51  ;;  %v2000_v20 = vld [vmem:[%s2561_s1 + $0x130] sm:$0xff]   ;;  %v2292_v49 = vsel %vm2220_vm5, %v242_v18, %v246_v15  ;;  %v2010_v61 = vld [vmem:[%s2561_s1 + $0x120] sm:$0xff]   ;;  %v277_v3 = vshrl.u32 %v188_v63, 16  ;;  %v280_v4 = vshll.u32 %v188_v63, 16 }
  0x21   : > { %v2244_v12 = vsel %vm2220_vm5, %v228_v5, %v232_v55  ;;  %v2001_v21 = vld [vmem:[%s2561_s1 + $0x1b0] sm:$0xff]   ;;  %v197_v0 = vld [vmem:[%s2177_s27 + $0x24] sm:$0x1] }
  0x22   : > { %1750 = vmatpush3.bf16.msra.mxu0 %v1982_v22  ;;  %v1602_v16 = vcombine.low %v219_v8, %v2244_v12  ;;  %v186_v22 = vld [vmem:[%s2177_s27 + $0x18] sm:$0xf]  ;;  %v272_v2 = vshll.u32 %v197_v0, 16  ;;  %v2331_v6 = vld [vmem:[%s2177_s27 + $0x30] sm:$0xf]  ;;  %v279_v15 = vrot.slane %v277_v3, 4 }
  0x23   : > { %1790 = vmatpush3.bf16.msra.mxu1 %v1983_v23  ;;  %1751 = vmatprep.subr.bf16.mxu0 %v1984_v24  ;;  %v357_v23 = vrot.slane %v2201_v40, 5  ;;  %v196_v24 = vld [vmem:[%s2177_s27 + $0x1c] sm:$0x1]  ;;  %v2309_v56 = vcombine.low %v2192_v34, %v186_v22  ;;  %v2011_v34 = vld [vmem:[%s2561_s1 + $0x1a0] sm:$0xff]   ;;  %v291_v7 = vshrl.u32 %v2331_v6, 16  ;;  %v294_v8 = vshll.u32 %v2331_v6, 16 }
  0x24   : > { %1791 = vmatprep.subr.bf16.mxu1 %v1985_v25  ;;  %1121 = vmatprep.mubr.bf16.mxu0 %v1602_v16  ;;  %v249_v25 = vshrl.u32 %v186_v22, 16  ;;  %v361_v39 = vrot.slane %v196_v24, 5  ;;  %v282_v16 = vrot.slane %v280_v4, 5 }
  0x25   : > { %v2278_v43 = vsel %vm2211_vm4, %v1590_v38, %v357_v23  ;;  %v2014_v23 = vld [vmem:[%s2561_s1 + $0x158] sm:$0xff]   ;;  %v2018_v38 = vld [vmem:[%s2561_s1 + $0x150] sm:$0xff]  }
  0x26   : > { %1752 = vmatpush3.bf16.msra.mxu0 %v1986_v26  ;;  %v252_v26 = vshll.u32 %v186_v22, 16  ;;  %v251_v35 = vrot.slane %v249_v25, 4  ;;  %v2285_v46 = vsel %vm2211_vm4, %v1591_v41, %v361_v39 }
  0x27   : > { %1792 = vmatpush3.bf16.msra.mxu1 %v1987_v27  ;;  %1753 = vmatprep.subr.bf16.mxu0 %v1988_v28  ;;  %v2266_v27 = vld [vmem:[%s2177_s27 + $0x20] sm:$0xf]  ;;  %v258_v28 = vshll.u32 %v196_v24, 16  ;;  %v2296_v51 = vcombine.low %v2278_v43, %v2285_v46  ;;  %v293_v24 = vrot.slane %v291_v7, 4  ;;  %v2025_v7 = vld [vmem:[%s2561_s1 + $0x1c8] sm:$0xff]  }
  0x28   : > { %1793 = vmatprep.subr.bf16.mxu1 %v1989_v29  ;;  %v263_v29 = vshrl.u32 %v2266_v27, 16  ;;  %v254_v36 = vrot.slane %v252_v26, 5  ;;  %v2371_v37 = vcombine.low %v2266_v27, %v188_v63 }
  0x29   : > { %v260_v40 = vrot.slane %v258_v28, 5  ;;  %v2015_v28 = vld [vmem:[%s2561_s1 + $0x1d8] sm:$0xff]  }
  0x2a   : > { %1754 = vmatpush3.bf16.msra.mxu0 %v1990_v30  ;;  %v266_v30 = vshll.u32 %v2266_v27, 16  ;;  %v255_v42 = vor.u32 %v254_v36, %v251_v35  ;;  %v265_v45 = vrot.slane %v263_v29, 4  ;;  %v296_v29 = vrot.slane %v294_v8, 5  ;;  %v2017_v35 = vld [vmem:[%s2561_s1 + $0x198] sm:$0xff]  }
  0x2b   : > { %1794 = vmatpush3.bf16.msra.mxu1 %v1991_v31  ;;  %1819 = vmatprep.subr.bf16.mxu0 %v1994_v59  ;;  %v1611_v31 = vcombine.low %v186_v22, %v2266_v27  ;;  %v283_v22 = vor.u32 %v282_v16, %v279_v15  ;;  %v2020_v27 = vld [vmem:[%s2561_s1 + $0x110] sm:$0xff]  }
  0x2c   : > { %1859 = vmatprep.subr.bf16.mxu1 %v1995_v1  ;;  %v268_v48 = vrot.slane %v266_v30, 5  ;;  %v256_v50 = vrot.slane %v255_v42, 4  ;;  %v198_v1 = vld [vmem:[%s2177_s27 + $0x2c] sm:$0x1]  ;;  %v297_v41 = vor.u32 %v296_v29, %v293_v24  ;;  %v2021_v42 = vld [vmem:[%s2561_s1 + $0x190] sm:$0xff]   ;;  %v2029_v24 = vld [vmem:[%s2561_s1 + $0x1c0] sm:$0xff]  }
  0x2d   : > { %1122 = vmatmul.mubr.bf16.vlgmr.msra.gmra.mxu0 %v1598_v13  ;;  %v286_v5 = vshll.u32 %v198_v1, 16  ;;  %v323_v13 = vld [vmem:[%s2177_s27 + $0x28] sm:$0xe] }
  0x2e   : > { %1187 = vmatmul.mubr.bf16.vlgmr.msra.gmra.mxu1 %v1606_v14  ;;  %1820 = vmatpush3.bf16.msra.mxu0 %v1996_v10  ;;  %v269_v54 = vor.u32 %v268_v48, %v265_v45  ;;  %v2306_v55 = vsel %vm2220_vm5, %v256_v50, %v260_v40  ;;  %v1612_v10 = vcombine.low %v188_v63, %v2331_v6  ;;  %v274_v14 = vrot.slane %v272_v2, 5  ;;  %v2019_v40 = vld [vmem:[%s2561_s1 + $0x1d0] sm:$0xff]   ;;  %v325_v2 = vld [vmem:[%s2177_s27 + $0x38] sm:$0xe] }
  0x2f   : > { %1860 = vmatpush3.bf16.msra.mxu1 %v1997_v11  ;;  %1821 = vmatprep.subr.bf16.mxu0 %v1998_v19  ;;  %v2317_v59 = vcombine.low %v2292_v49, %v2306_v55  ;;  %v322_v11 = vld [vmem:[%s2177_s27 + $0x20] sm:$0xe]  ;;  %v365_v19 = vrot.slane %v197_v0, 5  ;;  %v199_v45 = vld [vmem:[%s2177_s27 + $0x34] sm:$0x1] }
  0x30   : > { %1861 = vmatprep.subr.bf16.mxu1 %v1999_v17  ;;  %1194 = vmatprep.mubr.bf16.mxu1 %v1611_v31  ;;  %v270_v62 = vrot.slane %v269_v54, 4  ;;  %v288_v17 = vrot.slane %v286_v5, 5  ;;  %v1592_v18 = vrot.slane %v322_v11, 9  ;;  %v284_v31 = vrot.slane %v283_v22, 4  ;;  %v2028_v22 = vld [vmem:[%s2561_s1 + $0x140] sm:$0xff]  }
  0x31   : > { %1129 = vmatprep.mubr.bf16.mxu0 %v2317_v59  ;;  %v300_v48 = vshll.u32 %v199_v45, 16 }
  0x32   : > { %1822 = vmatpush3.bf16.msra.mxu0 %v2000_v20  ;;  %v1593_v20 = vrot.slane %v323_v13, 9  ;;  %v2343_v25 = vsel %vm2211_vm4, %v1592_v18, %v365_v19  ;;  %v2354_v30 = vsel %vm2220_vm5, %v270_v62, %v274_v14  ;;  %v2368_v36 = vsel %vm2220_vm5, %v284_v31, %v288_v17  ;;  %v2026_v17 = vld [vmem:[%s2561_s1 + $0x108] sm:$0xff]   ;;  %v2031_v31 = vld [vmem:[%s2561_s1 + $0x180] sm:$0xff]  }
  0x33   : > { %1862 = vmatpush3.bf16.msra.mxu1 %v2001_v21  ;;  %1823 = vmatprep.subr.bf16.mxu0 %v2004_v33  ;;  %v369_v21 = vrot.slane %v198_v1, 5  ;;  %v2016_v33 = vld [vmem:[%s2561_s1 + $0x118] sm:$0xff]   ;;  %v2379_v39 = vcombine.low %v2354_v30, %v2368_v36  ;;  %v298_v62 = vrot.slane %v297_v41, 4  ;;  %v302_v63 = vrot.slane %v300_v48, 5  ;;  %v2027_v19 = vld [vmem:[%s2561_s1 + $0x188] sm:$0xff]  }
  0x34   : > { %1863 = vmatprep.subr.bf16.mxu1 %v2005_v44  ;;  %v190_v44 = vld [vmem:[%s2177_s27 + $0x38] sm:$0xf]  ;;  %v201_v41 = vld [vmem:[%s2177_s27 + $0x44] sm:$0x1] }
  0x35   : > { %1130 = vmatmul.mubr.bf16.gmra.mxu0 %v2309_v56  ;;  %v2347_v26 = vsel %vm2211_vm4, %v1593_v20, %v369_v21  ;;  %v305_v50 = vshrl.u32 %v190_v44, 16  ;;  %v2413_v14 = vsel %vm2220_vm5, %v298_v62, %v302_v63  ;;  %v2434_v21 = vcombine.low %v2331_v6, %v190_v44  ;;  %v2030_v6 = vld [vmem:[%s2561_s1 + $0x100] sm:$0xff]  }
  0x36   : > { %1195 = vmatmul.mubr.bf16.gmra.mxu1 %v2296_v51  ;;  %1824 = vmatpush3.bf16.msra.mxu0 %v2006_v47  ;;  %v2358_v32 = vcombine.low %v2343_v25, %v2347_v26  ;;  %v200_v47 = vld [vmem:[%s2177_s27 + $0x3c] sm:$0x1]  ;;  %v1615_v63 = vcombine.low %v2306_v55, %v2354_v30 }
  0x37   : > { %1864 = vmatpush3.bf16.msra.mxu1 %v2007_v52  ;;  %1825 = vmatprep.subr.bf16.mxu0 %v2008_v53  ;;  %v308_v52 = vshll.u32 %v190_v44, 16  ;;  %v2024_v53 = vld [vmem:[%s2561_s1 + $0x148] sm:$0xff]   ;;  %v314_v54 = vshll.u32 %v200_v47, 16  ;;  %v307_v0 = vrot.slane %v305_v50, 4  ;;  %v377_v11 = vrot.slane %v200_v47, 5  ;;  %v2036_v55 = vld [vmem:[%s2561_s1 + $0x218] sm:$0xff]  }
  0x38   : > { %1865 = vmatprep.subr.bf16.mxu1 %v2009_v57  ;;  %1202 = vmatprep.mubr.bf16.mxu1 %v1612_v10  ;;  %v2399_v57 = vld [vmem:[%s2177_s27 + $0x40] sm:$0xf]  ;;  %v1595_v10 = vrot.slane %v325_v2, 9  ;;  %v389_v50 = vshll.u32 %v201_v41, 16 }
  0x39   : > { %1137 = vmatprep.mubr.bf16.mxu0 %v2379_v39  ;;  %v310_v1 = vrot.slane %v308_v52, 5  ;;  %v316_v3 = vrot.slane %v314_v54, 5  ;;  %v1613_v4 = vcombine.low %v190_v44, %v2399_v57  ;;  %v380_v29 = vshrl.u32 %v2399_v57, 16  ;;  %v326_v44 = vld [vmem:[%s2177_s27 + $0x40] sm:$0xe] }
  0x3a   : > { %1826 = vmatpush3.bf16.msra.mxu0 %v2010_v61  ;;  %v324_v61 = vld [vmem:[%s2177_s27 + $0x30] sm:$0xe]  ;;  %v2417_v16 = vsel %vm2211_vm4, %v1595_v10, %v377_v11  ;;  %v1596_v47 = vrot.slane %v326_v44, 9  ;;  %v391_v2 = vrot.slane %v389_v50, 5  ;;  %v2039_v10 = vld [vmem:[%s2561_s1 + $0x208] sm:$0xff]  }
  0x3b   : > { %1866 = vmatpush3.bf16.msra.mxu1 %v2011_v34  ;;  %1827 = vmatprep.subr.bf16.mxu0 %v2014_v23  ;;  %v373_v34 = vrot.slane %v199_v45, 5  ;;  %v1594_v5 = vrot.slane %v324_v61, 9  ;;  %v311_v8 = vor.u32 %v310_v1, %v307_v0  ;;  %v327_v45 = vld [vmem:[%s2177_s27 + $0x48] sm:$0xe]  ;;  %v2035_v0 = vld [vmem:[%s2561_s1 + $0x220] sm:$0xff]  }
  0x3c   : > { %1867 = vmatprep.subr.bf16.mxu1 %v2015_v28  ;;  %v1618_v28 = vcombine.low %v2234_v9, %v2278_v43  ;;  %v2032_v9 = vld [vmem:[%s2561_s1 + $0x238] sm:$0xff]   ;;  %v2033_v43 = vld [vmem:[%s2561_s1 + $0x230] sm:$0xff]   ;;  %v1597_v48 = vrot.slane %v327_v45, 9 }
  0x3d   : > { %1138 = vmatmul.mubr.bf16.gmra.mxu0 %v2371_v37  ;;  %v2409_v13 = vsel %vm2211_vm4, %v1594_v5, %v373_v34  ;;  %v312_v15 = vrot.slane %v311_v8, 4  ;;  %v1616_v8 = vcombine.low %v2368_v36, %v2413_v14  ;;  %v2040_v36 = vld [vmem:[%s2561_s1 + $0x200] sm:$0xff]  }
  0x3e   : > { %1203 = vmatmul.mubr.bf16.gmra.mxu1 %v2358_v32  ;;  %1828 = vmatpush3.bf16.msra.mxu0 %v2016_v33  ;;  %v2424_v18 = vcombine.low %v2409_v13, %v2417_v16  ;;  %v383_v33 = vshll.u32 %v2399_v57, 16  ;;  %v1620_v58 = vcombine.low %v2347_v26, %v2409_v13  ;;  %v2037_v26 = vld [vmem:[%s2561_s1 + $0x210] sm:$0xff]  }
  0x3f   : > { %1868 = vmatpush3.bf16.msra.mxu1 %v2017_v35  ;;  %1829 = vmatprep.subr.bf16.mxu0 %v2018_v38  ;;  %v2431_v20 = vsel %vm2220_vm5, %v312_v15, %v316_v3  ;;  %v1614_v35 = vcombine.low %v2244_v12, %v2292_v49  ;;  %v382_v38 = vrot.slane %v380_v29, 4  ;;  %v397_v12 = vrot.slane %v201_v41, 5 }
  0x40   : > { %1869 = vmatprep.subr.bf16.mxu1 %v2019_v40  ;;  %1210 = vmatprep.mubr.bf16.mxu1 %v1613_v4  ;;  %v2441_v23 = vcombine.low %v2413_v14, %v2431_v20  ;;  %v1619_v40 = vcombine.low %v2285_v46, %v2343_v25 }
  0x41   : > { %v2482_v54 = vsel %vm2211_vm4, %v1596_v47, %v397_v12 }
  0x42   : > { %1830 = vmatpush3.bf16.msra.mxu0 %v2020_v27  ;;  %1145 = vmatprep.mubr.bf16.mxu0 %v2441_v23  ;;  %v2034_v27 = vld [vmem:[%s2561_s1 + $0x228] sm:$0xff]   ;;  %v1621_v60 = vcombine.low %v2417_v16, %v2482_v54 }
  0x43   : > { %1870 = vmatpush3.bf16.msra.mxu1 %v2021_v42  ;;  %1831 = vmatprep.subr.bf16.mxu0 %v2024_v53  ;;  %v202_v42 = vld [vmem:[%s2177_s27 + $0x4c] sm:$0x1] }
  0x44   : > { %1871 = vmatprep.subr.bf16.mxu1 %v2025_v7  ;;  %v417_v49 = vrot.slane %v202_v42, 5  ;;  %v409_v52 = vshll.u32 %v202_v42, 16 }
  0x45   : > { %1146 = vmatmul.mubr.bf16.gmra.mxu0 %v2434_v21 }
  0x46   : > { %1832 = vmatpush3.bf16.msra.mxu0 %v2026_v17  ;;  %1211 = vmatmul.mubr.bf16.gmra.mxu1 %v2424_v18  ;;  %v411_v4 = vrot.slane %v409_v52, 5 }
  0x47   : > { %1872 = vmatpush3.bf16.msra.mxu1 %v2027_v19  ;;  %1833 = vmatprep.subr.bf16.mxu0 %v2028_v22 }
  0x48   : > { %1873 = vmatprep.subr.bf16.mxu1 %v2029_v24  ;;  %1316 = vmatprep.mubr.bf16.mxu1 %v2317_v59  ;;  %v385_v59 = vrot.slane %v383_v33, 5 }
  0x49   : > { %1251 = vmatprep.mubr.bf16.mxu0 %v1618_v28 }
  0x4a   : > { %1834 = vmatpush3.bf16.msra.mxu0 %v2030_v6  ;;  %v386_v46 = vor.u32 %v385_v59, %v382_v38 }
  0x4b   : > { %1874 = vmatpush3.bf16.msra.mxu1 %v2031_v31  ;;  %1911 = vmatprep.subr.bf16.mxu0 %v2032_v9 }
  0x4c   : > { %1935 = vmatprep.subr.bf16.mxu1 %v2032_v9  ;;  %v387_v1 = vrot.slane %v386_v46, 4 }
  0x4d   : > { %1252 = vmatmul.mubr.bf16.vlgmr.msra.gmra.mxu0 %v1614_v35 }
  0x4e   : > { %1317 = vmatmul.mubr.bf16.vlgmr.msra.gmra.mxu1 %v2309_v56  ;;  %v192_v56 = vld [vmem:[%s2177_s27 + $0x48] sm:$0xf]  ;;  %1912 = vmatpush3.bf16.msra.mxu0 %v2032_v9  ;;  %v392_v30 = vsel %vm2220_vm5, %v387_v1, %v391_v2 }
  0x4f   : > { %1943 = vmatpush3.bf16.msra.mxu1 %v2032_v9  ;;  %1324 = vmatprep.mubr.bf16.mxu1 %v2379_v39  ;;  %v400_v25 = vshrl.u32 %v192_v56, 16  ;;  %v403_v53 = vshll.u32 %v192_v56, 16  ;;  %v418_v39 = vsel %vm2211_vm4, %v1597_v48, %v417_v49  ;;  %v1622_v11 = vcombine.low %v2399_v57, %v192_v56 }
  0x50   : > { %1936 = vmatprep.subr.bf16.mxu1 %v2033_v43  ;;  %1259 = vmatprep.mubr.bf16.mxu0 %v1619_v40  ;;  %v1624_v61 = vcombine.low %v2482_v54, %v418_v39  ;;  %v1617_v13 = vcombine.low %v2431_v20, %v392_v30 }
  0x51   : > { %1913 = vmatprep.subr.bf16.mxu0 %v2033_v43  ;;  %v402_v34 = vrot.slane %v400_v25, 4  ;;  %v405_v62 = vrot.slane %v403_v53, 5 }
  0x52   : > { %1914 = vmatpush3.bf16.msra.mxu0 %v2033_v43 }
  0x53   : > { %1944 = vmatpush3.bf16.msra.mxu1 %v2033_v43  ;;  %v406_v3 = vor.u32 %v405_v62, %v402_v34  ;;  %1915 = vmatprep.subr.bf16.mxu0 %v2034_v27 }
  0x54   : > { %1937 = vmatprep.subr.bf16.mxu1 %v2034_v27 }
  0x55   : > { %v407_v5 = vrot.slane %v406_v3, 4  ;;  %1260 = vmatmul.mubr.bf16.gmra.mxu0 %v1615_v63 }
  0x56   : > { %1325 = vmatmul.mubr.bf16.gmra.mxu1 %v2371_v37  ;;  %1916 = vmatpush3.bf16.msra.mxu0 %v2034_v27 }
  0x57   : > { %1945 = vmatpush3.bf16.msra.mxu1 %v2034_v27  ;;  %1332 = vmatprep.mubr.bf16.mxu1 %v2441_v23  ;;  %v412_v37 = vsel %vm2220_vm5, %v407_v5, %v411_v4 }
  0x58   : > { %1938 = vmatprep.subr.bf16.mxu1 %v2035_v0  ;;  %1267 = vmatprep.mubr.bf16.mxu0 %v1620_v58  ;;  %v1623_v7 = vcombine.low %v392_v30, %v412_v37 }
  0x59   : > { %1917 = vmatprep.subr.bf16.mxu0 %v2035_v0 }
  0x5a   : > { %1918 = vmatpush3.bf16.msra.mxu0 %v2035_v0 }
  0x5b   : > { %1946 = vmatpush3.bf16.msra.mxu1 %v2035_v0  ;;  %1919 = vmatprep.subr.bf16.mxu0 %v2036_v55 }
  0x5c   : > { %1939 = vmatprep.subr.bf16.mxu1 %v2036_v55 }
  0x5d   : > { %1268 = vmatmul.mubr.bf16.gmra.mxu0 %v1616_v8 }
  0x5e   : > { %1333 = vmatmul.mubr.bf16.gmra.mxu1 %v2434_v21  ;;  %1920 = vmatpush3.bf16.msra.mxu0 %v2036_v55 }
  0x5f   : > { %1947 = vmatpush3.bf16.msra.mxu1 %v2036_v55  ;;  %1340 = vmatprep.mubr.bf16.mxu1 %v1623_v7 }
  0x60   : > { %1940 = vmatprep.subr.bf16.mxu1 %v2037_v26  ;;  %1275 = vmatprep.mubr.bf16.mxu0 %v1621_v60 }
  0x61   : > { %1921 = vmatprep.subr.bf16.mxu0 %v2037_v26 }
  0x62   : > { %1922 = vmatpush3.bf16.msra.mxu0 %v2037_v26 }
  0x63   : > { %1948 = vmatpush3.bf16.msra.mxu1 %v2037_v26  ;;  %1923 = vmatprep.subr.bf16.mxu0 %v2039_v10 }
  0x64   : > { %1941 = vmatprep.subr.bf16.mxu1 %v2039_v10 }
  0x65   : > { %1276 = vmatmul.mubr.bf16.gmra.mxu0 %v1617_v13 }
  0x66   : > { %1341 = vmatmul.mubr.bf16.gmra.mxu1 %v1622_v11  ;;  %1924 = vmatpush3.bf16.msra.mxu0 %v2039_v10 }
  0x67   : > { %1949 = vmatpush3.bf16.msra.mxu1 %v2039_v10  ;;  %1931 = vmatprep.mubr.bf16.mxu1 %v2424_v18 }
  0x68   : > { %1942 = vmatprep.subr.bf16.mxu1 %v2040_v36  ;;  %1927 = vmatprep.mubr.bf16.mxu0 %v2296_v51 }
  0x69   : > { %1925 = vmatprep.subr.bf16.mxu0 %v2040_v36 }
  0x6a   : > { %1926 = vmatpush3.bf16.msra.mxu0 %v2040_v36 }
  0x6b   : > { %1950 = vmatpush3.bf16.msra.mxu1 %v2040_v36 }
  0x6d   : > { %1928 = vmatmul.mubr.bf16.vlgmr.msra.gmra.mxu0 %v2358_v32 }
  0x6e   : > { %1932 = vmatmul.mubr.bf16.vlgmr.msra.gmra.mxu1 %v1624_v61 }
  0xed   : > { %v1755_v14 = vpop.f32.mrf.mxu0 }
  0xee   : > { %v1795_v57 = vpop.f32.mrf.mxu1 }
  0xef   : > { %v1756_v17 = vpop.f32.mrf.mxu0 }
  0xf0   : > { %v1796_v15 = vpop.f32.mrf.mxu1  ;;  %v1757_v26 = vadd.f32 %v1756_v17, %v1755_v14 }
  0xf1   : > { %v2522_v16 = vadd.f32 %v1796_v15, %v1795_v57  ;;  %v2526_v20 = vpop.f32.mrf.mxu0 }
  0xf2   : > { %v2524_v19 = vpop.f32.mrf.mxu1  ;;  %2569 = vst [vmem:[#allocation3_spill] sm:$0xff] %v2526_v20 }
  0xf3   : > { %2568 = vst [vmem:[#allocation2_spill] sm:$0xff] %v2524_v19  ;;  %v2530_v21 = vpop.f32.mrf.mxu0  ;;  %v1189_v20 = vadd.f32 %v2522_v16, %v1757_v26 }
  0xf4   : > { %v2528_v18 = vpop.f32.mrf.mxu1  ;;  %2571 = vst [vmem:[#allocation5_spill] sm:$0xff] %v2530_v21 }
  0xf5   : > { %2570 = vst [vmem:[#allocation4_spill] sm:$0xff] %v2528_v18  ;;  %v1761_v23 = vpop.f32.mrf.mxu0 }
  0xf6   : > { %v1801_v51 = vpop.f32.mrf.mxu1 }
  0xf7   : > { %v1762_v28 = vpop.f32.mrf.mxu0 }
  0xf8   : > { %v1802_v22 = vpop.f32.mrf.mxu1  ;;  %v1763_v7 = vadd.f32 %v1762_v28, %v1761_v23 }
  0xf9   : > { %v1764_v32 = vpop.f32.mrf.mxu0  ;;  %v1803_v8 = vadd.f32 %v1802_v22, %v1801_v51  ;;  %v2576_v14 = vld [vmem:[#allocation3_spill] sm:$0xff] }
  0xfa   : > { %v1804_v24 = vpop.f32.mrf.mxu1  ;;  %v2578_v51 = vld [vmem:[#allocation2_spill] sm:$0xff] }
  0xfb   : > { %v1765_v29 = vpop.f32.mrf.mxu0  ;;  %v2577_v17 = vld [vmem:[#allocation5_spill] sm:$0xff] }
  0xfc   : > { %v1805_v6 = vpop.f32.mrf.mxu1  ;;  %v1766_v10 = vadd.f32 %v1765_v29, %v1764_v32  ;;  %v1760_v23 = vadd.f32 %v2577_v17, %v2576_v14  ;;  %v2579_v22 = vld [vmem:[#allocation4_spill] sm:$0xff] }
  0xfd   : > { %v1767_v9 = vpop.f32.mrf.mxu0  ;;  %v1806_v11 = vadd.f32 %v1805_v6, %v1804_v24  ;;  %v1800_v28 = vadd.f32 %v2579_v22, %v2578_v51  ;;  %v1197_v24 = vadd.f32 %v1803_v8, %v1763_v7 }
  0xfe   : > { %v1807_v31 = vpop.f32.mrf.mxu1 }
  0xff   : > { %v1768_v35 = vpop.f32.mrf.mxu0  ;;  %v1200_v6 = vadd.f32 %v1806_v11, %v1766_v10 }
 0x100   : > { %v1808_v33 = vpop.f32.mrf.mxu1  ;;  %v1769_v36 = vadd.f32 %v1768_v35, %v1767_v9 }
 0x101   : > { %v1770_v38 = vpop.f32.mrf.mxu0  ;;  %v1809_v13 = vadd.f32 %v1808_v33, %v1807_v31 }
 0x102   : > { %v1810_v43 = vpop.f32.mrf.mxu1 }
 0x103   : > { %v1771_v40 = vpop.f32.mrf.mxu0  ;;  %v1205_v29 = vadd.f32 %v1809_v13, %v1769_v36 }
 0x104   : > { %v1811_v59 = vpop.f32.mrf.mxu1 }
 0x105   : > { %v1773_v42 = vpop.f32.mrf.mxu0 }
 0x106   : > { %v1813_v27 = vpop.f32.mrf.mxu1 }
 0x107   : > { %v1774_v45 = vpop.f32.mrf.mxu0 }
 0x108   : > { %v1814_v41 = vpop.f32.mrf.mxu1  ;;  %v1775_v15 = vadd.f32 %v1774_v45, %v1773_v42 }
 0x109   : > { %v1776_v49 = vpop.f32.mrf.mxu0 }
 0x10a   : > { %v1816_v44 = vpop.f32.mrf.mxu1 }
 0x10b   : > { %v1777_v48 = vpop.f32.mrf.mxu0 }
 0x10c   : > { %v1817_v12 = vpop.f32.mrf.mxu1  ;;  %v1778_v18 = vadd.f32 %v1777_v48, %v1776_v49 }
 0x10d   : > { %v1835_v50 = vpop.f32.mrf.mxu0  ;;  %v1818_v19 = vadd.f32 %v1817_v12, %v1816_v44 }
 0x10e   : > { %v2532_v47 = vpop.f32.mrf.mxu1 }
 0x10f   : > { %2572 = vst [vmem:[#allocation6_spill] sm:$0xff] %v2532_v47  ;;  %v1836_v46 = vpop.f32.mrf.mxu0  ;;  %v1812_v47 = vadd.f32 %v1811_v59, %v1810_v43  ;;  %v1216_v16 = vadd.f32 %v1818_v19, %v1778_v18  ;;  %v1192_v19 = vadd.f32 %v1800_v28, %v1760_v23 }
 0x110   : > { %v2534_v56 = vpop.f32.mrf.mxu1 }
 0x111   : > { %2573 = vst [vmem:[#allocation7_spill] sm:$0xff] %v2534_v56  ;;  %v1838_v53 = vpop.f32.mrf.mxu0  ;;  %v1772_v56 = vadd.f32 %v1771_v40, %v1770_v38 }
 0x112   : > { %v2536_v52 = vpop.f32.mrf.mxu1 }
 0x113   : > { %2574 = vst [vmem:[#allocation8_spill] sm:$0xff] %v2536_v52  ;;  %v1839_v39 = vpop.f32.mrf.mxu0 }
 0x114   : > { %v2538_v25 = vpop.f32.mrf.mxu1  ;;  %v1840_v42 = vadd.f32 %v1839_v39, %v1838_v53 }
 0x115   : > { %2575 = vst [vmem:[#allocation9_spill] sm:$0xff] %v2538_v25  ;;  %v1841_v34 = vpop.f32.mrf.mxu0  ;;  %v1815_v25 = vadd.f32 %v1814_v41, %v1813_v27  ;;  %v1208_v27 = vadd.f32 %v1812_v47, %v1772_v56  ;;  %v1837_v41 = vadd.f32 %v1836_v46, %v1835_v50 }
 0x116   : > { %v1881_v54 = vpop.f32.mrf.mxu1  ;;  %v2580_v56 = vld [vmem:[#allocation6_spill] sm:$0xff] }
 0x117   : > { %v1842_v63 = vpop.f32.mrf.mxu0  ;;  %v1213_v35 = vadd.f32 %v1815_v25, %v1775_v15  ;;  %v1254_v18 = vadd.f32 %v1837_v41, %v1189_v20 }
 0x118   : > { %v1882_v61 = vpop.f32.mrf.mxu1  ;;  %v1843_v43 = vadd.f32 %v1842_v63, %v1841_v34  ;;  %v2581_v50 = vld [vmem:[#allocation7_spill] sm:$0xff] }
 0x119   : > { %v1844_v1 = vpop.f32.mrf.mxu0  ;;  %v1883_v45 = vadd.f32 %v1882_v61, %v1881_v54  ;;  %v1877_v46 = vadd.f32 %v2581_v50, %v2580_v56  ;;  %v1257_v61 = vadd.f32 %v1840_v42, %v1192_v19 }
 0x11a   : > { %v1884_v62 = vpop.f32.mrf.mxu1  ;;  %v1262_v25 = vadd.f32 %v1843_v43, %v1197_v24 }
 0x11b   : > { %v1845_v3 = vpop.f32.mrf.mxu0  ;;  %v1319_v20 = vadd.f32 %v1877_v46, %v1254_v18 }
 0x11c   : > { %v1885_v0 = vpop.f32.mrf.mxu1  ;;  %v1846_v38 = vadd.f32 %v1845_v3, %v1844_v1 }
 0x11d   : > { %v1847_v58 = vpop.f32.mrf.mxu0  ;;  %v1886_v12 = vadd.f32 %v1885_v0, %v1884_v62  ;;  %v2582_v62 = vld [vmem:[#allocation8_spill] sm:$0xff]  ;;  %v2583_v0 = vld [vmem:[#allocation9_spill] sm:$0xff] }
 0x11e   : > { %v1887_v2 = vpop.f32.mrf.mxu1  ;;  %v1265_v34 = vadd.f32 %v1846_v38, %v1200_v6  ;;  %v1880_v1 = vadd.f32 %v2583_v0, %v2582_v62 }
 0x11f   : > { %v1848_v55 = vpop.f32.mrf.mxu0 }
 0x120   : > { %v1888_v4 = vpop.f32.mrf.mxu1  ;;  %v1849_v31 = vadd.f32 %v1848_v55, %v1847_v58  ;;  %v1322_v51 = vadd.f32 %v1880_v1, %v1257_v61 }
 0x121   : > { %v1850_v37 = vpop.f32.mrf.mxu0  ;;  %v1889_v8 = vadd.f32 %v1888_v4, %v1887_v2 }
 0x122   : > { %v1890_v5 = vpop.f32.mrf.mxu1  ;;  %v1270_v7 = vadd.f32 %v1849_v31, %v1205_v29 }
 0x123   : > { %v1851_v57 = vpop.f32.mrf.mxu0 }
 0x124   : > { %v1891_v30 = vpop.f32.mrf.mxu1  ;;  %v1852_v33 = vadd.f32 %v1851_v57, %v1850_v37  ;;  %v1335_v3 = vadd.f32 %v1889_v8, %v1270_v7 }
 0x125   : > { %v1853_v21 = vpop.f32.mrf.mxu0  ;;  %v1892_v55 = vadd.f32 %v1891_v30, %v1890_v5  ;;  %v1327_v5 = vadd.f32 %v1883_v45, %v1262_v25  ;;  %v1330_v30 = vadd.f32 %v1886_v12, %v1265_v34 }
 0x126   : > { %v1893_v60 = vpop.f32.mrf.mxu1  ;;  %v1273_v58 = vadd.f32 %v1852_v33, %v1208_v27 }
 0x127   : > { %v1854_v9 = vpop.f32.mrf.mxu0 }
 0x128   : > { %v1894_v52 = vpop.f32.mrf.mxu1  ;;  %v1855_v59 = vadd.f32 %v1854_v9, %v1853_v21  ;;  %v1338_v4 = vadd.f32 %v1892_v55, %v1273_v58 }
 0x129   : > { %v1856_v44 = vpop.f32.mrf.mxu0  ;;  %v1895_v48 = vadd.f32 %v1894_v52, %v1893_v60 }
 0x12a   : > { %v1896_v32 = vpop.f32.mrf.mxu1  ;;  %v1278_v49 = vadd.f32 %v1855_v59, %v1213_v35 }
 0x12b   : > { %v1857_v37 = vpop.f32.mrf.mxu0 }
 0x12c   : > { %v1897_v40 = vpop.f32.mrf.mxu1  ;;  %v1858_v63 = vadd.f32 %v1857_v37, %v1856_v44  ;;  %v1343_v52 = vadd.f32 %v1895_v48, %v1278_v49 }
 0x12d   : > { %v1898_v21 = vadd.f32 %v1897_v40, %v1896_v32  ;;  %v1929_v53 = vpop.f32.mrf.mxu0 }
 0x12e   : > { %v1933_v26 = vpop.f32.mrf.mxu1  ;;  %v1281_v54 = vadd.f32 %v1858_v63, %v1216_v16  ;;  %v1392_v57 = vadd.f32 %v1929_v53, %v1327_v5 }
 0x12f   : > { %v1383_v2 = vpop.f32.mrf.mxu0  ;;  %v1408_v15 = vadd.f32 %v1933_v26, %v1343_v52 }
 0x130   : > { %v1399_v47 = vpop.f32.mrf.mxu1  ;;  %v1346_v60 = vadd.f32 %v1898_v21, %v1281_v54  ;;  %v1384_v23 = vadd.f32 %v1383_v2, %v1319_v20  ;;  %v1469_v35 = vmul.f32 %v1392_v57, %v1392_v57 }
 0x131   : > { %v1400_v11 = vadd.f32 %v1399_v47, %v1335_v3  ;;  %v1930_v36 = vpop.f32.mrf.mxu0  ;;  %v1473_v49 = vmul.f32 %v1408_v15, %v1408_v15 }
 0x132   : > { %v1934_v39 = vpop.f32.mrf.mxu1  ;;  %v1395_v14 = vadd.f32 %v1930_v36, %v1330_v30  ;;  %v1467_v29 = vmul.f32 %v1384_v23, %v1384_v23 }
 0x133   : > { %v1411_v17 = vadd.f32 %v1934_v39, %v1346_v60  ;;  %v1386_v22 = vpop.f32.mrf.mxu0  ;;  %v1471_v16 = vmul.f32 %v1400_v11, %v1400_v11 }
 0x134   : > { %v1402_v10 = vpop.f32.mrf.mxu1  ;;  %v1724_v24 = vpack.c.bf16 %v1395_v14, %v1392_v57  ;;  %v1387_v6 = vadd.f32 %v1386_v22, %v1322_v51  ;;  %v1470_v59 = vmul.f32 %v1395_v14, %v1395_v14 }
 0x135   : > { %v1403_v13 = vadd.f32 %v1402_v10, %v1338_v4  ;;  %v1734_v32 = vpack.c.bf16 %v1411_v17, %v1408_v15  ;;  %v1474_v7 = vmul.f32 %v1411_v17, %v1411_v17 }
 0x136   : > { %1736 = vst [vmem:[%s177_s17 + $0x8] sm:$0xff] %v1724_v24   ;;  %v1719_v31 = vpack.c.bf16 %v1387_v6, %v1384_v23  ;;  %v1454_v33 = vadd.f32 %v1387_v6, %v1384_v23  ;;  %v1468_v9 = vmul.f32 %v1387_v6, %v1387_v6 }
 0x137   : > { %v1729_v28 = vpack.c.bf16 %v1403_v13, %v1400_v11  ;;  %1738 = vst [vmem:[%s177_s17 + $0x18] sm:$0xff] %v1734_v32   ;;  %v1472_v45 = vmul.f32 %v1403_v13, %v1403_v13 }
 0x138   : > { %1720 = vst [vmem:[%s177_s17] sm:$0xff] %v1719_v31   ;;  %v1455_v43 = vadd.f32 %v1454_v33, %v1392_v57  ;;  %v1475_v38 = vadd.f32 %v1468_v9, %v1467_v29 }
 0x139   : > { %1737 = vst [vmem:[%s177_s17 + $0x10] sm:$0xff] %v1729_v28  }
 0x13a   : > { %v1476_v40 = vadd.f32 %v1475_v38, %v1469_v35  ;;  %v1456_v27 = vadd.f32 %v1455_v43, %v1395_v14 }
 0x13c   : > { %v1457_v41 = vadd.f32 %v1456_v27, %v1400_v11  ;;  %v1477_v42 = vadd.f32 %v1476_v40, %v1470_v59 }
 0x13e   : > { %v1458_v44 = vadd.f32 %v1457_v41, %v1403_v13  ;;  %v1478_v12 = vadd.f32 %v1477_v42, %v1471_v16 }
 0x140   : > { %v1459_v48 = vadd.f32 %v1458_v44, %v1408_v15  ;;  %v1479_v26 = vadd.f32 %v1478_v12, %v1472_v45 }
 0x142   : > { %v1460_v8 = vadd.f32 %v1459_v48, %v1411_v17  ;;  %v1480_v58 = vadd.f32 %v1479_v26, %v1473_v49 }
 0x144   : > { %v1461_v55 = vrot.slane %v1460_v8, 4  ;;  %v1481_v37 = vadd.f32 %v1480_v58, %v1474_v7 }
 0x146   : > { %v1462_v25 = vadd.f32 %v1461_v55, %v1460_v8  ;;  %v1482_v34 = vrot.slane %v1481_v37, 4 }
 0x148   : > { %v1463_v63 = vrot.slane %v1462_v25, 2  ;;  %v1483_v21 = vadd.f32 %v1482_v34, %v1481_v37 }
 0x14a   : > { %v1464_v47 = vadd.f32 %v1463_v63, %v1462_v25  ;;  %v1484_v19 = vrot.slane %v1483_v21, 2 }
 0x14c   : > { %v1465_v18 = vrot.slane %v1464_v47, 1  ;;  %v1485_v56 = vadd.f32 %v1484_v19, %v1483_v21 }
 0x14e   : > { %v1486_v50 = vrot.slane %v1485_v56, 1  ;;  %v1466_v46 = vadd.f32 %v1465_v18, %v1464_v47 }
 0x150   : > { %v1487_v53 = vadd.f32 %v1486_v50, %v1485_v56 }
 0x152   : > { %v1489_v54 = vsel %vm1488_vm6, %v1466_v46, %v1487_v53 }
 0x153   : > { %v1491_v52 = vsel %vm1490_vm7, %v1489_v54, 0.0 }
 0x154   : > { %1492 = vst [vmem:[%s181_s21] sm:$0xff] %v1491_v52 }
 0x155 PF: > { %s14_s12 = sadd.s32 1, %s2047_s12  }
 0x156   : > { %p11_p4 = scmp.ge.s32.totalorder %s14_s12, 4  }
 0x158   :  { %13 = sbr.rel (!%p11_p4) target bundleno = 1 (0x1), region = 70 }

// kernel: _lambda_.23
= control target key start
LH: loop header
LB: loop body
LE: loop exit
PB: predicated region body
PF: predicated region fallthrough
CT: control target
= control target key end

     0   :  { %s1324_s12 = smov 0   ;;  %s1482_s0 = inlined_call_operand.vmem [shape: bf16[2,16,16,256], index: 0, kind: input, shape index: {}]   ;;  %s1483_s1 = inlined_call_operand.vmem [shape: bf16[256,128], index: 1, kind: input, shape index: {}]   ;;  %s1484_s2 = inlined_call_operand.vmem [shape: f32[1,128], index: 2, kind: input, shape index: {}]   ;;  %s1485_s3 = inlined_call_operand.vmem [shape: bf16[2,256,128], index: 3, kind: output, shape index: {}]  }
   0x1 LB: > { %s875_s13 = sadd.s32 4294967295, %s1302_s12   ;;  %p879_p0 = scmp.ge.s32.totalorder %s1302_s12, 1  ;;  %s1302_s12 = sphi %s1324_s12, %s13_s12  }
   0x2   : > { %p137_p1 = scmp.lt.s32.totalorder %s1302_s12, 3 }
   0x4   : > { %p138_p2 = pnand %p879_p0, %p137_p1 }
   0x5   : > { %p161_p3 = scmp.lt.s32.totalorder (!%p138_p2), %s875_s13, 1 }
   0x6   : > { %141 = sbr.rel (%p138_p2) target bundleno = 306 (0x132), region = 32 }
   0xb   : > { %v1232_v0 = vld [vmem:[%s1483_s1 + $0x78] sm:$0xff]   ;;  %v1234_v2 = vld [vmem:[%s1483_s1 + $0x70] sm:$0xff]   ;;  %v1236_v4 = vld [vmem:[%s1483_s1 + $0x68] sm:$0xff]   ;;  %s1487_s13 = smov (!%p161_p3, %s875_s13), 1 }
   0xc   : > { %v1233_v1 = vld [vmem:[%s1483_s1 + $0x38] sm:$0xff]   ;;  %1096 = vmatprep.subr.bf16.mxu0 %v1232_v0  ;;  %1208 = vmatprep.subr.bf16.mxu1 %v1232_v0  ;;  %v1235_v3 = vld [vmem:[%s1483_s1 + $0x30] sm:$0xff]   ;;  %v1237_v5 = vld [vmem:[%s1483_s1 + $0x28] sm:$0xff]   ;;  %s967_s30 = sshll.u32 %s1487_s13, 8  ;;  %s968_s27 = sshll.u32 %s1487_s13, 7 }
   0xd   : > { %1097 = vmatpush3.bf16.msra.mxu0 %v1233_v1  ;;  %1216 = vmatpush3.bf16.msra.mxu1 %v1233_v1  ;;  %v1238_v6 = vld [vmem:[%s1483_s1 + $0x60] sm:$0xff]   ;;  %v1240_v8 = vld [vmem:[%s1483_s1 + $0x58] sm:$0xff]   ;;  %s1365_s8 = scalar_lea.vmem %s1482_s0, %s967_s30  ;;  %v1242_v10 = vld [vmem:[%s1483_s1 + $0x50] sm:$0xff]   ;;  %s1433_s30 = scalar_lea.vmem %s1485_s3, %s968_s27 }
   0xe   : > { %1098 = vmatprep.subr.bf16.mxu0 %v1234_v2  ;;  %1209 = vmatprep.subr.bf16.mxu1 %v1234_v2  ;;  %v1239_v7 = vld [vmem:[%s1483_s1 + $0x20] sm:$0xff]   ;;  %v1241_v9 = vld [vmem:[%s1483_s1 + $0x18] sm:$0xff]   ;;  %v1243_v13 = vld [vmem:[%s1483_s1 + $0x10] sm:$0xff]  }
   0xf   : > { %v1250_v11 = vld [vmem:[%s1365_s8 + $0x4] ss:$8 sps:$4 sm:$0xff]   ;;  %v1248_v18 = vld [vmem:[%s1365_s8] ss:$8 sps:$4 sm:$0xff]   ;;  %v1254_v20 = vld [vmem:[%s1365_s8 + $0x14] ss:$8 sps:$4 sm:$0xff]  }
  0x10   : > { %v1253_v12 = vld [vmem:[%s1365_s8 + $0x84] ss:$8 sps:$4 sm:$0xff]   ;;  %531 = vmatprep.mubr.bf16.mxu0 %v1250_v11  ;;  %v1251_v19 = vld [vmem:[%s1365_s8 + $0x80] ss:$8 sps:$4 sm:$0xff]   ;;  %v1256_v21 = vld [vmem:[%s1365_s8 + $0x94] ss:$8 sps:$4 sm:$0xff]  }
  0x11   : > { %1099 = vmatpush3.bf16.msra.mxu0 %v1235_v3  ;;  %1217 = vmatpush3.bf16.msra.mxu1 %v1235_v3  ;;  %v1244_v14 = vld [vmem:[%s1483_s1 + $0x48] sm:$0xff]   ;;  %v1246_v16 = vld [vmem:[%s1483_s1 + $0x40] sm:$0xff]   ;;  %v1258_v22 = vld [vmem:[%s1365_s8 + $0x10] ss:$8 sps:$4 sm:$0xff]  }
  0x12   : > { %1100 = vmatprep.subr.bf16.mxu0 %v1236_v4  ;;  %1210 = vmatprep.subr.bf16.mxu1 %v1236_v4  ;;  %v1245_v15 = vld [vmem:[%s1483_s1 + $0x8] sm:$0xff]   ;;  %v1247_v17 = vld [vmem:[%s1483_s1] sm:$0xff]   ;;  %v1259_v23 = vld [vmem:[%s1365_s8 + $0x90] ss:$8 sps:$4 sm:$0xff]  }
  0x13   : > { %595 = vmatprep.mubr.bf16.mxu1 %v1253_v12  ;;  %v1260_v24 = vld [vmem:[%s1365_s8 + $0x24] ss:$8 sps:$4 sm:$0xff]   ;;  %v1264_v26 = vld [vmem:[%s1365_s8 + $0x20] ss:$8 sps:$4 sm:$0xff]   ;;  %v1266_v28 = vld [vmem:[%s1365_s8 + $0x34] ss:$8 sps:$4 sm:$0xff]  }
  0x14   : > { %v1262_v25 = vld [vmem:[%s1365_s8 + $0xa4] ss:$8 sps:$4 sm:$0xff]   ;;  %v1265_v27 = vld [vmem:[%s1365_s8 + $0xa0] ss:$8 sps:$4 sm:$0xff]   ;;  %v1268_v29 = vld [vmem:[%s1365_s8 + $0xb4] ss:$8 sps:$4 sm:$0xff]  }
  0x15   : > { %1101 = vmatpush3.bf16.msra.mxu0 %v1237_v5  ;;  %1218 = vmatpush3.bf16.msra.mxu1 %v1237_v5  ;;  %v1270_v30 = vld [vmem:[%s1365_s8 + $0x30] ss:$8 sps:$4 sm:$0xff]   ;;  %v1272_v32 = vld [vmem:[%s1365_s8 + $0x44] ss:$8 sps:$4 sm:$0xff]   ;;  %v1276_v34 = vld [vmem:[%s1365_s8 + $0x40] ss:$8 sps:$4 sm:$0xff]  }
  0x16   : > { %1102 = vmatprep.subr.bf16.mxu0 %v1238_v6  ;;  %1211 = vmatprep.subr.bf16.mxu1 %v1238_v6  ;;  %v1271_v31 = vld [vmem:[%s1365_s8 + $0xb0] ss:$8 sps:$4 sm:$0xff]   ;;  %v1274_v33 = vld [vmem:[%s1365_s8 + $0xc4] ss:$8 sps:$4 sm:$0xff]   ;;  %v1277_v35 = vld [vmem:[%s1365_s8 + $0xc0] ss:$8 sps:$4 sm:$0xff]  }
  0x17   : > { %v1278_v36 = vld [vmem:[%s1365_s8 + $0x54] ss:$8 sps:$4 sm:$0xff]   ;;  %v1282_v38 = vld [vmem:[%s1365_s8 + $0x50] ss:$8 sps:$4 sm:$0xff]   ;;  %v1284_v40 = vld [vmem:[%s1365_s8 + $0x64] ss:$8 sps:$4 sm:$0xff]  }
  0x18   : > { %v1280_v37 = vld [vmem:[%s1365_s8 + $0xd4] ss:$8 sps:$4 sm:$0xff]   ;;  %v1283_v39 = vld [vmem:[%s1365_s8 + $0xd0] ss:$8 sps:$4 sm:$0xff]   ;;  %v1286_v41 = vld [vmem:[%s1365_s8 + $0xe4] ss:$8 sps:$4 sm:$0xff]  }
  0x19   : > { %1103 = vmatpush3.bf16.msra.mxu0 %v1239_v7  ;;  %1219 = vmatpush3.bf16.msra.mxu1 %v1239_v7  ;;  %v1288_v42 = vld [vmem:[%s1365_s8 + $0x60] ss:$8 sps:$4 sm:$0xff]   ;;  %v1290_v44 = vld [vmem:[%s1365_s8 + $0x74] ss:$8 sps:$4 sm:$0xff]   ;;  %v1294_v46 = vld [vmem:[%s1365_s8 + $0x70] ss:$8 sps:$4 sm:$0xff]  }
  0x1a   : > { %1104 = vmatprep.subr.bf16.mxu0 %v1240_v8  ;;  %1212 = vmatprep.subr.bf16.mxu1 %v1240_v8  ;;  %v1289_v43 = vld [vmem:[%s1365_s8 + $0xe0] ss:$8 sps:$4 sm:$0xff]   ;;  %v1292_v45 = vld [vmem:[%s1365_s8 + $0xf4] ss:$8 sps:$4 sm:$0xff]   ;;  %v1295_v47 = vld [vmem:[%s1365_s8 + $0xf0] ss:$8 sps:$4 sm:$0xff]  }
  0x1b   : > { %v1423_v56 = vld [vmem:[%s1484_s2] ss:$0 sm:$0xff] }
  0x1d   : > { %1105 = vmatpush3.bf16.msra.mxu0 %v1241_v9  ;;  %1220 = vmatpush3.bf16.msra.mxu1 %v1241_v9 }
  0x1e   : > { %1106 = vmatprep.subr.bf16.mxu0 %v1242_v10  ;;  %1213 = vmatprep.subr.bf16.mxu1 %v1242_v10 }
  0x21   : > { %1107 = vmatpush3.bf16.msra.mxu0 %v1243_v13  ;;  %1221 = vmatpush3.bf16.msra.mxu1 %v1243_v13 }
  0x22   : > { %1108 = vmatprep.subr.bf16.mxu0 %v1244_v14  ;;  %1214 = vmatprep.subr.bf16.mxu1 %v1244_v14 }
  0x25   : > { %1109 = vmatpush3.bf16.msra.mxu0 %v1245_v15  ;;  %1222 = vmatpush3.bf16.msra.mxu1 %v1245_v15 }
  0x26   : > { %1110 = vmatprep.subr.bf16.mxu0 %v1246_v16  ;;  %1215 = vmatprep.subr.bf16.mxu1 %v1246_v16 }
  0x29   : > { %1111 = vmatpush3.bf16.msra.mxu0 %v1247_v17  ;;  %1223 = vmatpush3.bf16.msra.mxu1 %v1247_v17 }
  0x2c   : > { %532 = vmatmul.mubr.bf16.vlgmr.msra.gmra.mxu0 %v1248_v18  ;;  %596 = vmatmul.mubr.bf16.vlgmr.msra.gmra.mxu1 %v1251_v19 }
  0x2d   : > { %539 = vmatprep.mubr.bf16.mxu0 %v1254_v20  ;;  %603 = vmatprep.mubr.bf16.mxu1 %v1256_v21 }
  0x34   : > { %540 = vmatmul.mubr.bf16.gmra.mxu0 %v1258_v22  ;;  %604 = vmatmul.mubr.bf16.gmra.mxu1 %v1259_v23 }
  0x35   : > { %547 = vmatprep.mubr.bf16.mxu0 %v1260_v24  ;;  %611 = vmatprep.mubr.bf16.mxu1 %v1262_v25 }
  0x3c   : > { %548 = vmatmul.mubr.bf16.gmra.mxu0 %v1264_v26  ;;  %612 = vmatmul.mubr.bf16.gmra.mxu1 %v1265_v27 }
  0x3d   : > { %555 = vmatprep.mubr.bf16.mxu0 %v1266_v28  ;;  %619 = vmatprep.mubr.bf16.mxu1 %v1268_v29 }
  0x44   : > { %556 = vmatmul.mubr.bf16.gmra.mxu0 %v1270_v30  ;;  %620 = vmatmul.mubr.bf16.gmra.mxu1 %v1271_v31 }
  0x45   : > { %563 = vmatprep.mubr.bf16.mxu0 %v1272_v32  ;;  %627 = vmatprep.mubr.bf16.mxu1 %v1274_v33 }
  0x4c   : > { %564 = vmatmul.mubr.bf16.gmra.mxu0 %v1276_v34  ;;  %628 = vmatmul.mubr.bf16.gmra.mxu1 %v1277_v35 }
  0x4d   : > { %571 = vmatprep.mubr.bf16.mxu0 %v1278_v36  ;;  %635 = vmatprep.mubr.bf16.mxu1 %v1280_v37 }
  0x54   : > { %572 = vmatmul.mubr.bf16.gmra.mxu0 %v1282_v38  ;;  %636 = vmatmul.mubr.bf16.gmra.mxu1 %v1283_v39 }
  0x55   : > { %579 = vmatprep.mubr.bf16.mxu0 %v1284_v40  ;;  %643 = vmatprep.mubr.bf16.mxu1 %v1286_v41 }
  0x5c   : > { %580 = vmatmul.mubr.bf16.gmra.mxu0 %v1288_v42  ;;  %644 = vmatmul.mubr.bf16.gmra.mxu1 %v1289_v43 }
  0x5d   : > { %587 = vmatprep.mubr.bf16.mxu0 %v1290_v44  ;;  %651 = vmatprep.mubr.bf16.mxu1 %v1292_v45 }
  0x64   : > { %588 = vmatmul.mubr.bf16.gmra.mxu0 %v1294_v46  ;;  %652 = vmatmul.mubr.bf16.gmra.mxu1 %v1295_v47 }
  0xec   : > { %v1112_v48 = vpop.f32.mrf.mxu0  ;;  %v1160_v49 = vpop.f32.mrf.mxu1 }
  0xee   : > { %v1113_v50 = vpop.f32.mrf.mxu0  ;;  %v1161_v51 = vpop.f32.mrf.mxu1 }
  0xef   : > { %v1114_v54 = vadd.f32 %v1113_v50, %v1112_v48  ;;  %v1162_v55 = vadd.f32 %v1161_v51, %v1160_v49 }
  0xf0   : > { %v1115_v52 = vpop.f32.mrf.mxu0  ;;  %v1163_v53 = vpop.f32.mrf.mxu1 }
  0xf1   : > { %v534_v63 = vadd.f32 %v1114_v54, %v1423_v56  ;;  %v598_v0 = vadd.f32 %v1162_v55, %v1423_v56 }
  0xf2   : > { %v1116_v57 = vpop.f32.mrf.mxu0  ;;  %v1164_v58 = vpop.f32.mrf.mxu1 }
  0xf3   : > { %v1117_v59 = vadd.f32 %v1116_v57, %v1115_v52  ;;  %v1165_v60 = vadd.f32 %v1164_v58, %v1163_v53 }
  0xf4   : > { %v1118_v61 = vpop.f32.mrf.mxu0  ;;  %v1166_v62 = vpop.f32.mrf.mxu1 }
  0xf5   : > { %v537_v1 = vadd.f32 %v1117_v59, %v1423_v56  ;;  %v601_v2 = vadd.f32 %v1165_v60, %v1423_v56 }
  0xf6   : > { %v1119_v3 = vpop.f32.mrf.mxu0  ;;  %v1167_v4 = vpop.f32.mrf.mxu1 }
  0xf7   : > { %v1004_v5 = vpack.c.bf16 %v537_v1, %v534_v63  ;;  %v1044_v6 = vpack.c.bf16 %v601_v2, %v598_v0  ;;  %v1120_v9 = vadd.f32 %v1119_v3, %v1118_v61  ;;  %v1168_v10 = vadd.f32 %v1167_v4, %v1166_v62 }
  0xf8   : > { %v1121_v7 = vpop.f32.mrf.mxu0  ;;  %v1169_v8 = vpop.f32.mrf.mxu1 }
  0xf9   : > { %1005 = vst [vmem:[%s1433_s30] sm:$0xff] %v1004_v5   ;;  %1088 = vst [vmem:[%s1433_s30 + $0x40] sm:$0xff] %v1044_v6   ;;  %v542_v17 = vadd.f32 %v1120_v9, %v1423_v56  ;;  %v606_v18 = vadd.f32 %v1168_v10, %v1423_v56 }
  0xfa   : > { %v1122_v11 = vpop.f32.mrf.mxu0  ;;  %v1170_v12 = vpop.f32.mrf.mxu1 }
  0xfb   : > { %v1123_v13 = vadd.f32 %v1122_v11, %v1121_v7  ;;  %v1171_v14 = vadd.f32 %v1170_v12, %v1169_v8 }
  0xfc   : > { %v1124_v15 = vpop.f32.mrf.mxu0  ;;  %v1172_v16 = vpop.f32.mrf.mxu1 }
  0xfd   : > { %v545_v19 = vadd.f32 %v1123_v13, %v1423_v56  ;;  %v609_v20 = vadd.f32 %v1171_v14, %v1423_v56 }
  0xfe   : > { %v1125_v21 = vpop.f32.mrf.mxu0  ;;  %v1173_v22 = vpop.f32.mrf.mxu1 }
  0xff   : > { %v1009_v23 = vpack.c.bf16 %v545_v19, %v542_v17  ;;  %v1049_v24 = vpack.c.bf16 %v609_v20, %v606_v18  ;;  %v1126_v27 = vadd.f32 %v1125_v21, %v1124_v15  ;;  %v1174_v28 = vadd.f32 %v1173_v22, %v1172_v16 }
 0x100   : > { %v1127_v25 = vpop.f32.mrf.mxu0  ;;  %v1175_v26 = vpop.f32.mrf.mxu1 }
 0x101   : > { %1081 = vst [vmem:[%s1433_s30 + $0x8] sm:$0xff] %v1009_v23   ;;  %1089 = vst [vmem:[%s1433_s30 + $0x48] sm:$0xff] %v1049_v24   ;;  %v550_v35 = vadd.f32 %v1126_v27, %v1423_v56  ;;  %v614_v36 = vadd.f32 %v1174_v28, %v1423_v56 }
 0x102   : > { %v1128_v29 = vpop.f32.mrf.mxu0  ;;  %v1176_v30 = vpop.f32.mrf.mxu1 }
 0x103   : > { %v1129_v31 = vadd.f32 %v1128_v29, %v1127_v25  ;;  %v1177_v32 = vadd.f32 %v1176_v30, %v1175_v26 }
 0x104   : > { %v1130_v33 = vpop.f32.mrf.mxu0  ;;  %v1178_v34 = vpop.f32.mrf.mxu1 }
 0x105   : > { %v553_v37 = vadd.f32 %v1129_v31, %v1423_v56  ;;  %v617_v38 = vadd.f32 %v1177_v32, %v1423_v56 }
 0x106   : > { %v1131_v39 = vpop.f32.mrf.mxu0  ;;  %v1179_v40 = vpop.f32.mrf.mxu1 }
 0x107   : > { %v1014_v41 = vpack.c.bf16 %v553_v37, %v550_v35  ;;  %v1054_v42 = vpack.c.bf16 %v617_v38, %v614_v36  ;;  %v1132_v45 = vadd.f32 %v1131_v39, %v1130_v33  ;;  %v1180_v46 = vadd.f32 %v1179_v40, %v1178_v34 }
 0x108   : > { %v1133_v43 = vpop.f32.mrf.mxu0  ;;  %v1181_v44 = vpop.f32.mrf.mxu1 }
 0x109   : > { %1082 = vst [vmem:[%s1433_s30 + $0x10] sm:$0xff] %v1014_v41   ;;  %1090 = vst [vmem:[%s1433_s30 + $0x50] sm:$0xff] %v1054_v42   ;;  %v558_v53 = vadd.f32 %v1132_v45, %v1423_v56  ;;  %v622_v54 = vadd.f32 %v1180_v46, %v1423_v56 }
 0x10a   : > { %v1134_v47 = vpop.f32.mrf.mxu0  ;;  %v1182_v48 = vpop.f32.mrf.mxu1 }
 0x10b   : > { %v1135_v49 = vadd.f32 %v1134_v47, %v1133_v43  ;;  %v1183_v50 = vadd.f32 %v1182_v48, %v1181_v44 }
 0x10c   : > { %v1136_v51 = vpop.f32.mrf.mxu0  ;;  %v1184_v52 = vpop.f32.mrf.mxu1 }
 0x10d   : > { %v561_v55 = vadd.f32 %v1135_v49, %v1423_v56  ;;  %v625_v57 = vadd.f32 %v1183_v50, %v1423_v56 }
 0x10e   : > { %v1137_v58 = vpop.f32.mrf.mxu0  ;;  %v1185_v59 = vpop.f32.mrf.mxu1 }
 0x10f   : > { %v1019_v60 = vpack.c.bf16 %v561_v55, %v558_v53  ;;  %v1059_v61 = vpack.c.bf16 %v625_v57, %v622_v54  ;;  %v1138_v0 = vadd.f32 %v1137_v58, %v1136_v51  ;;  %v1186_v1 = vadd.f32 %v1185_v59, %v1184_v52 }
 0x110   : > { %v1139_v62 = vpop.f32.mrf.mxu0  ;;  %v1187_v63 = vpop.f32.mrf.mxu1 }
 0x111   : > { %1083 = vst [vmem:[%s1433_s30 + $0x18] sm:$0xff] %v1019_v60   ;;  %1091 = vst [vmem:[%s1433_s30 + $0x58] sm:$0xff] %v1059_v61   ;;  %v566_v8 = vadd.f32 %v1138_v0, %v1423_v56  ;;  %v630_v9 = vadd.f32 %v1186_v1, %v1423_v56 }
 0x112   : > { %v1140_v2 = vpop.f32.mrf.mxu0  ;;  %v1188_v3 = vpop.f32.mrf.mxu1 }
 0x113   : > { %v1141_v4 = vadd.f32 %v1140_v2, %v1139_v62  ;;  %v1189_v5 = vadd.f32 %v1188_v3, %v1187_v63 }
 0x114   : > { %v1142_v6 = vpop.f32.mrf.mxu0  ;;  %v1190_v7 = vpop.f32.mrf.mxu1 }
 0x115   : > { %v569_v10 = vadd.f32 %v1141_v4, %v1423_v56  ;;  %v633_v11 = vadd.f32 %v1189_v5, %v1423_v56 }
 0x116   : > { %v1143_v12 = vpop.f32.mrf.mxu0  ;;  %v1191_v13 = vpop.f32.mrf.mxu1 }
 0x117   : > { %v1024_v14 = vpack.c.bf16 %v569_v10, %v566_v8  ;;  %v1064_v15 = vpack.c.bf16 %v633_v11, %v630_v9  ;;  %v1144_v18 = vadd.f32 %v1143_v12, %v1142_v6  ;;  %v1192_v19 = vadd.f32 %v1191_v13, %v1190_v7 }
 0x118   : > { %v1145_v16 = vpop.f32.mrf.mxu0  ;;  %v1193_v17 = vpop.f32.mrf.mxu1 }
 0x119   : > { %1084 = vst [vmem:[%s1433_s30 + $0x20] sm:$0xff] %v1024_v14   ;;  %1092 = vst [vmem:[%s1433_s30 + $0x60] sm:$0xff] %v1064_v15   ;;  %v574_v26 = vadd.f32 %v1144_v18, %v1423_v56  ;;  %v638_v27 = vadd.f32 %v1192_v19, %v1423_v56 }
 0x11a   : > { %v1146_v20 = vpop.f32.mrf.mxu0  ;;  %v1194_v21 = vpop.f32.mrf.mxu1 }
 0x11b   : > { %v1147_v22 = vadd.f32 %v1146_v20, %v1145_v16  ;;  %v1195_v23 = vadd.f32 %v1194_v21, %v1193_v17 }
 0x11c   : > { %v1148_v24 = vpop.f32.mrf.mxu0  ;;  %v1196_v25 = vpop.f32.mrf.mxu1 }
 0x11d   : > { %v577_v28 = vadd.f32 %v1147_v22, %v1423_v56  ;;  %v641_v29 = vadd.f32 %v1195_v23, %v1423_v56 }
 0x11e   : > { %v1149_v30 = vpop.f32.mrf.mxu0  ;;  %v1197_v31 = vpop.f32.mrf.mxu1 }
 0x11f   : > { %v1029_v32 = vpack.c.bf16 %v577_v28, %v574_v26  ;;  %v1069_v33 = vpack.c.bf16 %v641_v29, %v638_v27  ;;  %v1150_v36 = vadd.f32 %v1149_v30, %v1148_v24  ;;  %v1198_v37 = vadd.f32 %v1197_v31, %v1196_v25 }
 0x120   : > { %v1151_v34 = vpop.f32.mrf.mxu0  ;;  %v1199_v35 = vpop.f32.mrf.mxu1 }
 0x121   : > { %1085 = vst [vmem:[%s1433_s30 + $0x28] sm:$0xff] %v1029_v32   ;;  %1093 = vst [vmem:[%s1433_s30 + $0x68] sm:$0xff] %v1069_v33   ;;  %v582_v44 = vadd.f32 %v1150_v36, %v1423_v56  ;;  %v646_v45 = vadd.f32 %v1198_v37, %v1423_v56 }
 0x122   : > { %v1152_v38 = vpop.f32.mrf.mxu0  ;;  %v1200_v39 = vpop.f32.mrf.mxu1 }
 0x123   : > { %v1153_v40 = vadd.f32 %v1152_v38, %v1151_v34  ;;  %v1201_v41 = vadd.f32 %v1200_v39, %v1199_v35 }
 0x124   : > { %v1154_v42 = vpop.f32.mrf.mxu0  ;;  %v1202_v43 = vpop.f32.mrf.mxu1 }
 0x125   : > { %v585_v46 = vadd.f32 %v1153_v40, %v1423_v56  ;;  %v649_v47 = vadd.f32 %v1201_v41, %v1423_v56 }
 0x126   : > { %v1155_v48 = vpop.f32.mrf.mxu0  ;;  %v1203_v49 = vpop.f32.mrf.mxu1 }
 0x127   : > { %v1034_v50 = vpack.c.bf16 %v585_v46, %v582_v44  ;;  %v1074_v51 = vpack.c.bf16 %v649_v47, %v646_v45  ;;  %v1156_v54 = vadd.f32 %v1155_v48, %v1154_v42  ;;  %v1204_v55 = vadd.f32 %v1203_v49, %v1202_v43 }
 0x128   : > { %v1157_v52 = vpop.f32.mrf.mxu0  ;;  %v1205_v53 = vpop.f32.mrf.mxu1 }
 0x129   : > { %1086 = vst [vmem:[%s1433_s30 + $0x30] sm:$0xff] %v1034_v50   ;;  %1094 = vst [vmem:[%s1433_s30 + $0x70] sm:$0xff] %v1074_v51   ;;  %v590_v61 = vadd.f32 %v1156_v54, %v1423_v56  ;;  %v654_v62 = vadd.f32 %v1204_v55, %v1423_v56 }
 0x12a   : > { %v1158_v57 = vpop.f32.mrf.mxu0  ;;  %v1206_v58 = vpop.f32.mrf.mxu1 }
 0x12b   : > { %v1159_v59 = vadd.f32 %v1158_v57, %v1157_v52  ;;  %v1207_v60 = vadd.f32 %v1206_v58, %v1205_v53 }
 0x12d   : > { %v593_v63 = vadd.f32 %v1159_v59, %v1423_v56  ;;  %v657_v0 = vadd.f32 %v1207_v60, %v1423_v56 }
 0x12f   : > { %v1039_v1 = vpack.c.bf16 %v593_v63, %v590_v61  ;;  %v1079_v2 = vpack.c.bf16 %v657_v0, %v654_v62 }
 0x131   : > { %1087 = vst [vmem:[%s1433_s30 + $0x38] sm:$0xff] %v1039_v1   ;;  %1095 = vst [vmem:[%s1433_s30 + $0x78] sm:$0xff] %v1079_v2  }
 0x132 PF: > { %s13_s12 = sadd.s32 1, %s1302_s12  }
 0x133   : > { %p10_p4 = scmp.ge.s32.totalorder %s13_s12, 4  }
 0x135   :  { %12 = sbr.rel (!%p10_p4) target bundleno = 1 (0x1), region = 62 }

// kernel: _lambda_.20
= control target key start
LH: loop header
LB: loop body
LE: loop exit
PB: predicated region body
PF: predicated region fallthrough
CT: control target
= control target key end

     0   :  { %s600_s12 = smov 0   ;;  %s657_s0 = inlined_call_operand.vmem [shape: bf16[2,8,8,128], index: 0, kind: input, shape index: {}]   ;;  %s658_s1 = inlined_call_operand.vmem [shape: bf16[128,128], index: 1, kind: input, shape index: {}]   ;;  %s659_s2 = inlined_call_operand.vmem [shape: f32[1,128], index: 2, kind: input, shape index: {}]   ;;  %s660_s3 = inlined_call_operand.vmem [shape: bf16[2,64,128], index: 3, kind: output, shape index: {}]  }
   0x1 LB: > { %s435_s13 = sadd.s32 4294967295, %s578_s12   ;;  %p439_p0 = scmp.ge.s32.totalorder %s578_s12, 1  ;;  %s578_s12 = sphi %s600_s12, %s13_s12  }
   0x2   : > { %p137_p1 = scmp.lt.s32.totalorder %s578_s12, 3 }
   0x4   : > { %p138_p2 = pnand %p439_p0, %p137_p1 }
   0x5   : > { %p161_p3 = scmp.lt.s32.totalorder (!%p138_p2), %s435_s13, 1 }
   0x6   : > { %141 = sbr.rel (%p138_p2) target bundleno = 248 (0xf8), region = 32 }
   0xb   : > { %v560_v0 = vld [vmem:[%s658_s1 + $0x38] sm:$0xff]   ;;  %v561_v1 = vld [vmem:[%s658_s1 + $0x30] sm:$0xff]   ;;  %s662_s13 = smov (!%p161_p3, %s435_s13), 1  ;;  %v562_v2 = vld [vmem:[%s658_s1 + $0x28] sm:$0xff]  }
   0xc   : > { %512 = vmatprep.subr.bf16.mxu0 %v560_v0  ;;  %536 = vmatprep.subr.bf16.mxu1 %v560_v0  ;;  %s467_s20 = sshll.u32 %s662_s13, 5  ;;  %v563_v3 = vld [vmem:[%s658_s1 + $0x20] sm:$0xff]   ;;  %v564_v6 = vld [vmem:[%s658_s1 + $0x18] sm:$0xff]   ;;  %v565_v7 = vld [vmem:[%s658_s1 + $0x10] sm:$0xff]  }
   0xd   : > { %513 = vmatpush3.bf16.msra.mxu0 %v560_v0  ;;  %544 = vmatpush3.bf16.msra.mxu1 %v560_v0  ;;  %s625_s23 = scalar_lea.vmem %s657_s0, %s467_s20  ;;  %v566_v8 = vld [vmem:[%s658_s1 + $0x8] sm:$0xff]   ;;  %v567_v9 = vld [vmem:[%s658_s1] sm:$0xff]   ;;  %s170_s11 = scalar_lea.vmem %s660_s3, %s467_s20 }
   0xe   : > { %514 = vmatprep.subr.bf16.mxu0 %v561_v1  ;;  %537 = vmatprep.subr.bf16.mxu1 %v561_v1  ;;  %v568_v4 = vld [vmem:[%s625_s23] sm:$0xff]   ;;  %v569_v5 = vld [vmem:[%s625_s23 + $0x10] sm:$0xff]   ;;  %v570_v10 = vld [vmem:[%s625_s23 + $0x8] sm:$0xff]  }
   0xf   : > { %528 = vmatprep.mubr.bf16.mxu0 %v568_v4  ;;  %532 = vmatprep.mubr.bf16.mxu1 %v569_v5  ;;  %v571_v11 = vld [vmem:[%s625_s23 + $0x18] sm:$0xff]   ;;  %v444_v14 = vld [vmem:[%s659_s2] ss:$0 sm:$0xff] }
  0x11   : > { %515 = vmatpush3.bf16.msra.mxu0 %v561_v1  ;;  %545 = vmatpush3.bf16.msra.mxu1 %v561_v1 }
  0x12   : > { %516 = vmatprep.subr.bf16.mxu0 %v562_v2  ;;  %538 = vmatprep.subr.bf16.mxu1 %v562_v2 }
  0x15   : > { %517 = vmatpush3.bf16.msra.mxu0 %v562_v2  ;;  %546 = vmatpush3.bf16.msra.mxu1 %v562_v2 }
  0x16   : > { %518 = vmatprep.subr.bf16.mxu0 %v563_v3  ;;  %539 = vmatprep.subr.bf16.mxu1 %v563_v3 }
  0x19   : > { %519 = vmatpush3.bf16.msra.mxu0 %v563_v3  ;;  %547 = vmatpush3.bf16.msra.mxu1 %v563_v3 }
  0x1a   : > { %520 = vmatprep.subr.bf16.mxu0 %v564_v6  ;;  %540 = vmatprep.subr.bf16.mxu1 %v564_v6 }
  0x1d   : > { %521 = vmatpush3.bf16.msra.mxu0 %v564_v6  ;;  %548 = vmatpush3.bf16.msra.mxu1 %v564_v6 }
  0x1e   : > { %522 = vmatprep.subr.bf16.mxu0 %v565_v7  ;;  %541 = vmatprep.subr.bf16.mxu1 %v565_v7 }
  0x21   : > { %523 = vmatpush3.bf16.msra.mxu0 %v565_v7  ;;  %549 = vmatpush3.bf16.msra.mxu1 %v565_v7 }
  0x22   : > { %524 = vmatprep.subr.bf16.mxu0 %v566_v8  ;;  %542 = vmatprep.subr.bf16.mxu1 %v566_v8 }
  0x25   : > { %525 = vmatpush3.bf16.msra.mxu0 %v566_v8  ;;  %550 = vmatpush3.bf16.msra.mxu1 %v566_v8 }
  0x26   : > { %526 = vmatprep.subr.bf16.mxu0 %v567_v9  ;;  %543 = vmatprep.subr.bf16.mxu1 %v567_v9 }
  0x29   : > { %527 = vmatpush3.bf16.msra.mxu0 %v567_v9  ;;  %551 = vmatpush3.bf16.msra.mxu1 %v567_v9 }
  0x2c   : > { %529 = vmatmul.mubr.bf16.vlgmr.msra.gmra.mxu0 %v570_v10  ;;  %533 = vmatmul.mubr.bf16.vlgmr.msra.gmra.mxu1 %v571_v11 }
  0xec   : > { %v530_v12 = vpop.f32.mrf.mxu0  ;;  %v534_v13 = vpop.f32.mrf.mxu1 }
  0xed   : > { %v318_v19 = vadd.f32 %v530_v12, %v444_v14  ;;  %v334_v20 = vadd.f32 %v534_v13, %v444_v14 }
  0xee   : > { %v309_v15 = vpop.f32.mrf.mxu0  ;;  %v325_v16 = vpop.f32.mrf.mxu1 }
  0xef   : > { %v310_v23 = vadd.f32 %v444_v14, %v309_v15  ;;  %v326_v24 = vadd.f32 %v444_v14, %v325_v16 }
  0xf0   : > { %v531_v17 = vpop.f32.mrf.mxu0  ;;  %v535_v18 = vpop.f32.mrf.mxu1 }
  0xf1   : > { %v321_v21 = vadd.f32 %v531_v17, %v444_v14  ;;  %v337_v22 = vadd.f32 %v535_v18, %v444_v14 }
  0xf2   : > { %v312_v25 = vpop.f32.mrf.mxu0  ;;  %v328_v26 = vpop.f32.mrf.mxu1 }
  0xf3   : > { %v485_v27 = vpack.c.bf16 %v321_v21, %v318_v19  ;;  %v495_v28 = vpack.c.bf16 %v337_v22, %v334_v20  ;;  %v313_v29 = vadd.f32 %v444_v14, %v312_v25  ;;  %v329_v30 = vadd.f32 %v444_v14, %v328_v26 }
  0xf5   : > { %497 = vst [vmem:[%s170_s11 + $0x8] sm:$0xff] %v485_v27   ;;  %499 = vst [vmem:[%s170_s11 + $0x18] sm:$0xff] %v495_v28   ;;  %v480_v31 = vpack.c.bf16 %v313_v29, %v310_v23  ;;  %v490_v32 = vpack.c.bf16 %v329_v30, %v326_v24 }
  0xf7   : > { %481 = vst [vmem:[%s170_s11] sm:$0xff] %v480_v31   ;;  %498 = vst [vmem:[%s170_s11 + $0x10] sm:$0xff] %v490_v32  }
  0xf8 PF: > { %s13_s12 = sadd.s32 1, %s578_s12  }
  0xf9   : > { %p10_p4 = scmp.ge.s32.totalorder %s13_s12, 4  }
  0xfb   :  { %12 = sbr.rel (!%p10_p4) target bundleno = 1 (0x1), region = 62 }

</bundles_post_ra>
